<compile_context>
chip_gen: v7x
topology: tpu7x:2x2x1
jax: 0.10.0
libtpu: 0.0.40
codegen_flags: <defaults>
</compile_context>

<pallas_src>
import numpy as np
import jax
import jax.numpy as jnp
from jax.experimental import pallas as pl
from jax.experimental.pallas import tpu as pltpu

HID = 96
XYZ_FREQS = (1.0, 2.0, 4.0, 8.0)   # 2 ** linspace(0, 3, 4)
RGB_FREQS = (1.0, 2.0)             # 2 ** linspace(0, 1, 2)
XYZ_EDIM, XYZ_EPAD = 27, 32        # 3 + 4*2*3, padded K for the fused dot
RGB_EDIM, RGB_EPAD = 15, 16        # 3 + 2*2*3, padded K for the fused dot


def _emb_pieces(x, freqs):
    """[x, sin(f1*x), cos(f1*x), sin(f2*x), ...] - torch Embedder order."""
    pieces = [x]
    for f in freqs:
        xf = x * f
        pieces.append(jnp.sin(xf))
        pieces.append(jnp.cos(xf))
    return pieces


def _embed_fm(x, freqs, pad_to):
    """Feature-major embedding: x (3, tm) f32 -> (pad_to, tm) bf16 (zero-padded rows)."""
    pieces = _emb_pieces(x, freqs)
    dim = 3 * len(pieces)
    if pad_to > dim:
        pieces.append(jnp.zeros((pad_to - dim, x.shape[1]), jnp.float32))
    return jnp.concatenate(pieces, axis=0).astype(jnp.bfloat16)


def stylenet_kernel(xyz_ref, rgb_ref,
                    w0_ref, b0_ref,
                    wmid_ref, bmid_ref,
                    w4h_ref, w4r_ref, b4_ref,
                    wd_ref, bd_ref,
                    wp_ref, bp_ref,
                    out_ref):
    f32, bf16 = jnp.float32, jnp.bfloat16

    xyz = xyz_ref[...]                                   # (3, tm) f32
    rgb = rgb_ref[...]                                   # (3, tm) f32

    # ---- fcs[0]: single fused dot on the padded xyz embedding ----
    emb_x = _embed_fm(xyz, XYZ_FREQS, XYZ_EPAD)          # (32, tm) bf16
    h = jnp.dot(w0_ref[...], emb_x, preferred_element_type=f32)
    h = jnp.maximum(h + b0_ref[...], 0.0)                # (96, tm) f32

    # ---- fcs[1..3] ----
    for j in range(3):
        h = jnp.dot(wmid_ref[j], h.astype(bf16), preferred_element_type=f32)
        h = jnp.maximum(h + bmid_ref[j], 0.0)

    # ---- fcs[4] (skip): Linear(96 + 15 -> 96) on concat([h, emb(rgb)]) ----
    emb_r = _embed_fm(rgb, RGB_FREQS, RGB_EPAD)          # (16, tm) bf16
    h = (jnp.dot(w4h_ref[...], h.astype(bf16), preferred_element_type=f32)
         + jnp.dot(w4r_ref[...], emb_r, preferred_element_type=f32))
    h = jnp.maximum(h + b4_ref[...], 0.0)

    # ---- fcs[5..6] ----
    for j in range(3, 5):
        h = jnp.dot(wmid_ref[j], h.astype(bf16), preferred_element_type=f32)
        h = jnp.maximum(h + bmid_ref[j], 0.0)

    # ---- delta_sh_head ----
    delta = jnp.tanh(
        jnp.dot(wd_ref[...], h.astype(bf16), preferred_element_type=f32)
        + bd_ref[...])                                   # (3, tm)

    # ---- rgb_proj (3x3): VPU broadcast MACs, no MXU ----
    wp = wp_ref[...]                                     # (3, 3) f32
    proj = (wp[:, 0:1] * rgb[0:1, :]
            + wp[:, 1:2] * rgb[1:2, :]
            + wp[:, 2:3] * rgb[2:3, :]
            + bp_ref[...])
    proj = jnp.tanh(proj)

    out_ref[...] = jnp.clip(rgb + delta + proj, 0.0, 1.0)


def stylenet_forward(params, xyz, rgb, *, tm=1024):
    """xyz, rgb: (N, 3) float32. Returns (N, 3) float32 in [0, 1]."""
    assert tm % 128 == 0
    n = xyz.shape[0]
    n_pad = pl.cdiv(n, tm) * tm
    grid = (n_pad // tm,)

    # Feature-major, lane-dense layout for the 3-wide tensors (+ zero pad to tile).
    xyz_t = jnp.pad(xyz.T.astype(jnp.float32), ((0, 0), (0, n_pad - n)))
    rgb_t = jnp.pad(rgb.T.astype(jnp.float32), ((0, 0), (0, n_pad - n)))

    def col_spec(rows):
        return pl.BlockSpec((rows, tm), lambda i: (0, i))

    def const_spec(shape):
        zeros = (0,) * len(shape)
        return pl.BlockSpec(shape, lambda i, _z=zeros: _z)

    in_specs = [
        col_spec(3), col_spec(3),                              # xyz, rgb
        const_spec((HID, XYZ_EPAD)), const_spec((HID, 1)),     # fcs[0]
        const_spec((5, HID, HID)), const_spec((5, HID, 1)),    # fcs[1..3, 5..6]
        const_spec((HID, HID)), const_spec((HID, RGB_EPAD)),   # fcs[4] (skip)
        const_spec((HID, 1)),
        const_spec((3, HID)), const_spec((3, 1)),              # delta_sh_head
        const_spec((3, 3)), const_spec((3, 1)),                # rgb_proj
    ]

    out_t = pl.pallas_call(
        stylenet_kernel,
        out_shape=jax.ShapeDtypeStruct((3, n_pad), jnp.float32),
        grid=grid,
        in_specs=in_specs,
        out_specs=col_spec(3),
        compiler_params=pltpu.CompilerParams(
            dimension_semantics=("parallel",)),
    )(xyz_t, rgb_t,
      params["w0"], params["b0"],
      params["wmid"], params["bmid"],
      params["w4h"], params["w4r"], params["b4"],
      params["wd"], params["bd"],
      params["wp"], params["bp"])

    return out_t[:, :n].T


# --------------------- deterministic parameter construction ---------------------
def _linear(key, fan_in, fan_out, w_bound=None, b_bound=None):
    """torch nn.Linear-style init; weight in torch's (out, in) layout."""
    kw, kb = jax.random.split(key)
    wb = (1.0 / np.sqrt(fan_in)) if w_bound is None else w_bound
    bb = (1.0 / np.sqrt(fan_in)) if b_bound is None else b_bound
    w = jax.random.uniform(kw, (fan_out, fan_in), jnp.float32, -wb, wb)
    b = jax.random.uniform(kb, (fan_out, 1), jnp.float32, -bb, bb)
    return w, b


def make_params(key):
    keys = jax.random.split(key, 9)

    w0, b0 = _linear(keys[0], XYZ_EDIM, HID)               # fcs[0]: 27 -> 96
    wmid, bmid = [], []
    for k in keys[1:6]:                                    # fcs[1..3], fcs[5..6]: 96 -> 96
        w, b = _linear(k, HID, HID)
        wmid.append(w)
        bmid.append(b)
    w4, b4 = _linear(keys[6], HID + RGB_EDIM, HID)         # fcs[4]: 111 -> 96
    wd, bd = _linear(keys[7], HID, 3, w_bound=0.01, b_bound=0.001)   # delta_sh_head
    wp, bp = _linear(keys[8], 3, 3, w_bound=0.01, b_bound=0.001)     # rgb_proj

    def pad_k(w, k_pad):   # zero-pad the (out, in) weight along the input dim
        return jnp.pad(w, ((0, 0), (0, k_pad - w.shape[1])))

    bf16 = jnp.bfloat16
    return {
        # MXU operands stored in bf16 (f32 accumulation in the kernel)
        "w0": pad_k(w0, XYZ_EPAD).astype(bf16),            # (96, 32)
        "b0": b0,                                          # (96, 1) f32
        "wmid": jnp.stack(wmid, 0).astype(bf16),           # (5, 96, 96)
        "bmid": jnp.stack(bmid, 0),                        # (5, 96, 1) f32
        "w4h": w4[:, :HID].astype(bf16),                   # (96, 96)  - hidden part
        "w4r": pad_k(w4[:, HID:], RGB_EPAD).astype(bf16),  # (96, 16)  - emb(rgb) part
        "b4": b4,                                          # (96, 1) f32
        "wd": wd.astype(bf16), "bd": bd,                   # (3, 96) bf16 / (3, 1) f32
        "wp": wp, "bp": bp,                                # f32 (VPU path)
    }


# --------------------------- pure-JAX f32 reference ---------------------------
def _embed_rm(x, freqs):
    return jnp.concatenate(_emb_pieces(x, freqs), axis=-1)


def stylenet_ref(params, xyz, rgb):
    f32 = jnp.float32
    e = _embed_rm(xyz, XYZ_FREQS)                          # (N, 27)
    h = jax.nn.relu(e @ params["w0"].astype(f32)[:, :XYZ_EDIM].T + params["b0"][:, 0])
    for j in range(3):
        h = jax.nn.relu(h @ params["wmid"][j].astype(f32).T + params["bmid"][j][:, 0])
    re = _embed_rm(rgb, RGB_FREQS)                         # (N, 15)
    h = jax.nn.relu(h @ params["w4h"].astype(f32).T
                    + re @ params["w4r"].astype(f32)[:, :RGB_EDIM].T
                    + params["b4"][:, 0])
    for j in range(3, 5):
        h = jax.nn.relu(h @ params["wmid"][j].astype(f32).T + params["bmid"][j][:, 0])
    delta = jnp.tanh(h @ params["wd"].astype(f32).T + params["bd"][:, 0])
    proj = jnp.tanh(rgb @ params["wp"].T + params["bp"][:, 0])
    return jnp.clip(rgb + delta + proj, 0.0, 1.0)


if __name__ == "__main__":
    key = jax.random.PRNGKey(0)
    k_param, k_xyz, k_rgb = jax.random.split(key, 3)

    # N is deliberately not a multiple of the tile to exercise the pad+slice path;
    # with tm=1024 this gives a grid of 2 steps.
    N = 2000
    params = make_params(k_param)
    xyz = jax.random.uniform(k_xyz, (N, 3), jnp.float32, -1.0, 1.0)
    rgb = jax.random.uniform(k_rgb, (N, 3), jnp.float32, 0.0, 1.0)

    out = stylenet_forward(params, xyz, rgb, tm=1024)
    out = jax.block_until_ready(out)

    ref = stylenet_ref(params, xyz, rgb)
    # bf16 matmul operands (f32 accumulate) vs the f32 reference -> loosened tolerance.
    np.testing.assert_allclose(np.asarray(out), np.asarray(ref), atol=1e-2, rtol=1e-2)

    print("KERNEL_OK")
</pallas_src>

<mosaic_0001>
module attributes {stable_mosaic.version = 11 : i64} {
  func.func @stylenet_kernel(%arg0: i32, %arg1: memref<3x1024xf32, #tpu.memory_space<vmem>>, %arg2: memref<3x1024xf32, #tpu.memory_space<vmem>>, %arg3: memref<96x32xbf16, #tpu.memory_space<vmem>>, %arg4: memref<96x1xf32, #tpu.memory_space<vmem>>, %arg5: memref<5x96x96xbf16, #tpu.memory_space<vmem>>, %arg6: memref<5x96x1xf32, #tpu.memory_space<vmem>>, %arg7: memref<96x96xbf16, #tpu.memory_space<vmem>>, %arg8: memref<96x16xbf16, #tpu.memory_space<vmem>>, %arg9: memref<96x1xf32, #tpu.memory_space<vmem>>, %arg10: memref<3x96xbf16, #tpu.memory_space<vmem>>, %arg11: memref<3x1xf32, #tpu.memory_space<vmem>>, %arg12: memref<3x3xf32, #tpu.memory_space<vmem>>, %arg13: memref<3x1xf32, #tpu.memory_space<vmem>>, %arg14: memref<3x1024xf32, #tpu.memory_space<vmem>>) attributes {dimension_semantics = [#tpu.dimension_semantics<parallel>], iteration_bounds = array<i64: 2>, scalar_prefetch = 0 : i64, scratch_operands = 0 : i64, tpu.core_type = #tpu.core_type<tc>, window_params = [{transform_indices = @transform_0, window_bounds = array<i64: 3, 1024>}, {transform_indices = @transform_1, window_bounds = array<i64: 3, 1024>}, {pipeline_mode = #tpu.pipeline_mode<synchronous>, transform_indices = @transform_2, window_bounds = array<i64: 96, 32>}, {pipeline_mode = #tpu.pipeline_mode<synchronous>, transform_indices = @transform_3, window_bounds = array<i64: 96, 1>}, {pipeline_mode = #tpu.pipeline_mode<synchronous>, transform_indices = @transform_4, window_bounds = array<i64: 5, 96, 96>}, {pipeline_mode = #tpu.pipeline_mode<synchronous>, transform_indices = @transform_5, window_bounds = array<i64: 5, 96, 1>}, {pipeline_mode = #tpu.pipeline_mode<synchronous>, transform_indices = @transform_6, window_bounds = array<i64: 96, 96>}, {pipeline_mode = #tpu.pipeline_mode<synchronous>, transform_indices = @transform_7, window_bounds = array<i64: 96, 16>}, {pipeline_mode = #tpu.pipeline_mode<synchronous>, transform_indices = @transform_8, window_bounds = array<i64: 96, 1>}, {pipeline_mode = #tpu.pipeline_mode<synchronous>, transform_indices = @transform_9, window_bounds = array<i64: 3, 96>}, {pipeline_mode = #tpu.pipeline_mode<synchronous>, transform_indices = @transform_10, window_bounds = array<i64: 3, 1>}, {pipeline_mode = #tpu.pipeline_mode<synchronous>, transform_indices = @transform_11, window_bounds = array<i64: 3, 3>}, {pipeline_mode = #tpu.pipeline_mode<synchronous>, transform_indices = @transform_12, window_bounds = array<i64: 3, 1>}, {transform_indices = @transform_13, window_bounds = array<i64: 3, 1024>}]} {
    %c0 = arith.constant 0 : index
    %c0_0 = arith.constant 0 : index
    %0 = vector.load %arg1[%c0, %c0_0] : memref<3x1024xf32, #tpu.memory_space<vmem>>, vector<3x1024xf32>
    %c0_1 = arith.constant 0 : index
    %c0_2 = arith.constant 0 : index
    %1 = vector.load %arg2[%c0_1, %c0_2] : memref<3x1024xf32, #tpu.memory_space<vmem>>, vector<3x1024xf32>
    %cst = arith.constant 1.000000e+00 : f32
    %2 = vector.broadcast %cst : f32 to vector<3x1024xf32>
    %3 = arith.mulf %0, %2 : vector<3x1024xf32>
    %4 = math.sin %3 : vector<3x1024xf32>
    %5 = math.cos %3 : vector<3x1024xf32>
    %cst_3 = arith.constant 2.000000e+00 : f32
    %6 = vector.broadcast %cst_3 : f32 to vector<3x1024xf32>
    %7 = arith.mulf %0, %6 : vector<3x1024xf32>
    %8 = math.sin %7 : vector<3x1024xf32>
    %9 = math.cos %7 : vector<3x1024xf32>
    %cst_4 = arith.constant 4.000000e+00 : f32
    %10 = vector.broadcast %cst_4 : f32 to vector<3x1024xf32>
    %11 = arith.mulf %0, %10 : vector<3x1024xf32>
    %12 = math.sin %11 : vector<3x1024xf32>
    %13 = math.cos %11 : vector<3x1024xf32>
    %cst_5 = arith.constant 8.000000e+00 : f32
    %14 = vector.broadcast %cst_5 : f32 to vector<3x1024xf32>
    %15 = arith.mulf %0, %14 : vector<3x1024xf32>
    %16 = math.sin %15 : vector<3x1024xf32>
    %17 = math.cos %15 : vector<3x1024xf32>
    %cst_6 = arith.constant 0.000000e+00 : f32
    %18 = vector.broadcast %cst_6 : f32 to vector<5x1024xf32>
    %19 = tpu.concatenate %0, %4, %5, %8, %9, %12, %13, %16, %17, %18 in 0 : vector<3x1024xf32>, vector<3x1024xf32>, vector<3x1024xf32>, vector<3x1024xf32>, vector<3x1024xf32>, vector<3x1024xf32>, vector<3x1024xf32>, vector<3x1024xf32>, vector<3x1024xf32>, vector<5x1024xf32> -> vector<32x1024xf32>
    %20 = arith.truncf %19 : vector<32x1024xf32> to vector<32x1024xbf16>
    %c0_7 = arith.constant 0 : index
    %c0_8 = arith.constant 0 : index
    %21 = vector.load %arg3[%c0_7, %c0_8] : memref<96x32xbf16, #tpu.memory_space<vmem>>, vector<96x32xbf16>
    %cst_9 = arith.constant dense<0.000000e+00> : vector<96x1024xf32>
    %22 = tpu.matmul %21, %20, %cst_9 {dimension_numbers = #tpu.dot_dimension_numbers<[1], [0], [0], [1], [0, 0, 1, 1], [], []>} : vector<96x32xbf16>, vector<32x1024xbf16>, vector<96x1024xf32> -> vector<96x1024xf32>
    %c0_10 = arith.constant 0 : index
    %c0_11 = arith.constant 0 : index
    %23 = vector.load %arg4[%c0_10, %c0_11] : memref<96x1xf32, #tpu.memory_space<vmem>>, vector<96x1xf32>
    %24 = vector.broadcast %23 : vector<96x1xf32> to vector<96x1024xf32>
    %25 = arith.addf %22, %24 : vector<96x1024xf32>
    %cst_12 = arith.constant 0.000000e+00 : f32
    %26 = vector.broadcast %cst_12 : f32 to vector<96x1024xf32>
    %27 = arith.maximumf %25, %26 : vector<96x1024xf32>
    %c0_13 = arith.constant 0 : index
    %c0_14 = arith.constant 0 : index
    %c0_15 = arith.constant 0 : index
    %28 = vector.load %arg5[%c0_13, %c0_14, %c0_15] : memref<5x96x96xbf16, #tpu.memory_space<vmem>>, vector<1x96x96xbf16>
    %29 = vector.shape_cast %28 : vector<1x96x96xbf16> to vector<96x96xbf16>
    %30 = arith.truncf %27 : vector<96x1024xf32> to vector<96x1024xbf16>
    %cst_16 = arith.constant dense<0.000000e+00> : vector<96x1024xf32>
    %31 = tpu.matmul %29, %30, %cst_16 {dimension_numbers = #tpu.dot_dimension_numbers<[1], [0], [0], [1], [0, 0, 1, 1], [], []>} : vector<96x96xbf16>, vector<96x1024xbf16>, vector<96x1024xf32> -> vector<96x1024xf32>
    %c0_17 = arith.constant 0 : index
    %c0_18 = arith.constant 0 : index
    %c0_19 = arith.constant 0 : index
    %32 = vector.load %arg6[%c0_17, %c0_18, %c0_19] : memref<5x96x1xf32, #tpu.memory_space<vmem>>, vector<1x96x1xf32>
    %33 = vector.shape_cast %32 : vector<1x96x1xf32> to vector<96x1xf32>
    %34 = vector.broadcast %33 : vector<96x1xf32> to vector<96x1024xf32>
    %35 = arith.addf %31, %34 : vector<96x1024xf32>
    %cst_20 = arith.constant 0.000000e+00 : f32
    %36 = vector.broadcast %cst_20 : f32 to vector<96x1024xf32>
    %37 = arith.maximumf %35, %36 : vector<96x1024xf32>
    %c1 = arith.constant 1 : index
    %c0_21 = arith.constant 0 : index
    %c0_22 = arith.constant 0 : index
    %38 = vector.load %arg5[%c1, %c0_21, %c0_22] : memref<5x96x96xbf16, #tpu.memory_space<vmem>>, vector<1x96x96xbf16>
    %39 = vector.shape_cast %38 : vector<1x96x96xbf16> to vector<96x96xbf16>
    %40 = arith.truncf %37 : vector<96x1024xf32> to vector<96x1024xbf16>
    %cst_23 = arith.constant dense<0.000000e+00> : vector<96x1024xf32>
    %41 = tpu.matmul %39, %40, %cst_23 {dimension_numbers = #tpu.dot_dimension_numbers<[1], [0], [0], [1], [0, 0, 1, 1], [], []>} : vector<96x96xbf16>, vector<96x1024xbf16>, vector<96x1024xf32> -> vector<96x1024xf32>
    %c1_24 = arith.constant 1 : index
    %c0_25 = arith.constant 0 : index
    %c0_26 = arith.constant 0 : index
    %42 = vector.load %arg6[%c1_24, %c0_25, %c0_26] : memref<5x96x1xf32, #tpu.memory_space<vmem>>, vector<1x96x1xf32>
    %43 = vector.shape_cast %42 : vector<1x96x1xf32> to vector<96x1xf32>
    %44 = vector.broadcast %43 : vector<96x1xf32> to vector<96x1024xf32>
    %45 = arith.addf %41, %44 : vector<96x1024xf32>
    %cst_27 = arith.constant 0.000000e+00 : f32
    %46 = vector.broadcast %cst_27 : f32 to vector<96x1024xf32>
    %47 = arith.maximumf %45, %46 : vector<96x1024xf32>
    %c2 = arith.constant 2 : index
    %c0_28 = arith.constant 0 : index
    %c0_29 = arith.constant 0 : index
    %48 = vector.load %arg5[%c2, %c0_28, %c0_29] : memref<5x96x96xbf16, #tpu.memory_space<vmem>>, vector<1x96x96xbf16>
    %49 = vector.shape_cast %48 : vector<1x96x96xbf16> to vector<96x96xbf16>
    %50 = arith.truncf %47 : vector<96x1024xf32> to vector<96x1024xbf16>
    %cst_30 = arith.constant dense<0.000000e+00> : vector<96x1024xf32>
    %51 = tpu.matmul %49, %50, %cst_30 {dimension_numbers = #tpu.dot_dimension_numbers<[1], [0], [0], [1], [0, 0, 1, 1], [], []>} : vector<96x96xbf16>, vector<96x1024xbf16>, vector<96x1024xf32> -> vector<96x1024xf32>
    %c2_31 = arith.constant 2 : index
    %c0_32 = arith.constant 0 : index
    %c0_33 = arith.constant 0 : index
    %52 = vector.load %arg6[%c2_31, %c0_32, %c0_33] : memref<5x96x1xf32, #tpu.memory_space<vmem>>, vector<1x96x1xf32>
    %53 = vector.shape_cast %52 : vector<1x96x1xf32> to vector<96x1xf32>
    %54 = vector.broadcast %53 : vector<96x1xf32> to vector<96x1024xf32>
    %55 = arith.addf %51, %54 : vector<96x1024xf32>
    %cst_34 = arith.constant 0.000000e+00 : f32
    %56 = vector.broadcast %cst_34 : f32 to vector<96x1024xf32>
    %57 = arith.maximumf %55, %56 : vector<96x1024xf32>
    %cst_35 = arith.constant 1.000000e+00 : f32
    %58 = vector.broadcast %cst_35 : f32 to vector<3x1024xf32>
    %59 = arith.mulf %1, %58 : vector<3x1024xf32>
    %60 = math.sin %59 : vector<3x1024xf32>
    %61 = math.cos %59 : vector<3x1024xf32>
    %cst_36 = arith.constant 2.000000e+00 : f32
    %62 = vector.broadcast %cst_36 : f32 to vector<3x1024xf32>
    %63 = arith.mulf %1, %62 : vector<3x1024xf32>
    %64 = math.sin %63 : vector<3x1024xf32>
    %65 = math.cos %63 : vector<3x1024xf32>
    %cst_37 = arith.constant 0.000000e+00 : f32
    %66 = vector.broadcast %cst_37 : f32 to vector<1x1024xf32>
    %67 = tpu.concatenate %1, %60, %61, %64, %65, %66 in 0 : vector<3x1024xf32>, vector<3x1024xf32>, vector<3x1024xf32>, vector<3x1024xf32>, vector<3x1024xf32>, vector<1x1024xf32> -> vector<16x1024xf32>
    %68 = arith.truncf %67 : vector<16x1024xf32> to vector<16x1024xbf16>
    %c0_38 = arith.constant 0 : index
    %c0_39 = arith.constant 0 : index
    %69 = vector.load %arg7[%c0_38, %c0_39] : memref<96x96xbf16, #tpu.memory_space<vmem>>, vector<96x96xbf16>
    %70 = arith.truncf %57 : vector<96x1024xf32> to vector<96x1024xbf16>
    %cst_40 = arith.constant dense<0.000000e+00> : vector<96x1024xf32>
    %71 = tpu.matmul %69, %70, %cst_40 {dimension_numbers = #tpu.dot_dimension_numbers<[1], [0], [0], [1], [0, 0, 1, 1], [], []>} : vector<96x96xbf16>, vector<96x1024xbf16>, vector<96x1024xf32> -> vector<96x1024xf32>
    %c0_41 = arith.constant 0 : index
    %c0_42 = arith.constant 0 : index
    %72 = vector.load %arg8[%c0_41, %c0_42] : memref<96x16xbf16, #tpu.memory_space<vmem>>, vector<96x16xbf16>
    %cst_43 = arith.constant dense<0.000000e+00> : vector<96x1024xf32>
    %73 = tpu.matmul %72, %68, %cst_43 {dimension_numbers = #tpu.dot_dimension_numbers<[1], [0], [0], [1], [0, 0, 1, 1], [], []>} : vector<96x16xbf16>, vector<16x1024xbf16>, vector<96x1024xf32> -> vector<96x1024xf32>
    %74 = arith.addf %71, %73 : vector<96x1024xf32>
    %c0_44 = arith.constant 0 : index
    %c0_45 = arith.constant 0 : index
    %75 = vector.load %arg9[%c0_44, %c0_45] : memref<96x1xf32, #tpu.memory_space<vmem>>, vector<96x1xf32>
    %76 = vector.broadcast %75 : vector<96x1xf32> to vector<96x1024xf32>
    %77 = arith.addf %74, %76 : vector<96x1024xf32>
    %cst_46 = arith.constant 0.000000e+00 : f32
    %78 = vector.broadcast %cst_46 : f32 to vector<96x1024xf32>
    %79 = arith.maximumf %77, %78 : vector<96x1024xf32>
    %c3 = arith.constant 3 : index
    %c0_47 = arith.constant 0 : index
    %c0_48 = arith.constant 0 : index
    %80 = vector.load %arg5[%c3, %c0_47, %c0_48] : memref<5x96x96xbf16, #tpu.memory_space<vmem>>, vector<1x96x96xbf16>
    %81 = vector.shape_cast %80 : vector<1x96x96xbf16> to vector<96x96xbf16>
    %82 = arith.truncf %79 : vector<96x1024xf32> to vector<96x1024xbf16>
    %cst_49 = arith.constant dense<0.000000e+00> : vector<96x1024xf32>
    %83 = tpu.matmul %81, %82, %cst_49 {dimension_numbers = #tpu.dot_dimension_numbers<[1], [0], [0], [1], [0, 0, 1, 1], [], []>} : vector<96x96xbf16>, vector<96x1024xbf16>, vector<96x1024xf32> -> vector<96x1024xf32>
    %c3_50 = arith.constant 3 : index
    %c0_51 = arith.constant 0 : index
    %c0_52 = arith.constant 0 : index
    %84 = vector.load %arg6[%c3_50, %c0_51, %c0_52] : memref<5x96x1xf32, #tpu.memory_space<vmem>>, vector<1x96x1xf32>
    %85 = vector.shape_cast %84 : vector<1x96x1xf32> to vector<96x1xf32>
    %86 = vector.broadcast %85 : vector<96x1xf32> to vector<96x1024xf32>
    %87 = arith.addf %83, %86 : vector<96x1024xf32>
    %cst_53 = arith.constant 0.000000e+00 : f32
    %88 = vector.broadcast %cst_53 : f32 to vector<96x1024xf32>
    %89 = arith.maximumf %87, %88 : vector<96x1024xf32>
    %c4 = arith.constant 4 : index
    %c0_54 = arith.constant 0 : index
    %c0_55 = arith.constant 0 : index
    %90 = vector.load %arg5[%c4, %c0_54, %c0_55] : memref<5x96x96xbf16, #tpu.memory_space<vmem>>, vector<1x96x96xbf16>
    %91 = vector.shape_cast %90 : vector<1x96x96xbf16> to vector<96x96xbf16>
    %92 = arith.truncf %89 : vector<96x1024xf32> to vector<96x1024xbf16>
    %cst_56 = arith.constant dense<0.000000e+00> : vector<96x1024xf32>
    %93 = tpu.matmul %91, %92, %cst_56 {dimension_numbers = #tpu.dot_dimension_numbers<[1], [0], [0], [1], [0, 0, 1, 1], [], []>} : vector<96x96xbf16>, vector<96x1024xbf16>, vector<96x1024xf32> -> vector<96x1024xf32>
    %c4_57 = arith.constant 4 : index
    %c0_58 = arith.constant 0 : index
    %c0_59 = arith.constant 0 : index
    %94 = vector.load %arg6[%c4_57, %c0_58, %c0_59] : memref<5x96x1xf32, #tpu.memory_space<vmem>>, vector<1x96x1xf32>
    %95 = vector.shape_cast %94 : vector<1x96x1xf32> to vector<96x1xf32>
    %96 = vector.broadcast %95 : vector<96x1xf32> to vector<96x1024xf32>
    %97 = arith.addf %93, %96 : vector<96x1024xf32>
    %cst_60 = arith.constant 0.000000e+00 : f32
    %98 = vector.broadcast %cst_60 : f32 to vector<96x1024xf32>
    %99 = arith.maximumf %97, %98 : vector<96x1024xf32>
    %c0_61 = arith.constant 0 : index
    %c0_62 = arith.constant 0 : index
    %100 = vector.load %arg10[%c0_61, %c0_62] : memref<3x96xbf16, #tpu.memory_space<vmem>>, vector<3x96xbf16>
    %101 = arith.truncf %99 : vector<96x1024xf32> to vector<96x1024xbf16>
    %cst_63 = arith.constant dense<0.000000e+00> : vector<3x1024xf32>
    %102 = tpu.matmul %100, %101, %cst_63 {dimension_numbers = #tpu.dot_dimension_numbers<[1], [0], [0], [1], [0, 0, 1, 1], [], []>} : vector<3x96xbf16>, vector<96x1024xbf16>, vector<3x1024xf32> -> vector<3x1024xf32>
    %c0_64 = arith.constant 0 : index
    %c0_65 = arith.constant 0 : index
    %103 = vector.load %arg11[%c0_64, %c0_65] : memref<3x1xf32, #tpu.memory_space<vmem>>, vector<3x1xf32>
    %104 = vector.broadcast %103 : vector<3x1xf32> to vector<3x1024xf32>
    %105 = arith.addf %102, %104 : vector<3x1024xf32>
    %106 = math.tanh %105 : vector<3x1024xf32>
    %c0_66 = arith.constant 0 : index
    %c0_67 = arith.constant 0 : index
    %107 = vector.load %arg12[%c0_66, %c0_67] : memref<3x3xf32, #tpu.memory_space<vmem>>, vector<3x3xf32>
    %108 = vector.extract_strided_slice %107 {offsets = [0, 0], sizes = [3, 1], strides = [1, 1]} : vector<3x3xf32> to vector<3x1xf32>
    %109 = vector.extract_strided_slice %1 {offsets = [0, 0], sizes = [1, 1024], strides = [1, 1]} : vector<3x1024xf32> to vector<1x1024xf32>
    %110 = vector.broadcast %108 : vector<3x1xf32> to vector<3x1024xf32>
    %111 = vector.broadcast %109 : vector<1x1024xf32> to vector<3x1024xf32>
    %112 = arith.mulf %110, %111 : vector<3x1024xf32>
    %113 = vector.extract_strided_slice %107 {offsets = [0, 1], sizes = [3, 1], strides = [1, 1]} : vector<3x3xf32> to vector<3x1xf32>
    %114 = vector.extract_strided_slice %1 {offsets = [1, 0], sizes = [1, 1024], strides = [1, 1]} : vector<3x1024xf32> to vector<1x1024xf32>
    %115 = vector.broadcast %113 : vector<3x1xf32> to vector<3x1024xf32>
    %116 = vector.broadcast %114 : vector<1x1024xf32> to vector<3x1024xf32>
    %117 = arith.mulf %115, %116 : vector<3x1024xf32>
    %118 = arith.addf %112, %117 : vector<3x1024xf32>
    %119 = vector.extract_strided_slice %107 {offsets = [0, 2], sizes = [3, 1], strides = [1, 1]} : vector<3x3xf32> to vector<3x1xf32>
    %120 = vector.extract_strided_slice %1 {offsets = [2, 0], sizes = [1, 1024], strides = [1, 1]} : vector<3x1024xf32> to vector<1x1024xf32>
    %121 = vector.broadcast %119 : vector<3x1xf32> to vector<3x1024xf32>
    %122 = vector.broadcast %120 : vector<1x1024xf32> to vector<3x1024xf32>
    %123 = arith.mulf %121, %122 : vector<3x1024xf32>
    %124 = arith.addf %118, %123 : vector<3x1024xf32>
    %c0_68 = arith.constant 0 : index
    %c0_69 = arith.constant 0 : index
    %125 = vector.load %arg13[%c0_68, %c0_69] : memref<3x1xf32, #tpu.memory_space<vmem>>, vector<3x1xf32>
    %126 = vector.broadcast %125 : vector<3x1xf32> to vector<3x1024xf32>
    %127 = arith.addf %124, %126 : vector<3x1024xf32>
    %128 = math.tanh %127 : vector<3x1024xf32>
    %129 = arith.addf %1, %106 : vector<3x1024xf32>
    %130 = arith.addf %129, %128 : vector<3x1024xf32>
    %cst_70 = arith.constant 0.000000e+00 : f32
    %cst_71 = arith.constant 1.000000e+00 : f32
    %131 = vector.broadcast %cst_70 : f32 to vector<3x1024xf32>
    %132 = arith.maximumf %131, %130 : vector<3x1024xf32>
    %133 = vector.broadcast %cst_71 : f32 to vector<3x1024xf32>
    %134 = arith.minimumf %133, %132 : vector<3x1024xf32>
    %c0_72 = arith.constant 0 : index
    %c0_73 = arith.constant 0 : index
    %135 = vector.load %arg14[%c0_72, %c0_73] : memref<3x1024xf32, #tpu.memory_space<vmem>>, vector<3x1024xf32>
    tpu.vector_store %arg14[%c0_72, %c0_73], %134 {strides = array<i32>} : memref<3x1024xf32, #tpu.memory_space<vmem>>, vector<3x1024xf32>,
    return
  }
  func.func @transform_0(%arg0: i32) -> (i32, i32) {
    %c0_i32 = arith.constant 0 : i32
    %c0_i32_0 = arith.constant 0 : i32
    return %c0_i32, %arg0 : i32, i32
  }
  func.func @transform_1(%arg0: i32) -> (i32, i32) {
    %c0_i32 = arith.constant 0 : i32
    %c0_i32_0 = arith.constant 0 : i32
    return %c0_i32, %arg0 : i32, i32
  }
  func.func @transform_2(%arg0: i32) -> (i32, i32) {
    %c0_i32 = arith.constant 0 : i32
    %c0_i32_0 = arith.constant 0 : i32
    %c0_i32_1 = arith.constant 0 : i32
    return %c0_i32, %c0_i32_0 : i32, i32
  }
  func.func @transform_3(%arg0: i32) -> (i32, i32) {
    %c0_i32 = arith.constant 0 : i32
    %c0_i32_0 = arith.constant 0 : i32
    %c0_i32_1 = arith.constant 0 : i32
    return %c0_i32, %c0_i32_0 : i32, i32
  }
  func.func @transform_4(%arg0: i32) -> (i32, i32, i32) {
    %c0_i32 = arith.constant 0 : i32
    %c0_i32_0 = arith.constant 0 : i32
    %c0_i32_1 = arith.constant 0 : i32
    %c0_i32_2 = arith.constant 0 : i32
    return %c0_i32, %c0_i32_0, %c0_i32_1 : i32, i32, i32
  }
  func.func @transform_5(%arg0: i32) -> (i32, i32, i32) {
    %c0_i32 = arith.constant 0 : i32
    %c0_i32_0 = arith.constant 0 : i32
    %c0_i32_1 = arith.constant 0 : i32
    %c0_i32_2 = arith.constant 0 : i32
    return %c0_i32, %c0_i32_0, %c0_i32_1 : i32, i32, i32
  }
  func.func @transform_6(%arg0: i32) -> (i32, i32) {
    %c0_i32 = arith.constant 0 : i32
    %c0_i32_0 = arith.constant 0 : i32
    %c0_i32_1 = arith.constant 0 : i32
    return %c0_i32, %c0_i32_0 : i32, i32
  }
  func.func @transform_7(%arg0: i32) -> (i32, i32) {
    %c0_i32 = arith.constant 0 : i32
    %c0_i32_0 = arith.constant 0 : i32
    %c0_i32_1 = arith.constant 0 : i32
    return %c0_i32, %c0_i32_0 : i32, i32
  }
  func.func @transform_8(%arg0: i32) -> (i32, i32) {
    %c0_i32 = arith.constant 0 : i32
    %c0_i32_0 = arith.constant 0 : i32
    %c0_i32_1 = arith.constant 0 : i32
    return %c0_i32, %c0_i32_0 : i32, i32
  }
  func.func @transform_9(%arg0: i32) -> (i32, i32) {
    %c0_i32 = arith.constant 0 : i32
    %c0_i32_0 = arith.constant 0 : i32
    %c0_i32_1 = arith.constant 0 : i32
    return %c0_i32, %c0_i32_0 : i32, i32
  }
  func.func @transform_10(%arg0: i32) -> (i32, i32) {
    %c0_i32 = arith.constant 0 : i32
    %c0_i32_0 = arith.constant 0 : i32
    %c0_i32_1 = arith.constant 0 : i32
    return %c0_i32, %c0_i32_0 : i32, i32
  }
  func.func @transform_11(%arg0: i32) -> (i32, i32) {
    %c0_i32 = arith.constant 0 : i32
    %c0_i32_0 = arith.constant 0 : i32
    %c0_i32_1 = arith.constant 0 : i32
    return %c0_i32, %c0_i32_0 : i32, i32
  }
  func.func @transform_12(%arg0: i32) -> (i32, i32) {
    %c0_i32 = arith.constant 0 : i32
    %c0_i32_0 = arith.constant 0 : i32
    %c0_i32_1 = arith.constant 0 : i32
    return %c0_i32, %c0_i32_0 : i32, i32
  }
  func.func @transform_13(%arg0: i32) -> (i32, i32) {
    %c0_i32 = arith.constant 0 : i32
    %c0_i32_0 = arith.constant 0 : i32
    return %c0_i32, %arg0 : i32, i32
  }
}

</mosaic_0001>

<bundles_post_ra>
// kernel: tpu_custom_call.1
= control target key start
LH: loop header
LB: loop body
LE: loop exit
PB: predicated region body
PF: predicated region fallthrough
CT: control target
= control target key end

     0   :  { %18 = vsyncpa [#allocation3], 0  ;;  %s18482_s0 = inlined_call_operand.vmem [shape: f32[3,2048], index: 0, kind: input, shape index: {}]   ;;  %s18483_s1 = inlined_call_operand.vmem [shape: f32[3,2048], index: 1, kind: input, shape index: {}]   ;;  %s18484_s2 = inlined_call_operand.vmem [shape: bf16[96,32], index: 2, kind: input, shape index: {}]   ;;  %s18485_s3 = inlined_call_operand.vmem [shape: f32[96,1], index: 3, kind: input, shape index: {}]   ;;  %s18486_s4 = inlined_call_operand.vmem [shape: bf16[5,96,96], index: 4, kind: input, shape index: {}]   ;;  %s18487_s5 = inlined_call_operand.vmem [shape: f32[5,96,1], index: 5, kind: input, shape index: {}]   ;;  %s18488_s6 = inlined_call_operand.vmem [shape: bf16[96,96], index: 6, kind: input, shape index: {}]   ;;  %s18489_s7 = inlined_call_operand.vmem [shape: bf16[96,16], index: 7, kind: input, shape index: {}]   ;;  %s18490_s8 = inlined_call_operand.vmem [shape: f32[96,1], index: 8, kind: input, shape index: {}]   ;;  %s18491_s9 = inlined_call_operand.vmem [shape: bf16[3,96], index: 9, kind: input, shape index: {}]   ;;  %s18492_s10 = inlined_call_operand.vmem [shape: f32[3,1], index: 10, kind: input, shape index: {}]   ;;  %s18493_s11 = inlined_call_operand.vmem [shape: f32[3,3], index: 11, kind: input, shape index: {}]   ;;  %s18494_s12 = inlined_call_operand.vmem [shape: f32[3,1], index: 12, kind: input, shape index: {}]   ;;  %s18495_s13 = inlined_call_operand.hbm [shape: f32[3,2048], index: 13, kind: output, shape index: {}]  }
   0x1   :  { %20 = vsyncpa [#allocation3 + $0x1], 0  ;;  %s12754_s25 = smov 0   ;;  %s12756_s26 = smov 0  }
   0x2   :  { %s12758_s27 = smov 0   ;;  %s12760_s28 = smov 0  }
   0x3 LB: > { %18623 = sst [smem:[#allocation5_spill]] %s12667_s27  ;;  %s12775_s29 = sadd.s32 4294967295, %s12671_s28   ;;  %s12671_s28 = sphi %s12760_s28, %s19063_s28   ;;  %s12667_s27 = sphi %s12758_s27, %s19065_s27   ;;  %s12663_s26 = sphi %s12756_s26, %s19067_s26   ;;  %s12659_s25 = sphi %s12754_s25, %s19066_s25  }
   0x4   : > { %s11555_s30 = sadd.s32 4294967294, %s12671_s28   ;;  %s12779_s14 = sadd.s32 1, %s12671_s28  }
   0x5   : > { %18624 = sst [smem:[#allocation6_spill]] %s12779_s14  ;;  %s316_s15 = sadd.s32 1, %s12667_s27 }
   0x6   : > { %s313_s16 = ssub.s32 %s12671_s28, %s12779_s14  ;;  %p326_p0 = scmp.ne.s32.totalorder %s12667_s27, %s12663_s26 }
   0x7   : > { %p314_p1 = scmp.eq.s32.totalorder %s313_s16, 0  ;;  %p327_p2 = scmp.eq.s32.totalorder %s12775_s29, 1 }
   0x8   : > { %p332_p3 = scmp.ne.s32.totalorder %s12663_s26, %s12659_s25  ;;  %p333_p4 = scmp.eq.s32.totalorder %s11555_s30, 1 }
   0x9   : > { %s12790_s17 = scalar_select %p314_p1, %s12667_s27, %s316_s15  }
   0xa   : > { %p12792_p5 = por %p327_p2, %p326_p0  ;;  %p12796_p6 = por %p333_p4, %p332_p3 }
   0xb   : > { %18625 = sst [smem:[#allocation7_spill]] %s12790_s17  ;;  %p11558_p7 = scmp.ge.s32.totalorder %s12671_s28, 1 }
   0xc   : > { %s18627_s19 = scalar_select %p12796_p6, 1, 0 }
   0xd   : > { %p402_p8 = scmp.lt.s32.totalorder %s12671_s28, 3 }
   0xe   : > { %18628 = sst [smem:[#allocation8_spill]] %s18627_s19 }
   0xf   : > { %p403_p9 = pnand %p11558_p7, %p402_p8 }
  0x11   : > { %406 = sbr.rel (%p403_p9) target bundleno = 2709 (0xa95), region = 72 }
  0x18   : > { %v4078_v0 = vld [vmem:[%s18485_s3 + $0x10] sm:$0xff]  ;;  %v4076_v1 = vld [vmem:[%s18485_s3] sm:$0xff]  ;;  %s11560_s24 = sshll.u32 %s12775_s29, 3  ;;  %v18508_v2 = vmov 0   ;;  %v4079_v3 = vld [vmem:[%s18485_s3 + $0x18] sm:$0xff]  ;;  %s448_s16 = sand.u32 1, %s12663_s26  }
  0x19   : > { %12392 = vset.pattern.permute.xlu1 %v18508_v2  ;;  %12391 = vset.pattern.permute.xlu0 %v18508_v2  ;;  %p452_p10 = scmp.lt.s32.totalorder %s11560_s24, 15  ;;  %v4077_v4 = vld [vmem:[%s18485_s3 + $0x8] sm:$0xff]  ;;  %v4080_v6 = vld [vmem:[%s18485_s3 + $0x20] sm:$0xff]  ;;  %v4083_v7 = vld [vmem:[%s18485_s3 + $0x38] sm:$0xff]  ;;  %v18522_v45 = vmov 683565275  }
  0x1a   : > { %4100 = vperm.xlu1 %12392, %v4078_v0   ;;  %4090 = vperm.xlu0 %12391, %v4076_v1   ;;  %v4081_v5 = vld [vmem:[%s18485_s3 + $0x28] sm:$0xff]  ;;  %v4082_v8 = vld [vmem:[%s18485_s3 + $0x30] sm:$0xff]  ;;  %v4084_v11 = vld [vmem:[%s18485_s3 + $0x40] sm:$0xff]  ;;  %v18520_v47 = vmov 2475754826   ;;  %s11559_s27 = sshll.u32 %s448_s16, 5 }
  0x1b   : > { %4229 = vmatprep.mubr.bf16.mxu0 %v18508_v2  ;;  %4322 = vmatprep.mubr.bf16.mxu1 %v18508_v2  ;;  %s19069_s24 = smov (!%p452_p10, %s11560_s24), 15  ;;  %v4085_v10 = vld [vmem:[%s18485_s3 + $0x48] sm:$0xff]  ;;  %v4087_v19 = vld [vmem:[%s18485_s3 + $0x58] sm:$0xff]  ;;  %v4086_v20 = vld [vmem:[%s18485_s3 + $0x50] sm:$0xff]  ;;  %v18517_v50 = vmov 2131351028  }
  0x1c   : > { %s11561_s15 = sshll.u32 %s19069_s24, 2  ;;  %v4726_v26 = vld [vmem:[%s18487_s5 + $0x8] sm:$0xff]  ;;  %v4725_v29 = vld [vmem:[%s18487_s5] sm:$0xff]  ;;  %v4728_v37 = vld [vmem:[%s18487_s5 + $0x18] sm:$0xff]  ;;  %v18515_v52 = vmov 2102212464  }
  0x1d   : > { %s12839_s21 = scalar_lea.vmem %s18482_s0, %s11561_s15  ;;  %v4727_v40 = vld [vmem:[%s18487_s5 + $0x10] sm:$0xff]  ;;  %v18513_v54 = vmov 920167782   ;;  %v4730_v56 = vld [vmem:[%s18487_s5 + $0x28] sm:$0xff]  ;;  %v4729_v60 = vld [vmem:[%s18487_s5 + $0x20] sm:$0xff]  ;;  %s18375_s14 = scalar_lea.vmem [#allocation2], %s11559_s27 }
  0x1e   : > { %4105 = vperm.xlu1 %12392, %v4079_v3   ;;  %4095 = vperm.xlu0 %12391, %v4077_v4   ;;  %v12842_v9 = vld [vmem:[%s12839_s21] sm:$0x77]  ;;  %v18511_v63 = vmov 1326507024   ;;  %s12149_s24 = sshll.u32 %s12775_s29, 9  ;;  %s12683_s29 = smov [#allocation2]  }
  0x1f   : > { %v473_v12 = vand.u32 2147483647, %v12842_v9  ;;  %v476_v13 = vand.u32 2139095040, %v12842_v9  ;;  %v12853_v14 = vmul.f32 2.0, %v12842_v9  ;;  %v12856_v15 = vmul.f32 4.0, %v12842_v9  ;;  %s18437_s20 = scalar_lea.hbm %s18495_s13, %s12149_s24  ;;  %s12613_s23 = sshll.u32 %s12683_s29, 4  ;;  %s12614_s23 = int_to_ptr.vmem [resolvable:$false] %s12613_s23 }
  0x20   : > { %vm475_vm13 = vcmp.lt.s32.totalorder %v12842_v9, 0  ;;  %s12615_s30 = scalar_lea.vmem %s12614_s23, 1024 }
  0x21   : > { %v477_v16 = vshrl.u32 %v476_v13, 23  ;;  %v1305_v17 = vand.u32 2147483647, %v12853_v14  ;;  %v1308_v18 = vand.u32 2139095040, %v12853_v14  ;;  %v480_v21 = vand.u32 8388607, %v473_v12 }
  0x22   : > { %4115 = vperm.xlu1 %12392, %v4081_v5   ;;  %4110 = vperm.xlu0 %12391, %v4080_v6   ;;  %v2140_v25 = vand.u32 2139095040, %v12856_v15  ;;  %v2137_v35 = vand.u32 2147483647, %v12856_v15  ;;  %v4732_v5 = vld [vmem:[%s18487_s5 + $0x38] sm:$0xff] }
  0x23   : > { %v11564_v22 = vadd.s32 4294967169, %v477_v16  ;;  %v1309_v23 = vshrl.u32 %v1308_v18, 23  ;;  %v1312_v24 = vand.u32 8388607, %v1305_v17  ;;  %v481_v30 = vor.u32 8388608, %v480_v21 }
  0x24   : > { %v2141_v32 = vshrl.u32 %v2140_v25, 23 }
  0x25   : > { %v483_v27 = vadd.s32 1, %v11564_v22  ;;  %v11596_v28 = vadd.s32 4294967169, %v1309_v23  ;;  %v1313_v31 = vor.u32 8388608, %v1312_v24  ;;  %v12886_v41 = vshll.u32 %v481_v30, 8 }
  0x26   : > { %4125 = vperm.xlu1 %12392, %v4083_v7   ;;  %4120 = vperm.xlu0 %12391, %v4082_v8   ;;  %v11628_v36 = vadd.s32 4294967169, %v2141_v32 }
  0x27   : > { %vm484_vm0 = vcmp.gt.s32.totalorder %v483_v27, 0  ;;  %v1315_v33 = vadd.s32 1, %v11596_v28  ;;  %v12888_v43 = vshll.u32 %v1313_v31, 8  ;;  %v4734_v28 = vld [vmem:[%s18487_s5 + $0x48] sm:$0xff] }
  0x28   : > { %v485_v34 = vsel %vm484_vm0, %v483_v27, 0  ;;  %v12892_v49 = vadd.s32 1, %v11628_v36  ;;  %vm13097_vm0 = vcmp.le.f32.partialorder %v473_v12, 0.7853982  ;;  %v11799_v12 = vld [vmem:[%s18487_s5 + $0xb8] sm:$0xff] }
  0x29   : > { %v12881_v38 = vshrl.u32 %v485_v34, 5  ;;  %v487_v39 = vand.u32 31, %v485_v34  ;;  %vm1316_vm1 = vcmp.gt.s32.totalorder %v1315_v33, 0 }
  0x2a   : > { %4135 = vperm.xlu1 %12392, %v4085_v10   ;;  %4130 = vperm.xlu0 %12391, %v4084_v11   ;;  %v1317_v42 = vsel %vm1316_vm1, %v1315_v33, 0  ;;  %v4731_v11 = vld [vmem:[%s18487_s5 + $0x30] sm:$0xff]  ;;  %vm2148_vm8 = vcmp.gt.s32.totalorder %v12892_v49, 0 }
  0x2b   : > { %v488_v44 = vsub.s32 32, %v487_v39  ;;  %v490_v46 = vshll.u32 %v18522_v45, %v487_v39  ;;  %v493_v48 = vshll.u32 %v18520_v47, %v487_v39  ;;  %v496_v51 = vshll.u32 %v18517_v50, %v487_v39 }
  0x2c   : > { %v499_v53 = vshll.u32 %v18515_v52, %v487_v39  ;;  %v502_v55 = vshll.u32 %v18513_v54, %v487_v39  ;;  %vm505_vm2 = vcmp.lt.s32.totalorder %v12881_v38, 1  ;;  %vm506_vm3 = vcmp.lt.s32.totalorder %v12881_v38, 2 }
  0x2d   : > { %v489_v57 = vshrl.u32 %v18522_v45, %v488_v44  ;;  %v491_v58 = vshrl.u32 %v18520_v47, %v488_v44  ;;  %v494_v59 = vshrl.u32 %v18517_v50, %v488_v44  ;;  %v497_v61 = vshrl.u32 %v18515_v52, %v488_v44 }
  0x2e   : > { %4145 = vperm.xlu1 %12392, %v4087_v19   ;;  %4140 = vperm.xlu0 %12391, %v4086_v20   ;;  %v500_v62 = vshrl.u32 %v18513_v54, %v488_v44  ;;  %v503_v0 = vshrl.u32 %v18511_v63, %v488_v44  ;;  %vm507_vm4 = vcmp.lt.s32.totalorder %v12881_v38, 3  ;;  %vm508_vm5 = vcmp.lt.s32.totalorder %v12881_v38, 4 }
  0x2f   : > { %v492_v1 = vor.u32 %v491_v58, %v490_v46  ;;  %v495_v3 = vor.u32 %v494_v59, %v493_v48  ;;  %v1319_v4 = vand.u32 31, %v1317_v42  ;;  %v498_v6 = vor.u32 %v497_v61, %v496_v51 }
  0x30   : > { %v501_v7 = vor.u32 %v500_v62, %v499_v53  ;;  %v504_v8 = vor.u32 %v503_v0, %v502_v55  ;;  %v12916_v10 = vshrl.u32 %v1317_v42, 5  ;;  %v4736_v55 = vld [vmem:[%s18487_s5 + $0x58] sm:$0xff] }
  0x31   : > { %v509_v13 = vsel %vm505_vm2, %v489_v57, %v492_v1  ;;  %v513_v16 = vsel %vm505_vm2, %v492_v1, %v495_v3  ;;  %v1320_v18 = vsub.s32 32, %v1319_v4  ;;  %v1322_v19 = vshll.u32 %v18522_v45, %v1319_v4 }
  0x32   : > { %4744 = vperm.xlu1 %12392, %v4726_v26   ;;  %4739 = vperm.xlu0 %12391, %v4725_v29   ;;  %v510_v20 = vsel %vm508_vm5, %v498_v6, 2102212464  ;;  %v514_v21 = vsel %vm508_vm5, %v501_v7, 920167782  ;;  %v517_v22 = vsel %vm505_vm2, %v495_v3, %v498_v6  ;;  %v518_v23 = vsel %vm508_vm5, %v504_v8, 1326507024 }
  0x33   : > { %v511_v24 = vsel %vm507_vm4, %v495_v3, %v510_v20  ;;  %v515_v25 = vsel %vm507_vm4, %v498_v6, %v514_v21  ;;  %v519_v26 = vsel %vm507_vm4, %v501_v7, %v518_v23  ;;  %v1321_v27 = vshrl.u32 %v18522_v45, %v1320_v18  ;;  %v4733_v29 = vld [vmem:[%s18487_s5 + $0x40] sm:$0xff] }
  0x34   : > { %v512_v30 = vsel %vm506_vm3, %v509_v13, %v511_v24  ;;  %v516_v31 = vsel %vm506_vm3, %v513_v16, %v515_v25  ;;  %v520_v32 = vsel %vm506_vm3, %v517_v22, %v519_v26  ;;  %v1323_v33 = vshrl.u32 %v18520_v47, %v1320_v18  ;;  %v13013_v24 = vld [vmem:[%s12839_s21 + $0x8] sm:$0x77] }
  0x35   : > { %v12955_v34 = vmul.u32.u64.low %v12886_v41, %v520_v32  ;;  %v12956_v36 = vmul.u32.u64.high %v12886_v41, %v520_v32, %v12955_v34  ;;  %v1325_v44 = vshll.u32 %v18520_v47, %v1319_v4  ;;  %v1326_v38 = vshrl.u32 %v18517_v50, %v1320_v18 }
  0x36   : > { %4754 = vperm.xlu1 %12392, %v4728_v37   ;;  %4749 = vperm.xlu0 %12391, %v4727_v40   ;;  %v12959_v37 = vmul.u32.u64.low %v12886_v41, %v516_v31  ;;  %v12960_v39 = vmul.u32.u64.high %v12886_v41, %v516_v31, %v12959_v37  ;;  %v528_v40 = vmul.u32 %v12886_v41, %v512_v30  ;;  %v1324_v42 = vor.u32 %v1323_v33, %v1322_v19  ;;  %v4735_v41 = vld [vmem:[%s18487_s5 + $0x50] sm:$0xff] }
  0x37   : > { %v1328_v46 = vshll.u32 %v18517_v50, %v1319_v4  ;;  %v1329_v48 = vshrl.u32 %v18515_v52, %v1320_v18  ;;  %v1331_v51 = vshll.u32 %v18515_v52, %v1319_v4  ;;  %v1332_v53 = vshrl.u32 %v18513_v54, %v1320_v18  ;;  %v11790_v33 = vld [vmem:[%s18487_s5 + $0x70] sm:$0xff] }
  0x38   : > { %v1334_v57 = vshll.u32 %v18513_v54, %v1319_v4  ;;  %v1335_v58 = vshrl.u32 %v18511_v63, %v1320_v18  ;;  %vm1337_vm6 = vcmp.lt.s32.totalorder %v12916_v10, 1  ;;  %vm530_vm7 = vc.u32 %v12956_v36, %v12959_v37  ;;  %v11789_v4 = vld [vmem:[%s18487_s5 + $0x68] sm:$0xff] }
  0x39   : > { %v531_v59 = vadd.s32 1, %v12960_v39  ;;  %v1333_v61 = vor.u32 %v1332_v53, %v1331_v51  ;;  %vm1338_vm9 = vcmp.lt.s32.totalorder %v12916_v10, 2  ;;  %vm1339_vm10 = vcmp.lt.s32.totalorder %v12916_v10, 3 }
  0x3a   : > { %4764 = vperm.xlu1 %12392, %v4730_v56   ;;  %4759 = vperm.xlu0 %12391, %v4729_v60   ;;  %v1327_v56 = vor.u32 %v1326_v38, %v1325_v44  ;;  %v1330_v60 = vor.u32 %v1329_v48, %v1328_v46  ;;  %v1336_v62 = vor.u32 %v1335_v58, %v1334_v57  ;;  %vm1340_vm11 = vcmp.lt.s32.totalorder %v12916_v10, 4  ;;  %v11793_v46 = vld [vmem:[%s18487_s5 + $0x88] sm:$0xff] }
  0x3b   : > { %v532_v0 = vsel %vm530_vm7, %v531_v59, %v12960_v39  ;;  %v1341_v1 = vsel %vm1337_vm6, %v1321_v27, %v1324_v42  ;;  %v1346_v8 = vsel %vm1340_vm11, %v1333_v61, 920167782  ;;  %v2144_v19 = vand.u32 8388607, %v2137_v35 }
  0x3c   : > { %v1345_v3 = vsel %vm1337_vm6, %v1324_v42, %v1327_v56  ;;  %v533_v6 = vadd.s32 %v532_v0, %v528_v40  ;;  %v1342_v7 = vsel %vm1340_vm11, %v1330_v60, 2102212464  ;;  %v1347_v16 = vsel %vm1339_vm10, %v1330_v60, %v1346_v8  ;;  %v11795_v0 = vld [vmem:[%s18487_s5 + $0x98] sm:$0xff] }
  0x3d   : > { %v1343_v13 = vsel %vm1339_vm10, %v1327_v56, %v1342_v7  ;;  %v1350_v18 = vsel %vm1340_vm11, %v1336_v62, 1326507024  ;;  %v1348_v21 = vsel %vm1338_vm9, %v1345_v3, %v1347_v16  ;;  %v2149_v23 = vsel %vm2148_vm8, %v12892_v49, 0  ;;  %v11791_v49 = vld [vmem:[%s18487_s5 + $0x78] sm:$0xff]  ;;  %v11797_v16 = vld [vmem:[%s18487_s5 + $0xa8] sm:$0xff] }
  0x3e   : > { %4774 = vperm.xlu1 %12392, %v4732_v5   ;;  %4769 = vperm.xlu0 %12391, %v4731_v11   ;;  %v11788_v5 = vld [vmem:[%s18487_s5 + $0x60] sm:$0xff]  ;;  %v1349_v11 = vsel %vm1337_vm6, %v1327_v56, %v1330_v60  ;;  %v534_v20 = vadd.s32 536870912, %v533_v6  ;;  %v1351_v22 = vsel %vm1339_vm10, %v1333_v61, %v1350_v18  ;;  %v1344_v25 = vsel %vm1338_vm9, %v1341_v1, %v1343_v13  ;;  %v11794_v1 = vld [vmem:[%s18487_s5 + $0x90] sm:$0xff] }
  0x3f   : > { %v1352_v26 = vsel %vm1338_vm9, %v1349_v11, %v1351_v22  ;;  %v2151_v32 = vand.u32 31, %v2149_v23  ;;  %v577_v10 = vand.u32 2147483647, %v13013_v24  ;;  %v1360_v39 = vmul.u32 %v12888_v43, %v1344_v25  ;;  %v11796_v18 = vld [vmem:[%s18487_s5 + $0xa0] sm:$0xff] }
  0x40   : > { %v13027_v30 = vmul.u32.u64.low %v12888_v43, %v1352_v26  ;;  %v13028_v31 = vmul.u32.u64.high %v12888_v43, %v1352_v26, %v13027_v30  ;;  %v2145_v40 = vor.u32 8388608, %v2144_v19  ;;  %v580_v42 = vand.u32 2139095040, %v13013_v24 }
  0x41   : > { %v2152_v38 = vsub.s32 32, %v2151_v32  ;;  %v13057_v56 = vand.u32 8388607, %v577_v10  ;;  %v2160_v58 = vshll.u32 %v18517_v50, %v2151_v32  ;;  %v13062_v62 = vshrl.u32 %v2149_v23, 5 }
  0x42   : > { %4784 = vperm.xlu1 %12392, %v4734_v28   ;;  %4779 = vperm.xlu0 %12391, %v4733_v29   ;;  %v13020_v27 = vmul.u32.u64.low %v12888_v43, %v1348_v21  ;;  %v13021_v28 = vmul.u32.u64.high %v12888_v43, %v1348_v21, %v13020_v27  ;;  %v13024_v29 = vshrl.u32 %v534_v20, 30  ;;  %v11792_v43 = vld [vmem:[%s18487_s5 + $0x80] sm:$0xff]  ;;  %v581_v60 = vshrl.u32 %v580_v42, 23 }
  0x43   : > { %v2161_v59 = vshrl.u32 %v18515_v52, %v2152_v38  ;;  %v2158_v8 = vshrl.u32 %v18517_v50, %v2152_v38  ;;  %v2163_v11 = vshll.u32 %v18515_v52, %v2151_v32  ;;  %v2164_v13 = vshrl.u32 %v18513_v54, %v2152_v38 }
  0x44   : > { %v536_v34 = vshll.u32 %v13024_v29, 30  ;;  %v1363_v44 = vadd.s32 1, %v13021_v28  ;;  %vm1362_vm12 = vc.u32 %v13028_v31, %v13020_v27  ;;  %v529_v19 = vadd.s32 %v12959_v37, %v12956_v36 }
  0x45   : > { %v2153_v21 = vshrl.u32 %v18522_v45, %v2152_v38  ;;  %v2162_v22 = vor.u32 %v2161_v59, %v2160_v58  ;;  %v2166_v25 = vshll.u32 %v18513_v54, %v2151_v32  ;;  %v2167_v26 = vshrl.u32 %v18511_v63, %v2152_v38 }
  0x46   : > { %4794 = vperm.xlu1 %12392, %v4736_v55   ;;  %4789 = vperm.xlu0 %12391, %v4735_v41   ;;  %v13044_v48 = vsub.s32 %v533_v6, %v536_v34  ;;  %v1364_v51 = vsel %vm1362_vm12, %v1363_v44, %v13021_v28  ;;  %v13053_v41 = vshll.u32 %v2145_v40, 8  ;;  %v2157_v6 = vshll.u32 %v18520_v47, %v2151_v32 }
  0x47   : > { %v1365_v55 = vadd.s32 %v1364_v51, %v1360_v39  ;;  %vm2172_vm14 = vcmp.lt.s32.totalorder %v13062_v62, 4  ;;  %v559_v28 = vsub.s32 4, %v13024_v29  ;;  %v2165_v30 = vor.u32 %v2164_v13, %v2163_v11 }
  0x48   : > { %v539_v53 = vsub.s32 0, %v13044_v48  ;;  %v2174_v36 = vsel %vm2172_vm14, %v2162_v22, 2102212464  ;;  %v2159_v34 = vor.u32 %v2158_v8, %v2157_v6  ;;  %vm2169_vm1 = vcmp.lt.s32.totalorder %v13062_v62, 1 }
  0x49   : > { %v1366_v61 = vadd.s32 536870912, %v1365_v55  ;;  %vm2171_vm2 = vcmp.lt.s32.totalorder %v13062_v62, 3  ;;  %vm2170_vm3 = vcmp.lt.s32.totalorder %v13062_v62, 2  ;;  %v11568_v59 = vadd.s32 4294967169, %v581_v60  ;;  %v11842_v60 = vld [vmem:[%s18487_s5 + $0xc0] sm:$0xff] }
  0x4a   : > { %5395 = vperm.xlu1 %12392, %v11789_v4   ;;  %5390 = vperm.xlu0 %12391, %v11788_v5   ;;  %v11565_v57 = vmin.u32 %v539_v53, %v13044_v48  ;;  %v2154_v4 = vshll.u32 %v18522_v45, %v2151_v32  ;;  %v2155_v5 = vshrl.u32 %v18520_v47, %v2152_v38  ;;  %vm1307_vm4 = vcmp.lt.s32.totalorder %v12853_v14, 0 }
  0x4b   : > { %v13074_v7 = vshrl.u32 %v1366_v61, 30  ;;  %v2168_v38 = vor.u32 %v2167_v26, %v2166_v25  ;;  %v2175_v53 = vsel %vm2171_vm2, %v2159_v34, %v2174_v36  ;;  %v2181_v8 = vsel %vm2169_vm1, %v2159_v34, %v2162_v22  ;;  %v11845_v36 = vld [vmem:[%s18487_s5 + $0xd8] sm:$0xff] }
  0x4c   : > { %v541_v3 = vclz %v11565_v57  ;;  %v2156_v32 = vor.u32 %v2155_v5, %v2154_v4  ;;  %v11843_v4 = vld [vmem:[%s18487_s5 + $0xc8] sm:$0xff]  ;;  %v1361_v5 = vadd.s32 %v13020_v27, %v13028_v31  ;;  %v587_v25 = vadd.s32 1, %v11568_v59 }
  0x4d   : > { %v1368_v23 = vshll.u32 %v13074_v7, 30  ;;  %v1391_v26 = vsub.s32 4, %v13074_v7  ;;  %vm13175_vm7 = vcmp.le.f32.partialorder %v1305_v17, 0.7853982 }
  0x4e   : > { %5405 = vperm.xlu1 %12392, %v11791_v49   ;;  %5400 = vperm.xlu0 %12391, %v11790_v33   ;;  %v11566_v20 = vadd.s32 4294967294, %v541_v3  ;;  %v2177_v58 = vsel %vm2169_vm1, %v2156_v32, %v2159_v34  ;;  %vm588_vm6 = vcmp.gt.s32.totalorder %v587_v25, 0 }
  0x4f   : > { %v13101_v33 = vsub.s32 %v1365_v55, %v1368_v23  ;;  %v2178_v55 = vsel %vm2172_vm14, %v2165_v30, 920167782 }
  0x50   : > { %vm11567_vm15 = vcmp.lt.s32.totalorder %v11566_v20, 0  ;;  %v2179_v3 = vsel %vm2171_vm2, %v2162_v22, %v2178_v55 }
  0x51   : > { %v544_v49 = vsel %vm11567_vm15, 0, %v11566_v20  ;;  %v1371_v44 = vsub.s32 0, %v13101_v33 }
  0x52   : > { %5415 = vperm.xlu1 %12392, %v11793_v46   ;;  %5410 = vperm.xlu0 %12391, %v11792_v43   ;;  %v545_v39 = vsub.s32 32, %v544_v49  ;;  %v546_v40 = vshll.u32 %v13044_v48, %v544_v49  ;;  %v549_v42 = vsub.s32 4294967266, %v544_v49  ;;  %v2173_v46 = vsel %vm2169_vm1, %v2153_v21, %v2156_v32  ;;  %v11798_v48 = vld [vmem:[%s18487_s5 + $0xb0] sm:$0xff] }
  0x53   : > { %v11597_v57 = vmin.u32 %v1371_v44, %v13101_v33  ;;  %v11844_v49 = vld [vmem:[%s18487_s5 + $0xd0] sm:$0xff]  ;;  %v11847_v44 = vld [vmem:[%s18487_s5 + $0xe8] sm:$0xff] }
  0x54   : > { %v547_v43 = vshrl.u32 %v529_v19, %v545_v39  ;;  %v550_v51 = vadd.s32 127, %v549_v42 }
  0x55   : > { %v1373_v6 = vclz %v11597_v57 }
  0x56   : > { %5425 = vperm.xlu1 %12392, %v11795_v0   ;;  %5420 = vperm.xlu0 %12391, %v11794_v1   ;;  %v548_v61 = vor.u32 %v547_v43, %v546_v40  ;;  %v551_v0 = vshll.u32 %v550_v51, 23  ;;  %v560_v1 = vsel %vm475_vm13, %v559_v28, %v13024_v29  ;;  %v2176_v29 = vsel %vm2170_vm3, %v2173_v46, %v2175_v53 }
  0x57   : > { %v11598_v19 = vadd.s32 4294967294, %v1373_v6  ;;  %v562_v22 = vsel %vm13097_vm0, 0, %v560_v1  ;;  %v2192_v34 = vmul.u32 %v13053_v41, %v2176_v29  ;;  %v1392_v53 = vsel %vm1307_vm4, %v1391_v26, %v13074_v7 }
  0x58   : > { %v552_v11 = vor.u32 4788187, %v551_v0  ;;  %v555_v13 = vcvt.s32.f32 %v548_v61  ;;  %v13194_v1 = vand.u32 3, %v562_v22  ;;  %v1394_v7 = vsel %vm13175_vm7, 0, %v1392_v53 }
  0x59   : > { %vm11599_vm5 = vcmp.lt.s32.totalorder %v11598_v19, 0 }
  0x5a   : > { %5435 = vperm.xlu1 %12392, %v11797_v16   ;;  %5430 = vperm.xlu0 %12391, %v11796_v18   ;;  %v2180_v16 = vsel %vm2170_vm3, %v2177_v58, %v2179_v3  ;;  %v2182_v18 = vsel %vm2172_vm14, %v2168_v38, 1326507024  ;;  %v553_v21 = vand.u32 2147483647, %v552_v11  ;;  %v1376_v32 = vsel %vm11599_vm5, 0, %v11598_v19 }
  0x5b   : > { %v2183_v20 = vsel %vm2171_vm2, %v2165_v30, %v2182_v18  ;;  %v13148_v27 = vmul.u32.u64.low %v13053_v41, %v2180_v16  ;;  %v13149_v31 = vmul.u32.u64.high %v13053_v41, %v2180_v16, %v13148_v27  ;;  %v1377_v39 = vsub.s32 32, %v1376_v32 }
  0x5c   : > { %v2184_v23 = vsel %vm2170_vm3, %v2181_v8, %v2183_v20  ;;  %v556_v62 = vmul.f32 %v555_v13, %v553_v21  ;;  %v1378_v40 = vshll.u32 %v13101_v33, %v1376_v32  ;;  %v1381_v42 = vsub.s32 4294967266, %v1376_v32  ;;  %v11846_v33 = vld [vmem:[%s18487_s5 + $0xe0] sm:$0xff] }
  0x5d   : > { %v13158_v28 = vmul.u32.u64.low %v13053_v41, %v2184_v23  ;;  %v13159_v30 = vmul.u32.u64.high %v13053_v41, %v2184_v23, %v13158_v28  ;;  %v585_v41 = vor.u32 8388608, %v13057_v56  ;;  %v1379_v43 = vshrl.u32 %v1361_v5, %v1377_v39 }
  0x5e   : > { %5445 = vperm.xlu1 %12392, %v11799_v12   ;;  %5440 = vperm.xlu0 %12391, %v11798_v48   ;;  %v2195_v12 = vadd.s32 1, %v13149_v31  ;;  %v557_v38 = vxor.u32 2147483648, %v556_v62  ;;  %v589_v48 = vsel %vm588_vm6, %v587_v25, 0  ;;  %v1382_v51 = vadd.s32 127, %v1381_v42 }
  0x5f   : > { %vm2194_vm8 = vc.u32 %v13159_v30, %v13148_v27  ;;  %v566_v56 = vadd.s32 3, %v562_v22  ;;  %v591_v57 = vand.u32 31, %v589_v48  ;;  %v1380_v59 = vor.u32 %v1379_v43, %v1378_v40 }
  0x60   : > { %v558_v17 = vsel %vm475_vm13, %v557_v38, %v556_v62  ;;  %v2196_v55 = vsel %vm2194_vm8, %v2195_v12, %v13149_v31  ;;  %v1383_v61 = vshll.u32 %v1382_v51, 23  ;;  %v13200_v37 = vshll.u32 %v585_v41, 8 }
  0x61   : > { %v561_v58 = vsel %vm13097_vm0, %v12842_v9, %v558_v17  ;;  %v2197_v0 = vadd.s32 %v2196_v55, %v2192_v34  ;;  %v592_v3 = vsub.s32 32, %v591_v57  ;;  %v13198_v6 = vand.u32 3, %v566_v56 }
  0x62   : > { %6045 = vperm.xlu1 %12392, %v11843_v4   ;;  %6040 = vperm.xlu0 %12391, %v11842_v60   ;;  %12453 = vcosq.f32 %v561_v58  ;;  %v1384_v4 = vor.u32 4788187, %v1383_v61  ;;  %v1387_v60 = vcvt.s32.f32 %v1380_v59  ;;  %v1398_v8 = vadd.s32 3, %v1394_v7 }
  0x63   : > { %12455 = vsinq.f32 %v561_v58  ;;  %v2198_v5 = vadd.s32 536870912, %v2197_v0  ;;  %v13205_v13 = vmul.f32 2.0, %v13013_v24  ;;  %v594_v16 = vshll.u32 %v18522_v45, %v591_v57 }
  0x64   : > { %v1385_v29 = vand.u32 2147483647, %v1384_v4  ;;  %v595_v18 = vshrl.u32 %v18520_v47, %v592_v3  ;;  %v597_v19 = vshll.u32 %v18520_v47, %v591_v57  ;;  %v598_v20 = vshrl.u32 %v18517_v50, %v592_v3 }
  0x65   : > { %v13202_v11 = vshrl.u32 %v2198_v5, 30  ;;  %vm984_vm9 = vcmp.eq.s32.totalorder %v13194_v1, 0  ;;  %vm987_vm10 = vcmp.eq.s32.totalorder %v13194_v1, 2  ;;  %v603_v22 = vshll.u32 %v18515_v52, %v591_v57 }
  0x66   : > { %6055 = vperm.xlu1 %12392, %v11845_v36   ;;  %6050 = vperm.xlu0 %12391, %v11844_v49   ;;  %v1388_v31 = vmul.f32 %v1387_v60, %v1385_v29  ;;  %v604_v23 = vshrl.u32 %v18513_v54, %v592_v3  ;;  %vm568_vm11 = vcmp.lt.s32.totalorder %v13198_v6, 2  ;;  %vm569_vm12 = vcmp.eq.s32.totalorder %v13198_v6, 0 }
  0x67   : > { %v2200_v21 = vshll.u32 %v13202_v11, 30  ;;  %vm572_vm13 = vcmp.eq.s32.totalorder %v13198_v6, 2  ;;  %v13219_v25 = vshrl.u32 %v589_v48, 5  ;;  %v13221_v28 = vand.u32 3, %v1398_v8 }
  0x68   : > { %v1389_v26 = vxor.u32 2147483648, %v1388_v31  ;;  %v13223_v36 = vand.u32 3, %v1394_v7  ;;  %vm2139_vm14 = vcmp.lt.s32.totalorder %v12856_v15, 0  ;;  %vm983_vm15 = vcmp.lt.s32.totalorder %v13194_v1, 2 }
  0x69   : > { %v13226_v49 = vsub.s32 %v2197_v0, %v2200_v21  ;;  %v596_v62 = vor.u32 %v595_v18, %v594_v16  ;;  %v600_v32 = vshll.u32 %v18517_v50, %v591_v57  ;;  %v601_v34 = vshrl.u32 %v18515_v52, %v592_v3 }
  0x6a   : > { %6065 = vperm.xlu1 %12392, %v11847_v44   ;;  %6060 = vperm.xlu0 %12391, %v11846_v33   ;;  %v1412_v39 = vand.u32 2139095040, %v13205_v13  ;;  %vm565_vm0 = vweird.f32 %v12842_v9  ;;  %v1390_v40 = vsel %vm1307_vm4, %v1389_v26, %v1388_v31  ;;  %v599_v12 = vor.u32 %v598_v20, %v597_v19 }
  0x6b   : > { %v2203_v42 = vsub.s32 0, %v13226_v49  ;;  %v605_v44 = vor.u32 %v604_v23, %v603_v22  ;;  %v1393_v41 = vsel %vm13175_vm7, %v12853_v14, %v1390_v40  ;;  %v606_v48 = vshll.u32 %v18513_v54, %v591_v57 }
  0x6c   : > { %v12454_v38 = vpop.eup %12453  ;;  %v607_v33 = vshrl.u32 %v18511_v63, %v592_v3  ;;  %vm612_vm1 = vcmp.lt.s32.totalorder %v13219_v25, 4  ;;  %12457 = vcosq.f32 %v1393_v41  ;;  %v2223_v17 = vsub.s32 4, %v13202_v11 }
  0x6d   : > { %v12456_v43 = vpop.eup %12455  ;;  %v573_v51 = vxor.u32 2147483648, %v12454_v38  ;;  %v11629_v53 = vmin.u32 %v2203_v42, %v13226_v49  ;;  %12459 = vsinq.f32 %v1393_v41  ;;  %v602_v55 = vor.u32 %v601_v34, %v600_v32 }
  0x6e   : > { %v570_v56 = vxor.u32 2147483648, %v12456_v43  ;;  %vm609_vm2 = vcmp.lt.s32.totalorder %v13219_v25, 1  ;;  %vm1404_vm3 = vcmp.eq.s32.totalorder %v13221_v28, 2  ;;  %vm13248_vm4 = vcmp.le.f32.partialorder %v2137_v35, 0.7853982 }
  0x6f   : > { %v2205_v57 = vclz %v11629_v53  ;;  %v593_v58 = vshrl.u32 %v18522_v45, %v592_v3  ;;  %vm611_vm5 = vcmp.lt.s32.totalorder %v13219_v25, 3  ;;  %v618_v59 = vsel %vm612_vm1, %v605_v44, 920167782 }
  0x70   : > { %v571_v61 = vsel %vm569_vm12, %v12454_v38, %v570_v56  ;;  %v574_v0 = vsel %vm572_vm13, %v573_v51, %v12456_v43  ;;  %vm1401_vm6 = vcmp.eq.s32.totalorder %v13221_v28, 0  ;;  %v608_v35 = vor.u32 %v607_v33, %v606_v48 }
  0x71   : > { %v614_v7 = vsel %vm612_vm1, %v602_v55, 2102212464  ;;  %vm1400_vm7 = vcmp.lt.s32.totalorder %v13221_v28, 2  ;;  %v2193_v3 = vadd.s32 %v13148_v27, %v13159_v30  ;;  %v11630_v4 = vadd.s32 4294967294, %v2205_v57 }
  0x72   : > { %vm610_vm8 = vcmp.lt.s32.totalorder %v13219_v25, 2  ;;  %v617_v60 = vsel %vm609_vm2, %v596_v62, %v599_v12  ;;  %v986_v5 = vsel %vm984_vm9, %v12454_v38, %v570_v56  ;;  %v989_v29 = vsel %vm987_vm10, %v573_v51, %v12456_v43 }
  0x73   : > { %vm1397_vm12 = vweird.f32 %v12853_v14  ;;  %v2224_v8 = vsel %vm2139_vm14, %v2223_v17, %v13202_v11  ;;  %v619_v27 = vsel %vm611_vm5, %v602_v55, %v618_v59  ;;  %v575_v30 = vsel %vm568_vm11, %v571_v61, %v574_v0  ;;  %v11849_v0 = vld [vmem:[%s18487_s5 + $0xf8] sm:$0xff] }
  0x74   : > { %vm11631_vm13 = vcmp.lt.s32.totalorder %v11630_v4, 0  ;;  %v613_v16 = vsel %vm609_vm2, %v593_v58, %v596_v62  ;;  %v615_v18 = vsel %vm611_vm5, %v599_v12, %v614_v7  ;;  %v620_v20 = vsel %vm610_vm8, %v617_v60, %v619_v27  ;;  %v13339_v7 = vld [vmem:[%s12839_s21] sm:$0x77]  ;;  %6075 = vperm.xlu1 %12392, %v11849_v0  }
  0x75   : > { %v2208_v19 = vsel %vm11631_vm13, 0, %v11630_v4  ;;  %v621_v11 = vsel %vm609_vm2, %v599_v12, %v602_v55  ;;  %v622_v31 = vsel %vm612_vm1, %v608_v35, 1326507024  ;;  %v990_v6 = vsel %vm983_vm15, %v986_v5, %v989_v29  ;;  %v11848_v35 = vld [vmem:[%s18487_s5 + $0xf0] sm:$0xff] }
  0x76   : > { %v2209_v21 = vsub.s32 32, %v2208_v19  ;;  %v2210_v22 = vshll.u32 %v13226_v49, %v2208_v19  ;;  %v2213_v23 = vsub.s32 4294967266, %v2208_v19  ;;  %v13296_v26 = vsel %vm565_vm0, nan, %v575_v30  ;;  %v12458_v40 = vpop.eup %12457  ;;  %6070 = vperm.xlu0 %12391, %v11848_v35  }
  0x77   : > { %v623_v62 = vsel %vm611_vm5, %v605_v44, %v622_v31  ;;  %v13301_v32 = vmul.u32.u64.low %v13200_v37, %v620_v20  ;;  %v13302_v34 = vmul.u32.u64.high %v13200_v37, %v620_v20, %v13301_v32  ;;  %vm18618_vm9 = vcmask 1042432   ;;  %v12460_v38 = vpop.eup %12459 }
  0x78   : > { %v2211_v42 = vshrl.u32 %v2193_v3, %v2209_v21  ;;  %v2214_v1 = vadd.s32 127, %v2213_v23  ;;  %v616_v49 = vsel %vm610_vm8, %v613_v16, %v615_v18  ;;  %v624_v12 = vsel %vm610_vm8, %v621_v11, %v623_v62 }
  0x79   : > { %v1405_v41 = vxor.u32 2147483648, %v12458_v40  ;;  %v2226_v44 = vsel %vm13248_vm4, 0, %v2224_v8  ;;  %v13312_v48 = vmul.u32.u64.low %v13200_v37, %v624_v12  ;;  %v13313_v33 = vmul.u32.u64.high %v13200_v37, %v624_v12, %v13312_v48 }
  0x7a   : > { %v13317_v43 = vsel %vm565_vm0, nan, %v990_v6  ;;  %v1402_v51 = vxor.u32 2147483648, %v12460_v38  ;;  %v2212_v53 = vor.u32 %v2211_v42, %v2210_v22  ;;  %v2215_v17 = vshll.u32 %v2214_v1, 23 }
  0x7b   : > { %v1406_v25 = vsel %vm1404_vm3, %v1405_v41, %v12460_v38  ;;  %v3813_v56 = vcombine.high %v13296_v26, %v13296_v26  ;;  %v632_v55 = vmul.u32 %v13200_v37, %v616_v49  ;;  %v635_v57 = vadd.s32 1, %v13302_v34 }
  0x7c   : > { %v1403_v58 = vsel %vm1401_vm6, %v12458_v40, %v1402_v51  ;;  %v2216_v9 = vor.u32 4788187, %v2215_v17  ;;  %v2219_v59 = vcvt.s32.f32 %v2212_v53  ;;  %v1413_v61 = vshrl.u32 %v1412_v39, 23 }
  0x7d   : > { %v1407_v37 = vsel %vm1400_vm7, %v1403_v58, %v1406_v25  ;;  %vm1816_vm10 = vcmp.eq.s32.totalorder %v13223_v36, 0  ;;  %v3801_v3 = vcombine.high %v13339_v7, %v13339_v7  ;;  %vm634_vm11 = vc.u32 %v13313_v33, %v13301_v32 }
  0x7e   : > { %v13347_v39 = vsel %vm1397_vm12, nan, %v1407_v37  ;;  %vm1819_vm15 = vcmp.eq.s32.totalorder %v13223_v36, 2  ;;  %v2217_v4 = vand.u32 2147483647, %v2216_v9  ;;  %v636_v28 = vsel %vm634_vm11, %v635_v57, %v13302_v34 }
  0x7f   : > { %v2230_v60 = vadd.s32 3, %v2226_v44  ;;  %v3818_v5 = vrot.slane %v3813_v56, 5  ;;  %v3837_v29 = vcombine.high %v13317_v43, %v13317_v43  ;;  %v637_v8 = vadd.s32 %v636_v28, %v632_v55 }
  0x80   : > { %vm1815_vm0 = vcmp.lt.s32.totalorder %v13223_v36, 2  ;;  %v2220_v27 = vmul.f32 %v2219_v59, %v2217_v4  ;;  %v1409_v30 = vand.u32 2147483647, %v13205_v13  ;;  %v11600_v16 = vadd.s32 4294967169, %v1413_v61 }
  0x81   : > { %v1818_v18 = vsel %vm1816_vm10, %v12458_v40, %v1402_v51  ;;  %v1821_v19 = vsel %vm1819_vm15, %v1405_v41, %v12460_v38  ;;  %v3861_v20 = vcombine.high %v13347_v39, %v13347_v39  ;;  %v638_v11 = vadd.s32 536870912, %v637_v8 }
  0x82   : > { %v2221_v31 = vxor.u32 2147483648, %v2220_v27  ;;  %v13359_v6 = vand.u32 3, %v2226_v44  ;;  %vm18501_vm1 = vcmask 1045504   ;;  %v1419_v21 = vadd.s32 1, %v11600_v16 }
  0x83   : > { %v13361_v22 = vand.u32 3, %v2230_v60  ;;  %v3842_v23 = vrot.slane %v3837_v29, 2  ;;  %v3979_v62 = vsel %vm18618_vm9, %v3801_v3, %v3818_v5  ;;  %v13364_v34 = vshrl.u32 %v638_v11, 30 }
  0x84   : > { %v1822_v40 = vsel %vm1815_vm0, %v1818_v18, %v1821_v19  ;;  %v2222_v42 = vsel %vm2139_vm14, %v2221_v31, %v2220_v27  ;;  %v1416_v1 = vand.u32 8388607, %v1409_v30  ;;  %vm1420_vm2 = vcmp.gt.s32.totalorder %v1419_v21, 0 }
  0x85   : > { %v2225_v49 = vsel %vm13248_vm4, %v12856_v15, %v2222_v42  ;;  %v3866_v12 = vrot.slane %v3861_v20, 7  ;;  %v640_v38 = vshll.u32 %v13364_v34, 30  ;;  %v1421_v41 = vsel %vm1420_vm2, %v1419_v21, 0 }
  0x86   : > { %12461 = vcosq.f32 %v2225_v49  ;;  %vm18505_vm3 = vcmask 1040384   ;;  %v1423_v44 = vand.u32 31, %v1421_v41  ;;  %vm18500_vm5 = vcmask 1043456  }
  0x87   : > { %12463 = vsinq.f32 %v2225_v49  ;;  %v13376_v36 = vsub.s32 %v637_v8, %v640_v38  ;;  %v13380_v48 = vsel %vm1397_vm12, nan, %v1822_v40  ;;  %vm2236_vm14 = vcmp.eq.s32.totalorder %v13361_v22, 2 }
  0x88   : > { %vm2651_vm6 = vcmp.eq.s32.totalorder %v13359_v6, 2  ;;  %v13385_v46 = vsel %vm18501_vm1, %v3979_v62, %v3842_v23  ;;  %v1417_v51 = vor.u32 8388608, %v1416_v1  ;;  %v1424_v53 = vsub.s32 32, %v1423_v44 }
  0x89   : > { %vm2233_vm4 = vcmp.eq.s32.totalorder %v13361_v22, 0  ;;  %vm2648_vm7 = vcmp.eq.s32.totalorder %v13359_v6, 0  ;;  %v3997_v17 = vsel %vm18505_vm3, %v3842_v23, %v3866_v12  ;;  %v643_v25 = vsub.s32 0, %v13376_v36 }
  0x8a   : > { %v1426_v14 = vshll.u32 %v18522_v45, %v1423_v44  ;;  %v1429_v56 = vshll.u32 %v18520_v47, %v1423_v44  ;;  %vm2232_vm8 = vcmp.lt.s32.totalorder %v13361_v22, 2  ;;  %vm2647_vm12 = vcmp.lt.s32.totalorder %v13359_v6, 2 }
  0x8b   : > { %v3865_v55 = vrot.slane %v13347_v39, 7  ;;  %v633_v57 = vadd.s32 %v13301_v32, %v13313_v33  ;;  %v1427_v58 = vshrl.u32 %v18520_v47, %v1424_v53  ;;  %v1430_v9 = vshrl.u32 %v18517_v50, %v1424_v53 }
  0x8c   : > { %vm2229_vm13 = vweird.f32 %v12856_v15  ;;  %v11569_v59 = vmin.u32 %v643_v25, %v13376_v36  ;;  %v13402_v61 = vshrl.u32 %v1421_v41, 5  ;;  %v1432_v0 = vshll.u32 %v18517_v50, %v1423_v44 }
  0x8d   : > { %v1433_v35 = vshrl.u32 %v18515_v52, %v1424_v53  ;;  %v13408_v37 = vsel %vm18500_vm5, %v3997_v17, %v13380_v48  ;;  %v13410_v3 = vshll.u32 %v1417_v51, 8  ;;  %v13413_v32 = vmul.f32 4.0, %v13013_v24 }
  0x8e   : > { %v3817_v33 = vrot.slane %v13296_v26, 5  ;;  %v645_v4 = vclz %v11569_v59  ;;  %v1425_v28 = vshrl.u32 %v18522_v45, %v1424_v53  ;;  %v1428_v60 = vor.u32 %v1427_v58, %v1426_v14 }
  0x8f   : > { %v1431_v5 = vor.u32 %v1430_v9, %v1429_v56  ;;  %v1435_v29 = vshll.u32 %v18515_v52, %v1423_v44  ;;  %v1436_v8 = vshrl.u32 %v18513_v54, %v1424_v53  ;;  %v1438_v27 = vshll.u32 %v18513_v54, %v1423_v44 }
  0x90   : > { %v1439_v16 = vshrl.u32 %v18511_v63, %v1424_v53  ;;  %v11570_v18 = vadd.s32 4294967294, %v645_v4  ;;  %v1434_v19 = vor.u32 %v1433_v35, %v1432_v0  ;;  %vm1441_vm10 = vcmp.lt.s32.totalorder %v13402_v61, 1  ;;  %v12462_v20 = vpop.eup %12461 }
  0x91   : > { %vm1442_vm11 = vcmp.lt.s32.totalorder %v13402_v61, 2  ;;  %vm18504_vm15 = vcmask 1046528   ;;  %vm18502_vm0 = vcmask 1041408   ;;  %v1437_v11 = vor.u32 %v1436_v8, %v1435_v29  ;;  %v12464_v21 = vpop.eup %12463 }
  0x92   : > { %v1440_v31 = vor.u32 %v1439_v16, %v1438_v27  ;;  %vm1443_vm2 = vcmp.lt.s32.totalorder %v13402_v61, 3  ;;  %vm1444_vm5 = vcmp.lt.s32.totalorder %v13402_v61, 4  ;;  %v2237_v23 = vxor.u32 2147483648, %v12462_v20 }
  0x93   : > { %vm11571_vm1 = vcmp.lt.s32.totalorder %v11570_v18, 0  ;;  %v1445_v62 = vsel %vm1441_vm10, %v1425_v28, %v1428_v60  ;;  %v1446_v40 = vsel %vm1444_vm5, %v1434_v19, 2102212464  ;;  %v2234_v42 = vxor.u32 2147483648, %v12464_v21 }
  0x94   : > { %v648_v1 = vsel %vm11571_vm1, 0, %v11570_v18  ;;  %v1449_v49 = vsel %vm1441_vm10, %v1428_v60, %v1431_v5  ;;  %v1450_v12 = vsel %vm1444_vm5, %v1437_v11, 920167782  ;;  %v2238_v38 = vsel %vm2236_vm14, %v2237_v23, %v12464_v21 }
  0x95   : > { %v2653_v41 = vsel %vm2651_vm6, %v2237_v23, %v12464_v21  ;;  %v649_v44 = vsub.s32 32, %v648_v1  ;;  %v650_v51 = vshll.u32 %v13376_v36, %v648_v1  ;;  %v2235_v53 = vsel %vm2233_vm4, %v12462_v20, %v2234_v42 }
  0x96   : > { %v2650_v17 = vsel %vm2648_vm7, %v12462_v20, %v2234_v42  ;;  %v653_v25 = vsub.s32 4294967266, %v648_v1  ;;  %v1447_v14 = vsel %vm1443_vm2, %v1431_v5, %v1446_v40  ;;  %v2239_v56 = vsel %vm2232_vm8, %v2235_v53, %v2238_v38 }
  0x97   : > { %v2654_v58 = vsel %vm2647_vm12, %v2650_v17, %v2653_v41  ;;  %v651_v9 = vshrl.u32 %v633_v57, %v649_v44  ;;  %v1451_v36 = vsel %vm1443_vm2, %v1434_v19, %v1450_v12  ;;  %v13452_v59 = vsel %vm2229_vm13, nan, %v2239_v56 }
  0x98   : > { %v13456_v0 = vsel %vm2229_vm13, nan, %v2654_v58  ;;  %v654_v35 = vadd.s32 127, %v653_v25  ;;  %v2244_v4 = vand.u32 2139095040, %v13413_v32  ;;  %v3897_v22 = vcombine.high %v13452_v59, %v13452_v59 }
  0x99   : > { %v3921_v6 = vcombine.high %v13456_v0, %v13456_v0  ;;  %v652_v57 = vor.u32 %v651_v9, %v650_v51  ;;  %v1452_v28 = vsel %vm1442_vm11, %v1449_v49, %v1451_v36  ;;  %v1448_v29 = vsel %vm1442_vm11, %v1445_v62, %v1447_v14 }
  0x9a   : > { %v655_v60 = vshll.u32 %v654_v35, 23  ;;  %v1453_v15 = vsel %vm1441_vm10, %v1431_v5, %v1434_v19  ;;  %v1454_v8 = vsel %vm1444_vm5, %v1440_v31, 1326507024  ;;  %v3902_v27 = vrot.slane %v3897_v22, 1 }
  0x9b   : > { %v3926_v16 = vrot.slane %v3921_v6, 6  ;;  %v659_v18 = vcvt.s32.f32 %v652_v57  ;;  %v1455_v20 = vsel %vm1443_vm2, %v1437_v11, %v1454_v8  ;;  %v2245_v61 = vshrl.u32 %v2244_v4, 23 }
  0x9c   : > { %v656_v21 = vor.u32 4788187, %v655_v60  ;;  %v1456_v23 = vsel %vm1442_vm11, %v1453_v15, %v1455_v20  ;;  %v13476_v40 = vmul.u32.u64.low %v13410_v3, %v1452_v28  ;;  %v13477_v42 = vmul.u32.u64.high %v13410_v3, %v1452_v28, %v13476_v40 }
  0x9d   : > { %v4015_v5 = vsel %vm18504_vm15, %v13408_v37, %v3902_v27  ;;  %v13483_v19 = vsel %vm18502_vm0, %v3902_v27, %v3926_v16  ;;  %v13486_v31 = vmul.u32.u64.low %v13410_v3, %v1456_v23  ;;  %v13487_v62 = vmul.u32.u64.high %v13410_v3, %v1456_v23, %v13486_v31 }
  0x9e   : > { %v4049_v11 = vpack.c.bf16 %v4015_v5, %v13385_v46  ;;  %v657_v1 = vand.u32 2147483647, %v656_v21  ;;  %v3885_v49 = vcombine.low %v13380_v48, %v13380_v48  ;;  %v1464_v12 = vmul.u32 %v13410_v3, %v1448_v29 }
  0x9f   : > { %v3841_v38 = vrot.slane %v13317_v43, 2  ;;  %v3978_v37 = vsel %vm18618_vm9, %v13339_v7, %v3817_v33  ;;  %v1467_v44 = vadd.s32 1, %v13477_v42  ;;  %v11632_v51 = vadd.s32 4294967169, %v2245_v61 }
  0xa0   : > { %4197 = vmatprep.subr.bf16.mxu0 %v4049_v11  ;;  %v660_v41 = vmul.f32 %v659_v18, %v657_v1  ;;  %v3901_v46 = vrot.slane %v13452_v59, 1  ;;  %vm1466_vm1 = vc.u32 %v13487_v62, %v13476_v40  ;;  %vm18635_vm5 = vcmask 1045504  }
  0xa1   : > { %v3996_v48 = vsel %vm18505_vm3, %v3841_v38, %v3865_v55  ;;  %v1468_v26 = vsel %vm1466_vm1, %v1467_v44, %v13477_v42  ;;  %v2251_v3 = vadd.s32 1, %v11632_v51  ;;  %v3987_v33 = vsel %vm18635_vm5, %v3978_v37, %v3841_v38 }
  0xa2   : > { %v661_v43 = vxor.u32 2147483648, %v660_v41  ;;  %vm579_vm14 = vcmp.lt.s32.totalorder %v13013_v24, 0  ;;  %v1469_v53 = vadd.s32 %v1468_v26, %v1464_v12  ;;  %vm18636_vm6 = vcmask 1043456  }
  0xa3   : > { %v4005_v17 = vsel %vm18636_vm6, %v3996_v48, %v3885_v49  ;;  %vm2252_vm4 = vcmp.gt.s32.totalorder %v2251_v3, 0  ;;  %v663_v39 = vsub.s32 4, %v13364_v34  ;;  %vm13515_vm7 = vcmp.le.f32.partialorder %v577_v10, 0.7853982 }
  0xa4   : > { %v4014_v25 = vsel %vm18504_vm15, %v4005_v17, %v3901_v46  ;;  %v1470_v14 = vadd.s32 536870912, %v1469_v53  ;;  %v2253_v55 = vsel %vm2252_vm4, %v2251_v3, 0  ;;  %v662_v9 = vsel %vm579_vm14, %v661_v43, %v660_v41 }
  0xa5   : > { %v4048_v56 = vpack.c.bf16 %v4014_v25, %v3987_v33  ;;  %v2255_v36 = vand.u32 31, %v2253_v55  ;;  %v2241_v4 = vand.u32 2147483647, %v13413_v32  ;;  %v664_v6 = vsel %vm579_vm14, %v663_v39, %v13364_v34 }
  0xa6   : > { %v13521_v35 = vshrl.u32 %v1470_v14, 30  ;;  %v665_v10 = vsel %vm13515_vm7, %v13013_v24, %v662_v9  ;;  %v2254_v16 = vshrl.u32 %v2253_v55, 5  ;;  %v666_v21 = vsel %vm13515_vm7, 0, %v664_v6 }
  0xa7   : > { %4198 = vmatpush1.bf16.msra.mxu0 %v4048_v56  ;;  %v2256_v22 = vsub.s32 32, %v2255_v36  ;;  %v2258_v28 = vshll.u32 %v18522_v45, %v2255_v36  ;;  %v2261_v29 = vshll.u32 %v18520_v47, %v2255_v36  ;;  %v2267_v8 = vshll.u32 %v18515_v52, %v2255_v36 }
  0xa8   : > { %v1472_v57 = vshll.u32 %v13521_v35, 30  ;;  %v2248_v24 = vand.u32 8388607, %v2241_v4  ;;  %v2264_v18 = vshll.u32 %v18517_v50, %v2255_v36  ;;  %12465 = vcosq.f32 %v665_v10 }
  0xa9   : > { %v2259_v60 = vshrl.u32 %v18520_v47, %v2256_v22  ;;  %v2262_v15 = vshrl.u32 %v18517_v50, %v2256_v22  ;;  %v2268_v34 = vshrl.u32 %v18513_v54, %v2256_v22  ;;  %v2265_v20 = vshrl.u32 %v18515_v52, %v2256_v22 }
  0xaa   : > { %v13536_v27 = vsub.s32 %v1469_v53, %v1472_v57  ;;  %12467 = vsinq.f32 %v665_v10  ;;  %v2270_v1 = vshll.u32 %v18513_v54, %v2255_v36  ;;  %v2271_v61 = vshrl.u32 %v18511_v63, %v2256_v22  ;;  %v11851_v10 = vld [vmem:[%s18487_s5 + $0x108] sm:$0xff]  ;;  %v11850_v57 = vld [vmem:[%s18487_s5 + $0x100] sm:$0xff] }
  0xab   : > { %v2260_v42 = vor.u32 %v2259_v60, %v2258_v28  ;;  %v2263_v5 = vor.u32 %v2262_v15, %v2261_v29  ;;  %v2269_v31 = vor.u32 %v2268_v34, %v2267_v8  ;;  %vm2273_vm8 = vcmp.lt.s32.totalorder %v2254_v16, 1  ;;  %6085 = vperm.xlu1 %12392, %v11851_v10   ;;  %6080 = vperm.xlu0 %12391, %v11850_v57  }
  0xac   : > { %v1475_v23 = vsub.s32 0, %v13536_v27  ;;  %v670_v49 = vadd.s32 3, %v666_v21  ;;  %v2249_v12 = vor.u32 8388608, %v2248_v24  ;;  %v2266_v38 = vor.u32 %v2265_v20, %v2264_v18 }
  0xad   : > { %vm2276_vm12 = vcmp.lt.s32.totalorder %v2254_v16, 4  ;;  %vm2275_vm13 = vcmp.lt.s32.totalorder %v2254_v16, 3  ;;  %v2257_v41 = vshrl.u32 %v18522_v45, %v2256_v22  ;;  %vm2274_vm10 = vcmp.lt.s32.totalorder %v2254_v16, 2 }
  0xae   : > { %v11601_v11 = vmin.u32 %v1475_v23, %v13536_v27  ;;  %v2281_v44 = vsel %vm2273_vm8, %v2260_v42, %v2263_v5  ;;  %v2282_v51 = vsel %vm2276_vm12, %v2269_v31, 920167782  ;;  %v2272_v43 = vor.u32 %v2271_v61, %v2270_v1  ;;  %v11853_v23 = vld [vmem:[%s18487_s5 + $0x118] sm:$0xff] }
  0xaf   : > { %v2278_v26 = vsel %vm2276_vm12, %v2266_v38, 2102212464  ;;  %v13553_v3 = vand.u32 3, %v670_v49  ;;  %v13555_v33 = vand.u32 3, %v666_v21  ;;  %vm1411_vm11 = vcmp.lt.s32.totalorder %v13205_v13, 0  ;;  %6095 = vperm.xlu1 %12392, %v11853_v23  }
  0xb0   : > { %v1477_v37 = vclz %v11601_v11  ;;  %v2283_v53 = vsel %vm2275_vm13, %v2266_v38, %v2282_v51  ;;  %v2289_v17 = vshll.u32 %v2249_v12, 8  ;;  %v1465_v25 = vadd.s32 %v13476_v40, %v13487_v62 }
  0xb1   : > { %v2284_v39 = vsel %vm2274_vm10, %v2281_v44, %v2283_v53  ;;  %v13563_v14 = vmul.f32 8.0, %v13339_v7  ;;  %v2277_v56 = vsel %vm2273_vm8, %v2257_v41, %v2260_v42  ;;  %v2279_v58 = vsel %vm2275_vm13, %v2263_v5, %v2278_v26  ;;  %v11852_v42 = vld [vmem:[%s18487_s5 + $0x110] sm:$0xff] }
  0xb2   : > { %v11602_v48 = vadd.s32 4294967294, %v1477_v37  ;;  %v2285_v9 = vsel %vm2273_vm8, %v2263_v5, %v2266_v38  ;;  %v12466_v36 = vpop.eup %12465  ;;  %vm13570_vm1 = vcmp.le.f32.partialorder %v1409_v30, 0.7853982  ;;  %v2286_v7 = vsel %vm2276_vm12, %v2272_v43, 1326507024  ;;  %6090 = vperm.xlu0 %12391, %v11852_v42  }
  0xb3   : > { %v1495_v30 = vsub.s32 4, %v13521_v35  ;;  %v2287_v60 = vsel %vm2275_vm13, %v2269_v31, %v2286_v7  ;;  %v13584_v29 = vmul.u32.u64.low %v2289_v17, %v2284_v39  ;;  %v13585_v15 = vmul.u32.u64.high %v2289_v17, %v2284_v39, %v13584_v29 }
  0xb4   : > { %vm11603_vm2 = vcmp.lt.s32.totalorder %v11602_v48, 0  ;;  %v12468_v28 = vpop.eup %12467  ;;  %v2280_v34 = vsel %vm2274_vm10, %v2277_v56, %v2279_v58  ;;  %v2288_v24 = vsel %vm2274_vm10, %v2285_v9, %v2287_v60  ;;  %vm673_vm5 = vcmp.eq.s32.totalorder %v13553_v3, 0 }
  0xb5   : > { %v1480_v55 = vsel %vm11603_vm2, 0, %v11602_v48  ;;  %v13591_v18 = vmul.u32.u64.low %v2289_v17, %v2288_v24  ;;  %v13592_v20 = vmul.u32.u64.high %v2289_v17, %v2288_v24, %v13591_v18  ;;  %v2972_v21 = vand.u32 2139095040, %v13563_v14 }
  0xb6   : > { %v1481_v40 = vsub.s32 32, %v1480_v55  ;;  %v1482_v62 = vshll.u32 %v13536_v27, %v1480_v55  ;;  %v1485_v6 = vsub.s32 4294967266, %v1480_v55  ;;  %v674_v5 = vxor.u32 2147483648, %v12468_v28 }
  0xb7   : > { %v677_v31 = vxor.u32 2147483648, %v12466_v36  ;;  %v3925_v1 = vrot.slane %v13456_v0, 6  ;;  %vm676_vm14 = vcmp.eq.s32.totalorder %v13553_v3, 2  ;;  %v2296_v61 = vmul.u32 %v2289_v17, %v2280_v34  ;;  %v13623_v17 = vld [vmem:[%s12839_s21 + $0x8] sm:$0x77] }
  0xb8   : > { %v1483_v8 = vshrl.u32 %v1465_v25, %v1481_v40  ;;  %v1486_v27 = vadd.s32 127, %v1485_v6  ;;  %v2299_v49 = vadd.s32 1, %v13585_v15  ;;  %vm1087_vm6 = vcmp.eq.s32.totalorder %v13555_v33, 0 }
  0xb9   : > { %v1496_v37 = vsel %vm1411_vm11, %v1495_v30, %v13521_v35  ;;  %vm672_vm4 = vcmp.lt.s32.totalorder %v13553_v3, 2  ;;  %vm1090_vm7 = vcmp.eq.s32.totalorder %v13555_v33, 2  ;;  %vm2298_vm8 = vc.u32 %v13592_v20, %v13584_v29 }
  0xba   : > { %v1484_v11 = vor.u32 %v1483_v8, %v1482_v62  ;;  %v1487_v16 = vshll.u32 %v1486_v27, 23  ;;  %v2973_v0 = vshrl.u32 %v2972_v21, 23  ;;  %v675_v41 = vsel %vm673_vm5, %v12466_v36, %v674_v5 }
  0xbb   : > { %v678_v44 = vsel %vm676_vm14, %v677_v31, %v12468_v28  ;;  %v2300_v48 = vsel %vm2298_vm8, %v2299_v49, %v13585_v15  ;;  %v1498_v43 = vsel %vm13570_vm1, 0, %v1496_v37  ;;  %v13620_v53 = vsel %vm18502_vm0, %v3901_v46, %v3925_v1 }
  0xbc   : > { %v1488_v12 = vor.u32 4788187, %v1487_v16  ;;  %v1491_v38 = vcvt.s32.f32 %v1484_v11  ;;  %v2301_v26 = vadd.s32 %v2300_v48, %v2296_v61  ;;  %v11660_v35 = vadd.s32 4294967169, %v2973_v0 }
  0xbd   : > { %vm669_vm12 = vweird.f32 %v13623_v17  ;;  %vm1086_vm13 = vcmp.lt.s32.totalorder %v13555_v33, 2  ;;  %v1092_v25 = vsel %vm1090_vm7, %v677_v31, %v12468_v28  ;;  %v679_v55 = vsel %vm672_vm4, %v675_v41, %v678_v44 }
  0xbe   : > { %v1489_v51 = vand.u32 2147483647, %v1488_v12  ;;  %v1089_v56 = vsel %vm1087_vm6, %v12466_v36, %v674_v5  ;;  %v2302_v58 = vadd.s32 536870912, %v2301_v26  ;;  %v2979_v9 = vadd.s32 1, %v11660_v35 }
  0xbf   : > { %v1502_v40 = vadd.s32 3, %v1498_v43  ;;  %v2969_v62 = vand.u32 2147483647, %v13563_v14  ;;  %v13636_v6 = vsel %vm669_vm12, nan, %v679_v55  ;;  %v1093_v7 = vsel %vm1086_vm13, %v1089_v56, %v1092_v25 }
  0xc0   : > { %v1492_v39 = vmul.f32 %v1491_v38, %v1489_v51  ;;  %v13631_v46 = vshrl.u32 %v2302_v58, 30  ;;  %vm2980_vm10 = vcmp.gt.s32.totalorder %v2979_v9, 0  ;;  %v13646_v28 = vand.u32 3, %v1498_v43 }
  0xc1   : > { %v2981_v10 = vsel %vm2980_vm10, %v2979_v9, 0  ;;  %v13644_v57 = vand.u32 3, %v1502_v40  ;;  %v3802_v30 = vcombine.high %v13623_v17, %v13623_v17  ;;  %v13652_v15 = vsel %vm669_vm12, nan, %v1093_v7 }
  0xc2   : > { %v1493_v59 = vxor.u32 2147483648, %v1492_v39  ;;  %v2304_v36 = vshll.u32 %v13631_v46, 30  ;;  %v2983_v60 = vand.u32 31, %v2981_v10  ;;  %v3814_v22 = vcombine.high %v13636_v6, %v13636_v6 }
  0xc3   : > { %v2976_v27 = vand.u32 8388607, %v2969_v62  ;;  %v13661_v24 = vmul.f32 8.0, %v13623_v17  ;;  %v13664_v21 = vshrl.u32 %v2981_v10, 5  ;;  %v3838_v49 = vcombine.high %v13652_v15, %v13652_v15 }
  0xc4   : > { %v1494_v3 = vsel %vm1411_vm11, %v1493_v59, %v1492_v39  ;;  %v13654_v8 = vsub.s32 %v2301_v26, %v2304_v36  ;;  %v2984_v34 = vsub.s32 32, %v2983_v60  ;;  %v2986_v23 = vshll.u32 %v18522_v45, %v2983_v60 }
  0xc5   : > { %v1497_v33 = vsel %vm13570_vm1, %v13205_v13, %v1494_v3  ;;  %v2989_v42 = vshll.u32 %v18520_v47, %v2983_v60  ;;  %vm2243_vm11 = vcmp.lt.s32.totalorder %v13413_v32, 0  ;;  %v2992_v11 = vshll.u32 %v18517_v50, %v2983_v60 }
  0xc6   : > { %12469 = vcosq.f32 %v1497_v33  ;;  %v2307_v18 = vsub.s32 0, %v13654_v8  ;;  %v2987_v5 = vshrl.u32 %v18520_v47, %v2984_v34  ;;  %v2990_v31 = vshrl.u32 %v18517_v50, %v2984_v34 }
  0xc7   : > { %12471 = vsinq.f32 %v1497_v33  ;;  %v2993_v16 = vshrl.u32 %v18515_v52, %v2984_v34  ;;  %v13674_v61 = vrot.slane %v3814_v22, 5  ;;  %v3819_v12 = vrot.slane %v13636_v6, 5 }
  0xc8   : > { %v11633_v1 = vmin.u32 %v2307_v18, %v13654_v8  ;;  %v2297_v38 = vadd.s32 %v13584_v29, %v13592_v20  ;;  %v3843_v37 = vrot.slane %v13652_v15, 2  ;;  %v2977_v0 = vor.u32 8388608, %v2976_v27 }
  0xc9   : > { %v3076_v41 = vand.u32 2139095040, %v13661_v24  ;;  %v2327_v51 = vsub.s32 4, %v13631_v46  ;;  %v2988_v48 = vor.u32 %v2987_v5, %v2986_v23  ;;  %vm3001_vm2 = vcmp.lt.s32.totalorder %v13664_v21, 1 }
  0xca   : > { %v2309_v44 = vclz %v11633_v1  ;;  %vm1505_vm1 = vcmp.eq.s32.totalorder %v13644_v57, 0  ;;  %vm1508_vm5 = vcmp.eq.s32.totalorder %v13644_v57, 2  ;;  %vm1922_vm14 = vcmp.eq.s32.totalorder %v13646_v28, 2 }
  0xcb   : > { %vm13690_vm6 = vcmp.le.f32.partialorder %v2241_v4, 0.7853982  ;;  %v2991_v20 = vor.u32 %v2990_v31, %v2989_v42  ;;  %v2994_v43 = vor.u32 %v2993_v16, %v2992_v11  ;;  %v2995_v26 = vshll.u32 %v18515_v52, %v2983_v60 }
  0xcc   : > { %v2996_v35 = vshrl.u32 %v18513_v54, %v2984_v34  ;;  %vm1919_vm4 = vcmp.eq.s32.totalorder %v13646_v28, 0  ;;  %v11634_v25 = vadd.s32 4294967294, %v2309_v44  ;;  %v2998_v39 = vshll.u32 %v18513_v54, %v2983_v60 }
  0xcd   : > { %v2999_v55 = vshrl.u32 %v18511_v63, %v2984_v34  ;;  %vm3004_vm7 = vcmp.lt.s32.totalorder %v13664_v21, 4  ;;  %v2985_v4 = vshrl.u32 %v18522_v45, %v2984_v34  ;;  %v13701_v58 = vshll.u32 %v2977_v0, 8 }
  0xce   : > { %v2997_v56 = vor.u32 %v2996_v35, %v2995_v26  ;;  %v3073_v9 = vand.u32 2147483647, %v13661_v24  ;;  %vm11635_vm8 = vcmp.lt.s32.totalorder %v11634_v25, 0  ;;  %vm3003_vm12 = vcmp.lt.s32.totalorder %v13664_v21, 3 }
  0xcf   : > { %v3006_v40 = vsel %vm3004_vm7, %v2994_v43, 2102212464  ;;  %v3077_v6 = vshrl.u32 %v3076_v41, 23  ;;  %vm1504_vm13 = vcmp.lt.s32.totalorder %v13644_v57, 2  ;;  %vm1918_vm10 = vcmp.lt.s32.totalorder %v13646_v28, 2 }
  0xd0   : > { %v12470_v59 = vpop.eup %12469  ;;  %v2312_v3 = vsel %vm11635_vm8, 0, %v11634_v25  ;;  %vm3002_vm0 = vcmp.lt.s32.totalorder %v13664_v21, 2  ;;  %v3009_v10 = vsel %vm3001_vm2, %v2988_v48, %v2991_v20  ;;  %v3010_v33 = vsel %vm3004_vm7, %v2997_v56, 920167782 }
  0xd1   : > { %v12472_v7 = vpop.eup %12471  ;;  %v2313_v36 = vsub.s32 32, %v2312_v3  ;;  %v2314_v60 = vshll.u32 %v13654_v8, %v2312_v3  ;;  %v2328_v22 = vsel %vm2243_vm11, %v2327_v51, %v13631_v46  ;;  %v3000_v27 = vor.u32 %v2999_v55, %v2998_v39 }
  0xd2   : > { %v2317_v34 = vsub.s32 4294967266, %v2312_v3  ;;  %v3005_v18 = vsel %vm3001_vm2, %v2985_v4, %v2988_v48  ;;  %v3007_v23 = vsel %vm3003_vm12, %v2991_v20, %v3006_v40  ;;  %v3011_v42 = vsel %vm3003_vm12, %v2994_v43, %v3010_v33 }
  0xd3   : > { %vm1501_vm8 = vweird.f32 %v13205_v13  ;;  %v1506_v5 = vxor.u32 2147483648, %v12472_v7  ;;  %v1509_v31 = vxor.u32 2147483648, %v12470_v59  ;;  %v2315_v8 = vshrl.u32 %v2297_v38, %v2313_v36 }
  0xd4   : > { %v3012_v11 = vsel %vm3002_vm0, %v3009_v10, %v3011_v42  ;;  %v2318_v46 = vadd.s32 127, %v2317_v34  ;;  %v3980_v16 = vsel %vm18618_vm9, %v13623_v17, %v3819_v12  ;;  %v11664_v1 = vadd.s32 4294967169, %v3077_v6 }
  0xd5   : > { %v13731_v0 = vand.u32 8388607, %v3073_v9  ;;  %v2316_v41 = vor.u32 %v2315_v8, %v2314_v60  ;;  %v2330_v44 = vsel %vm13690_vm6, 0, %v2328_v22  ;;  %v3008_v51 = vsel %vm3002_vm0, %v3005_v18, %v3007_v23 }
  0xd6   : > { %v3013_v38 = vsel %vm3001_vm2, %v2991_v20, %v2994_v43  ;;  %v2319_v48 = vshll.u32 %v2318_v46, 23  ;;  %v3014_v26 = vsel %vm3004_vm7, %v3000_v27, 1326507024  ;;  %v1507_v25 = vsel %vm1505_vm1, %v12470_v59, %v1506_v5 }
  0xd7   : > { %v13742_v12 = vmul.u32.u64.low %v13701_v58, %v3012_v11  ;;  %v13743_v35 = vmul.u32.u64.high %v13701_v58, %v3012_v11, %v13742_v12  ;;  %v1510_v39 = vsel %vm1508_vm5, %v1509_v31, %v12472_v7  ;;  %v1924_v55 = vsel %vm1922_vm14, %v1509_v31, %v12472_v7 }
  0xd8   : > { %v3015_v20 = vsel %vm3003_vm12, %v2997_v56, %v3014_v26  ;;  %v1921_v43 = vsel %vm1919_vm4, %v12470_v59, %v1506_v5  ;;  %v2320_v4 = vor.u32 4788187, %v2319_v48  ;;  %v2323_v40 = vcvt.s32.f32 %v2316_v41 }
  0xd9   : > { %v3016_v6 = vsel %vm3002_vm0, %v3013_v38, %v3015_v20  ;;  %v2334_v3 = vadd.s32 3, %v2330_v44  ;;  %v3083_v36 = vadd.s32 1, %v11664_v1  ;;  %v13765_v7 = vrot.slane %v3838_v49, 2 }
  0xda   : > { %v13759_v10 = vmul.u32.u64.low %v13701_v58, %v3016_v6  ;;  %v13760_v33 = vmul.u32.u64.high %v13701_v58, %v3016_v6, %v13759_v10  ;;  %v2321_v60 = vand.u32 2147483647, %v2320_v4  ;;  %v13772_v56 = vsel %vm18618_vm9, %v3802_v30, %v13674_v61 }
  0xdb   : > { %v3027_v21 = vadd.s32 1, %v13743_v35  ;;  %v1511_v59 = vsel %vm1504_vm13, %v1507_v25, %v1510_v39  ;;  %v1925_v22 = vsel %vm1918_vm10, %v1921_v43, %v1924_v55  ;;  %v3024_v27 = vmul.u32 %v13701_v58, %v3008_v51  ;;  %v13821_v43 = vld [vmem:[%s12839_s21 + $0x10] sm:$0x77] }
  0xdc   : > { %vm3084_vm0 = vcmp.gt.s32.totalorder %v3083_v36, 0  ;;  %v2324_v49 = vmul.f32 %v2323_v40, %v2321_v60  ;;  %vm18643_vm2 = vcmask 1045504   ;;  %v3081_v17 = vor.u32 8388608, %v13731_v0 }
  0xdd   : > { %v13783_v34 = vsel %vm18643_vm2, %v3980_v16, %v3843_v37  ;;  %v3085_v30 = vsel %vm3084_vm0, %v3083_v36, 0  ;;  %v13786_v61 = vand.u32 3, %v2334_v3  ;;  %v13788_v18 = vand.u32 3, %v2330_v44 }
  0xde   : > { %vm3026_vm1 = vc.u32 %v13760_v33, %v13742_v12  ;;  %v3087_v57 = vand.u32 31, %v3085_v30  ;;  %v1512_v28 = vsel %vm1501_vm8, nan, %v1511_v59  ;;  %v13796_v58 = vsel %vm1501_vm8, nan, %v1925_v22 }
  0xdf   : > { %v2325_v23 = vxor.u32 2147483648, %v2324_v49  ;;  %v3028_v42 = vsel %vm3026_vm1, %v3027_v21, %v13743_v35  ;;  %v13799_v31 = vshrl.u32 %v3085_v30, 5  ;;  %vm2751_vm14 = vcmp.eq.s32.totalorder %v13788_v18, 0 }
  0xe0   : > { %v3029_v5 = vadd.s32 %v3028_v42, %v3024_v27  ;;  %v3088_v8 = vsub.s32 32, %v3087_v57  ;;  %v3090_v11 = vshll.u32 %v18522_v45, %v3087_v57  ;;  %v3093_v16 = vshll.u32 %v18520_v47, %v3087_v57 }
  0xe1   : > { %v2326_v46 = vsel %vm2243_vm11, %v2325_v23, %v2324_v49  ;;  %v3096_v1 = vshll.u32 %v18517_v50, %v3087_v57  ;;  %v3099_v13 = vshll.u32 %v18515_v52, %v3087_v57  ;;  %v3102_v51 = vshll.u32 %v18513_v54, %v3087_v57 }
  0xe2   : > { %v2329_v0 = vsel %vm13690_vm6, %v13413_v32, %v2326_v46  ;;  %v3030_v41 = vadd.s32 536870912, %v3029_v5  ;;  %v3091_v44 = vshrl.u32 %v18520_v47, %v3088_v8  ;;  %v3094_v38 = vshrl.u32 %v18517_v50, %v3088_v8 }
  0xe3   : > { %12473 = vcosq.f32 %v2329_v0  ;;  %v3097_v48 = vshrl.u32 %v18515_v52, %v3088_v8  ;;  %v3100_v26 = vshrl.u32 %v18513_v54, %v3088_v8  ;;  %v3103_v29 = vshrl.u32 %v18511_v63, %v3088_v8 }
  0xe4   : > { %12475 = vsinq.f32 %v2329_v0  ;;  %v13815_v35 = vshrl.u32 %v3030_v41, 30  ;;  %v3092_v25 = vor.u32 %v3091_v44, %v3090_v11  ;;  %vm2754_vm11 = vcmp.eq.s32.totalorder %v13788_v18, 2 }
  0xe5   : > { %v3095_v39 = vor.u32 %v3094_v38, %v3093_v16  ;;  %v3098_v55 = vor.u32 %v3097_v48, %v3096_v1  ;;  %v3101_v20 = vor.u32 %v3100_v26, %v3099_v13  ;;  %vm3105_vm5 = vcmp.lt.s32.totalorder %v13799_v31, 1 }
  0xe6   : > { %v3862_v4 = vcombine.high %v1512_v28, %v1512_v28  ;;  %v3867_v40 = vrot.slane %v1512_v28, 7  ;;  %v3032_v6 = vshll.u32 %v13815_v35, 30  ;;  %v684_v3 = vand.u32 2139095040, %v13821_v43 }
  0xe7   : > { %vm2750_vm6 = vcmp.lt.s32.totalorder %v13788_v18, 2  ;;  %v3089_v10 = vshrl.u32 %v18522_v45, %v3088_v8  ;;  %v3104_v36 = vor.u32 %v3103_v29, %v3102_v51  ;;  %vm3107_vm4 = vcmp.lt.s32.totalorder %v13799_v31, 3 }
  0xe8   : > { %vm3108_vm7 = vcmp.lt.s32.totalorder %v13799_v31, 4  ;;  %vm2333_vm12 = vweird.f32 %v13413_v32  ;;  %v13831_v60 = vsub.s32 %v3029_v5, %v3032_v6  ;;  %vm3106_vm13 = vcmp.lt.s32.totalorder %v13799_v31, 2 }
  0xe9   : > { %v3113_v21 = vsel %vm3105_vm5, %v3092_v25, %v3095_v39  ;;  %v3114_v59 = vsel %vm3108_vm7, %v3101_v20, 920167782  ;;  %vm2336_vm10 = vcmp.lt.s32.totalorder %v13786_v61, 2  ;;  %vm2337_vm8 = vcmp.eq.s32.totalorder %v13786_v61, 0 }
  0xea   : > { %v3115_v22 = vsel %vm3107_vm4, %v3098_v55, %v3114_v59  ;;  %v13842_v27 = vshll.u32 %v3081_v17, 8  ;;  %v3886_v49 = vcombine.low %v13796_v58, %v13796_v58  ;;  %v3035_v30 = vsub.s32 0, %v13831_v60 }
  0xeb   : > { %v3110_v57 = vsel %vm3108_vm7, %v3098_v55, 2102212464  ;;  %v685_v28 = vshrl.u32 %v684_v3, 23  ;;  %v3868_v23 = vrot.slane %v3862_v4, 7  ;;  %v3998_v42 = vsel %vm18505_vm3, %v3843_v37, %v3867_v40 }
  0xec   : > { %v3116_v5 = vsel %vm3106_vm13, %v3113_v21, %v3115_v22  ;;  %v3118_v17 = vsel %vm3108_vm7, %v3104_v36, 1326507024  ;;  %vm2340_vm0 = vcmp.eq.s32.totalorder %v13786_v61, 2  ;;  %v11661_v8 = vmin.u32 %v3035_v30, %v13831_v60 }
  0xed   : > { %v3109_v11 = vsel %vm3105_vm5, %v3089_v10, %v3092_v25  ;;  %v3117_v46 = vsel %vm3105_vm5, %v3095_v39, %v3098_v55  ;;  %v12474_v16 = vpop.eup %12473  ;;  %v3111_v15 = vsel %vm3107_vm4, %v3095_v39, %v3110_v57  ;;  %v3119_v37 = vsel %vm3107_vm4, %v3101_v20, %v3118_v17 }
  0xee   : > { %v13867_v1 = vmul.u32.u64.low %v13842_v27, %v3116_v5  ;;  %v13868_v13 = vmul.u32.u64.high %v13842_v27, %v3116_v5, %v13867_v1  ;;  %v12476_v0 = vpop.eup %12475  ;;  %v2341_v41 = vxor.u32 2147483648, %v12474_v16  ;;  %vm18644_vm2 = vcmask 1043456  }
  0xef   : > { %v4007_v44 = vsel %vm18644_vm2, %v3998_v42, %v3886_v49  ;;  %vm2971_vm1 = vcmp.lt.s32.totalorder %v13563_v14, 0  ;;  %v3037_v51 = vclz %v11661_v8  ;;  %v11572_v38 = vadd.s32 4294967169, %v685_v28 }
  0xf0   : > { %v2338_v48 = vxor.u32 2147483648, %v12476_v0  ;;  %v3999_v26 = vsel %vm18505_vm3, %v13765_v7, %v3868_v23  ;;  %v3025_v25 = vadd.s32 %v13742_v12, %v13760_v33  ;;  %v3120_v29 = vsel %vm3106_vm13, %v3117_v46, %v3119_v37 }
  0xf1   : > { %v2342_v39 = vsel %vm2340_vm0, %v2341_v41, %v12476_v0  ;;  %v2756_v55 = vsel %vm2754_vm11, %v2341_v41, %v12476_v0  ;;  %v11662_v20 = vadd.s32 4294967294, %v3037_v51  ;;  %v3112_v4 = vsel %vm3106_vm13, %v3109_v11, %v3111_v15 }
  0xf2   : > { %v2339_v40 = vsel %vm2337_vm8, %v12474_v16, %v2338_v48  ;;  %v2753_v6 = vsel %vm2751_vm14, %v12474_v16, %v2338_v48  ;;  %vm13891_vm5 = vcmp.le.f32.partialorder %v2969_v62, 0.7853982  ;;  %v691_v36 = vadd.s32 1, %v11572_v38 }
  0xf3   : > { %v13896_v33 = vmul.u32.u64.low %v13842_v27, %v3120_v29  ;;  %v13897_v3 = vmul.u32.u64.high %v13842_v27, %v3120_v29, %v13896_v33  ;;  %v2343_v31 = vsel %vm2336_vm10, %v2339_v40, %v2342_v39  ;;  %v2757_v10 = vsel %vm2750_vm6, %v2753_v6, %v2756_v55  ;;  %vm18648_vm6 = vmmov %vm18644_vm2 }
  0xf4   : > { %vm11663_vm11 = vcmp.lt.s32.totalorder %v11662_v20, 0  ;;  %v13905_v21 = vsel %vm2333_vm12, nan, %v2343_v31  ;;  %v3055_v59 = vsub.s32 4, %v13815_v35  ;;  %v3131_v22 = vadd.s32 1, %v13868_v13 }
  0xf5   : > { %v3040_v62 = vsel %vm11663_vm11, 0, %v11662_v20  ;;  %v3898_v49 = vcombine.high %v13905_v21, %v13905_v21  ;;  %vm18647_vm14 = vcmask 1045504   ;;  %v3903_v18 = vrot.slane %v13905_v21, 1 }
  0xf6   : > { %v3990_v61 = vsel %vm18647_vm14, %v13772_v56, %v13765_v7  ;;  %v3128_v30 = vmul.u32 %v13842_v27, %v3112_v4  ;;  %v4008_v57 = vsel %vm18648_vm6, %v3999_v26, %v13796_v58  ;;  %v3041_v28 = vsub.s32 32, %v3040_v62 }
  0xf7   : > { %v3042_v23 = vshll.u32 %v13831_v60, %v3040_v62  ;;  %v3045_v42 = vsub.s32 4294967266, %v3040_v62  ;;  %v13919_v5 = vrot.slane %v3898_v49, 1  ;;  %v4016_v17 = vsel %vm18504_vm15, %v4007_v44, %v3903_v18 }
  0xf8   : > { %vm3130_vm4 = vc.u32 %v13897_v3, %v13867_v1  ;;  %vm692_vm7 = vcmp.gt.s32.totalorder %v691_v36, 0  ;;  %v3043_v7 = vshrl.u32 %v3025_v25, %v3041_v28  ;;  %v3056_v58 = vsel %vm2971_vm1, %v3055_v59, %v13815_v35 }
  0xf9   : > { %v3046_v56 = vadd.s32 127, %v3045_v42  ;;  %v3132_v27 = vsel %vm3130_vm4, %v3131_v22, %v13868_v13  ;;  %v4017_v60 = vsel %vm18504_vm15, %v4008_v57, %v13919_v5  ;;  %v4050_v8 = vpack.c.bf16 %v4016_v17, %v13783_v34 }
  0xfa   : > { %v3133_v11 = vadd.s32 %v3132_v27, %v3128_v30  ;;  %v681_v46 = vand.u32 2147483647, %v13821_v43  ;;  %v4051_v16 = vpack.c.bf16 %v4017_v60, %v3990_v61  ;;  %v3044_v15 = vor.u32 %v3043_v7, %v3042_v23 }
  0xfb   : > { %v3047_v37 = vshll.u32 %v3046_v56, 23  ;;  %v693_v0 = vsel %vm692_vm7, %v691_v36, 0  ;;  %v3058_v41 = vsel %vm13891_vm5, 0, %v3056_v58  ;;  %v13941_v29 = vmul.f32 2.0, %v13821_v43 }
  0xfc   : > { %v3134_v44 = vadd.s32 536870912, %v3133_v11  ;;  %v695_v51 = vand.u32 31, %v693_v0  ;;  %4290 = vmatprep.subr.bf16.mxu1 %v4051_v16  ;;  %v3051_v13 = vcvt.s32.f32 %v3044_v15  ;;  %v3062_v26 = vadd.s32 3, %v3058_v41 }
  0xfd   : > { %v3048_v35 = vor.u32 4788187, %v3047_v37  ;;  %4291 = vmatpush1.bf16.msra.mxu1 %v4050_v8  ;;  %v688_v25 = vand.u32 8388607, %v681_v46  ;;  %v694_v62 = vshrl.u32 %v693_v0, 5  ;;  %v13958_v28 = vsel %vm2333_vm12, nan, %v2757_v10 }
  0xfe   : > { %v13936_v38 = vshrl.u32 %v3134_v44, 30  ;;  %v696_v48 = vsub.s32 32, %v695_v51  ;;  %v698_v55 = vshll.u32 %v18522_v45, %v695_v51  ;;  %v701_v20 = vshll.u32 %v18520_v47, %v695_v51 }
  0xff   : > { %v3049_v34 = vand.u32 2147483647, %v3048_v35  ;;  %v704_v4 = vshll.u32 %v18517_v50, %v695_v51  ;;  %v707_v59 = vshll.u32 %v18515_v52, %v695_v51  ;;  %v689_v61 = vor.u32 8388608, %v688_v25 }
 0x100   : > { %v3136_v39 = vshll.u32 %v13936_v38, 30  ;;  %v699_v6 = vshrl.u32 %v18520_v47, %v696_v48  ;;  %v702_v33 = vshrl.u32 %v18517_v50, %v696_v48  ;;  %v705_v31 = vshrl.u32 %v18515_v52, %v696_v48 }
 0x101   : > { %v3052_v40 = vmul.f32 %v3051_v13, %v3049_v34  ;;  %v708_v22 = vshrl.u32 %v18513_v54, %v696_v48  ;;  %v710_v30 = vshll.u32 %v18513_v54, %v695_v51  ;;  %v711_v57 = vshrl.u32 %v18511_v63, %v696_v48 }
 0x102   : > { %v13950_v36 = vsub.s32 %v3133_v11, %v3136_v39  ;;  %v13960_v23 = vand.u32 3, %v3062_v26  ;;  %v13962_v42 = vand.u32 3, %v3058_v41  ;;  %v700_v56 = vor.u32 %v699_v6, %v698_v55 }
 0x103   : > { %v3053_v49 = vxor.u32 2147483648, %v3052_v40  ;;  %v703_v58 = vor.u32 %v702_v33, %v701_v20  ;;  %v706_v27 = vor.u32 %v705_v31, %v704_v4  ;;  %v709_v10 = vor.u32 %v708_v22, %v707_v59 }
 0x104   : > { %v3139_v17 = vsub.s32 0, %v13950_v36  ;;  %vm713_vm12 = vcmp.lt.s32.totalorder %v694_v62, 1  ;;  %v697_v8 = vshrl.u32 %v18522_v45, %v696_v48  ;;  %v712_v11 = vor.u32 %v711_v57, %v710_v30 }
 0x105   : > { %v3054_v7 = vsel %vm2971_vm1, %v3053_v49, %v3052_v40  ;;  %v13972_v16 = vshll.u32 %v689_v61, 8  ;;  %v3922_v15 = vcombine.high %v13958_v28, %v13958_v28  ;;  %vm715_vm13 = vcmp.lt.s32.totalorder %v694_v62, 3 }
 0x106   : > { %v3057_v60 = vsel %vm13891_vm5, %v13563_v14, %v3054_v7  ;;  %v11665_v32 = vmin.u32 %v3139_v17, %v13950_v36  ;;  %vm3483_vm10 = vcmp.eq.s32.totalorder %v13962_v42, 2  ;;  %v3129_v12 = vadd.s32 %v13867_v1, %v13897_v3 }
 0x107   : > { %12477 = vcosq.f32 %v3057_v60  ;;  %vm714_vm8 = vcmp.lt.s32.totalorder %v694_v62, 2  ;;  %vm716_vm0 = vcmp.lt.s32.totalorder %v694_v62, 4  ;;  %v721_v0 = vsel %vm713_vm12, %v700_v56, %v703_v58 }
 0x108   : > { %12479 = vsinq.f32 %v3057_v60  ;;  %v3141_v37 = vclz %v11665_v32  ;;  %vm3480_vm2 = vcmp.eq.s32.totalorder %v13962_v42, 0  ;;  %vm3075_vm1 = vcmp.lt.s32.totalorder %v13661_v24, 0 }
 0x109   : > { %v718_v44 = vsel %vm716_vm0, %v706_v27, 2102212464  ;;  %v722_v51 = vsel %vm716_vm0, %v709_v10, 920167782  ;;  %v725_v35 = vsel %vm713_vm12, %v703_v58, %v706_v27  ;;  %vm3479_vm5 = vcmp.lt.s32.totalorder %v13962_v42, 2 }
 0x10a   : > { %v11666_v41 = vadd.s32 4294967294, %v3141_v37  ;;  %v717_v13 = vsel %vm713_vm12, %v697_v8, %v700_v56  ;;  %v723_v48 = vsel %vm715_vm13, %v706_v27, %v722_v51  ;;  %v726_v1 = vsel %vm716_vm0, %v712_v11, 1326507024 }
 0x10b   : > { %v1516_v3 = vand.u32 2139095040, %v13941_v29  ;;  %vm3061_vm11 = vweird.f32 %v13563_v14  ;;  %v719_v34 = vsel %vm715_vm13, %v703_v58, %v718_v44  ;;  %v724_v26 = vsel %vm714_vm8, %v721_v0, %v723_v48 }
 0x10c   : > { %vm11667_vm14 = vcmp.lt.s32.totalorder %v11666_v41, 0  ;;  %v727_v25 = vsel %vm715_vm13, %v709_v10, %v726_v1  ;;  %v13993_v20 = vmul.u32.u64.low %v13972_v16, %v724_v26  ;;  %v13994_v4 = vmul.u32.u64.high %v13972_v16, %v724_v26, %v13993_v20 }
 0x10d   : > { %v3144_v39 = vsel %vm11667_vm14, 0, %v11666_v41  ;;  %v728_v55 = vsel %vm714_vm8, %v725_v35, %v727_v25  ;;  %vm13999_vm6 = vcmp.le.f32.partialorder %v3073_v9, 0.7853982  ;;  %v3159_v59 = vsub.s32 4, %v13936_v38 }
 0x10e   : > { %v3145_v6 = vsub.s32 32, %v3144_v39  ;;  %v3146_v33 = vshll.u32 %v13950_v36, %v3144_v39  ;;  %v3149_v31 = vsub.s32 4294967266, %v3144_v39  ;;  %vm18506_vm4 = vcmask 1044480  }
 0x10f   : > { %v720_v22 = vsel %vm714_vm8, %v717_v13, %v719_v34  ;;  %v14007_v49 = vmul.u32.u64.low %v13972_v16, %v728_v55  ;;  %v14008_v61 = vmul.u32.u64.high %v13972_v16, %v728_v55, %v14007_v49  ;;  %v1517_v30 = vshrl.u32 %v1516_v3, 23 }
 0x110   : > { %vm3064_vm7 = vcmp.lt.s32.totalorder %v13960_v23, 2  ;;  %vm3065_vm12 = vcmp.eq.s32.totalorder %v13960_v23, 0  ;;  %v3147_v9 = vshrl.u32 %v3129_v12, %v3145_v6  ;;  %v3150_v57 = vadd.s32 127, %v3149_v31 }
 0x111   : > { %v12478_v17 = vpop.eup %12477  ;;  %v3928_v7 = vrot.slane %v3922_v15, 6  ;;  %vm3068_vm13 = vcmp.eq.s32.totalorder %v13960_v23, 2  ;;  %v739_v36 = vadd.s32 1, %v13994_v4  ;;  %v11604_v56 = vadd.s32 4294967169, %v1517_v30 }
 0x112   : > { %v12480_v62 = vpop.eup %12479  ;;  %v3069_v58 = vxor.u32 2147483648, %v12478_v17  ;;  %v3148_v27 = vor.u32 %v3147_v9, %v3146_v33  ;;  %v3151_v60 = vshll.u32 %v3150_v57, 23  ;;  %v736_v32 = vmul.u32 %v13972_v16, %v720_v22 }
 0x113   : > { %v3066_v10 = vxor.u32 2147483648, %v12480_v62  ;;  %v3160_v8 = vsel %vm3075_vm1, %v3159_v59, %v13936_v38  ;;  %vm738_vm8 = vc.u32 %v14008_v61, %v13993_v20  ;;  %v1523_v11 = vadd.s32 1, %v11604_v56 }
 0x114   : > { %v3070_v15 = vsel %vm3068_vm13, %v3069_v58, %v12480_v62  ;;  %v3485_v37 = vsel %vm3483_vm10, %v3069_v58, %v12480_v62  ;;  %v3152_v12 = vor.u32 4788187, %v3151_v60  ;;  %v3155_v0 = vcvt.s32.f32 %v3148_v27 }
 0x115   : > { %v3067_v41 = vsel %vm3065_vm12, %v12478_v17, %v3066_v10  ;;  %v3482_v16 = vsel %vm3480_vm2, %v12478_v17, %v3066_v10  ;;  %v740_v44 = vsel %vm738_vm8, %v739_v36, %v13994_v4  ;;  %vm1524_vm0 = vcmp.gt.s32.totalorder %v1523_v11, 0 }
 0x116   : > { %v3071_v38 = vsel %vm3064_vm7, %v3067_v41, %v3070_v15  ;;  %v3486_v51 = vsel %vm3479_vm5, %v3482_v16, %v3485_v37  ;;  %v3153_v35 = vand.u32 2147483647, %v3152_v12  ;;  %v741_v13 = vadd.s32 %v740_v44, %v736_v32 }
 0x117   : > { %v3072_v48 = vsel %vm3061_vm11, nan, %v3071_v38  ;;  %v3487_v1 = vsel %vm3061_vm11, nan, %v3486_v51  ;;  %v3162_v3 = vsel %vm13999_vm6, 0, %v3160_v8  ;;  %v1525_v34 = vsel %vm1524_vm0, %v1523_v11, 0 }
 0x118   : > { %v3927_v26 = vrot.slane %v13958_v28, 6  ;;  %v3945_v25 = vcombine.high %v3072_v48, %v3072_v48  ;;  %v3156_v23 = vmul.f32 %v3155_v0, %v3153_v35  ;;  %v3949_v39 = vrot.slane %v3072_v48, 3 }
 0x119   : > { %v3969_v55 = vcombine.high %v3487_v1, %v3487_v1  ;;  %v742_v42 = vadd.s32 536870912, %v741_v13  ;;  %v1513_v4 = vand.u32 2147483647, %v13941_v29  ;;  %v1527_v6 = vand.u32 31, %v1525_v34 }
 0x11a   : > { %v3950_v33 = vrot.slane %v3945_v25, 3  ;;  %v3157_v31 = vxor.u32 2147483648, %v3156_v23  ;;  %v3166_v59 = vadd.s32 3, %v3162_v3  ;;  %v4032_v14 = vsel %vm18506_vm4, %v13620_v53, %v3949_v39 }
 0x11b   : > { %vm18651_vm10 = vcmask 1041408   ;;  %vm4178_vm2 = vcmask 261120   ;;  %v14045_v28 = vshrl.u32 %v742_v42, 30  ;;  %v1528_v49 = vsub.s32 32, %v1527_v6 }
 0x11c   : > { %v14043_v22 = vsel %vm18651_vm10, %v13919_v5, %v3928_v7  ;;  %v4033_v30 = vsel %vm18506_vm4, %v13483_v19, %v3950_v33  ;;  %vm18503_vm5 = vmmov 1   ;;  %v3158_v53 = vsel %vm3075_vm1, %v3157_v31, %v3156_v23  ;;  %vm18654_vm14 = vmmov %vm18651_vm10 }
 0x11d   : > { %vm14051_vm11 = vmpackc.low %vm18618_vm9, %vm18503_vm5  ;;  %v11702_v57 = vpack.c.bf16 %v3487_v1, %v4032_v14  ;;  %v14060_v5 = vsel %vm18654_vm14, %v3903_v18, %v3927_v26  ;;  %v11699_v17 = vpack.c.bf16 %v3969_v55, %v4033_v30  ;;  %v3161_v19 = vsel %vm13999_vm6, %v13661_v24, %v3158_v53  ;;  %v14078_v18 = vld [vmem:[%s18484_s2] sm:$0xff]  }
 0x11e   : > { %v14065_v7 = vand.u32 3, %v3162_v3  ;;  %v744_v36 = vshll.u32 %v14045_v28, 30  ;;  %12481 = vcosq.f32 %v3161_v19  ;;  %v14068_v56 = vand.u32 3, %v3166_v59 }
 0x11f   : > { %v1520_v62 = vand.u32 8388607, %v1513_v4  ;;  %v1530_v21 = vshll.u32 %v18522_v45, %v1527_v6  ;;  %11700 = vmatprep.subr.msk.bf16.mxu0 %vm14051_vm11, %v11699_v17  ;;  %12483 = vsinq.f32 %v3161_v19  ;;  %v1531_v58 = vshrl.u32 %v18520_v47, %v1528_v49 }
 0x120   : > { %v14080_v40 = vsub.s32 %v741_v13, %v744_v36  ;;  %v1533_v27 = vshll.u32 %v18520_v47, %v1527_v6  ;;  %11703 = vmatpush1.bf16.msk.msra.mxu0 %vm14051_vm11, %v11702_v57  ;;  %v1534_v60 = vshrl.u32 %v18517_v50, %v1528_v49  ;;  %v1536_v32 = vshll.u32 %v18517_v50, %v1527_v6 }
 0x121   : > { %v1537_v10 = vshrl.u32 %v18515_v52, %v1528_v49  ;;  %v1539_v8 = vshll.u32 %v18515_v52, %v1527_v6  ;;  %vm3583_vm1 = vcmp.eq.s32.totalorder %v14065_v7, 0  ;;  %vm3586_vm6 = vcmp.eq.s32.totalorder %v14065_v7, 2 }
 0x122   : > { %v747_v11 = vsub.s32 0, %v14080_v40  ;;  %v14093_v15 = vshrl.u32 %v1525_v34, 5  ;;  %vm3168_vm7 = vcmp.lt.s32.totalorder %v14068_v56, 2  ;;  %vm3582_vm12 = vcmp.lt.s32.totalorder %v14065_v7, 2 }
 0x123   : > { %v1521_v37 = vor.u32 8388608, %v1520_v62  ;;  %v1540_v12 = vshrl.u32 %v18513_v54, %v1528_v49  ;;  %v1542_v0 = vshll.u32 %v18513_v54, %v1527_v6  ;;  %v1543_v41 = vshrl.u32 %v18511_v63, %v1528_v49  ;;  %11704 = vmatmul.mubr.msk.bf16.vlgmr.msra.gmra.mrb[0].mxu0 %vm4178_vm2, %v14078_v18 }
 0x124   : > { %vm3165_vm13 = vweird.f32 %v13661_v24  ;;  %vm3169_vm8 = vcmp.eq.s32.totalorder %v14068_v56, 0  ;;  %v11573_v16 = vmin.u32 %v747_v11, %v14080_v40  ;;  %v1529_v44 = vshrl.u32 %v18522_v45, %v1528_v49  ;;  %4239 = vmatprep.mubr.bf16.mxu0 %v18508_v2 }
 0x125   : > { %v1532_v38 = vor.u32 %v1531_v58, %v1530_v21  ;;  %v1535_v51 = vor.u32 %v1534_v60, %v1533_v27  ;;  %v1538_v35 = vor.u32 %v1537_v10, %v1536_v32  ;;  %v1541_v13 = vor.u32 %v1540_v12, %v1539_v8 }
 0x126   : > { %v1544_v48 = vor.u32 %v1543_v41, %v1542_v0  ;;  %vm3172_vm0 = vcmp.eq.s32.totalorder %v14068_v56, 2  ;;  %v749_v1 = vclz %v11573_v16  ;;  %vm1545_vm10 = vcmp.lt.s32.totalorder %v14093_v15, 1 }
 0x127   : > { %v14110_v3 = vmul.f32 4.0, %v13821_v43  ;;  %v737_v34 = vadd.s32 %v13993_v20, %v14008_v61  ;;  %vm1546_vm14 = vcmp.lt.s32.totalorder %v14093_v15, 2  ;;  %vm1548_vm5 = vcmp.lt.s32.totalorder %v14093_v15, 4 }
 0x128   : > { %v14116_v26 = vshll.u32 %v1521_v37, 8  ;;  %v11574_v25 = vadd.s32 4294967294, %v749_v1  ;;  %vm1547_vm15 = vcmp.lt.s32.totalorder %v14093_v15, 3  ;;  %v1550_v23 = vsel %vm1548_vm5, %v1538_v35, 2102212464  ;;  %v12482_v55 = vpop.eup %12481 }
 0x129   : > { %v1554_v39 = vsel %vm1548_vm5, %v1541_v13, 920167782  ;;  %v1549_v42 = vsel %vm1545_vm10, %v1529_v44, %v1532_v38  ;;  %v1553_v6 = vsel %vm1545_vm10, %v1532_v38, %v1535_v51  ;;  %v1557_v33 = vsel %vm1545_vm10, %v1535_v51, %v1538_v35  ;;  %v12484_v59 = vpop.eup %12483 }
 0x12a   : > { %v1558_v31 = vsel %vm1548_vm5, %v1544_v48, 1326507024  ;;  %v3173_v14 = vxor.u32 2147483648, %v12482_v55  ;;  %vm11575_vm3 = vcmp.lt.s32.totalorder %v11574_v25, 0  ;;  %v1551_v20 = vsel %vm1547_vm15, %v1535_v51, %v1550_v23 }
 0x12b   : > { %v2348_v61 = vand.u32 2139095040, %v14110_v3  ;;  %v3170_v49 = vxor.u32 2147483648, %v12484_v59  ;;  %v752_v30 = vsel %vm11575_vm3, 0, %v11574_v25  ;;  %v1555_v53 = vsel %vm1547_vm15, %v1538_v35, %v1554_v39 }
 0x12c   : > { %v1559_v57 = vsel %vm1547_vm15, %v1541_v13, %v1558_v31  ;;  %v3174_v17 = vsel %vm3172_vm0, %v3173_v14, %v12484_v59  ;;  %v3588_v19 = vsel %vm3586_vm6, %v3173_v14, %v12484_v59  ;;  %v753_v36 = vsub.s32 32, %v752_v30 }
 0x12d   : > { %v754_v62 = vshll.u32 %v14080_v40, %v752_v30  ;;  %v3171_v21 = vsel %vm3169_vm8, %v12482_v55, %v3170_v49  ;;  %v3585_v58 = vsel %vm3583_vm1, %v12482_v55, %v3170_v49  ;;  %v757_v27 = vsub.s32 4294967266, %v752_v30 }
 0x12e   : > { %v1560_v60 = vsel %vm1546_vm14, %v1557_v33, %v1559_v57  ;;  %v3175_v32 = vsel %vm3168_vm7, %v3171_v21, %v3174_v17  ;;  %v3589_v10 = vsel %vm3582_vm12, %v3585_v58, %v3588_v19  ;;  %v755_v8 = vshrl.u32 %v737_v34, %v753_v36  ;;  %v14190_v36 = vld [vmem:[%s12839_s21 + $0x18] sm:$0x77] }
 0x12f   : > { %v2349_v11 = vshrl.u32 %v2348_v61, 23  ;;  %v3176_v40 = vsel %vm3165_vm13, nan, %v3175_v32  ;;  %v3590_v37 = vsel %vm3165_vm13, nan, %v3589_v10  ;;  %v758_v12 = vadd.s32 127, %v757_v27 }
 0x130   : > { %v1556_v0 = vsel %vm1546_vm14, %v1553_v6, %v1555_v53  ;;  %v3946_v41 = vcombine.high %v3176_v40, %v3176_v40  ;;  %v3970_v16 = vcombine.high %v3590_v37, %v3590_v37  ;;  %v3951_v44 = vrot.slane %v3176_v40, 3 }
 0x131   : > { %v756_v56 = vor.u32 %v755_v8, %v754_v62  ;;  %v759_v38 = vshll.u32 %v758_v12, 23  ;;  %v14148_v7 = vmul.u32.u64.low %v14116_v26, %v1560_v60  ;;  %v14149_v51 = vmul.u32.u64.high %v14116_v26, %v1560_v60, %v14148_v7 }
 0x132   : > { %v11636_v35 = vadd.s32 4294967169, %v2349_v11  ;;  %v3952_v13 = vrot.slane %v3946_v41, 3  ;;  %v4034_v48 = vsel %vm18506_vm4, %v14060_v5, %v3951_v44  ;;  %v1552_v1 = vsel %vm1546_vm14, %v1549_v42, %v1551_v20 }
 0x133   : > { %v760_v24 = vor.u32 4788187, %v759_v38  ;;  %v14156_v34 = vmul.u32.u64.low %v14116_v26, %v1556_v0  ;;  %v14157_v25 = vmul.u32.u64.high %v14116_v26, %v1556_v0, %v14156_v34  ;;  %v11714_v39 = vpack.c.bf16 %v3590_v37, %v4034_v48 }
 0x134   : > { %v4035_v23 = vsel %vm18506_vm4, %v14043_v22, %v3952_v13  ;;  %v763_v55 = vcvt.s32.f32 %v756_v56  ;;  %v2355_v6 = vadd.s32 1, %v11636_v35  ;;  %v1568_v59 = vmul.u32 %v14116_v26, %v1552_v1 }
 0x135   : > { %v11711_v33 = vpack.c.bf16 %v3970_v16, %v4035_v23  ;;  %v761_v31 = vand.u32 2147483647, %v760_v24  ;;  %vm1570_vm3 = vc.u32 %v14149_v51, %v14156_v34  ;;  %v2345_v5 = vand.u32 2147483647, %v14110_v3 }
 0x136   : > { %vm2356_vm15 = vcmp.gt.s32.totalorder %v2355_v6, 0  ;;  %v1571_v15 = vadd.s32 1, %v14157_v25  ;;  %vm683_vm5 = vcmp.lt.s32.totalorder %v13821_v43, 0  ;;  %vm14175_vm1 = vcmp.le.f32.partialorder %v681_v46, 0.7853982 }
 0x137   : > { %11712 = vmatprep.subr.msk.bf16.mxu1 %vm14051_vm11, %v11711_v33  ;;  %v2357_v42 = vsel %vm2356_vm15, %v2355_v6, 0  ;;  %v764_v22 = vmul.f32 %v763_v55, %v761_v31  ;;  %v2352_v49 = vand.u32 8388607, %v2345_v5  ;;  %v788_v27 = vand.u32 2139095040, %v14190_v36 }
 0x138   : > { %11715 = vmatpush1.bf16.msk.msra.mxu1 %vm14051_vm11, %v11714_v39  ;;  %v2359_v14 = vand.u32 31, %v2357_v42  ;;  %v1572_v26 = vsel %vm1570_vm3, %v1571_v15, %v14157_v25  ;;  %v14184_v57 = vshrl.u32 %v2357_v42, 5  ;;  %v767_v44 = vsub.s32 4, %v14045_v28 }
 0x139   : > { %v1573_v61 = vadd.s32 %v1572_v26, %v1568_v59  ;;  %v765_v62 = vxor.u32 2147483648, %v764_v22  ;;  %v2353_v11 = vor.u32 8388608, %v2352_v49  ;;  %v789_v38 = vshrl.u32 %v788_v27, 23 }
 0x13a   : > { %v2360_v30 = vsub.s32 32, %v2359_v14  ;;  %v2362_v53 = vshll.u32 %v18522_v45, %v2359_v14  ;;  %v2365_v17 = vshll.u32 %v18520_v47, %v2359_v14  ;;  %v2368_v19 = vshll.u32 %v18517_v50, %v2359_v14 }
 0x13b   : > { %11716 = vmatmul.mubr.msk.bf16.vlgmr.msra.gmra.mrb[0].mxu1 %vm4178_vm2, %v14078_v18  ;;  %v2371_v46 = vshll.u32 %v18515_v52, %v2359_v14  ;;  %v1574_v21 = vadd.s32 536870912, %v1573_v61  ;;  %v2374_v10 = vshll.u32 %v18513_v54, %v2359_v14  ;;  %vm2377_vm6 = vcmp.lt.s32.totalorder %v14184_v57, 1  ;;  %v12402_v14 = vld [vmem:[%s18484_s2 + $0x8] sm:$0xff]  }
 0x13c   : > { %v2363_v58 = vshrl.u32 %v18520_v47, %v2360_v30  ;;  %4332 = vmatprep.mubr.bf16.mxu1 %v18508_v2  ;;  %v2366_v18 = vshrl.u32 %v18517_v50, %v2360_v30  ;;  %v2369_v60 = vshrl.u32 %v18515_v52, %v2360_v30  ;;  %v2372_v32 = vshrl.u32 %v18513_v54, %v2360_v30 }
 0x13d   : > { %v1575_v8 = vshrl.u32 %v1574_v21, 30  ;;  %v2375_v37 = vshrl.u32 %v18511_v63, %v2360_v30  ;;  %v766_v16 = vsel %vm683_vm5, %v765_v62, %v764_v22  ;;  %v2361_v7 = vshrl.u32 %v18522_v45, %v2360_v30  ;;  %11705 = vmatmul.mubr.msk.bf16.gmra.mrb[4].mxu0 %vm4178_vm2, %v12402_v14 }
 0x13e   : > { %v2364_v40 = vor.u32 %v2363_v58, %v2362_v53  ;;  %v2367_v12 = vor.u32 %v2366_v18, %v2365_v17  ;;  %v2370_v0 = vor.u32 %v2369_v60, %v2368_v19  ;;  %v2373_v41 = vor.u32 %v2372_v32, %v2371_v46  ;;  %4249 = vmatprep.mubr.bf16.mxu0 %v18508_v2 }
 0x13f   : > { %v1576_v56 = vshll.u32 %v1575_v8, 30  ;;  %v2376_v35 = vor.u32 %v2375_v37, %v2374_v10  ;;  %vm2379_vm7 = vcmp.lt.s32.totalorder %v14184_v57, 3  ;;  %vm2380_vm12 = vcmp.lt.s32.totalorder %v14184_v57, 4 }
 0x140   : > { %vm2378_vm13 = vcmp.lt.s32.totalorder %v14184_v57, 2  ;;  %v2385_v48 = vsel %vm2377_vm6, %v2364_v40, %v2367_v12  ;;  %v2386_v24 = vsel %vm2380_vm12, %v2373_v41, 920167782  ;;  %v2393_v25 = vshll.u32 %v2353_v11, 8 }
 0x141   : > { %v14207_v13 = vsub.s32 %v1573_v61, %v1576_v56  ;;  %v2387_v1 = vsel %vm2379_vm7, %v2370_v0, %v2386_v24  ;;  %v768_v23 = vsel %vm683_vm5, %v767_v44, %v14045_v28  ;;  %v2382_v55 = vsel %vm2380_vm12, %v2370_v0, 2102212464 }
 0x142   : > { %v769_v6 = vsel %vm14175_vm1, %v13821_v43, %v766_v16  ;;  %v1599_v33 = vsub.s32 4, %v1575_v8  ;;  %v2388_v31 = vsel %vm2378_vm13, %v2385_v48, %v2387_v1  ;;  %v2390_v59 = vsel %vm2380_vm12, %v2376_v35, 1326507024 }
 0x143   : > { %v1579_v39 = vsub.s32 0, %v14207_v13  ;;  %v2381_v42 = vsel %vm2377_vm6, %v2361_v7, %v2364_v40  ;;  %v2389_v28 = vsel %vm2377_vm6, %v2367_v12, %v2370_v0  ;;  %v11576_v22 = vadd.s32 4294967169, %v789_v38  ;;  %11717 = vmatmul.mubr.msk.bf16.gmra.mrb[4].mxu1 %vm4178_vm2, %v12402_v14  ;;  %v12403_v0 = vld [vmem:[%s18484_s2 + $0x10] sm:$0xff]  }
 0x144   : > { %v2383_v26 = vsel %vm2379_vm7, %v2367_v12, %v2382_v55  ;;  %v2391_v61 = vsel %vm2379_vm7, %v2373_v41, %v2390_v59  ;;  %v14235_v49 = vmul.u32.u64.low %v2393_v25, %v2388_v31  ;;  %v14236_v30 = vmul.u32.u64.high %v2393_v25, %v2388_v31, %v14235_v49  ;;  %4342 = vmatprep.mubr.bf16.mxu1 %v18508_v2 }
 0x145   : > { %v11605_v15 = vmin.u32 %v1579_v39, %v14207_v13  ;;  %v770_v53 = vsel %vm14175_vm1, 0, %v768_v23  ;;  %12485 = vcosq.f32 %v769_v6  ;;  %vm1515_vm8 = vcmp.lt.s32.totalorder %v13941_v29, 0  ;;  %11706 = vmatmul.mubr.msk.bf16.gmra.mrb[8].mxu0 %vm4178_vm2, %v12403_v0 }
 0x146   : > { %12487 = vsinq.f32 %v769_v6  ;;  %v2392_v19 = vsel %vm2378_vm13, %v2389_v28, %v2391_v61  ;;  %v1600_v20 = vsel %vm1515_vm8, %v1599_v33, %v1575_v8  ;;  %v2384_v62 = vsel %vm2378_vm13, %v2381_v42, %v2383_v26  ;;  %4259 = vmatprep.mubr.bf16.mxu0 %v18508_v2  ;;  %v12404_v61 = vld [vmem:[%s18484_s2 + $0x18] sm:$0xff]  }
 0x147   : > { %v1581_v17 = vclz %v11605_v15  ;;  %v795_v21 = vadd.s32 1, %v11576_v22  ;;  %v774_v58 = vadd.s32 3, %v770_v53  ;;  %vm14257_vm0 = vcmp.le.f32.partialorder %v1513_v4, 0.7853982 }
 0x148   : > { %v14252_v27 = vmul.u32.u64.low %v2393_v25, %v2392_v19  ;;  %v14253_v18 = vmul.u32.u64.high %v2393_v25, %v2392_v19, %v14252_v27  ;;  %v1569_v32 = vadd.s32 %v14156_v34, %v14149_v51  ;;  %v2403_v10 = vadd.s32 1, %v14236_v30 }
 0x149   : > { %v11606_v46 = vadd.s32 4294967294, %v1581_v17  ;;  %v14264_v8 = vand.u32 3, %v770_v53  ;;  %v1602_v11 = vsel %vm14257_vm0, 0, %v1600_v20  ;;  %v2400_v40 = vmul.u32 %v2393_v25, %v2384_v62 }
 0x14a   : > { %vm796_vm14 = vcmp.gt.s32.totalorder %v795_v21, 0  ;;  %v14272_v51 = vand.u32 3, %v774_v58  ;;  %vm2402_vm3 = vc.u32 %v14253_v18, %v14235_v49  ;;  %v785_v44 = vand.u32 2147483647, %v14190_v36 }
 0x14b   : > { %vm11607_vm10 = vcmp.lt.s32.totalorder %v11606_v46, 0  ;;  %v2404_v16 = vsel %vm2402_vm3, %v2403_v10, %v14236_v30  ;;  %11718 = vmatmul.mubr.msk.bf16.gmra.mrb[8].mxu1 %vm4178_vm2, %v12403_v0  ;;  %v1606_v56 = vadd.s32 3, %v1602_v11  ;;  %v797_v7 = vsel %vm796_vm14, %v795_v21, 0 }
 0x14c   : > { %v1584_v57 = vsel %vm11607_vm10, 0, %v11606_v46  ;;  %v2405_v38 = vadd.s32 %v2404_v16, %v2400_v40  ;;  %4352 = vmatprep.mubr.bf16.mxu1 %v18508_v2  ;;  %vm1193_vm15 = vcmp.eq.s32.totalorder %v14264_v8, 2  ;;  %v3803_v24 = vcombine.high %v13821_v43, %v13821_v43 }
 0x14d   : > { %v1585_v37 = vsub.s32 32, %v1584_v57  ;;  %v1586_v12 = vshll.u32 %v14207_v13, %v1584_v57  ;;  %v1589_v4 = vsub.s32 4294967266, %v1584_v57  ;;  %vm777_vm5 = vcmp.eq.s32.totalorder %v14272_v51, 0  ;;  %11707 = vmatmul.mubr.msk.bf16.gmra.mrb[12].mxu0 %vm4178_vm2, %v12404_v61 }
 0x14e   : > { %vm780_vm1 = vcmp.eq.s32.totalorder %v14272_v51, 2  ;;  %v2406_v25 = vadd.s32 536870912, %v2405_v38  ;;  %v799_v23 = vand.u32 31, %v797_v7  ;;  %v792_v6 = vand.u32 8388607, %v785_v44  ;;  %4269 = vmatprep.mubr.bf16.mxu0 %v18508_v2 }
 0x14f   : > { %v1587_v34 = vshrl.u32 %v1569_v32, %v1585_v37  ;;  %v1590_v41 = vadd.s32 127, %v1589_v4  ;;  %v14282_v35 = vpop.eup %12485  ;;  %v14294_v33 = vmul.f32 2.0, %v14190_v36  ;;  %vm776_vm6 = vcmp.lt.s32.totalorder %v14272_v51, 2 }
 0x150   : > { %v14287_v1 = vpop.eup %12487  ;;  %v14297_v31 = vand.u32 3, %v1606_v56  ;;  %v14299_v59 = vand.u32 3, %v1602_v11  ;;  %v14301_v15 = vshrl.u32 %v2406_v25, 30  ;;  %v800_v42 = vsub.s32 32, %v799_v23 }
 0x151   : > { %v1588_v13 = vor.u32 %v1587_v34, %v1586_v12  ;;  %v1591_v48 = vshll.u32 %v1590_v41, 23  ;;  %v778_v28 = vxor.u32 2147483648, %v14287_v1  ;;  %v781_v22 = vxor.u32 2147483648, %v14282_v35  ;;  %v9332_v12 = vld [vmem:[%s18490_s8 + $0x8] sm:$0xff]  ;;  %v9331_v41 = vld [vmem:[%s18490_s8] sm:$0xff] }
 0x152   : > { %v14305_v26 = vshrl.u32 %v797_v7, 5  ;;  %v2408_v30 = vshll.u32 %v14301_v15, 30  ;;  %v802_v53 = vshll.u32 %v18522_v45, %v799_v23  ;;  %v805_v17 = vshll.u32 %v18520_v47, %v799_v23  ;;  %9350 = vperm.xlu1 %12392, %v9332_v12   ;;  %9345 = vperm.xlu0 %12391, %v9331_v41  }
 0x153   : > { %v1592_v39 = vor.u32 4788187, %v1591_v48  ;;  %v1595_v55 = vcvt.s32.f32 %v1588_v13  ;;  %v811_v19 = vshll.u32 %v18515_v52, %v799_v23  ;;  %v803_v20 = vshrl.u32 %v18520_v47, %v800_v42  ;;  %11719 = vmatmul.mubr.msk.bf16.gmra.mrb[12].mxu1 %vm4178_vm2, %v12404_v61 }
 0x154   : > { %v806_v62 = vshrl.u32 %v18517_v50, %v800_v42  ;;  %v812_v21 = vshrl.u32 %v18513_v54, %v800_v42  ;;  %vm1190_vm7 = vcmp.eq.s32.totalorder %v14264_v8, 0  ;;  %v14319_v58 = vsub.s32 %v2405_v38, %v2408_v30  ;;  %4362 = vmatprep.mubr.bf16.mxu1 %v18508_v2 }
 0x155   : > { %v1593_v14 = vand.u32 2147483647, %v1592_v39  ;;  %v793_v27 = vor.u32 8388608, %v792_v6  ;;  %v808_v32 = vshll.u32 %v18517_v50, %v799_v23  ;;  %v809_v10 = vshrl.u32 %v18515_v52, %v800_v42 }
 0x156   : > { %vm773_vm12 = vweird.f32 %v13821_v43  ;;  %v782_v57 = vsel %vm780_vm1, %v781_v22, %v14287_v1  ;;  %v814_v40 = vshll.u32 %v18513_v54, %v799_v23  ;;  %v815_v37 = vshrl.u32 %v18511_v63, %v800_v42 }
 0x157   : > { %v1596_v46 = vmul.f32 %v1595_v55, %v1593_v14  ;;  %v779_v4 = vsel %vm777_vm5, %v14282_v35, %v778_v28  ;;  %v14343_v0 = vsel %vm1193_vm15, %v781_v22, %v14287_v1  ;;  %v2411_v34 = vsub.s32 0, %v14319_v58  ;;  %v9334_v55 = vld [vmem:[%s18490_s8 + $0x18] sm:$0xff] }
 0x158   : > { %vm817_vm13 = vcmp.lt.s32.totalorder %v14305_v26, 1  ;;  %vm1189_vm10 = vcmp.lt.s32.totalorder %v14264_v8, 2  ;;  %v804_v56 = vor.u32 %v803_v20, %v802_v53  ;;  %v807_v38 = vor.u32 %v806_v62, %v805_v17  ;;  %9360 = vperm.xlu1 %12392, %v9334_v55  }
 0x159   : > { %v1597_v11 = vxor.u32 2147483648, %v1596_v46  ;;  %v813_v7 = vor.u32 %v812_v21, %v811_v19  ;;  %v11637_v48 = vmin.u32 %v2411_v34, %v14319_v58  ;;  %v810_v25 = vor.u32 %v809_v10, %v808_v32  ;;  %v9336_v21 = vld [vmem:[%s18490_s8 + $0x28] sm:$0xff]  ;;  %v9335_v10 = vld [vmem:[%s18490_s8 + $0x20] sm:$0xff] }
 0x15a   : > { %vm820_vm14 = vcmp.lt.s32.totalorder %v14305_v26, 4  ;;  %v801_v23 = vshrl.u32 %v18522_v45, %v800_v42  ;;  %v816_v39 = vor.u32 %v815_v37, %v814_v40  ;;  %vm819_vm3 = vcmp.lt.s32.totalorder %v14305_v26, 3  ;;  %v9333_v42 = vld [vmem:[%s18490_s8 + $0x10] sm:$0xff] }
 0x15b   : > { %v1598_v16 = vsel %vm1515_vm8, %v1597_v11, %v1596_v46  ;;  %vm2347_vm8 = vcmp.lt.s32.totalorder %v14110_v3, 0  ;;  %v2413_v60 = vclz %v11637_v48  ;;  %v14365_v6 = vshll.u32 %v793_v27, 8  ;;  %9355 = vperm.xlu0 %12391, %v9333_v42  }
 0x15c   : > { %v1601_v13 = vsel %vm14257_vm0, %v13941_v29, %v1598_v16  ;;  %vm818_vm0 = vcmp.lt.s32.totalorder %v14305_v26, 2  ;;  %v783_v22 = vsel %vm776_vm6, %v779_v4, %v782_v57  ;;  %v822_v14 = vsel %vm820_vm14, %v810_v25, 2102212464  ;;  %9370 = vperm.xlu1 %12392, %v9336_v21   ;;  %v9337_v26 = vld [vmem:[%s18490_s8 + $0x30] sm:$0xff] }
 0x15d   : > { %12489 = vcosq.f32 %v1601_v13  ;;  %v825_v61 = vsel %vm817_vm13, %v804_v56, %v807_v38  ;;  %v826_v30 = vsel %vm820_vm14, %v813_v7, 920167782  ;;  %v2401_v53 = vadd.s32 %v14235_v49, %v14253_v18 }
 0x15e   : > { %12491 = vsinq.f32 %v1601_v13  ;;  %v11638_v17 = vadd.s32 4294967294, %v2413_v60  ;;  %v827_v19 = vsel %vm819_vm3, %v810_v25, %v826_v30  ;;  %v829_v51 = vsel %vm817_vm13, %v807_v38, %v810_v25 }
 0x15f   : > { %vm1609_vm15 = vcmp.eq.s32.totalorder %v14297_v31, 0  ;;  %vm14387_vm5 = vcmp.le.f32.partialorder %v2345_v5, 0.7853982  ;;  %v821_v20 = vsel %vm817_vm13, %v801_v23, %v804_v56  ;;  %v823_v49 = vsel %vm819_vm3, %v807_v38, %v822_v14  ;;  %9365 = vperm.xlu0 %12391, %v9335_v10   ;;  %v9338_v56 = vld [vmem:[%s18490_s8 + $0x38] sm:$0xff] }
 0x160   : > { %v828_v18 = vsel %vm818_vm0, %v825_v61, %v827_v19  ;;  %v830_v62 = vsel %vm820_vm14, %v816_v39, 1326507024  ;;  %vm11639_vm1 = vcmp.lt.s32.totalorder %v11638_v17, 0  ;;  %v1192_v57 = vsel %vm1190_vm7, %v14282_v35, %v778_v28  ;;  %9380 = vperm.xlu1 %12392, %v9338_v56  }
 0x161   : > { %v831_v5 = vsel %vm819_vm3, %v813_v7, %v830_v62  ;;  %v14405_v27 = vmul.u32.u64.low %v14365_v6, %v828_v18  ;;  %v14406_v32 = vmul.u32.u64.high %v14365_v6, %v828_v18, %v14405_v27  ;;  %vm2025_vm6 = vcmp.eq.s32.totalorder %v14299_v59, 2  ;;  %v9342_v18 = vld [vmem:[%s18490_s8 + $0x58] sm:$0xff] }
 0x162   : > { %v2416_v11 = vsel %vm11639_vm1, 0, %v11638_v17  ;;  %v2431_v40 = vsub.s32 4, %v14301_v15  ;;  %v832_v37 = vsel %vm818_vm0, %v829_v51, %v831_v5  ;;  %v14423_v12 = vsel %vm773_vm12, nan, %v783_v22  ;;  %v9340_v22 = vld [vmem:[%s18490_s8 + $0x48] sm:$0xff] }
 0x163   : > { %vm2022_vm13 = vcmp.eq.s32.totalorder %v14299_v59, 0  ;;  %v2417_v1 = vsub.s32 32, %v2416_v11  ;;  %v2418_v4 = vshll.u32 %v14319_v58, %v2416_v11  ;;  %v2421_v34 = vsub.s32 4294967266, %v2416_v11  ;;  %9375 = vperm.xlu0 %12391, %v9337_v26  }
 0x164   : > { %v824_v35 = vsel %vm818_vm0, %v821_v20, %v823_v49  ;;  %v14430_v28 = vmul.u32.u64.low %v14365_v6, %v832_v37  ;;  %v14431_v41 = vmul.u32.u64.high %v14365_v6, %v832_v37, %v14430_v28  ;;  %v1620_v16 = vand.u32 2139095040, %v14294_v33  ;;  %9390 = vperm.xlu1 %12392, %v9340_v22  }
 0x165   : > { %v1196_v38 = vsel %vm1189_vm10, %v1192_v57, %v14343_v0  ;;  %vm1612_vm7 = vcmp.eq.s32.totalorder %v14297_v31, 2  ;;  %v2419_v58 = vshrl.u32 %v2401_v53, %v2417_v1  ;;  %v2422_v7 = vadd.s32 127, %v2421_v34  ;;  %v9341_v57 = vld [vmem:[%s18490_s8 + $0x50] sm:$0xff] }
 0x166   : > { %vm1605_vm14 = vweird.f32 %v13941_v29  ;;  %v2432_v48 = vsel %vm2347_vm8, %v2431_v40, %v14301_v15  ;;  %v3815_v8 = vcombine.high %v14423_v12, %v14423_v12  ;;  %v843_v0 = vadd.s32 1, %v14406_v32  ;;  %v9339_v15 = vld [vmem:[%s18490_s8 + $0x40] sm:$0xff] }
 0x167   : > { %v12490_v13 = vpop.eup %12489  ;;  %v1621_v25 = vshrl.u32 %v1620_v16, 23  ;;  %v2420_v55 = vor.u32 %v2419_v58, %v2418_v4  ;;  %v2423_v60 = vshll.u32 %v2422_v7, 23  ;;  %v840_v42 = vmul.u32 %v14365_v6, %v824_v35  ;;  %9385 = vperm.xlu0 %12391, %v9339_v15  }
 0x168   : > { %v12492_v23 = vpop.eup %12491  ;;  %v1613_v39 = vxor.u32 2147483648, %v12490_v13  ;;  %v14460_v14 = vsel %vm773_vm12, nan, %v1196_v38  ;;  %vm842_vm10 = vc.u32 %v14431_v41, %v14405_v27  ;;  %v2434_v6 = vsel %vm14387_vm5, 0, %v2432_v48  ;;  %9400 = vperm.xlu1 %12392, %v9342_v18  }
 0x169   : > { %v1610_v61 = vxor.u32 2147483648, %v12492_v23  ;;  %v11608_v30 = vadd.s32 4294967169, %v1621_v25  ;;  %v2424_v53 = vor.u32 4788187, %v2423_v60  ;;  %v2427_v17 = vcvt.s32.f32 %v2420_v55  ;;  %v14525_v60 = vld [vmem:[%s12839_s21 + $0x10] sm:$0x77] }
 0x16a   : > { %v1617_v19 = vand.u32 2147483647, %v14294_v33  ;;  %vm1608_vm3 = vcmp.lt.s32.totalorder %v14297_v31, 2  ;;  %v3822_v51 = vrot.slane %v3815_v8, 5  ;;  %v844_v20 = vsel %vm842_vm10, %v843_v0, %v14406_v32 }
 0x16b   : > { %v1627_v49 = vadd.s32 1, %v11608_v30  ;;  %v1611_v62 = vsel %vm1609_vm15, %v12490_v13, %v1610_v61  ;;  %v1614_v21 = vsel %vm1612_vm7, %v1613_v39, %v12492_v23  ;;  %v2425_v5 = vand.u32 2147483647, %v2424_v53  ;;  %9395 = vperm.xlu0 %12391, %v9341_v57  }
 0x16c   : > { %v845_v10 = vadd.s32 %v844_v20, %v840_v42  ;;  %vm2021_vm12 = vcmp.lt.s32.totalorder %v14299_v59, 2  ;;  %v2438_v32 = vadd.s32 3, %v2434_v6  ;;  %v3839_v11 = vcombine.high %v14460_v14, %v14460_v14 }
 0x16d   : > { %vm1628_vm0 = vcmp.gt.s32.totalorder %v1627_v49, 0  ;;  %v2027_v40 = vsel %vm2025_vm6, %v1613_v39, %v12492_v23  ;;  %v2428_v37 = vmul.f32 %v2427_v17, %v2425_v5  ;;  %v3821_v1 = vrot.slane %v14423_v12, 5 }
 0x16e   : > { %v1624_v4 = vand.u32 8388607, %v1617_v19  ;;  %v1615_v34 = vsel %vm1608_vm3, %v1611_v62, %v1614_v21  ;;  %v2024_v35 = vsel %vm2022_vm13, %v12490_v13, %v1610_v61  ;;  %v846_v28 = vadd.s32 536870912, %v845_v10 }
 0x16f   : > { %v1629_v16 = vsel %vm1628_vm0, %v1627_v49, 0  ;;  %v2429_v56 = vxor.u32 2147483648, %v2428_v37  ;;  %v3845_v38 = vrot.slane %v14460_v14, 2  ;;  %v3983_v12 = vsel %vm18618_vm9, %v3803_v24, %v3822_v51 }
 0x170   : > { %v1631_v58 = vand.u32 31, %v1629_v16  ;;  %v14496_v7 = vand.u32 3, %v2438_v32  ;;  %v14498_v31 = vand.u32 3, %v2434_v6  ;;  %v3846_v26 = vrot.slane %v3839_v11, 2 }
 0x171   : > { %v14500_v48 = vshrl.u32 %v846_v28, 30  ;;  %v14504_v13 = vsel %vm1605_vm14, nan, %v1615_v34  ;;  %v2028_v8 = vsel %vm2021_vm12, %v2024_v35, %v2027_v40  ;;  %v2430_v43 = vsel %vm2347_vm8, %v2429_v56, %v2428_v37 }
 0x172   : > { %v1632_v24 = vsub.s32 32, %v1631_v58  ;;  %v2433_v0 = vsel %vm14387_vm5, %v14110_v3, %v2430_v43  ;;  %vm18661_vm15 = vcmask 1045504   ;;  %v1625_v39 = vor.u32 8388608, %v1624_v4 }
 0x173   : > { %v14514_v25 = vsel %vm18661_vm15, %v3983_v12, %v3846_v26  ;;  %v848_v23 = vshll.u32 %v14500_v48, 30  ;;  %12493 = vcosq.f32 %v2433_v0  ;;  %v14519_v55 = vadd.s32 %v14405_v27, %v14431_v41 }
 0x174   : > { %v14522_v59 = vmul.f32 4.0, %v14190_v36  ;;  %v14529_v46 = vsel %vm18618_vm9, %v14525_v60, %v3821_v1  ;;  %v14533_v42 = vsel %vm1605_vm14, nan, %v2028_v8  ;;  %12495 = vsinq.f32 %v2433_v0 }
 0x175   : > { %v3863_v22 = vcombine.high %v14504_v13, %v14504_v13  ;;  %v14537_v15 = vsub.s32 %v845_v10, %v848_v23  ;;  %vm2444_vm8 = vcmp.eq.s32.totalorder %v14496_v7, 2  ;;  %vm2857_vm5 = vcmp.eq.s32.totalorder %v14498_v31, 2 }
 0x176   : > { %v1634_v27 = vshll.u32 %v18522_v45, %v1631_v58  ;;  %v1635_v41 = vshrl.u32 %v18520_v47, %v1632_v24  ;;  %v1637_v61 = vshll.u32 %v18520_v47, %v1631_v58  ;;  %v1638_v29 = vshrl.u32 %v18517_v50, %v1632_v24 }
 0x177   : > { %vm2441_vm1 = vcmp.eq.s32.totalorder %v14496_v7, 0  ;;  %vm2854_vm6 = vcmp.eq.s32.totalorder %v14498_v31, 0  ;;  %v851_v30 = vsub.s32 0, %v14537_v15  ;;  %v14548_v53 = vshrl.u32 %v1629_v16, 5 }
 0x178   : > { %v1640_v17 = vshll.u32 %v18517_v50, %v1631_v58  ;;  %v1641_v6 = vshrl.u32 %v18515_v52, %v1632_v24  ;;  %vm2440_vm13 = vcmp.lt.s32.totalorder %v14496_v7, 2  ;;  %vm2853_vm7 = vcmp.lt.s32.totalorder %v14498_v31, 2 }
 0x179   : > { %v1643_v51 = vshll.u32 %v18515_v52, %v1631_v58  ;;  %v1644_v20 = vshrl.u32 %v18513_v54, %v1632_v24  ;;  %v1646_v49 = vshll.u32 %v18513_v54, %v1631_v58  ;;  %v14557_v18 = vshll.u32 %v1625_v39, 8 }
 0x17a   : > { %vm2437_vm14 = vweird.f32 %v14110_v3  ;;  %v3869_v62 = vrot.slane %v14504_v13, 7  ;;  %v3870_v21 = vrot.slane %v3863_v22, 7  ;;  %v11577_v5 = vmin.u32 %v851_v30, %v14537_v15 }
 0x17b   : > { %v1633_v10 = vshrl.u32 %v18522_v45, %v1632_v24  ;;  %v1636_v57 = vor.u32 %v1635_v41, %v1634_v27  ;;  %v1639_v32 = vor.u32 %v1638_v29, %v1637_v61  ;;  %v1645_v11 = vor.u32 %v1644_v20, %v1643_v51 }
 0x17c   : > { %v1647_v40 = vshrl.u32 %v18511_v63, %v1632_v24  ;;  %v3887_v37 = vcombine.low %v14533_v42, %v14533_v42  ;;  %v853_v1 = vclz %v11577_v5  ;;  %v1642_v4 = vor.u32 %v1641_v6, %v1640_v17 }
 0x17d   : > { %vm1649_vm10 = vcmp.lt.s32.totalorder %v14548_v53, 1  ;;  %vm1651_vm3 = vcmp.lt.s32.totalorder %v14548_v53, 3  ;;  %vm1652_vm12 = vcmp.lt.s32.totalorder %v14548_v53, 4  ;;  %v2452_v35 = vand.u32 2139095040, %v14522_v59  ;;  %v12494_v12 = vpop.eup %12493 }
 0x17e   : > { %v1648_v34 = vor.u32 %v1647_v40, %v1646_v49  ;;  %vm18662_vm0 = vcmask 1040384   ;;  %v11578_v16 = vadd.s32 4294967294, %v853_v1  ;;  %vm1650_vm15 = vcmp.lt.s32.totalorder %v14548_v53, 2  ;;  %v12496_v0 = vpop.eup %12495 }
 0x17f   : > { %v4001_v28 = vsel %vm18662_vm0, %v3846_v26, %v3870_v21  ;;  %v1654_v56 = vsel %vm1652_vm12, %v1642_v4, 2102212464  ;;  %v1653_v58 = vsel %vm1649_vm10, %v1633_v10, %v1636_v57  ;;  %v1657_v8 = vsel %vm1649_vm10, %v1636_v57, %v1639_v32 }
 0x180   : > { %v1658_v43 = vsel %vm1652_vm12, %v1645_v11, 920167782  ;;  %v1662_v24 = vsel %vm1652_vm12, %v1648_v34, 1326507024  ;;  %v2445_v23 = vxor.u32 2147483648, %v12494_v12  ;;  %vm11579_vm4 = vcmp.lt.s32.totalorder %v11578_v16, 0 }
 0x181   : > { %v1655_v39 = vsel %vm1651_vm3, %v1639_v32, %v1654_v56  ;;  %v1659_v26 = vsel %vm1651_vm3, %v1642_v4, %v1658_v43  ;;  %v2442_v22 = vxor.u32 2147483648, %v12496_v0  ;;  %v856_v27 = vsel %vm11579_vm4, 0, %v11578_v16 }
 0x182   : > { %v1661_v41 = vsel %vm1649_vm10, %v1639_v32, %v1642_v4  ;;  %v1663_v61 = vsel %vm1651_vm3, %v1645_v11, %v1662_v24  ;;  %v2446_v29 = vsel %vm2444_vm8, %v2445_v23, %v12496_v0  ;;  %v2859_v30 = vsel %vm2857_vm5, %v2445_v23, %v12496_v0  ;;  %vm18665_vm5 = vmmov %vm18662_vm0 }
 0x183   : > { %v857_v17 = vsub.s32 32, %v856_v27  ;;  %v1660_v6 = vsel %vm1650_vm15, %v1657_v8, %v1659_v26  ;;  %v2443_v51 = vsel %vm2441_vm1, %v12494_v12, %v2442_v22  ;;  %v2856_v20 = vsel %vm2854_vm6, %v12494_v12, %v2442_v22 }
 0x184   : > { %v858_v49 = vshll.u32 %v14537_v15, %v856_v27  ;;  %v861_v21 = vsub.s32 4294967266, %v856_v27  ;;  %v2447_v5 = vsel %vm2440_vm13, %v2443_v51, %v2446_v29  ;;  %v2860_v10 = vsel %vm2853_vm7, %v2856_v20, %v2859_v30 }
 0x185   : > { %v859_v57 = vshrl.u32 %v14519_v55, %v857_v17  ;;  %v1664_v32 = vsel %vm1650_vm15, %v1661_v41, %v1663_v61  ;;  %v2448_v11 = vsel %vm2437_vm14, nan, %v2447_v5  ;;  %v2861_v40 = vsel %vm2437_vm14, nan, %v2860_v10 }
 0x186   : > { %v862_v1 = vadd.s32 127, %v861_v21  ;;  %v2453_v15 = vshrl.u32 %v2452_v35, 23  ;;  %v3899_v4 = vcombine.high %v2448_v11, %v2448_v11  ;;  %v3923_v34 = vcombine.high %v2861_v40, %v2861_v40 }
 0x187   : > { %vm18663_vm4 = vcmask 1043456   ;;  %v1656_v31 = vsel %vm1650_vm15, %v1653_v58, %v1655_v39  ;;  %v860_v55 = vor.u32 %v859_v57, %v858_v49  ;;  %v3905_v8 = vrot.slane %v2448_v11, 1 }
 0x188   : > { %v4010_v7 = vsel %vm18663_vm4, %v4001_v28, %v14533_v42  ;;  %v863_v16 = vshll.u32 %v862_v1, 23  ;;  %v14611_v56 = vmul.u32.u64.low %v14557_v18, %v1664_v32  ;;  %v14612_v12 = vmul.u32.u64.high %v14557_v18, %v1664_v32, %v14611_v56  ;;  %vm18667_vm13 = vmmov %vm18663_vm4  ;;  %v12405_v32 = vld [vmem:[%s18484_s2 + $0x20] sm:$0xff]  }
 0x189   : > { %v3906_v43 = vrot.slane %v3899_v4, 1  ;;  %v14615_v3 = vmul.u32.u64.low %v14557_v18, %v1660_v6  ;;  %v14616_v24 = vmul.u32.u64.high %v14557_v18, %v1660_v6, %v14615_v3  ;;  %v3929_v35 = vrot.slane %v2861_v40, 6  ;;  %11708 = vmatmul.mubr.msk.bf16.gmra.mrb[16].mxu0 %vm4178_vm2, %v12405_v32  ;;  %11720 = vmatmul.mubr.msk.bf16.gmra.mrb[16].mxu1 %vm4178_vm2, %v12405_v32 }
 0x18a   : > { %v864_v0 = vor.u32 4788187, %v863_v16  ;;  %v867_v23 = vcvt.s32.f32 %v860_v55  ;;  %v11640_v28 = vadd.s32 4294967169, %v2453_v15  ;;  %v3930_v26 = vrot.slane %v3923_v34, 6  ;;  %4279 = vmatprep.mubr.bf16.mxu0 %v18508_v2  ;;  %4372 = vmatprep.mubr.bf16.mxu1 %v18508_v2 }
 0x18b   : > { %vm18664_vm8 = vcmask 1046528   ;;  %v1672_v58 = vmul.u32 %v14557_v18, %v1656_v31  ;;  %v4000_v39 = vsel %vm18665_vm5, %v3845_v38, %v3869_v62  ;;  %vm1674_vm1 = vc.u32 %v14612_v12, %v14615_v3 }
 0x18c   : > { %v4019_v53 = vsel %vm18664_vm8, %v4010_v7, %v3906_v43  ;;  %v865_v27 = vand.u32 2147483647, %v864_v0  ;;  %vm18666_vm6 = vcmask 1045504   ;;  %v1675_v61 = vadd.s32 1, %v14616_v24  ;;  %vm18668_vm7 = vmmov %vm18664_vm8 }
 0x18d   : > { %v4053_v22 = vpack.c.bf16 %v4019_v53, %v14514_v25  ;;  %v3991_v41 = vsel %vm18666_vm6, %v14529_v46, %v3845_v38  ;;  %v2459_v18 = vadd.s32 1, %v11640_v28  ;;  %v4009_v13 = vsel %vm18667_vm13, %v4000_v39, %v3887_v37 }
 0x18e   : > { %v868_v62 = vmul.f32 %v867_v23, %v865_v27  ;;  %v4018_v25 = vsel %vm18668_vm7, %v4009_v13, %v3905_v8  ;;  %vm18669_vm14 = vcmask 1041408   ;;  %v1676_v14 = vsel %vm1674_vm1, %v1675_v61, %v14616_v24 }
 0x18f   : > { %4383 = vmatprep.subr.bf16.mxu0 %v4053_v22  ;;  %v14640_v29 = vsel %vm18669_vm14, %v3905_v8, %v3929_v35  ;;  %vm2460_vm10 = vcmp.gt.s32.totalorder %v2459_v18, 0  ;;  %v4052_v30 = vpack.c.bf16 %v4018_v25, %v3991_v41  ;;  %vm18670_vm3 = vmmov %vm18669_vm14  ;;  %v871_v46 = vsub.s32 4, %v14500_v48 }
 0x190   : > { %v14644_v38 = vsel %vm18670_vm3, %v3906_v43, %v3930_v26  ;;  %v1677_v17 = vadd.s32 %v1676_v14, %v1672_v58  ;;  %v2461_v42 = vsel %vm2460_vm10, %v2459_v18, 0  ;;  %v869_v6 = vxor.u32 2147483648, %v868_v62 }
 0x191   : > { %v2463_v37 = vand.u32 31, %v2461_v42  ;;  %4384 = vmatpush1.bf16.msra.mxu0 %v4052_v30  ;;  %vm787_vm12 = vcmp.lt.s32.totalorder %v14190_v36, 0  ;;  %vm14650_vm0 = vcmp.le.f32.partialorder %v785_v44, 0.7853982  ;;  %v2449_v10 = vand.u32 2147483647, %v14522_v59 }
 0x192   : > { %v1678_v51 = vadd.s32 536870912, %v1677_v17  ;;  %v872_v21 = vsel %vm787_vm12, %v871_v46, %v14500_v48  ;;  %v14658_v57 = vshrl.u32 %v2461_v42, 5  ;;  %v870_v11 = vsel %vm787_vm12, %v869_v6, %v868_v62 }
 0x193   : > { %v2464_v49 = vsub.s32 32, %v2463_v37  ;;  %v2466_v40 = vshll.u32 %v18522_v45, %v2463_v37  ;;  %v2469_v44 = vshll.u32 %v18520_v47, %v2463_v37  ;;  %v2475_v1 = vshll.u32 %v18515_v52, %v2463_v37 }
 0x194   : > { %v14655_v5 = vshrl.u32 %v1678_v51, 30  ;;  %v2472_v4 = vshll.u32 %v18517_v50, %v2463_v37  ;;  %v2478_v55 = vshll.u32 %v18513_v54, %v2463_v37  ;;  %v14680_v8 = vmul.f32 8.0, %v14525_v60 }
 0x195   : > { %v2467_v48 = vshrl.u32 %v18520_v47, %v2464_v49  ;;  %v2476_v34 = vshrl.u32 %v18513_v54, %v2464_v49  ;;  %v2470_v7 = vshrl.u32 %v18517_v50, %v2464_v49  ;;  %v2473_v31 = vshrl.u32 %v18515_v52, %v2464_v49 }
 0x196   : > { %v1680_v15 = vshll.u32 %v14655_v5, 30  ;;  %v2479_v16 = vshrl.u32 %v18511_v63, %v2464_v49  ;;  %v2456_v43 = vand.u32 8388607, %v2449_v10  ;;  %v873_v35 = vsel %vm14650_vm0, %v14190_v36, %v870_v11  ;;  %v12406_v36 = vld [vmem:[%s18484_s2 + $0x28] sm:$0xff]  }
 0x197   : > { %v2477_v24 = vor.u32 %v2476_v34, %v2475_v1  ;;  %v874_v0 = vsel %vm14650_vm0, 0, %v872_v21  ;;  %v2468_v28 = vor.u32 %v2467_v48, %v2466_v40  ;;  %v2471_v26 = vor.u32 %v2470_v7, %v2469_v44  ;;  %11709 = vmatmul.mubr.msk.bf16.gmra.mrb[20].mxu0 %vm4178_vm2, %v12406_v36  ;;  %11721 = vmatmul.mubr.msk.bf16.gmra.mrb[20].mxu1 %vm4178_vm2, %v12406_v36  ;;  %v12045_v44 = vld [vmem:[%s18487_s5 + $0x128] sm:$0xff]  ;;  %v14743_v1 = vpop.permute.xlu0 %4090 }
 0x198   : > { %v14677_v56 = vsub.s32 %v1677_v17, %v1680_v15  ;;  %v2474_v53 = vor.u32 %v2473_v31, %v2472_v4  ;;  %v2480_v60 = vor.u32 %v2479_v16, %v2478_v55  ;;  %vm2484_vm15 = vcmp.lt.s32.totalorder %v14658_v57, 4  ;;  %4415 = vmatprep.mubr.bf16.mxu0 %v18508_v2  ;;  %4508 = vmatprep.mubr.bf16.mxu1 %v18508_v2 }
 0x199   : > { %vm2481_vm4 = vcmp.lt.s32.totalorder %v14658_v57, 1  ;;  %v3180_v39 = vand.u32 2139095040, %v14680_v8  ;;  %12497 = vcosq.f32 %v873_v35  ;;  %v2457_v22 = vor.u32 8388608, %v2456_v43  ;;  %9676 = vperm.xlu1 %12392, %v12045_v44   ;;  %v12047_v43 = vld [vmem:[%s18487_s5 + $0x138] sm:$0xff] }
 0x19a   : > { %v1683_v23 = vsub.s32 0, %v14677_v56  ;;  %vm2483_vm8 = vcmp.lt.s32.totalorder %v14658_v57, 3  ;;  %v2490_v27 = vsel %vm2484_vm15, %v2477_v24, 920167782  ;;  %12499 = vsinq.f32 %v873_v35 }
 0x19b   : > { %v878_v41 = vadd.s32 3, %v874_v0  ;;  %v2465_v18 = vshrl.u32 %v18522_v45, %v2464_v49  ;;  %vm2482_vm5 = vcmp.lt.s32.totalorder %v14658_v57, 2  ;;  %v2489_v13 = vsel %vm2481_vm4, %v2468_v28, %v2471_v26 }
 0x19c   : > { %v11609_v58 = vmin.u32 %v1683_v23, %v14677_v56  ;;  %v2493_v62 = vsel %vm2481_vm4, %v2471_v26, %v2474_v53  ;;  %v2494_v25 = vsel %vm2484_vm15, %v2480_v60, 1326507024  ;;  %v2486_v30 = vsel %vm2484_vm15, %v2474_v53, 2102212464  ;;  %v14778_v60 = vpop.permute.xlu0 %4095 }
 0x19d   : > { %v2491_v46 = vsel %vm2483_vm8, %v2474_v53, %v2490_v27  ;;  %v3181_v17 = vshrl.u32 %v3180_v39, 23  ;;  %vm1619_vm1 = vcmp.lt.s32.totalorder %v14294_v33, 0  ;;  %v1703_v42 = vsub.s32 4, %v14655_v5  ;;  %9686 = vperm.xlu1 %12392, %v12047_v43   ;;  %v12049_v27 = vld [vmem:[%s18487_s5 + $0x148] sm:$0xff] }
 0x19e   : > { %v1685_v61 = vclz %v11609_v58  ;;  %v2495_v6 = vsel %vm2483_vm8, %v2477_v24, %v2494_v25  ;;  %v14721_v37 = vshll.u32 %v2457_v22, 8  ;;  %v14723_v51 = vand.u32 3, %v874_v0 }
 0x19f   : > { %v1673_v20 = vadd.s32 %v14615_v3, %v14612_v12  ;;  %v2496_v49 = vsel %vm2482_vm5, %v2493_v62, %v2495_v6  ;;  %v2485_v32 = vsel %vm2481_vm4, %v2465_v18, %v2468_v28  ;;  %v2487_v11 = vsel %vm2483_vm8, %v2471_v26, %v2486_v30  ;;  %v12044_v12 = vld [vmem:[%s18487_s5 + $0x120] sm:$0xff]  ;;  %v14741_v3 = vpop.permute.xlu1 %4100  ;;  %v12055_v28 = vld [vmem:[%s18487_s5 + $0x178] sm:$0xff] }
 0x1a0   : > { %v11610_v14 = vadd.s32 4294967294, %v1685_v61  ;;  %v2492_v40 = vsel %vm2482_vm5, %v2489_v13, %v2491_v46  ;;  %v14745_v15 = vand.u32 3, %v878_v41  ;;  %v11668_v34 = vadd.s32 4294967169, %v3181_v17  ;;  %9671 = vperm.xlu0 %12391, %v12044_v12   ;;  %v12048_v41 = vld [vmem:[%s18487_s5 + $0x140] sm:$0xff]  ;;  %v14799_v30 = vpop.permute.xlu0 %4110 }
 0x1a1   : > { %v1704_v31 = vsel %vm1619_vm1, %v1703_v42, %v14655_v5  ;;  %v14752_v55 = vmul.u32.u64.low %v14721_v37, %v2496_v49  ;;  %v14753_v16 = vmul.u32.u64.high %v14721_v37, %v2496_v49, %v14752_v55  ;;  %v2488_v35 = vsel %vm2482_vm5, %v2485_v32, %v2487_v11  ;;  %9696 = vperm.xlu1 %12392, %v12049_v27  }
 0x1a2   : > { %vm11611_vm6 = vcmp.lt.s32.totalorder %v11610_v14, 0  ;;  %v14764_v0 = vmul.u32.u64.low %v14721_v37, %v2492_v40  ;;  %v14765_v23 = vmul.u32.u64.high %v14721_v37, %v2492_v40, %v14764_v0  ;;  %vm14772_vm13 = vcmp.le.f32.partialorder %v1617_v19, 0.7853982  ;;  %v12050_v40 = vld [vmem:[%s18487_s5 + $0x150] sm:$0xff] }
 0x1a3   : > { %v1688_v21 = vsel %vm11611_vm6, 0, %v11610_v14  ;;  %v14768_v5 = vpop.eup %12497  ;;  %v14776_v53 = vpop.permute.xlu1 %4105  ;;  %v1706_v39 = vsel %vm14772_vm13, 0, %v1704_v31  ;;  %v3187_v36 = vadd.s32 1, %v11668_v34  ;;  %v2504_v19 = vmul.u32 %v14721_v37, %v2488_v35  ;;  %v14826_v31 = vld [vmem:[%s12839_s21 + $0x18] sm:$0x77]  ;;  %s15240_s21 = scalar_lea.vmem %s18483_s1, %s11561_s15  ;;  %s11484_s15 = sshll.u32 %s18375_s14, 4  ;;  %s18439_s15 = int_to_ptr.vmem [resolvable:$true] %s11484_s15 }
 0x1a4   : > { %v1689_v48 = vsub.s32 32, %v1688_v21  ;;  %v1690_v4 = vshll.u32 %v14677_v56, %v1688_v21  ;;  %v1693_v7 = vsub.s32 4294967266, %v1688_v21  ;;  %v12046_v56 = vld [vmem:[%s18487_s5 + $0x130] sm:$0xff]  ;;  %v14780_v57 = vpop.eup %12499  ;;  %vm2506_vm7 = vc.u32 %v14753_v16, %v14764_v0  ;;  %v12051_v21 = vld [vmem:[%s18487_s5 + $0x158] sm:$0xff]  ;;  %s12609_s22 = scalar_lea.vmem %s18439_s15, 512  ;;  %p12616_p0 = scmp.lt.s32.totalorder %s18439_s15, %s12614_s23 }
 0x1a5   : > { %9681 = vperm.xlu0 %12391, %v12046_v56   ;;  %vm881_vm14 = vcmp.eq.s32.totalorder %v14745_v15, 0  ;;  %vm1296_vm10 = vcmp.eq.s32.totalorder %v14723_v51, 2  ;;  %v2507_v61 = vadd.s32 1, %v14765_v23  ;;  %v18507_v18 = vand.u32 2147483647, %v14680_v8  ;;  %9706 = vperm.xlu1 %12392, %v12051_v21   ;;  %p12610_p11 = scmp.ne.s32.totalorder %s18439_s15, %s12609_s22  ;;  %p12617_p1 = scmp.lt.s32.totalorder %s12615_s30, %s12609_s22 }
 0x1a6   : > { %v1691_v24 = vshrl.u32 %v1673_v20, %v1689_v48  ;;  %v1694_v26 = vadd.s32 127, %v1693_v7  ;;  %v1710_v25 = vadd.s32 3, %v1706_v39  ;;  %vm3188_vm3 = vcmp.gt.s32.totalorder %v3187_v36, 0  ;;  %v14823_v7 = vpop.permute.xlu0 %4120 }
 0x1a7   : > { %v14797_v14 = vpop.permute.xlu1 %4115  ;;  %v882_v46 = vxor.u32 2147483648, %v14780_v57  ;;  %v885_v17 = vxor.u32 2147483648, %v14768_v5  ;;  %v2508_v42 = vsel %vm2506_vm7, %v2507_v61, %v14765_v23  ;;  %v3189_v6 = vsel %vm3188_vm3, %v3187_v36, 0  ;;  %p12611_p12 = pnand %p12610_p11, %p12792_p5  ;;  %p12618_p2 = por %p12617_p1, %p12616_p0 }
 0x1a8   : > { %v1692_v58 = vor.u32 %v1691_v24, %v1690_v4  ;;  %v1695_v22 = vshll.u32 %v1694_v26, 23  ;;  %vm884_vm12 = vcmp.eq.s32.totalorder %v14745_v15, 2  ;;  %v2509_v20 = vadd.s32 %v2508_v42, %v2504_v19 }
 0x1a9   : > { %9691 = vperm.xlu0 %12391, %v12048_v41   ;;  %v3191_v49 = vand.u32 31, %v3189_v6  ;;  %vm880_vm0 = vcmp.lt.s32.totalorder %v14745_v15, 2  ;;  %vm1293_vm15 = vcmp.eq.s32.totalorder %v14723_v51, 0  ;;  %v14810_v32 = vand.u32 3, %v1706_v39  ;;  %v12053_v39 = vld [vmem:[%s18487_s5 + $0x168] sm:$0xff]  ;;  %v12052_v41 = vld [vmem:[%s18487_s5 + $0x160] sm:$0xff]  ;;  %p12612_p13 = pneg %p12611_p12 }
 0x1aa   : > { %v1696_v13 = vor.u32 4788187, %v1695_v22  ;;  %v1699_v62 = vcvt.s32.f32 %v1692_v58  ;;  %v14814_v11 = vand.u32 8388607, %v18507_v18  ;;  %v14819_v12 = vand.u32 3, %v1710_v25  ;;  %v14866_v42 = vpop.permute.xlu0 %4130  ;;  %9716 = vperm.xlu1 %12392, %v12053_v39   ;;  %v12054_v39 = vld [vmem:[%s18487_s5 + $0x170] sm:$0xff] }
 0x1ab   : > { %v2510_v48 = vadd.s32 536870912, %v2509_v20  ;;  %v3192_v4 = vsub.s32 32, %v3191_v49  ;;  %v14821_v34 = vpop.permute.xlu1 %4125  ;;  %vm877_vm4 = vweird.f32 %v14826_v31  ;;  %v883_v55 = vsel %vm881_vm14, %v14768_v5, %v882_v46  ;;  %v12099_v15 = vld [vmem:[%s18487_s5 + $0x188] sm:$0xff]  ;;  %p12619_p3 = pnand %p12618_p2, %p12612_p13 }
 0x1ac   : > { %v1697_v37 = vand.u32 2147483647, %v1696_v13  ;;  %v886_v43 = vsel %vm884_vm12, %v885_v17, %v14780_v57  ;;  %vm1292_vm8 = vcmp.lt.s32.totalorder %v14723_v51, 2  ;;  %v14841_v56 = vsel %vm1296_vm10, %v885_v17, %v14780_v57 }
 0x1ad   : > { %v14843_v24 = vshrl.u32 %v3189_v6, 5  ;;  %v14845_v23 = vshrl.u32 %v2510_v48, 30  ;;  %v3194_v26 = vshll.u32 %v18522_v45, %v3191_v49  ;;  %v3197_v58 = vshll.u32 %v18520_v47, %v3191_v49  ;;  %9701 = vperm.xlu0 %12391, %v12050_v40  }
 0x1ae   : > { %v1700_v44 = vmul.f32 %v1699_v62, %v1697_v37  ;;  %v3195_v36 = vshrl.u32 %v18520_v47, %v3192_v4  ;;  %v3198_v22 = vshrl.u32 %v18517_v50, %v3192_v4  ;;  %v3203_v19 = vshll.u32 %v18515_v52, %v3191_v49  ;;  %9726 = vperm.xlu1 %12392, %v12055_v28  }
 0x1af   : > { %v3204_v27 = vshrl.u32 %v18513_v54, %v3192_v4  ;;  %v2512_v13 = vshll.u32 %v14845_v23, 30  ;;  %v3200_v62 = vshll.u32 %v18517_v50, %v3191_v49  ;;  %v3201_v25 = vshrl.u32 %v18515_v52, %v3192_v4  ;;  %v14864_v17 = vpop.permute.xlu1 %4135 }
 0x1b0   : > { %v1701_v35 = vxor.u32 2147483648, %v1700_v44  ;;  %v3185_v37 = vor.u32 8388608, %v14814_v11  ;;  %v3206_v21 = vshll.u32 %v18513_v54, %v3191_v49  ;;  %v3207_v40 = vshrl.u32 %v18511_v63, %v3192_v4 }
 0x1b1   : > { %v3193_v48 = vshrl.u32 %v18522_v45, %v3192_v4  ;;  %9711 = vperm.xlu0 %12391, %v12052_v41   ;;  %v3196_v11 = vor.u32 %v3195_v36, %v3194_v26  ;;  %v3205_v49 = vor.u32 %v3204_v27, %v3203_v19  ;;  %vm1716_vm5 = vcmp.eq.s32.totalorder %v14819_v12, 2  ;;  %v14898_v36 = vpop.permute.xlu0 %4140 }
 0x1b2   : > { %v1702_v61 = vsel %vm1619_vm1, %v1701_v35, %v1700_v44  ;;  %v14874_v44 = vsub.s32 %v2509_v20, %v2512_v13  ;;  %v14878_v35 = vmul.f32 8.0, %v14826_v31  ;;  %v1295_v20 = vsel %vm1293_vm15, %v14768_v5, %v882_v46  ;;  %v12098_v13 = vld [vmem:[%s18487_s5 + $0x180] sm:$0xff]  ;;  %10326 = vperm.xlu1 %12392, %v12099_v15   ;;  %v12100_v15 = vld [vmem:[%s18487_s5 + $0x190] sm:$0xff] }
 0x1b3   : > { %v1705_v6 = vsel %vm14772_vm13, %v14294_v33, %v1702_v61  ;;  %v3199_v61 = vor.u32 %v3198_v22, %v3197_v58  ;;  %vm2128_vm1 = vcmp.eq.s32.totalorder %v14810_v32, 2  ;;  %vm2451_vm6 = vcmp.lt.s32.totalorder %v14522_v59, 0  ;;  %v14896_v58 = vpop.permute.xlu1 %4145 }
 0x1b4   : > { %12501 = vcosq.f32 %v1705_v6  ;;  %v2515_v4 = vsub.s32 0, %v14874_v44  ;;  %v3202_v26 = vor.u32 %v3201_v25, %v3200_v62  ;;  %vm3209_vm13 = vcmp.lt.s32.totalorder %v14843_v24, 1 }
 0x1b5   : > { %12503 = vsinq.f32 %v1705_v6  ;;  %v887_v57 = vsel %vm880_vm0, %v883_v55, %v886_v43  ;;  %vm1713_vm7 = vcmp.eq.s32.totalorder %v14819_v12, 0  ;;  %vm2125_vm14 = vcmp.eq.s32.totalorder %v14810_v32, 0  ;;  %9721 = vperm.xlu0 %12391, %v12054_v39  }
 0x1b6   : > { %v3208_v5 = vor.u32 %v3207_v40, %v3206_v21  ;;  %vm3212_vm10 = vcmp.lt.s32.totalorder %v14843_v24, 4  ;;  %v14905_v46 = vshll.u32 %v3185_v37, 8  ;;  %v11641_v22 = vmin.u32 %v2515_v4, %v14874_v44  ;;  %v14938_v40 = vpop.permute.xlu0 %4739 }
 0x1b7   : > { %vm3210_vm3 = vcmp.lt.s32.totalorder %v14843_v24, 2  ;;  %vm3211_vm12 = vcmp.lt.s32.totalorder %v14843_v24, 3  ;;  %v3284_v19 = vand.u32 2139095040, %v14878_v35  ;;  %vm1712_vm0 = vcmp.lt.s32.totalorder %v14819_v12, 2  ;;  %v14936_v21 = vpop.permute.xlu1 %4744  ;;  %v12104_v12 = vld [vmem:[%s18487_s5 + $0x1b0] sm:$0xff] }
 0x1b8   : > { %v3213_v55 = vsel %vm3209_vm13, %v3193_v48, %v3196_v11  ;;  %v3214_v43 = vsel %vm3212_vm10, %v3202_v26, 2102212464  ;;  %v3217_v27 = vsel %vm3209_vm13, %v3196_v11, %v3199_v61  ;;  %v3218_v41 = vsel %vm3212_vm10, %v3205_v49, 920167782 }
 0x1b9   : > { %v14928_v62 = vsel %vm877_vm4, nan, %v887_v57  ;;  %v1299_v25 = vsel %vm1292_vm8, %v1295_v20, %v14841_v56  ;;  %vm2124_vm15 = vcmp.lt.s32.totalorder %v14810_v32, 2  ;;  %v2517_v6 = vclz %v11641_v22  ;;  %10321 = vperm.xlu0 %12391, %v12098_v13  }
 0x1ba   : > { %v3221_v37 = vsel %vm3209_vm13, %v3199_v61, %v3202_v26  ;;  %v2535_v48 = vsub.s32 4, %v14845_v23  ;;  %v3215_v28 = vsel %vm3211_vm12, %v3199_v61, %v3214_v43  ;;  %v3219_v11 = vsel %vm3211_vm12, %v3202_v26, %v3218_v41  ;;  %v12101_v61 = vld [vmem:[%s18487_s5 + $0x198] sm:$0xff]  ;;  %v14975_v41 = vpop.permute.xlu0 %4749 }
 0x1bb   : > { %v3222_v51 = vsel %vm3212_vm10, %v3208_v5, 1326507024  ;;  %vm1709_vm8 = vweird.f32 %v14294_v33  ;;  %v11642_v56 = vadd.s32 4294967294, %v2517_v6  ;;  %v3216_v39 = vsel %vm3210_vm3, %v3213_v55, %v3215_v28  ;;  %v14973_v24 = vpop.permute.xlu1 %4754  ;;  %10336 = vperm.xlu1 %12392, %v12101_v61  }
 0x1bc   : > { %v3220_v20 = vsel %vm3210_vm3, %v3217_v27, %v3219_v11  ;;  %v3223_v4 = vsel %vm3211_vm12, %v3205_v49, %v3222_v51  ;;  %v3285_v22 = vshrl.u32 %v3284_v19, 23  ;;  %v2505_v49 = vadd.s32 %v14764_v0, %v14753_v16 }
 0x1bd   : > { %v3224_v26 = vsel %vm3210_vm3, %v3221_v37, %v3223_v4  ;;  %v14960_v57 = vmul.u32.u64.low %v14905_v46, %v3220_v20  ;;  %v14961_v5 = vmul.u32.u64.high %v14905_v46, %v3220_v20, %v14960_v57  ;;  %vm11643_vm13 = vcmp.lt.s32.totalorder %v11642_v56, 0  ;;  %10331 = vperm.xlu0 %12391, %v12100_v15   ;;  %v12103_v20 = vld [vmem:[%s18487_s5 + $0x1a8] sm:$0xff] }
 0x1be   : > { %v12502_v55 = vpop.eup %12501  ;;  %v14970_v43 = vmul.u32.u64.low %v14905_v46, %v3224_v26  ;;  %v14971_v27 = vmul.u32.u64.high %v14905_v46, %v3224_v26, %v14970_v43  ;;  %v2520_v19 = vsel %vm11643_vm13, 0, %v11642_v56  ;;  %v2536_v37 = vsel %vm2451_vm6, %v2535_v48, %v14845_v23  ;;  %v12102_v48 = vld [vmem:[%s18487_s5 + $0x1a0] sm:$0xff] }
 0x1bf   : > { %v12504_v13 = vpop.eup %12503  ;;  %v1717_v6 = vxor.u32 2147483648, %v12502_v55  ;;  %v3232_v28 = vmul.u32 %v14905_v46, %v3216_v39  ;;  %v2521_v0 = vsub.s32 32, %v2520_v19  ;;  %v2522_v11 = vshll.u32 %v14874_v44, %v2520_v19  ;;  %v14997_v15 = vpop.permute.xlu1 %4764  ;;  %10346 = vperm.xlu1 %12392, %v12103_v20  }
 0x1c0   : > { %v1714_v16 = vxor.u32 2147483648, %v12504_v13  ;;  %v2525_v51 = vsub.s32 4294967266, %v2520_v19  ;;  %v3235_v23 = vadd.s32 1, %v14961_v5  ;;  %v11672_v46 = vadd.s32 4294967169, %v3285_v22  ;;  %v14999_v43 = vpop.permute.xlu0 %4759 }
 0x1c1   : > { %v1718_v56 = vsel %vm1716_vm5, %v1717_v6, %v12504_v13  ;;  %v2130_v4 = vsel %vm2128_vm1, %v1717_v6, %v12504_v13  ;;  %v2523_v61 = vshrl.u32 %v2505_v49, %v2521_v0  ;;  %vm15003_vm5 = vcmp.le.f32.partialorder %v2449_v10, 0.7853982  ;;  %10341 = vperm.xlu0 %12391, %v12102_v48  }
 0x1c2   : > { %v1715_v44 = vsel %vm1713_vm7, %v12502_v55, %v1714_v16  ;;  %v2127_v39 = vsel %vm2125_vm14, %v12502_v55, %v1714_v16  ;;  %v2526_v26 = vadd.s32 127, %v2525_v51  ;;  %v3804_v13 = vcombine.high %v14826_v31, %v14826_v31  ;;  %v12105_v16 = vld [vmem:[%s18487_s5 + $0x1b8] sm:$0xff] }
 0x1c3   : > { %v3816_v6 = vcombine.high %v14928_v62, %v14928_v62  ;;  %vm3234_vm1 = vc.u32 %v14971_v27, %v14960_v57  ;;  %v15015_v55 = vsel %vm877_vm4, nan, %v1299_v25  ;;  %v1719_v10 = vsel %vm1712_vm0, %v1715_v44, %v1718_v56  ;;  %10356 = vperm.xlu1 %12392, %v12105_v16  }
 0x1c4   : > { %v2524_v49 = vor.u32 %v2523_v61, %v2522_v11  ;;  %v2527_v19 = vshll.u32 %v2526_v26, 23  ;;  %v2131_v0 = vsel %vm2124_vm15, %v2127_v39, %v2130_v4  ;;  %v2538_v51 = vsel %vm15003_vm5, 0, %v2536_v37  ;;  %v15031_v61 = vpop.permute.xlu1 %4774  ;;  %v15033_v26 = vpop.permute.xlu0 %4769 }
 0x1c5   : > { %v3236_v20 = vsel %vm3234_vm1, %v3235_v23, %v14961_v5  ;;  %v18510_v25 = vand.u32 2147483647, %v14878_v35  ;;  %v3291_v44 = vadd.s32 1, %v11672_v46  ;;  %v1720_v32 = vsel %vm1709_vm8, nan, %v1719_v10  ;;  %10351 = vperm.xlu0 %12391, %v12104_v12  }
 0x1c6   : > { %v2528_v11 = vor.u32 4788187, %v2527_v19  ;;  %v2531_v56 = vcvt.s32.f32 %v2524_v49  ;;  %v3237_v48 = vadd.s32 %v3236_v20, %v3232_v28  ;;  %v3823_v37 = vrot.slane %v14928_v62, 5  ;;  %v12107_v28 = vld [vmem:[%s18487_s5 + $0x1c8] sm:$0xff]  ;;  %v12106_v49 = vld [vmem:[%s18487_s5 + $0x1c0] sm:$0xff] }
 0x1c7   : > { %v3824_v5 = vrot.slane %v3816_v6, 5  ;;  %v3840_v4 = vcombine.high %v15015_v55, %v15015_v55  ;;  %v2542_v39 = vadd.s32 3, %v2538_v51  ;;  %vm3292_vm4 = vcmp.gt.s32.totalorder %v3291_v44, 0  ;;  %10366 = vperm.xlu1 %12392, %v12107_v28  }
 0x1c8   : > { %v2529_v23 = vand.u32 2147483647, %v2528_v11  ;;  %v3238_v19 = vadd.s32 536870912, %v3237_v48  ;;  %v15045_v46 = vsel %vm1709_vm8, nan, %v2131_v0  ;;  %v18519_v62 = vrot.slane %v15015_v55, 2  ;;  %v15055_v18 = vpop.permute.xlu1 %4784  ;;  %v15057_v33 = vpop.permute.xlu0 %4779 }
 0x1c9   : > { %v3288_v6 = vand.u32 8388607, %v18510_v25  ;;  %v3293_v10 = vsel %vm3292_vm4, %v3291_v44, 0  ;;  %v3864_v20 = vcombine.high %v1720_v32, %v1720_v32  ;;  %v3871_v12 = vrot.slane %v1720_v32, 7  ;;  %10361 = vperm.xlu0 %12391, %v12106_v49  }
 0x1ca   : > { %v2532_v16 = vmul.f32 %v2531_v56, %v2529_v23  ;;  %v15053_v11 = vshrl.u32 %v3238_v19, 30  ;;  %v15059_v0 = vrot.slane %v3840_v4, 2  ;;  %v15062_v2 = vsel %vm18618_vm9, %v3804_v13, %v3824_v5  ;;  %v12109_v4 = vld [vmem:[%s18487_s5 + $0x1d8] sm:$0xff] }
 0x1cb   : > { %v15066_v44 = vsel %vm18618_vm9, %v14826_v31, %v3823_v37  ;;  %v3295_v25 = vand.u32 31, %v3293_v10  ;;  %v15068_v23 = vand.u32 3, %v2542_v39  ;;  %v15070_v32 = vand.u32 3, %v2538_v51  ;;  %v12108_v37 = vld [vmem:[%s18487_s5 + $0x1d0] sm:$0xff]  ;;  %10376 = vperm.xlu1 %12392, %v12109_v4  }
 0x1cc   : > { %v2533_v56 = vxor.u32 2147483648, %v2532_v16  ;;  %v3240_v19 = vshll.u32 %v15053_v11, 30  ;;  %v3888_v13 = vcombine.low %v15045_v46, %v15045_v46  ;;  %v3289_v5 = vor.u32 8388608, %v3288_v6  ;;  %v15088_v63 = vpop.permute.xlu1 %4794  ;;  %v15090_v54 = vpop.permute.xlu0 %4789 }
 0x1cd   : > { %v3296_v31 = vsub.s32 32, %v3295_v25  ;;  %v3872_v39 = vrot.slane %v3864_v20, 7  ;;  %vm18677_vm7 = vcmask 1040384   ;;  %18678 = vst [vmem:[#allocation9_spill] sm:$0xff] %v15088_v63  ;;  %18679 = vst [vmem:[#allocation10_spill] sm:$0xff] %v15090_v54  ;;  %v3298_v52 = vshll.u32 %v18522_v45, %v3295_v25  ;;  %10371 = vperm.xlu0 %12391, %v12108_v37  }
 0x1ce   : > { %v2534_v51 = vsel %vm2451_vm6, %v2533_v56, %v2532_v16  ;;  %v4002_v28 = vsel %vm18677_vm7, %v18519_v62, %v3871_v12  ;;  %v15086_v49 = vsub.s32 %v3237_v48, %v3240_v19  ;;  %v3301_v16 = vshll.u32 %v18520_v47, %v3295_v25 }
 0x1cf   : > { %v2537_v6 = vsel %vm15003_vm5, %v14522_v59, %v2534_v51  ;;  %v3299_v50 = vshrl.u32 %v18520_v47, %v3296_v31  ;;  %v15099_v48 = vshrl.u32 %v3293_v10, 5  ;;  %v18680_v12 = vmov 2131351028   ;;  %v11125_v47 = vld [vmem:[%s18493_s11] sm:$0x7]  ;;  %vm18687_vm5 = vmmov %vm18677_vm7 }
 0x1d0   : > { %12505 = vcosq.f32 %v2537_v6  ;;  %v3243_v20 = vsub.s32 0, %v15086_v49  ;;  %v3304_v56 = vshll.u32 %v18680_v12, %v3295_v25  ;;  %v3302_v19 = vshrl.u32 %v18680_v12, %v3296_v31  ;;  %v15119_v45 = vpop.permute.xlu0 %5390 }
 0x1d1   : > { %12507 = vsinq.f32 %v2537_v6  ;;  %v18681_v22 = vmov 2102212464   ;;  %vm2548_vm6 = vcmp.eq.s32.totalorder %v15068_v23, 2  ;;  %vm2960_vm14 = vcmp.eq.s32.totalorder %v15070_v32, 2  ;;  %v15117_v6 = vpop.permute.xlu1 %5395  ;;  %18683 = vst [vmem:[#allocation12_spill] sm:$0xff] %v15119_v45  ;;  %11128 = vperm.xlu0 %12391, %v11125_v47  }
 0x1d2   : > { %v3305_v51 = vshrl.u32 %v18681_v22, %v3296_v31  ;;  %v3307_v62 = vshll.u32 %v18681_v22, %v3295_v25  ;;  %v15112_v10 = vadd.s32 %v14960_v57, %v14971_v27  ;;  %v11669_v4 = vmin.u32 %v3243_v20, %v15086_v49  ;;  %18682 = vst [vmem:[#allocation11_spill] sm:$0xff] %v15117_v6 }
 0x1d3   : > { %v15115_v37 = vshll.u32 %v3289_v5, 8  ;;  %vm2545_vm10 = vcmp.eq.s32.totalorder %v15068_v23, 0  ;;  %vm2957_vm3 = vcmp.eq.s32.totalorder %v15070_v32, 0  ;;  %vm18684_vm12 = vcmask 1043456  }
 0x1d4   : > { %v15124_v22 = vsel %vm18684_vm12, %v4002_v28, %v3888_v13  ;;  %v3300_v12 = vor.u32 %v3299_v50, %v3298_v52  ;;  %v3303_v63 = vor.u32 %v3302_v19, %v3301_v16  ;;  %v18685_v54 = vmov 920167782  }
 0x1d5   : > { %v3308_v57 = vshrl.u32 %v18685_v54, %v3296_v31  ;;  %v12681_v27 = vmov 1   ;;  %vm2544_vm0 = vcmp.lt.s32.totalorder %v15068_v23, 2  ;;  %vm2956_vm15 = vcmp.lt.s32.totalorder %v15070_v32, 2 }
 0x1d6   : > { %12393 = vset.pattern.permute.xlu1 %v12681_v27  ;;  %v3245_v5 = vclz %v11669_v4  ;;  %v18686_v20 = vmov 683565275   ;;  %v3306_v45 = vor.u32 %v3305_v51, %v3304_v56  ;;  %vm3313_vm8 = vcmp.lt.s32.totalorder %v15099_v48, 1  ;;  %v10944_v56 = vld [vmem:[%s18492_s10] sm:$0x7]  ;;  %v15144_v51 = vpop.permute.xlu1 %5405 }
 0x1d7   : > { %v3297_v6 = vshrl.u32 %v18686_v20, %v3296_v31  ;;  %11212 = vperm.xlu1 %12393, %v11125_v47   ;;  %vm2541_vm13 = vweird.f32 %v14522_v59  ;;  %v15134_v50 = vsel %vm18687_vm5, %v15059_v0, %v3872_v39  ;;  %v3309_v52 = vor.u32 %v3308_v57, %v3307_v62  ;;  %18689 = vst [vmem:[#allocation13_spill] sm:$0xff] %v15144_v51  ;;  %v15146_v39 = vpop.permute.xlu0 %5400 }
 0x1d8   : > { %v3310_v13 = vshll.u32 %v18685_v54, %v3295_v25  ;;  %v18688_v28 = vmov 1326507024   ;;  %v11670_v19 = vadd.s32 4294967294, %v3245_v5  ;;  %vm3314_vm1 = vcmp.lt.s32.totalorder %v15099_v48, 2 }
 0x1d9   : > { %v3311_v16 = vshrl.u32 %v18688_v28, %v3296_v31  ;;  %vm3315_vm4 = vcmp.lt.s32.totalorder %v15099_v48, 3  ;;  %vm3316_vm7 = vcmp.lt.s32.totalorder %v15099_v48, 4  ;;  %v3321_v31 = vsel %vm3313_vm8, %v3300_v12, %v3303_v63 }
 0x1da   : > { %v3318_v25 = vsel %vm3316_vm7, %v3306_v45, 2102212464  ;;  %v3322_v4 = vsel %vm3316_vm7, %v3309_v52, 920167782  ;;  %vm11671_vm12 = vcmp.lt.s32.totalorder %v11670_v19, 0  ;;  %v3317_v57 = vsel %vm3313_vm8, %v3297_v6, %v3300_v12  ;;  %v12506_v6 = vpop.eup %12505 }
 0x1db   : > { %v3312_v62 = vor.u32 %v3311_v16, %v3310_v13  ;;  %v3323_v27 = vsel %vm3315_vm4, %v3306_v45, %v3322_v4  ;;  %v3325_v5 = vsel %vm3313_vm8, %v3303_v63, %v3306_v45  ;;  %v18690_v13 = vmov 0  }
 0x1dc   : > { %12395 = vset.pattern.permute.xlu1 %v18690_v13  ;;  %v12682_v16 = vmov 2   ;;  %v3248_v28 = vsel %vm11671_vm12, 0, %v11670_v19  ;;  %v3319_v54 = vsel %vm3315_vm4, %v3303_v63, %v3318_v25  ;;  %v3324_v20 = vsel %vm3314_vm1, %v3321_v31, %v3323_v27  ;;  %v11395_v63 = vld [vmem:[%s18494_s12] sm:$0x7]  ;;  %v15173_v19 = vpop.permute.xlu1 %5415  ;;  %v15175_v25 = vpop.permute.xlu0 %5410 }
 0x1dd   : > { %12394 = vset.pattern.permute.xlu0 %v12682_v16  ;;  %v3326_v12 = vsel %vm3316_vm7, %v3312_v62, 1326507024  ;;  %10947 = vperm.xlu1 %12395, %v10944_v56   ;;  %v3249_v4 = vsub.s32 32, %v3248_v28  ;;  %v3250_v45 = vshll.u32 %v15086_v49, %v3248_v28  ;;  %v3253_v51 = vsub.s32 4294967266, %v3248_v28  ;;  %18691 = vst [vmem:[#allocation14_spill] sm:$0xff] %v15173_v19  ;;  %18692 = vst [vmem:[#allocation15_spill] sm:$0xff] %v15175_v25  ;;  %v12508_v31 = vpop.eup %12507 }
 0x1de   : > { %11304 = vperm.xlu0 %12394, %v11125_v47   ;;  %v3327_v16 = vsel %vm3315_vm4, %v3309_v52, %v3326_v12  ;;  %v2549_v62 = vxor.u32 2147483648, %v12506_v6  ;;  %v15180_v56 = vmul.u32.u64.low %v15115_v37, %v3324_v20  ;;  %v15181_v49 = vmul.u32.u64.high %v15115_v37, %v3324_v20, %v15180_v56 }
 0x1df   : > { %v3328_v47 = vsel %vm3314_vm1, %v3325_v5, %v3327_v16  ;;  %v2546_v28 = vxor.u32 2147483648, %v12508_v31  ;;  %v3251_v52 = vshrl.u32 %v15112_v10, %v3249_v4  ;;  %v3254_v27 = vadd.s32 127, %v3253_v51 }
 0x1e0   : > { %v3320_v12 = vsel %vm3314_vm1, %v3317_v57, %v3319_v54  ;;  %v2550_v19 = vsel %vm2548_vm6, %v2549_v62, %v12508_v31  ;;  %v2962_v25 = vsel %vm2960_vm14, %v2549_v62, %v12508_v31  ;;  %v15200_v51 = vpop.permute.xlu1 %5425  ;;  %v15202_v57 = vpop.permute.xlu0 %5420  ;;  %v3339_v31 = vadd.s32 1, %v15181_v49 }
 0x1e1   : > { %v15192_v5 = vmul.u32.u64.low %v15115_v37, %v3328_v47  ;;  %v15193_v16 = vmul.u32.u64.high %v15115_v37, %v3328_v47, %v15192_v5  ;;  %11398 = vperm.xlu1 %12395, %v11395_v63   ;;  %v2547_v10 = vsel %vm2545_vm10, %v12506_v6, %v2546_v28  ;;  %v2959_v48 = vsel %vm2957_vm3, %v12506_v6, %v2546_v28  ;;  %18693 = vst [vmem:[#allocation16_spill] sm:$0xff] %v15200_v51  ;;  %18694 = vst [vmem:[#allocation17_spill] sm:$0xff] %v15202_v57 }
 0x1e2   : > { %12396 = vset.pattern.permute.xlu0 %v18690_v13  ;;  %v3252_v54 = vor.u32 %v3251_v52, %v3250_v45  ;;  %v3255_v20 = vshll.u32 %v3254_v27, 23  ;;  %v2551_v4 = vsel %vm2544_vm0, %v2547_v10, %v2550_v19  ;;  %v15208_v63 = vsel %vm2956_vm15, %v2959_v48, %v2962_v25 }
 0x1e3   : > { %v11131_v62 = vlaneseq  ;;  %v15213_v6 = vsel %vm2541_vm13, nan, %v2551_v4  ;;  %v3336_v28 = vmul.u32 %v15115_v37, %v3320_v12  ;;  %v18695_v32 = vrot.slane %v15015_v55, 2 }
 0x1e4   : > { %v3256_v45 = vor.u32 4788187, %v3255_v20  ;;  %v3259_v47 = vcvt.s32.f32 %v3252_v54  ;;  %v3900_v23 = vcombine.high %v15213_v6, %v15213_v6  ;;  %v18534_v19 = vrot.slane %v15213_v6, 1  ;;  %v15229_v37 = vpop.permute.xlu1 %5435  ;;  %v15231_v12 = vpop.permute.xlu0 %5430 }
 0x1e5   : > { %vm18696_vm6 = vcmask 1045504   ;;  %v3263_v52 = vsub.s32 4, %v15053_v11  ;;  %vm18697_vm14 = vcmask 1043456   ;;  %vm3338_vm10 = vc.u32 %v15193_v16, %v15180_v56  ;;  %18698 = vst [vmem:[#allocation18_spill] sm:$0xff] %v15229_v37  ;;  %18699 = vst [vmem:[#allocation19_spill] sm:$0xff] %v15231_v12 }
 0x1e6   : > { %v3993_v25 = vsel %vm18696_vm6, %v15066_v44, %v18695_v32  ;;  %v4012_v27 = vsel %vm18697_vm14, %v15134_v50, %v15045_v46  ;;  %v3257_v5 = vand.u32 2147483647, %v3256_v45  ;;  %v15233_v10 = vshrl.u32 %v11131_v62, 7  ;;  %vm18700_vm3 = vmmov %vm18696_vm6 }
 0x1e7   : > { %v15242_v55 = vrot.slane %v3900_v23, 1  ;;  %v3994_v46 = vsel %vm18700_vm3, %v15062_v2, %v15059_v0  ;;  %vm18701_vm0 = vcmask 1046528   ;;  %v3340_v50 = vsel %vm3338_vm10, %v3339_v31, %v15181_v49  ;;  %v15259_v0 = vld [vmem:[%s15240_s21 + $0x18] sm:$0x77] }
 0x1e8   : > { %v4020_v44 = vsel %vm18701_vm0, %v15124_v22, %v18534_v19  ;;  %vm3179_vm15 = vcmp.lt.s32.totalorder %v14680_v8, 0  ;;  %v3260_v48 = vmul.f32 %v3259_v47, %v3257_v5  ;;  %v3341_v54 = vadd.s32 %v3340_v50, %v3336_v28  ;;  %vm18702_vm8 = vmmov %vm18701_vm0  ;;  %v15261_v32 = vpop.permute.xlu1 %5445  ;;  %v15263_v49 = vpop.permute.xlu0 %5440 }
 0x1e9   : > { %v4021_v20 = vsel %vm18702_vm8, %v4012_v27, %v15242_v55  ;;  %v4054_v4 = vpack.c.bf16 %v4020_v44, %v3993_v25  ;;  %v18703_v62 = vand.u32 2147483647, %v14680_v8  ;;  %v3264_v2 = vsel %vm3179_vm15, %v3263_v52, %v15053_v11  ;;  %18704 = vst [vmem:[#allocation20_spill] sm:$0xff] %v15261_v32  ;;  %18705 = vst [vmem:[#allocation21_spill] sm:$0xff] %v15263_v49 }
 0x1ea   : > { %v4055_v45 = vpack.c.bf16 %v4021_v20, %v3994_v46  ;;  %v3261_v23 = vxor.u32 2147483648, %v3260_v48  ;;  %v3342_v22 = vadd.s32 536870912, %v3341_v54  ;;  %v15266_v31 = vsub.s32 5, %v15233_v10 }
 0x1eb   : > { %vm3178_vm5 = vcmp.le.f32.partialorder %v18703_v62, 0.7853982  ;;  %v15279_v44 = vsub.s32 1, %v15233_v10  ;;  %vm3269_vm3 = vweird.f32 %v14680_v8  ;;  %vm18721_vm0 = vcmask 1044480  }
 0x1ec   : > { %18706 = vst [vmem:[#allocation22_spill] sm:$0xff] %v15266_v31  ;;  %4476 = vmatprep.subr.bf16.mxu1 %v4055_v45  ;;  %v3262_v47 = vsel %vm3179_vm15, %v3261_v23, %v3260_v48  ;;  %v15268_v28 = vshrl.u32 %v3342_v22, 30  ;;  %v3266_v11 = vsel %vm3178_vm5, 0, %v3264_v2  ;;  %v11246_v52 = vrot.slane %v15259_v0, %v15266_v31  ;;  %v15274_v5 = vpop.permute.xlu1 %6045  ;;  %v15276_v46 = vpop.permute.xlu0 %6040  ;;  %vm18725_vm15 = vmmov %vm18721_vm0 }
 0x1ed   : > { %4477 = vmatpush1.bf16.msra.mxu1 %v4054_v4  ;;  %v3265_v25 = vsel %vm3178_vm5, %v14680_v8, %v3262_v47  ;;  %18707 = vst [vmem:[#allocation23_spill] sm:$0xff] %v15274_v5  ;;  %18708 = vst [vmem:[#allocation24_spill] sm:$0xff] %v15276_v46  ;;  %v3270_v50 = vadd.s32 3, %v3266_v11  ;;  %v15285_v4 = vsub.s32 4, %v15233_v10  ;;  %v3684_v22 = vand.u32 3, %v3266_v11 }
 0x1ee   : > { %12509 = vcosq.f32 %v3265_v25  ;;  %v3344_v27 = vshll.u32 %v15268_v28, 30  ;;  %18709 = vst [vmem:[#allocation25_spill] sm:$0xff] %v15279_v44  ;;  %v15282_v20 = vrot.slane %v11246_v52, %v15279_v44  ;;  %v15298_v52 = vsub.s32 0, %v15233_v10 }
 0x1ef   : > { %12511 = vsinq.f32 %v3265_v25  ;;  %18710 = vst [vmem:[#allocation26_spill] sm:$0xff] %v15285_v4  ;;  %v3271_v23 = vand.u32 3, %v3270_v50  ;;  %v11162_v25 = vrot.slane %v15259_v0, %v15285_v4  ;;  %vm3685_vm4 = vcmp.lt.s32.totalorder %v3684_v22, 2 }
 0x1f0   : > { %v3345_v48 = vsub.s32 %v3341_v54, %v3344_v27  ;;  %v15287_v2 = vpop.permute.xlu1 %6055  ;;  %v15289_v45 = vpop.permute.xlu0 %6050  ;;  %18715 = vst [vmem:[#allocation31_spill] sm:$0xff] %v15298_v52  ;;  %vm3689_vm7 = vcmp.eq.s32.totalorder %v3684_v22, 2  ;;  %vm3686_vm6 = vcmp.eq.s32.totalorder %v3684_v22, 0  ;;  %vm3283_vm8 = vcmp.lt.s32.totalorder %v14878_v35, 0 }
 0x1f1   : > { %18711 = vst [vmem:[#allocation27_spill] sm:$0xff] %v15287_v2  ;;  %18712 = vst [vmem:[#allocation28_spill] sm:$0xff] %v15289_v45  ;;  %vm3276_vm1 = vcmp.eq.s32.totalorder %v3271_v23, 2  ;;  %vm3273_vm12 = vcmp.eq.s32.totalorder %v3271_v23, 0  ;;  %v15301_v50 = vrot.slane %v11162_v25, %v15298_v52  ;;  %vm3272_vm14 = vcmp.lt.s32.totalorder %v3271_v23, 2 }
 0x1f2   : > { %v3347_v62 = vsub.s32 0, %v3345_v48 }
 0x1f4   : > { %v11673_v47 = vmin.u32 %v3347_v62, %v3345_v48  ;;  %v15293_v31 = vpop.permute.xlu1 %6065  ;;  %v15295_v54 = vpop.permute.xlu0 %6060 }
 0x1f5   : > { %18713 = vst [vmem:[#allocation29_spill] sm:$0xff] %v15293_v31  ;;  %18714 = vst [vmem:[#allocation30_spill] sm:$0xff] %v15295_v54 }
 0x1f6   : > { %v3349_v19 = vclz %v11673_v47  ;;  %v3337_v47 = vadd.s32 %v15180_v56, %v15193_v16  ;;  %v4231_v46 = vpop.f32.mrb[0].mxu0 }
 0x1f7   : > { %v4233_v12 = vpop.f32.mrb[1].mxu0 }
 0x1f8   : > { %v12510_v27 = vpop.eup %12509  ;;  %v11674_v2 = vadd.s32 4294967294, %v3349_v19  ;;  %v15305_v4 = vpop.permute.xlu1 %6075 }
 0x1f9   : > { %v12512_v45 = vpop.eup %12511  ;;  %v3277_v11 = vxor.u32 2147483648, %v12510_v27  ;;  %18716 = vst [vmem:[#allocation32_spill] sm:$0xff] %v15305_v4  ;;  %v15307_v31 = vpop.permute.xlu0 %6070  ;;  %v15314_v4 = vsub.s32 6, %v15233_v10 }
 0x1fa   : > { %v3274_v62 = vxor.u32 2147483648, %v12512_v45  ;;  %vm11675_vm10 = vcmp.lt.s32.totalorder %v11674_v2, 0  ;;  %18717 = vst [vmem:[#allocation33_spill] sm:$0xff] %v15307_v31  ;;  %v4235_v31 = vpop.f32.mrb[2].mxu0 }
 0x1fb   : > { %v3278_v19 = vsel %vm3276_vm1, %v3277_v11, %v12512_v45  ;;  %v3691_v54 = vsel %vm3689_vm7, %v3277_v11, %v12512_v45  ;;  %v3352_v5 = vsel %vm11675_vm10, 0, %v11674_v2  ;;  %18718 = vst [vmem:[#allocation34_spill] sm:$0xff] %v15314_v4  ;;  %v11338_v8 = vrot.slane %v15259_v0, %v15314_v4 }
 0x1fc   : > { %v3275_v32 = vsel %vm3273_vm12, %v12510_v27, %v3274_v62  ;;  %v3688_v25 = vsel %vm3686_vm6, %v12510_v27, %v3274_v62  ;;  %v3353_v49 = vsub.s32 32, %v3352_v5  ;;  %v3354_v37 = vshll.u32 %v3345_v48, %v3352_v5  ;;  %v15320_v27 = vpop.permute.xlu1 %6085 }
 0x1fd   : > { %v3279_v51 = vsel %vm3272_vm14, %v3275_v32, %v3278_v19  ;;  %v3692_v56 = vsel %vm3685_vm4, %v3688_v25, %v3691_v54  ;;  %v3357_v16 = vsub.s32 4294967266, %v3352_v5  ;;  %18719 = vst [vmem:[#allocation35_spill] sm:$0xff] %v15320_v27  ;;  %v15322_v48 = vpop.permute.xlu0 %6080  ;;  %v4237_v54 = vpop.f32.mrb[3].mxu0  ;;  %v4234_v4 = vadd.f32 %v4233_v12, %v14743_v1 }
 0x1fe   : > { %v3280_v57 = vsel %vm3269_vm3, nan, %v3279_v51  ;;  %v3693_v2 = vsel %vm3269_vm3, nan, %v3692_v56  ;;  %v3355_v45 = vshrl.u32 %v3337_v47, %v3353_v49  ;;  %18720 = vst [vmem:[#allocation36_spill] sm:$0xff] %v15322_v48  ;;  %v15333_v47 = vsub.s32 2, %v15233_v10 }
 0x1ff   : > { %v3947_v23 = vcombine.high %v3280_v57, %v3280_v57  ;;  %v3953_v32 = vrot.slane %v3280_v57, 3  ;;  %v3358_v22 = vadd.s32 127, %v3357_v16  ;;  %v3971_v5 = vcombine.high %v3693_v2, %v3693_v2 }
 0x200   : > { %v3356_v11 = vor.u32 %v3355_v45, %v3354_v37  ;;  %v15328_v51 = vpop.permute.xlu1 %6095  ;;  %18724 = vst [vmem:[#allocation39_spill] sm:$0xff] %v15333_v47  ;;  %v4232_v57 = vadd.f32 %v4231_v46, %v14743_v1  ;;  %v4236_v10 = vadd.f32 %v4235_v31, %v14778_v60  ;;  %v4570_v12 = vmax.f32 %v4234_v4, 0.0 }
 0x201   : > { %v3954_v62 = vrot.slane %v3947_v23, 3  ;;  %v4036_v19 = vsel %vm18721_vm0, %v14640_v29, %v3953_v32  ;;  %v3359_v25 = vshll.u32 %v3358_v22, 23  ;;  %18722 = vst [vmem:[#allocation37_spill] sm:$0xff] %v15328_v51  ;;  %v15330_v49 = vpop.permute.xlu0 %6090  ;;  %v3367_v23 = vsub.s32 4, %v15268_v28 }
 0x202   : > { %18723 = vst [vmem:[#allocation38_spill] sm:$0xff] %v15330_v49  ;;  %v11726_v56 = vpack.c.bf16 %v3693_v2, %v4036_v19  ;;  %v3363_v45 = vcvt.s32.f32 %v3356_v11  ;;  %v15340_v22 = vrot.slane %v11338_v8, %v15333_v47  ;;  %v4238_v2 = vadd.f32 %v4237_v54, %v14778_v60  ;;  %v15360_v54 = vld [vmem:[%s18484_s2] sm:$0xff]  }
 0x203   : > { %v4037_v37 = vsel %vm18725_vm15, %v14644_v38, %v3954_v62  ;;  %v3360_v16 = vor.u32 4788187, %v3359_v25  ;;  %v4569_v11 = vmax.f32 %v4232_v57, 0.0  ;;  %v4577_v62 = vmax.f32 %v4236_v10, 0.0  ;;  %v15377_v10 = vld [vmem:[%s18484_s2 + $0x8] sm:$0xff]   ;;  %vm18742_vm15 = vmmov %vm18721_vm0 }
 0x204   : > { %v11723_v29 = vpack.c.bf16 %v3971_v5, %v4037_v37  ;;  %v15346_v46 = vpop.permute.xlu1 %9350  ;;  %v4578_v19 = vmax.f32 %v4238_v2, 0.0  ;;  %v18728_v31 = vand.u32 2147483647, %v14878_v35  ;;  %v3368_v8 = vsel %vm3283_vm8, %v3367_v23, %v15268_v28 }
 0x205   : > { %v3361_v32 = vand.u32 2147483647, %v3360_v16  ;;  %18726 = vst [vmem:[#allocation40_spill] sm:$0xff] %v15346_v46  ;;  %v15348_v38 = vpop.permute.xlu0 %9345  ;;  %v4677_v37 = vpack.c.bf16 %v4577_v62, %v4569_v11  ;;  %v2964_v11 = vsel %vm2541_vm13, nan, %v15208_v63  ;;  %vm3373_vm1 = vweird.f32 %v14878_v35 }
 0x206   : > { %11724 = vmatprep.subr.msk.bf16.mxu0 %vm14051_vm11, %v11723_v29  ;;  %18727 = vst [vmem:[#allocation41_spill] sm:$0xff] %v15348_v38  ;;  %vm3282_vm5 = vcmp.le.f32.partialorder %v18728_v31, 0.7853982  ;;  %v4678_v4 = vpack.c.bf16 %v4578_v19, %v4570_v12  ;;  %vm18738_vm10 = vcmask 1041408  }
 0x207   : > { %v3364_v5 = vmul.f32 %v3363_v45, %v3361_v32  ;;  %11727 = vmatpush1.bf16.msk.msra.mxu0 %vm14051_vm11, %v11726_v56  ;;  %v3370_v28 = vsel %vm3282_vm5, 0, %v3368_v8  ;;  %vm18741_vm3 = vmmov %vm18738_vm10 }
 0x208   : > { %v15364_v57 = vpop.permute.xlu1 %9360  ;;  %4846 = vmatprep.subr.bf16.mxu0 %v4678_v4  ;;  %v3374_v32 = vadd.s32 3, %v3370_v28  ;;  %v3787_v12 = vand.u32 3, %v3370_v28  ;;  %v3924_v4 = vcombine.high %v2964_v11, %v2964_v11 }
 0x209   : > { %v3365_v25 = vxor.u32 2147483648, %v3364_v5  ;;  %18729 = vst [vmem:[#allocation42_spill] sm:$0xff] %v15364_v57  ;;  %v15366_v56 = vpop.permute.xlu0 %9355 }
 0x20a   : > { %11728 = vmatmul.mubr.msk.bf16.vlgmr.msra.gmra.mrb[24].mxu0 %vm4178_vm2, %v15360_v54  ;;  %18730 = vst [vmem:[#allocation43_spill] sm:$0xff] %v15366_v56  ;;  %v3375_v62 = vand.u32 3, %v3374_v32  ;;  %vm3789_vm7 = vcmp.eq.s32.totalorder %v3787_v12, 0  ;;  %vm3792_vm12 = vcmp.eq.s32.totalorder %v3787_v12, 2  ;;  %vm3788_vm14 = vcmp.lt.s32.totalorder %v3787_v12, 2  ;;  %v15401_v56 = vld [vmem:[%s18484_s2 + $0x10] sm:$0xff]  }
 0x20b   : > { %v3366_v16 = vsel %vm3283_vm8, %v3365_v25, %v3364_v5  ;;  %4425 = vmatprep.mubr.bf16.mxu0 %v18690_v13  ;;  %4847 = vmatpush1.bf16.msra.mxu0 %v4677_v37 }
 0x20c   : > { %v3369_v45 = vsel %vm3282_vm5, %v14878_v35, %v3366_v16  ;;  %v15370_v29 = vpop.permute.xlu1 %9370  ;;  %v3931_v16 = vrot.slane %v2964_v11, 6  ;;  %vm3377_vm4 = vcmp.eq.s32.totalorder %v3375_v62, 0  ;;  %vm3380_vm13 = vcmp.eq.s32.totalorder %v3375_v62, 2 }
 0x20d   : > { %12513 = vcosq.f32 %v3369_v45  ;;  %18731 = vst [vmem:[#allocation44_spill] sm:$0xff] %v15370_v29  ;;  %v15372_v23 = vpop.permute.xlu0 %9365  ;;  %vm3376_vm6 = vcmp.lt.s32.totalorder %v3375_v62, 2 }
 0x20e   : > { %12515 = vsinq.f32 %v3369_v45  ;;  %18732 = vst [vmem:[#allocation45_spill] sm:$0xff] %v15372_v23  ;;  %v4324_v19 = vpop.f32.mrb[0].mxu1 }
 0x20f   : > { %v4325_v31 = vadd.f32 %v4324_v19, %v14743_v1  ;;  %v4326_v25 = vpop.f32.mrb[1].mxu1 }
 0x210   : > { %v15381_v2 = vpop.permute.xlu1 %9380  ;;  %v4327_v8 = vadd.f32 %v4326_v25, %v14743_v1  ;;  %v4328_v37 = vpop.f32.mrb[2].mxu1 }
 0x211   : > { %18733 = vst [vmem:[#allocation46_spill] sm:$0xff] %v15381_v2  ;;  %v15383_v5 = vpop.permute.xlu0 %9375  ;;  %v4329_v45 = vadd.f32 %v4328_v37, %v14778_v60  ;;  %v4330_v59 = vpop.f32.mrb[3].mxu1  ;;  %v4571_v25 = vmax.f32 %v4325_v31, 0.0 }
 0x212   : > { %11729 = vmatmul.mubr.msk.bf16.gmra.mrb[28].mxu0 %vm4178_vm2, %v15377_v10  ;;  %18734 = vst [vmem:[#allocation47_spill] sm:$0xff] %v15383_v5  ;;  %v4331_v11 = vadd.f32 %v4330_v59, %v14778_v60  ;;  %v4572_v37 = vmax.f32 %v4327_v8, 0.0 }
 0x213   : > { %4435 = vmatprep.mubr.bf16.mxu0 %v18690_v13  ;;  %v4579_v5 = vmax.f32 %v4329_v45, 0.0  ;;  %v3932_v45 = vrot.slane %v3924_v4, 6 }
 0x214   : > { %v15393_v32 = vpop.permute.xlu1 %9390  ;;  %v4580_v31 = vmax.f32 %v4331_v11, 0.0 }
 0x215   : > { %18735 = vst [vmem:[#allocation48_spill] sm:$0xff] %v15393_v32  ;;  %v15395_v19 = vpop.permute.xlu0 %9385  ;;  %v15405_v32 = vpack.c.bf16 %v4579_v5, %v4571_v25  ;;  %v18737_v5 = vrot.slane %v15213_v6, 1 }
 0x216   : > { %18736 = vst [vmem:[#allocation49_spill] sm:$0xff] %v15395_v19  ;;  %v4334_v12 = vpop.f32.mrb[4].mxu1 }
 0x217   : > { %v12514_v2 = vpop.eup %12513  ;;  %v4029_v25 = vsel %vm18738_vm10, %v18737_v5, %v3931_v16  ;;  %v4335_v16 = vadd.f32 %v4334_v12, %v14741_v3 }
 0x218   : > { %v12516_v63 = vpop.eup %12515  ;;  %v3381_v28 = vxor.u32 2147483648, %v12514_v2  ;;  %v15417_v11 = vpop.permute.xlu1 %9400 }
 0x219   : > { %v3378_v29 = vxor.u32 2147483648, %v12516_v63  ;;  %18739 = vst [vmem:[#allocation50_spill] sm:$0xff] %v15417_v11 }
 0x21a   : > { %v3382_v23 = vsel %vm3380_vm13, %v3381_v28, %v12516_v63  ;;  %v3794_v57 = vsel %vm3792_vm12, %v3381_v28, %v12516_v63  ;;  %11730 = vmatmul.mubr.msk.bf16.gmra.mrb[32].mxu0 %vm4178_vm2, %v15401_v56  ;;  %v4680_v28 = vpack.c.bf16 %v4580_v31, %v4572_v37  ;;  %v4336_v31 = vpop.f32.mrb[5].mxu1 }
 0x21b   : > { %v3379_v59 = vsel %vm3377_vm4, %v12514_v2, %v3378_v29  ;;  %v3791_v19 = vsel %vm3789_vm7, %v12514_v2, %v3378_v29  ;;  %4445 = vmatprep.mubr.bf16.mxu0 %v18690_v13  ;;  %v15419_v29 = vpop.permute.xlu0 %9395 }
 0x21c   : > { %v3383_v8 = vsel %vm3376_vm6, %v3379_v59, %v3382_v23  ;;  %v3795_v63 = vsel %vm3788_vm14, %v3791_v19, %v3794_v57  ;;  %18740 = vst [vmem:[#allocation51_spill] sm:$0xff] %v15419_v29  ;;  %v4030_v57 = vsel %vm18741_vm3, %v15242_v55, %v3932_v45  ;;  %v4241_v23 = vpop.f32.mrb[4].mxu0  ;;  %v15431_v55 = vld [vmem:[%s18484_s2 + $0x18] sm:$0xff]   ;;  %v4337_v45 = vadd.f32 %v4336_v31, %v14741_v3 }
 0x21d   : > { %v3384_v46 = vsel %vm3373_vm1, nan, %v3383_v8  ;;  %v3796_v38 = vsel %vm3373_vm1, nan, %v3795_v63  ;;  %v4242_v37 = vadd.f32 %v4241_v23, %v14741_v3  ;;  %v4243_v6 = vpop.f32.mrb[5].mxu0  ;;  %v4338_v8 = vpop.f32.mrb[6].mxu1 }
 0x21e   : > { %v3948_v4 = vcombine.high %v3384_v46, %v3384_v46  ;;  %v3955_v62 = vrot.slane %v3384_v46, 3  ;;  %v3972_v2 = vcombine.high %v3796_v38, %v3796_v38  ;;  %v4244_v46 = vadd.f32 %v4243_v6, %v14741_v3  ;;  %v4245_v59 = vpop.f32.mrb[6].mxu0 }
 0x21f   : > { %v4587_v6 = vmax.f32 %v4335_v16, 0.0 }
 0x220   : > { %v3956_v19 = vrot.slane %v3948_v4, 3  ;;  %v4038_v35 = vsel %vm18721_vm0, %v4029_v25, %v3955_v62  ;;  %v4246_v25 = vadd.f32 %v4245_v59, %v14776_v53  ;;  %v4247_v4 = vpop.f32.mrb[7].mxu0  ;;  %v4340_v62 = vpop.f32.mrb[7].mxu1  ;;  %v4586_v31 = vmax.f32 %v4244_v46, 0.0 }
 0x221   : > { %v11738_v5 = vpack.c.bf16 %v3796_v38, %v4038_v35  ;;  %v4585_v38 = vmax.f32 %v4242_v37, 0.0  ;;  %v4341_v35 = vadd.f32 %v4340_v62, %v14776_v53  ;;  %v15447_v59 = vpop.permute.xlu0 %9671  ;;  %v4251_v62 = vpop.f32.mrb[8].mxu0 }
 0x222   : > { %v4039_v63 = vsel %vm18742_vm15, %v4030_v57, %v3956_v19  ;;  %11731 = vmatmul.mubr.msk.bf16.gmra.mrb[36].mxu0 %vm4178_vm2, %v15431_v55  ;;  %v4339_v57 = vadd.f32 %v4338_v8, %v14776_v53  ;;  %v4593_v12 = vmax.f32 %v4246_v25, 0.0  ;;  %v4248_v19 = vadd.f32 %v4247_v4, %v14776_v53  ;;  %18744 = vst [vmem:[#allocation53_spill] sm:$0xff] %v15447_v59  ;;  %v4344_v29 = vpop.f32.mrb[8].mxu1  ;;  %v4253_v46 = vpop.f32.mrb[9].mxu0 }
 0x223   : > { %v11735_v23 = vpack.c.bf16 %v3972_v2, %v4039_v63  ;;  %4455 = vmatprep.mubr.bf16.mxu0 %v18690_v13  ;;  %v15445_v2 = vpop.permute.xlu1 %9676  ;;  %v4588_v8 = vmax.f32 %v4337_v45, 0.0  ;;  %v4596_v25 = vmax.f32 %v4341_v35, 0.0  ;;  %v4345_v16 = vadd.f32 %v4344_v29, %v14799_v30 }
 0x224   : > { %v4595_v11 = vmax.f32 %v4339_v57, 0.0  ;;  %18743 = vst [vmem:[#allocation52_spill] sm:$0xff] %v15445_v2  ;;  %v4685_v37 = vpack.c.bf16 %v4593_v12, %v4585_v38  ;;  %v4594_v63 = vmax.f32 %v4248_v19, 0.0  ;;  %v4346_v57 = vpop.f32.mrb[9].mxu1  ;;  %v4254_v45 = vadd.f32 %v4253_v46, %v14799_v30  ;;  %v4255_v12 = vpop.f32.mrb[10].mxu0 }
 0x225   : > { %11736 = vmatprep.subr.msk.bf16.mxu1 %vm14051_vm11, %v11735_v23  ;;  %v4252_v23 = vadd.f32 %v4251_v62, %v14799_v30  ;;  %v4347_v38 = vadd.f32 %v4346_v57, %v14799_v30  ;;  %v15465_v19 = vpop.permute.xlu0 %9681 }
 0x226   : > { %11739 = vmatpush1.bf16.msk.msra.mxu1 %vm14051_vm11, %v11738_v5  ;;  %v4687_v4 = vpack.c.bf16 %v4595_v11, %v4587_v6  ;;  %v4686_v9 = vpack.c.bf16 %v4594_v63, %v4586_v31  ;;  %v4688_v5 = vpack.c.bf16 %v4596_v25, %v4588_v8  ;;  %v4348_v11 = vpop.f32.mrb[10].mxu1  ;;  %18746 = vst [vmem:[#allocation55_spill] sm:$0xff] %v15465_v19  ;;  %v4603_v31 = vmax.f32 %v4345_v16, 0.0  ;;  %v4257_v8 = vpop.f32.mrb[11].mxu0 }
 0x227   : > { %4939 = vmatprep.subr.bf16.mxu1 %v4680_v28  ;;  %v15459_v28 = vld [vmem:[%s18484_s2 + $0x20] sm:$0xff]   ;;  %v15463_v29 = vpop.permute.xlu1 %9686  ;;  %v4349_v35 = vadd.f32 %v4348_v11, %v14797_v14  ;;  %v4601_v6 = vmax.f32 %v4252_v23, 0.0  ;;  %v4350_v63 = vpop.f32.mrb[11].mxu1  ;;  %v4258_v46 = vadd.f32 %v4257_v8, %v14797_v14 }
 0x228   : > { %18745 = vst [vmem:[#allocation54_spill] sm:$0xff] %v15463_v29  ;;  %4848 = vmatprep.subr.bf16.mxu0 %v4686_v9  ;;  %v4351_v57 = vadd.f32 %v4350_v63, %v14797_v14  ;;  %v4602_v29 = vmax.f32 %v4254_v45, 0.0 }
 0x229   : > { %11740 = vmatmul.mubr.msk.bf16.vlgmr.msra.gmra.mrb[24].mxu1 %vm4178_vm2, %v15360_v54  ;;  %v4256_v54 = vadd.f32 %v4255_v12, %v14797_v14  ;;  %v4611_v62 = vmax.f32 %v4349_v35, 0.0  ;;  %v4604_v12 = vmax.f32 %v4347_v38, 0.0  ;;  %4849 = vmatpush1.bf16.msra.mxu0 %v4685_v37  ;;  %v15475_v19 = vpop.permute.xlu0 %9691  ;;  %v4610_v16 = vmax.f32 %v4258_v46, 0.0 }
 0x22a   : > { %4518 = vmatprep.mubr.bf16.mxu1 %v18690_v13  ;;  %11732 = vmatmul.mubr.msk.bf16.gmra.mrb[40].mxu0 %vm4178_vm2, %v15459_v28  ;;  %18748 = vst [vmem:[#allocation57_spill] sm:$0xff] %v15475_v19  ;;  %v4612_v2 = vmax.f32 %v4351_v57, 0.0 }
 0x22b   : > { %4465 = vmatprep.mubr.bf16.mxu0 %v18690_v13  ;;  %4940 = vmatpush1.bf16.msra.mxu1 %v15405_v32  ;;  %v4609_v25 = vmax.f32 %v4256_v54, 0.0  ;;  %v15473_v11 = vpop.permute.xlu1 %9696  ;;  %v4695_v23 = vpack.c.bf16 %v4611_v62, %v4603_v31  ;;  %v4261_v54 = vpop.f32.mrb[12].mxu0  ;;  %v4694_v8 = vpack.c.bf16 %v4610_v16, %v4602_v29 }
 0x22c   : > { %4941 = vmatprep.subr.bf16.mxu1 %v4688_v5  ;;  %18747 = vst [vmem:[#allocation56_spill] sm:$0xff] %v15473_v11  ;;  %v4262_v9 = vadd.f32 %v4261_v54, %v14823_v7  ;;  %v4354_v5 = vpop.f32.mrb[12].mxu1  ;;  %v4263_v35 = vpop.f32.mrb[13].mxu0  ;;  %v4696_v59 = vpack.c.bf16 %v4612_v2, %v4604_v12 }
 0x22d   : > { %v4693_v32 = vpack.c.bf16 %v4609_v25, %v4601_v6  ;;  %v4355_v37 = vadd.f32 %v4354_v5, %v14823_v7  ;;  %v4356_v45 = vpop.f32.mrb[13].mxu1  ;;  %v4265_v38 = vpop.f32.mrb[14].mxu0  ;;  %v4264_v29 = vadd.f32 %v4263_v35, %v14823_v7  ;;  %4850 = vmatprep.subr.bf16.mxu0 %v4694_v8 }
 0x22e   : > { %v4266_v2 = vadd.f32 %v4265_v38, %v14821_v34  ;;  %v4358_v31 = vpop.f32.mrb[14].mxu1  ;;  %v4357_v63 = vadd.f32 %v4356_v45, %v14823_v7  ;;  %v4267_v62 = vpop.f32.mrb[15].mxu0  ;;  %v4617_v46 = vmax.f32 %v4262_v9, 0.0 }
 0x22f   : > { %4942 = vmatpush1.bf16.msra.mxu1 %v4687_v4  ;;  %v12590_v4 = vld [vmem:[%s18484_s2 + $0x28] sm:$0xff]   ;;  %v15486_v6 = vpop.permute.xlu1 %9706  ;;  %v4359_v25 = vadd.f32 %v4358_v31, %v14821_v34  ;;  %v4268_v12 = vadd.f32 %v4267_v62, %v14821_v34  ;;  %v4360_v16 = vpop.f32.mrb[15].mxu1  ;;  %4851 = vmatpush1.bf16.msra.mxu0 %v4693_v32  ;;  %v4619_v54 = vmax.f32 %v4355_v37, 0.0  ;;  %v4618_v45 = vmax.f32 %v4264_v29, 0.0 }
 0x230   : > { %18749 = vst [vmem:[#allocation58_spill] sm:$0xff] %v15486_v6  ;;  %4943 = vmatprep.subr.bf16.mxu1 %v4696_v59  ;;  %v4625_v57 = vmax.f32 %v4266_v2, 0.0  ;;  %v4361_v35 = vadd.f32 %v4360_v16, %v14821_v34  ;;  %v4620_v9 = vmax.f32 %v4357_v63, 0.0 }
 0x231   : > { %11741 = vmatmul.mubr.msk.bf16.gmra.mrb[28].mxu1 %vm4178_vm2, %v15377_v10  ;;  %v15490_v10 = vpop.permute.xlu0 %9701  ;;  %v4627_v5 = vmax.f32 %v4359_v25, 0.0  ;;  %v4626_v8 = vmax.f32 %v4268_v12, 0.0 }
 0x232   : > { %4528 = vmatprep.mubr.bf16.mxu1 %v18690_v13  ;;  %11733 = vmatmul.mubr.msk.bf16.gmra.mrb[44].mxu0 %vm4178_vm2, %v12590_v4  ;;  %18750 = vst [vmem:[#allocation59_spill] sm:$0xff] %v15490_v10  ;;  %v4701_v31 = vpack.c.bf16 %v4625_v57, %v4617_v46  ;;  %v4628_v6 = vmax.f32 %v4361_v35, 0.0  ;;  %v11158_v35 = vrot.slane %v15259_v0, %v15298_v52 }
 0x233   : > { %4944 = vmatpush1.bf16.msra.mxu1 %v4695_v23  ;;  %4878 = vmatprep.mubr.bf16.mxu0 %v18690_v13  ;;  %v15497_v38 = vpop.permute.xlu1 %9716  ;;  %v4703_v2 = vpack.c.bf16 %v4627_v5, %v4619_v54  ;;  %v4702_v62 = vpack.c.bf16 %v4626_v8, %v4618_v45  ;;  %v11242_v54 = vrot.slane %v15259_v0, %v15279_v44 }
 0x234   : > { %18751 = vst [vmem:[#allocation60_spill] sm:$0xff] %v15497_v38  ;;  %v4704_v32 = vpack.c.bf16 %v4628_v6, %v4620_v9  ;;  %v11198_v9 = vrot.slane %v11158_v35, %v15298_v52 }
 0x235   : > { %v15499_v59 = vpop.permute.xlu0 %9711  ;;  %4852 = vmatprep.subr.bf16.mxu0 %v4702_v62  ;;  %v11282_v45 = vrot.slane %v11242_v54, %v15279_v44 }
 0x236   : > { %18752 = vst [vmem:[#allocation61_spill] sm:$0xff] %v15499_v59  ;;  %4945 = vmatprep.subr.bf16.mxu1 %v4704_v32  ;;  %4853 = vmatpush1.bf16.msra.mxu0 %v4701_v31  ;;  %v11334_v31 = vrot.slane %v15259_v0, %v15333_v47 }
 0x237   : > { %v15504_v23 = vpop.permute.xlu1 %9726  ;;  %4946 = vmatpush1.bf16.msra.mxu1 %v4703_v2 }
 0x238   : > { %18753 = vst [vmem:[#allocation62_spill] sm:$0xff] %v15504_v23  ;;  %v11374_v32 = vrot.slane %v11334_v31, %v15333_v47 }
 0x239   : > { %11742 = vmatmul.mubr.msk.bf16.gmra.mrb[32].mxu1 %vm4178_vm2, %v15401_v56  ;;  %v15506_v37 = vpop.permute.xlu0 %9721 }
 0x23a   : > { %4538 = vmatprep.mubr.bf16.mxu1 %v18690_v13  ;;  %18754 = vst [vmem:[#allocation63_spill] sm:$0xff] %v15506_v37 }
 0x23b   : > { %v15508_v29 = vpop.permute.xlu1 %10326 }
 0x23c   : > { %18755 = vst [vmem:[#allocation64_spill] sm:$0xff] %v15508_v29 }
 0x23d   : > { %v15510_v63 = vpop.permute.xlu0 %10321 }
 0x23e   : > { %18756 = vst [vmem:[#allocation65_spill] sm:$0xff] %v15510_v63 }
 0x23f   : > { %v15515_v56 = vpop.permute.xlu1 %10336 }
 0x240   : > { %18757 = vst [vmem:[#allocation66_spill] sm:$0xff] %v15515_v56 }
 0x241   : > { %11743 = vmatmul.mubr.msk.bf16.gmra.mrb[36].mxu1 %vm4178_vm2, %v15431_v55  ;;  %v15517_v6 = vpop.permute.xlu0 %10331 }
 0x242   : > { %4548 = vmatprep.mubr.bf16.mxu1 %v18690_v13  ;;  %18758 = vst [vmem:[#allocation67_spill] sm:$0xff] %v15517_v6 }
 0x243   : > { %v15519_v25 = vpop.permute.xlu1 %10346 }
 0x244   : > { %18759 = vst [vmem:[#allocation68_spill] sm:$0xff] %v15519_v25 }
 0x245   : > { %v15521_v46 = vpop.permute.xlu0 %10341 }
 0x246   : > { %18760 = vst [vmem:[#allocation69_spill] sm:$0xff] %v15521_v46 }
 0x247   : > { %v15526_v57 = vpop.permute.xlu1 %10356 }
 0x248   : > { %18761 = vst [vmem:[#allocation70_spill] sm:$0xff] %v15526_v57 }
 0x249   : > { %11744 = vmatmul.mubr.msk.bf16.gmra.mrb[40].mxu1 %vm4178_vm2, %v15459_v28  ;;  %v15528_v12 = vpop.permute.xlu0 %10351 }
 0x24a   : > { %4558 = vmatprep.mubr.bf16.mxu1 %v18690_v13  ;;  %18762 = vst [vmem:[#allocation71_spill] sm:$0xff] %v15528_v12 }
 0x24b   : > { %v15530_v55 = vpop.permute.xlu1 %10366 }
 0x24c   : > { %18763 = vst [vmem:[#allocation72_spill] sm:$0xff] %v15530_v55 }
 0x24d   : > { %v15532_v16 = vpop.permute.xlu0 %10361 }
 0x24e   : > { %18764 = vst [vmem:[#allocation73_spill] sm:$0xff] %v15532_v16 }
 0x24f   : > { %v15537_v5 = vpop.permute.xlu1 %10376 }
 0x250   : > { %18765 = vst [vmem:[#allocation74_spill] sm:$0xff] %v15537_v5 }
 0x251   : > { %11745 = vmatmul.mubr.msk.bf16.gmra.mrb[44].mxu1 %vm4178_vm2, %v12590_v4  ;;  %v15540_v28 = vpop.permute.xlu0 %10371  ;;  %vm18616_vm2 = vcmask 785408  }
 0x252   : > { %4971 = vmatprep.mubr.bf16.mxu1 %v18690_v13  ;;  %18766 = vst [vmem:[#allocation75_spill] sm:$0xff] %v15540_v28 }
 0x255   : > { %v15549_v4 = vpop.permute.xlu0 %11128 }
 0x256   : > { %v15547_v8 = vpop.permute.xlu1 %11212  ;;  %18768 = vst [vmem:[#allocation77_spill] sm:$0xff] %v15549_v4  ;;  %v11209_v5 = vmul.f32 %v11198_v9, %v15549_v4  ;;  %v11210_v54 = vmul.f32 %v15301_v50, %v15549_v4 }
 0x257   : > { %18767 = vst [vmem:[#allocation76_spill] sm:$0xff] %v15547_v8  ;;  %v11293_v2 = vmul.f32 %v11282_v45, %v15547_v8  ;;  %v11294_v62 = vmul.f32 %v15282_v20, %v15547_v8 }
 0x259   : > { %v11301_v45 = vadd.f32 %v11293_v2, %v11209_v5  ;;  %v11302_v52 = vadd.f32 %v11294_v62, %v11210_v54 }
 0x25c   : > { %v15559_v44 = vpop.permute.xlu1 %10947  ;;  %v4364_v4 = vpop.f32.mrb[16].mxu1 }
 0x25d   : > { %18769 = vst [vmem:[#allocation78_spill] sm:$0xff] %v15559_v44  ;;  %v15561_v0 = vpop.permute.xlu0 %11304  ;;  %v4271_v44 = vpop.f32.mrb[16].mxu0 }
 0x25e   : > { %18770 = vst [vmem:[#allocation79_spill] sm:$0xff] %v15561_v0  ;;  %v11385_v28 = vmul.f32 %v11374_v32, %v15561_v0  ;;  %v11386_v35 = vmul.f32 %v15340_v22, %v15561_v0  ;;  %v4272_v8 = vadd.f32 %v4271_v44, %v14866_v42  ;;  %v4365_v32 = vadd.f32 %v4364_v4, %v14866_v42  ;;  %v4273_v47 = vpop.f32.mrb[17].mxu0  ;;  %v4366_v22 = vpop.f32.mrb[17].mxu1 }
 0x25f   : > { %v4274_v5 = vadd.f32 %v4273_v47, %v14866_v42  ;;  %v4367_v2 = vadd.f32 %v4366_v22, %v14866_v42 }
 0x260   : > { %v15566_v55 = vpop.permute.xlu1 %11398  ;;  %v11393_v20 = vadd.f32 %v11385_v28, %v11301_v45  ;;  %v11394_v31 = vadd.f32 %v11386_v35, %v11302_v52  ;;  %v4275_v28 = vpop.f32.mrb[18].mxu0  ;;  %v4635_v4 = vmax.f32 %v4365_v32, 0.0 }
 0x261   : > { %18771 = vst [vmem:[#allocation80_spill] sm:$0xff] %v15566_v55  ;;  %v4368_v52 = vpop.f32.mrb[18].mxu1  ;;  %v4276_v62 = vadd.f32 %v4275_v28, %v14864_v17  ;;  %v4277_v35 = vpop.f32.mrb[19].mxu0  ;;  %v4634_v16 = vmax.f32 %v4274_v5, 0.0  ;;  %v4636_v47 = vmax.f32 %v4367_v2, 0.0 }
 0x262   : > { %v15569_v9 = vadd.f32 %v15566_v55, %v11393_v20  ;;  %v15572_v50 = vadd.f32 %v15566_v55, %v11394_v31  ;;  %v4369_v54 = vadd.f32 %v4368_v52, %v14864_v17  ;;  %v4370_v45 = vpop.f32.mrb[19].mxu1  ;;  %v4278_v20 = vadd.f32 %v4277_v35, %v14864_v17 }
 0x263   : > { %v4371_v44 = vadd.f32 %v4370_v45, %v14864_v17  ;;  %v4633_v31 = vmax.f32 %v4272_v8, 0.0  ;;  %v4641_v55 = vmax.f32 %v4276_v62, 0.0 }
 0x264   : > { %v4643_v0 = vmax.f32 %v4369_v54, 0.0  ;;  %v4642_v57 = vmax.f32 %v4278_v20, 0.0  ;;  %12517 = vtanh.f32 %v15569_v9  ;;  %v15630_v9 = vld [vmem:[%s18486_s4 + $0x18] sm:$0xff]  }
 0x265   : > { %v4644_v22 = vmax.f32 %v4371_v44, 0.0  ;;  %v4709_v12 = vpack.c.bf16 %v4641_v55, %v4633_v31  ;;  %12519 = vtanh.f32 %v15572_v50 }
 0x266   : > { %v4711_v25 = vpack.c.bf16 %v4643_v0, %v4635_v4  ;;  %v4710_v56 = vpack.c.bf16 %v4642_v57, %v4634_v16 }
 0x267   : > { %v4712_v52 = vpack.c.bf16 %v4644_v22, %v4636_v47 }
 0x268   : > { %4854 = vmatprep.subr.bf16.mxu0 %v4710_v56 }
 0x269   : > { %4947 = vmatprep.subr.bf16.mxu1 %v4712_v52  ;;  %4855 = vmatpush1.bf16.msra.mxu0 %v4709_v12  ;;  %v15617_v12 = vld [vmem:[%s18486_s4 + $0x10] sm:$0xff]  }
 0x26a   : > { %v4281_v46 = vpop.f32.mrb[20].mxu0  ;;  %v4374_v28 = vpop.f32.mrb[20].mxu1  ;;  %4948 = vmatpush1.bf16.msra.mxu1 %v4711_v25  ;;  %v15593_v25 = vld [vmem:[%s18486_s4] sm:$0xff]  }
 0x26b   : > { %v4282_v6 = vadd.f32 %v4281_v46, %v14898_v36  ;;  %v4375_v35 = vadd.f32 %v4374_v28, %v14898_v36  ;;  %v4283_v29 = vpop.f32.mrb[21].mxu0  ;;  %v4376_v45 = vpop.f32.mrb[21].mxu1 }
 0x26c   : > { %v4284_v8 = vadd.f32 %v4283_v29, %v14898_v36  ;;  %v4377_v32 = vadd.f32 %v4376_v45, %v14898_v36  ;;  %v4285_v5 = vpop.f32.mrb[22].mxu0  ;;  %v4378_v2 = vpop.f32.mrb[22].mxu1 }
 0x26d   : > { %v4286_v55 = vadd.f32 %v4285_v5, %v14896_v58  ;;  %v4379_v0 = vadd.f32 %v4378_v2, %v14896_v58  ;;  %v4287_v57 = vpop.f32.mrb[23].mxu0  ;;  %v4380_v16 = vpop.f32.mrb[23].mxu1  ;;  %v4649_v54 = vmax.f32 %v4282_v6, 0.0  ;;  %v4651_v29 = vmax.f32 %v4375_v35, 0.0  ;;  %v15604_v6 = vld [vmem:[%s18486_s4 + $0x8] sm:$0xff]  }
 0x26e   : > { %v4288_v46 = vadd.f32 %v4287_v57, %v14896_v58  ;;  %v4381_v62 = vadd.f32 %v4380_v16, %v14896_v58  ;;  %v4650_v31 = vmax.f32 %v4284_v8, 0.0  ;;  %v4652_v4 = vmax.f32 %v4377_v32, 0.0  ;;  %v15625_v35 = vpop.eup %12517  ;;  %v15645_v32 = vld [vmem:[%s18486_s4 + $0x20] sm:$0xff]   ;;  %v15656_v5 = vld [vmem:[%s18486_s4 + $0x28] sm:$0xff]  }
 0x26f   : > { %v4657_v20 = vmax.f32 %v4286_v55, 0.0  ;;  %v4659_v44 = vmax.f32 %v4379_v0, 0.0  ;;  %18772 = vst [vmem:[#allocation81_spill] sm:$0xff] %v15625_v35  ;;  %v15632_v50 = vpop.eup %12519 }
 0x270   : > { %v4658_v56 = vmax.f32 %v4288_v46, 0.0  ;;  %v4660_v47 = vmax.f32 %v4381_v62, 0.0  ;;  %18773 = vst [vmem:[#allocation82_spill] sm:$0xff] %v15632_v50 }
 0x271   : > { %v4717_v22 = vpack.c.bf16 %v4657_v20, %v4649_v54  ;;  %v4719_v28 = vpack.c.bf16 %v4659_v44, %v4651_v29 }
 0x272   : > { %v4718_v52 = vpack.c.bf16 %v4658_v56, %v4650_v31  ;;  %v4720_v45 = vpack.c.bf16 %v4660_v47, %v4652_v4 }
 0x274   : > { %4856 = vmatprep.subr.bf16.mxu0 %v4718_v52  ;;  %4949 = vmatprep.subr.bf16.mxu1 %v4720_v45 }
 0x275   : > { %4857 = vmatpush1.bf16.msra.mxu0 %v4717_v22  ;;  %4950 = vmatpush1.bf16.msra.mxu1 %v4719_v28 }
 0x278   : > { %11752 = vmatmul.mubr.msk.bf16.vlgmr.msra.gmra.mrb[48].mxu0 %vm18616_vm2, %v15593_v25  ;;  %11758 = vmatmul.mubr.msk.bf16.vlgmr.msra.gmra.mrb[48].mxu1 %vm18616_vm2, %v15593_v25 }
 0x279   : > { %4888 = vmatprep.mubr.bf16.mxu0 %v18690_v13  ;;  %4981 = vmatprep.mubr.bf16.mxu1 %v18690_v13 }
 0x280   : > { %11753 = vmatmul.mubr.msk.bf16.gmra.mrb[52].mxu0 %vm18616_vm2, %v15604_v6  ;;  %11759 = vmatmul.mubr.msk.bf16.gmra.mrb[52].mxu1 %vm18616_vm2, %v15604_v6 }
 0x281   : > { %4898 = vmatprep.mubr.bf16.mxu0 %v18690_v13  ;;  %4991 = vmatprep.mubr.bf16.mxu1 %v18690_v13 }
 0x288   : > { %11754 = vmatmul.mubr.msk.bf16.gmra.mrb[56].mxu0 %vm18616_vm2, %v15617_v12  ;;  %11760 = vmatmul.mubr.msk.bf16.gmra.mrb[56].mxu1 %vm18616_vm2, %v15617_v12 }
 0x289   : > { %4908 = vmatprep.mubr.bf16.mxu0 %v18690_v13  ;;  %5001 = vmatprep.mubr.bf16.mxu1 %v18690_v13 }
 0x290   : > { %11755 = vmatmul.mubr.msk.bf16.gmra.mrb[60].mxu0 %vm18616_vm2, %v15630_v9  ;;  %11761 = vmatmul.mubr.msk.bf16.gmra.mrb[60].mxu1 %vm18616_vm2, %v15630_v9 }
 0x291   : > { %4918 = vmatprep.mubr.bf16.mxu0 %v18690_v13  ;;  %5011 = vmatprep.mubr.bf16.mxu1 %v18690_v13 }
 0x298   : > { %11756 = vmatmul.mubr.msk.bf16.gmra.mrb[64].mxu0 %vm18616_vm2, %v15645_v32  ;;  %11762 = vmatmul.mubr.msk.bf16.gmra.mrb[64].mxu1 %vm18616_vm2, %v15645_v32 }
 0x299   : > { %4928 = vmatprep.mubr.bf16.mxu0 %v18690_v13  ;;  %5021 = vmatprep.mubr.bf16.mxu1 %v18690_v13 }
 0x2a0   : > { %11757 = vmatmul.mubr.msk.bf16.gmra.mrb[68].mxu0 %vm18616_vm2, %v15656_v5  ;;  %11763 = vmatmul.mubr.msk.bf16.gmra.mrb[68].mxu1 %vm18616_vm2, %v15656_v5 }
 0x2a1   : > { %5064 = vmatprep.mubr.bf16.mxu0 %v18690_v13  ;;  %5157 = vmatprep.mubr.bf16.mxu1 %v18690_v13 }
 0x2dd   : > { %v4417_v2 = vpop.f32.mrb[24].mxu0 }
 0x2de   : > { %v4418_v55 = vadd.f32 %v4417_v2, %v14743_v1  ;;  %v4419_v0 = vpop.f32.mrb[25].mxu0 }
 0x2df   : > { %v4420_v57 = vadd.f32 %v4419_v0, %v14743_v1  ;;  %v4421_v16 = vpop.f32.mrb[26].mxu0 }
 0x2e0   : > { %v4422_v46 = vadd.f32 %v4421_v16, %v14778_v60  ;;  %v4423_v62 = vpop.f32.mrb[27].mxu0  ;;  %v4573_v29 = vmax.f32 %v4418_v55, 0.0 }
 0x2e1   : > { %v4424_v54 = vadd.f32 %v4423_v62, %v14778_v60  ;;  %v4574_v44 = vmax.f32 %v4420_v57, 0.0 }
 0x2e2   : > { %v4581_v20 = vmax.f32 %v4422_v46, 0.0 }
 0x2e3   : > { %v4582_v31 = vmax.f32 %v4424_v54, 0.0 }
 0x2e4   : > { %v4681_v4 = vpack.c.bf16 %v4581_v20, %v4573_v29 }
 0x2e5   : > { %v4427_v56 = vpop.f32.mrb[28].mxu0  ;;  %v4682_v47 = vpack.c.bf16 %v4582_v31, %v4574_v44 }
 0x2e6   : > { %v4428_v22 = vadd.f32 %v4427_v56, %v14741_v3  ;;  %v4429_v28 = vpop.f32.mrb[29].mxu0 }
 0x2e7   : > { %v4430_v52 = vadd.f32 %v4429_v28, %v14741_v3  ;;  %v4431_v45 = vpop.f32.mrb[30].mxu0  ;;  %5032 = vmatprep.subr.bf16.mxu0 %v4682_v47 }
 0x2e8   : > { %v4432_v2 = vadd.f32 %v4431_v45, %v14776_v53  ;;  %v4433_v0 = vpop.f32.mrb[31].mxu0  ;;  %5033 = vmatpush1.bf16.msra.mxu0 %v4681_v4  ;;  %v4589_v55 = vmax.f32 %v4428_v22, 0.0 }
 0x2e9   : > { %v4434_v16 = vadd.f32 %v4433_v0, %v14776_v53  ;;  %v4590_v57 = vmax.f32 %v4430_v52, 0.0 }
 0x2ea   : > { %v4597_v46 = vmax.f32 %v4432_v2, 0.0 }
 0x2eb   : > { %v4598_v62 = vmax.f32 %v4434_v16, 0.0 }
 0x2ec   : > { %v4689_v54 = vpack.c.bf16 %v4597_v46, %v4589_v55 }
 0x2ed   : > { %v4437_v29 = vpop.f32.mrb[32].mxu0  ;;  %v4690_v20 = vpack.c.bf16 %v4598_v62, %v4590_v57 }
 0x2ee   : > { %v4438_v44 = vadd.f32 %v4437_v29, %v14799_v30  ;;  %v4439_v31 = vpop.f32.mrb[33].mxu0 }
 0x2ef   : > { %v4440_v56 = vadd.f32 %v4439_v31, %v14799_v30  ;;  %v4441_v28 = vpop.f32.mrb[34].mxu0  ;;  %5034 = vmatprep.subr.bf16.mxu0 %v4690_v20 }
 0x2f0   : > { %v4442_v47 = vadd.f32 %v4441_v28, %v14797_v14  ;;  %v4443_v45 = vpop.f32.mrb[35].mxu0  ;;  %5035 = vmatpush1.bf16.msra.mxu0 %v4689_v54  ;;  %v4605_v22 = vmax.f32 %v4438_v44, 0.0 }
 0x2f1   : > { %v4444_v4 = vadd.f32 %v4443_v45, %v14797_v14  ;;  %v4606_v52 = vmax.f32 %v4440_v56, 0.0 }
 0x2f2   : > { %v4613_v2 = vmax.f32 %v4442_v47, 0.0 }
 0x2f3   : > { %v4614_v0 = vmax.f32 %v4444_v4, 0.0 }
 0x2f4   : > { %v4697_v16 = vpack.c.bf16 %v4613_v2, %v4605_v22 }
 0x2f5   : > { %v4447_v55 = vpop.f32.mrb[36].mxu0  ;;  %v4698_v46 = vpack.c.bf16 %v4614_v0, %v4606_v52 }
 0x2f6   : > { %v4448_v57 = vadd.f32 %v4447_v55, %v14823_v7  ;;  %v4449_v62 = vpop.f32.mrb[37].mxu0 }
 0x2f7   : > { %v4450_v29 = vadd.f32 %v4449_v62, %v14823_v7  ;;  %v4451_v31 = vpop.f32.mrb[38].mxu0  ;;  %5036 = vmatprep.subr.bf16.mxu0 %v4698_v46 }
 0x2f8   : > { %v4452_v20 = vadd.f32 %v4451_v31, %v14821_v34  ;;  %v4453_v28 = vpop.f32.mrb[39].mxu0  ;;  %5037 = vmatpush1.bf16.msra.mxu0 %v4697_v16  ;;  %v4621_v44 = vmax.f32 %v4448_v57, 0.0 }
 0x2f9   : > { %v4454_v54 = vadd.f32 %v4453_v28, %v14821_v34  ;;  %v4622_v56 = vmax.f32 %v4450_v29, 0.0 }
 0x2fa   : > { %v4629_v47 = vmax.f32 %v4452_v20, 0.0 }
 0x2fb   : > { %v4630_v45 = vmax.f32 %v4454_v54, 0.0 }
 0x2fc   : > { %v4510_v4 = vpop.f32.mrb[24].mxu1  ;;  %v4705_v22 = vpack.c.bf16 %v4629_v47, %v4621_v44 }
 0x2fd   : > { %v4511_v2 = vadd.f32 %v4510_v4, %v14743_v1  ;;  %v4512_v52 = vpop.f32.mrb[25].mxu1  ;;  %v4457_v0 = vpop.f32.mrb[40].mxu0  ;;  %v4706_v55 = vpack.c.bf16 %v4630_v45, %v4622_v56 }
 0x2fe   : > { %v4513_v62 = vadd.f32 %v4512_v52, %v14743_v1  ;;  %v4514_v46 = vpop.f32.mrb[26].mxu1  ;;  %v4458_v31 = vadd.f32 %v4457_v0, %v14866_v42  ;;  %v4459_v8 = vpop.f32.mrb[41].mxu0 }
 0x2ff   : > { %v4515_v16 = vadd.f32 %v4514_v46, %v14778_v60  ;;  %v4516_v28 = vpop.f32.mrb[27].mxu1  ;;  %v4460_v57 = vadd.f32 %v4459_v8, %v14866_v42  ;;  %v4461_v29 = vpop.f32.mrb[42].mxu0  ;;  %5038 = vmatprep.subr.bf16.mxu0 %v4706_v55  ;;  %v4575_v47 = vmax.f32 %v4511_v2, 0.0 }
 0x300   : > { %v4517_v20 = vadd.f32 %v4516_v28, %v14778_v60  ;;  %v4462_v54 = vadd.f32 %v4461_v29, %v14864_v17  ;;  %v4463_v44 = vpop.f32.mrb[43].mxu0  ;;  %5039 = vmatpush1.bf16.msra.mxu0 %v4705_v22  ;;  %v4576_v45 = vmax.f32 %v4513_v62, 0.0  ;;  %v4637_v52 = vmax.f32 %v4458_v31, 0.0 }
 0x301   : > { %v4583_v56 = vmax.f32 %v4515_v16, 0.0  ;;  %v4464_v1 = vadd.f32 %v4463_v44, %v14864_v17  ;;  %v4638_v50 = vmax.f32 %v4460_v57, 0.0 }
 0x302   : > { %v4584_v4 = vmax.f32 %v4517_v20, 0.0  ;;  %v4645_v0 = vmax.f32 %v4462_v54, 0.0 }
 0x303   : > { %v4683_v46 = vpack.c.bf16 %v4583_v56, %v4575_v47  ;;  %v4646_v35 = vmax.f32 %v4464_v1, 0.0 }
 0x304   : > { %v4520_v8 = vpop.f32.mrb[28].mxu1  ;;  %v4684_v63 = vpack.c.bf16 %v4584_v4, %v4576_v45  ;;  %v4713_v55 = vpack.c.bf16 %v4645_v0, %v4637_v52 }
 0x305   : > { %v4521_v60 = vadd.f32 %v4520_v8, %v14741_v3  ;;  %v4522_v28 = vpop.f32.mrb[29].mxu1  ;;  %v4467_v29 = vpop.f32.mrb[44].mxu0  ;;  %v4714_v23 = vpack.c.bf16 %v4646_v35, %v4638_v50 }
 0x306   : > { %v4523_v22 = vadd.f32 %v4522_v28, %v14741_v3  ;;  %v4524_v2 = vpop.f32.mrb[30].mxu1  ;;  %5125 = vmatprep.subr.bf16.mxu1 %v4684_v63  ;;  %v4468_v62 = vadd.f32 %v4467_v29, %v14898_v36  ;;  %v4469_v16 = vpop.f32.mrb[45].mxu0 }
 0x307   : > { %v4525_v31 = vadd.f32 %v4524_v2, %v14776_v53  ;;  %v4526_v20 = vpop.f32.mrb[31].mxu1  ;;  %5126 = vmatpush1.bf16.msra.mxu1 %v4683_v46  ;;  %v4470_v57 = vadd.f32 %v4469_v16, %v14898_v36  ;;  %v4471_v54 = vpop.f32.mrb[46].mxu0  ;;  %5040 = vmatprep.subr.bf16.mxu0 %v4714_v23  ;;  %v4591_v3 = vmax.f32 %v4521_v60, 0.0 }
 0x308   : > { %v4527_v44 = vadd.f32 %v4526_v20, %v14776_v53  ;;  %v4472_v47 = vadd.f32 %v4471_v54, %v14896_v58  ;;  %v4473_v35 = vpop.f32.mrb[47].mxu0  ;;  %5041 = vmatpush1.bf16.msra.mxu0 %v4713_v55  ;;  %v4592_v56 = vmax.f32 %v4523_v22, 0.0  ;;  %v4653_v45 = vmax.f32 %v4468_v62, 0.0 }
 0x309   : > { %v4599_v50 = vmax.f32 %v4525_v31, 0.0  ;;  %v4474_v63 = vadd.f32 %v4473_v35, %v14896_v58  ;;  %v4654_v0 = vmax.f32 %v4470_v57, 0.0 }
 0x30a   : > { %v4600_v1 = vmax.f32 %v4527_v44, 0.0  ;;  %v4661_v4 = vmax.f32 %v4472_v47, 0.0 }
 0x30b   : > { %v4691_v52 = vpack.c.bf16 %v4599_v50, %v4591_v3  ;;  %v4662_v46 = vmax.f32 %v4474_v63, 0.0 }
 0x30c   : > { %v4530_v8 = vpop.f32.mrb[32].mxu1  ;;  %v4692_v28 = vpack.c.bf16 %v4600_v1, %v4592_v56  ;;  %v4721_v23 = vpack.c.bf16 %v4661_v4, %v4653_v45 }
 0x30d   : > { %v4531_v53 = vadd.f32 %v4530_v8, %v14799_v30  ;;  %v4532_v29 = vpop.f32.mrb[33].mxu1  ;;  %v4722_v2 = vpack.c.bf16 %v4662_v46, %v4654_v0 }
 0x30e   : > { %v4533_v55 = vadd.f32 %v4532_v29, %v14799_v30  ;;  %v4534_v60 = vpop.f32.mrb[34].mxu1  ;;  %5127 = vmatprep.subr.bf16.mxu1 %v4692_v28 }
 0x30f   : > { %v4535_v16 = vadd.f32 %v4534_v60, %v14797_v14  ;;  %v4536_v22 = vpop.f32.mrb[35].mxu1  ;;  %5128 = vmatpush1.bf16.msra.mxu1 %v4691_v52  ;;  %5042 = vmatprep.subr.bf16.mxu0 %v4722_v2  ;;  %v4607_v31 = vmax.f32 %v4531_v53, 0.0 }
 0x310   : > { %v4537_v62 = vadd.f32 %v4536_v22, %v14797_v14  ;;  %5043 = vmatpush1.bf16.msra.mxu0 %v4721_v23  ;;  %v4608_v57 = vmax.f32 %v4533_v55, 0.0 }
 0x311   : > { %v4615_v20 = vmax.f32 %v4535_v16, 0.0 }
 0x312   : > { %v4616_v54 = vmax.f32 %v4537_v62, 0.0 }
 0x313   : > { %v4699_v44 = vpack.c.bf16 %v4615_v20, %v4607_v31  ;;  %11764 = vmatmul.mubr.msk.bf16.vlgmr.msra.gmra.mrb[72].mxu0 %vm18616_vm2, %v15593_v25 }
 0x314   : > { %v4540_v47 = vpop.f32.mrb[36].mxu1  ;;  %v4700_v30 = vpack.c.bf16 %v4616_v54, %v4608_v57  ;;  %5074 = vmatprep.mubr.bf16.mxu0 %v18690_v13 }
 0x315   : > { %v4541_v35 = vadd.f32 %v4540_v47, %v14823_v7  ;;  %v4542_v3 = vpop.f32.mrb[37].mxu1 }
 0x316   : > { %v4543_v50 = vadd.f32 %v4542_v3, %v14823_v7  ;;  %v4544_v63 = vpop.f32.mrb[38].mxu1  ;;  %5129 = vmatprep.subr.bf16.mxu1 %v4700_v30 }
 0x317   : > { %v4545_v14 = vadd.f32 %v4544_v63, %v14821_v34  ;;  %v4546_v56 = vpop.f32.mrb[39].mxu1  ;;  %5130 = vmatpush1.bf16.msra.mxu1 %v4699_v44  ;;  %v4623_v45 = vmax.f32 %v4541_v35, 0.0 }
 0x318   : > { %v4547_v1 = vadd.f32 %v4546_v56, %v14821_v34  ;;  %v4624_v52 = vmax.f32 %v4543_v50, 0.0 }
 0x319   : > { %v4631_v4 = vmax.f32 %v4545_v14, 0.0 }
 0x31a   : > { %v4632_v0 = vmax.f32 %v4547_v1, 0.0 }
 0x31b   : > { %v4707_v46 = vpack.c.bf16 %v4631_v4, %v4623_v45  ;;  %11765 = vmatmul.mubr.msk.bf16.gmra.mrb[76].mxu0 %vm18616_vm2, %v15604_v6 }
 0x31c   : > { %v4550_v8 = vpop.f32.mrb[40].mxu1  ;;  %v4708_v28 = vpack.c.bf16 %v4632_v0, %v4624_v52  ;;  %5084 = vmatprep.mubr.bf16.mxu0 %v18690_v13 }
 0x31d   : > { %v4551_v7 = vadd.f32 %v4550_v8, %v14866_v42  ;;  %v4552_v23 = vpop.f32.mrb[41].mxu1 }
 0x31e   : > { %v4553_v53 = vadd.f32 %v4552_v23, %v14866_v42  ;;  %v4554_v29 = vpop.f32.mrb[42].mxu1  ;;  %5131 = vmatprep.subr.bf16.mxu1 %v4708_v28 }
 0x31f   : > { %v4555_v34 = vadd.f32 %v4554_v29, %v14864_v17  ;;  %v4556_v2 = vpop.f32.mrb[43].mxu1  ;;  %5132 = vmatpush1.bf16.msra.mxu1 %v4707_v46  ;;  %v4639_v60 = vmax.f32 %v4551_v7, 0.0 }
 0x320   : > { %v4557_v55 = vadd.f32 %v4556_v2, %v14864_v17  ;;  %v4640_v22 = vmax.f32 %v4553_v53, 0.0 }
 0x321   : > { %v4647_v16 = vmax.f32 %v4555_v34, 0.0 }
 0x322   : > { %v4648_v62 = vmax.f32 %v4557_v55, 0.0 }
 0x323   : > { %v4715_v31 = vpack.c.bf16 %v4647_v16, %v4639_v60  ;;  %11766 = vmatmul.mubr.msk.bf16.gmra.mrb[80].mxu0 %vm18616_vm2, %v15617_v12 }
 0x324   : > { %v4560_v20 = vpop.f32.mrb[44].mxu1  ;;  %v4716_v57 = vpack.c.bf16 %v4648_v62, %v4640_v22  ;;  %5094 = vmatprep.mubr.bf16.mxu0 %v18690_v13 }
 0x325   : > { %v4561_v42 = vadd.f32 %v4560_v20, %v14898_v36  ;;  %v4562_v54 = vpop.f32.mrb[45].mxu1 }
 0x326   : > { %v4563_v44 = vadd.f32 %v4562_v54, %v14898_v36  ;;  %v4564_v47 = vpop.f32.mrb[46].mxu1  ;;  %5133 = vmatprep.subr.bf16.mxu1 %v4716_v57 }
 0x327   : > { %v4565_v17 = vadd.f32 %v4564_v47, %v14896_v58  ;;  %v4566_v30 = vpop.f32.mrb[47].mxu1  ;;  %5134 = vmatpush1.bf16.msra.mxu1 %v4715_v31  ;;  %v4655_v3 = vmax.f32 %v4561_v42, 0.0 }
 0x328   : > { %v4567_v35 = vadd.f32 %v4566_v30, %v14896_v58  ;;  %v4656_v63 = vmax.f32 %v4563_v44, 0.0 }
 0x329   : > { %v4663_v50 = vmax.f32 %v4565_v17, 0.0 }
 0x32a   : > { %v4664_v14 = vmax.f32 %v4567_v35, 0.0 }
 0x32b   : > { %v4723_v56 = vpack.c.bf16 %v4663_v50, %v4655_v3  ;;  %11767 = vmatmul.mubr.msk.bf16.gmra.mrb[84].mxu0 %vm18616_vm2, %v15630_v9 }
 0x32c   : > { %v4724_v1 = vpack.c.bf16 %v4664_v14, %v4656_v63  ;;  %5104 = vmatprep.mubr.bf16.mxu0 %v18690_v13 }
 0x32e   : > { %5135 = vmatprep.subr.bf16.mxu1 %v4724_v1 }
 0x32f   : > { %5136 = vmatpush1.bf16.msra.mxu1 %v4723_v56 }
 0x332   : > { %11770 = vmatmul.mubr.msk.bf16.vlgmr.msra.gmra.mrb[72].mxu1 %vm18616_vm2, %v15593_v25 }
 0x333   : > { %5167 = vmatprep.mubr.bf16.mxu1 %v18690_v13  ;;  %11768 = vmatmul.mubr.msk.bf16.gmra.mrb[88].mxu0 %vm18616_vm2, %v15645_v32 }
 0x334   : > { %5114 = vmatprep.mubr.bf16.mxu0 %v18690_v13 }
 0x33a   : > { %11771 = vmatmul.mubr.msk.bf16.gmra.mrb[76].mxu1 %vm18616_vm2, %v15604_v6 }
 0x33b   : > { %5177 = vmatprep.mubr.bf16.mxu1 %v18690_v13  ;;  %11769 = vmatmul.mubr.msk.bf16.gmra.mrb[92].mxu0 %vm18616_vm2, %v15656_v5 }
 0x33c   : > { %5528 = vmatprep.mubr.bf16.mxu0 %v18690_v13 }
 0x342   : > { %11772 = vmatmul.mubr.msk.bf16.gmra.mrb[80].mxu1 %vm18616_vm2, %v15617_v12 }
 0x343   : > { %5187 = vmatprep.mubr.bf16.mxu1 %v18690_v13 }
 0x34a   : > { %11773 = vmatmul.mubr.msk.bf16.gmra.mrb[84].mxu1 %vm18616_vm2, %v15630_v9 }
 0x34b   : > { %5197 = vmatprep.mubr.bf16.mxu1 %v18690_v13  ;;  %v4880_v58 = vpop.f32.mrb[48].mxu0  ;;  %v4973_v36 = vpop.f32.mrb[48].mxu1 }
 0x34c   : > { %v4881_v25 = vadd.f32 %v4880_v58, %v14938_v40  ;;  %v4974_v6 = vadd.f32 %v4973_v36, %v14938_v40  ;;  %v4882_v45 = vpop.f32.mrb[49].mxu0  ;;  %v4975_v12 = vpop.f32.mrb[49].mxu1 }
 0x34d   : > { %v4883_v4 = vadd.f32 %v4882_v45, %v14938_v40  ;;  %v4976_v52 = vadd.f32 %v4975_v12, %v14938_v40  ;;  %v4884_v9 = vpop.f32.mrb[50].mxu0  ;;  %v4977_v0 = vpop.f32.mrb[50].mxu1 }
 0x34e   : > { %v4885_v46 = vadd.f32 %v4884_v9, %v14936_v21  ;;  %v4886_v8 = vpop.f32.mrb[51].mxu0  ;;  %v4979_v28 = vpop.f32.mrb[51].mxu1  ;;  %v5218_v53 = vmax.f32 %v4881_v25, 0.0  ;;  %v5220_v29 = vmax.f32 %v4974_v6, 0.0 }
 0x34f   : > { %v4887_v7 = vadd.f32 %v4886_v8, %v14936_v21  ;;  %v4980_v23 = vadd.f32 %v4979_v28, %v14936_v21  ;;  %v5219_v55 = vmax.f32 %v4883_v4, 0.0  ;;  %v5221_v60 = vmax.f32 %v4976_v52, 0.0 }
 0x350   : > { %v5226_v34 = vmax.f32 %v4885_v46, 0.0 }
 0x351   : > { %v5227_v16 = vmax.f32 %v4887_v7, 0.0  ;;  %v5229_v22 = vmax.f32 %v4980_v23, 0.0 }
 0x352   : > { %11774 = vmatmul.mubr.msk.bf16.gmra.mrb[88].mxu1 %vm18616_vm2, %v15645_v32  ;;  %v4978_v32 = vadd.f32 %v4977_v0, %v14936_v21  ;;  %v5327_v62 = vpack.c.bf16 %v5226_v34, %v5218_v53 }
 0x353   : > { %5207 = vmatprep.mubr.bf16.mxu1 %v18690_v13  ;;  %v4890_v20 = vpop.f32.mrb[52].mxu0  ;;  %v4983_v57 = vpop.f32.mrb[52].mxu1  ;;  %v5328_v42 = vpack.c.bf16 %v5227_v16, %v5219_v55  ;;  %v5330_v54 = vpack.c.bf16 %v5229_v22, %v5221_v60 }
 0x354   : > { %v5228_v2 = vmax.f32 %v4978_v32, 0.0  ;;  %v4891_v44 = vadd.f32 %v4890_v20, %v14975_v41  ;;  %v4892_v47 = vpop.f32.mrb[53].mxu0  ;;  %v4985_v17 = vpop.f32.mrb[53].mxu1 }
 0x355   : > { %v4893_v30 = vadd.f32 %v4892_v47, %v14975_v41  ;;  %v4986_v35 = vadd.f32 %v4985_v17, %v14975_v41  ;;  %v4894_v3 = vpop.f32.mrb[54].mxu0  ;;  %v4987_v50 = vpop.f32.mrb[54].mxu1  ;;  %5496 = vmatprep.subr.bf16.mxu0 %v5328_v42  ;;  %5589 = vmatprep.subr.bf16.mxu1 %v5330_v54 }
 0x356   : > { %v5329_v31 = vpack.c.bf16 %v5228_v2, %v5220_v29  ;;  %v4895_v63 = vadd.f32 %v4894_v3, %v14973_v24  ;;  %v4988_v14 = vadd.f32 %v4987_v50, %v14973_v24  ;;  %v4896_v56 = vpop.f32.mrb[55].mxu0  ;;  %v4989_v1 = vpop.f32.mrb[55].mxu1  ;;  %5497 = vmatpush1.bf16.msra.mxu0 %v5327_v62  ;;  %v5234_v25 = vmax.f32 %v4891_v44, 0.0 }
 0x357   : > { %v4897_v58 = vadd.f32 %v4896_v56, %v14973_v24  ;;  %v4990_v36 = vadd.f32 %v4989_v1, %v14973_v24  ;;  %v5235_v4 = vmax.f32 %v4893_v30, 0.0  ;;  %v5237_v52 = vmax.f32 %v4986_v35, 0.0 }
 0x358   : > { %5590 = vmatpush1.bf16.msra.mxu1 %v5329_v31  ;;  %v5242_v45 = vmax.f32 %v4895_v63, 0.0  ;;  %v5244_v12 = vmax.f32 %v4988_v14, 0.0 }
 0x359   : > { %v5243_v9 = vmax.f32 %v4897_v58, 0.0  ;;  %v5245_v0 = vmax.f32 %v4990_v36, 0.0 }
 0x35a   : > { %11775 = vmatmul.mubr.msk.bf16.gmra.mrb[92].mxu1 %vm18616_vm2, %v15656_v5  ;;  %v4984_v5 = vadd.f32 %v4983_v57, %v14975_v41  ;;  %v5335_v46 = vpack.c.bf16 %v5242_v45, %v5234_v25 }
 0x35b   : > { %5621 = vmatprep.mubr.bf16.mxu1 %v18690_v13  ;;  %v4900_v8 = vpop.f32.mrb[56].mxu0  ;;  %v4993_v28 = vpop.f32.mrb[56].mxu1  ;;  %v5336_v7 = vpack.c.bf16 %v5243_v9, %v5235_v4  ;;  %v5338_v23 = vpack.c.bf16 %v5245_v0, %v5237_v52 }
 0x35c   : > { %v5236_v6 = vmax.f32 %v4984_v5, 0.0  ;;  %v4901_v53 = vadd.f32 %v4900_v8, %v14999_v43  ;;  %v4994_v29 = vadd.f32 %v4993_v28, %v14999_v43  ;;  %v4902_v34 = vpop.f32.mrb[57].mxu0  ;;  %v4995_v2 = vpop.f32.mrb[57].mxu1 }
 0x35d   : > { %v4903_v55 = vadd.f32 %v4902_v34, %v14999_v43  ;;  %v4996_v60 = vadd.f32 %v4995_v2, %v14999_v43  ;;  %v4904_v16 = vpop.f32.mrb[58].mxu0  ;;  %v4997_v22 = vpop.f32.mrb[58].mxu1  ;;  %5498 = vmatprep.subr.bf16.mxu0 %v5336_v7  ;;  %5591 = vmatprep.subr.bf16.mxu1 %v5338_v23 }
 0x35e   : > { %v5337_v32 = vpack.c.bf16 %v5244_v12, %v5236_v6  ;;  %v4905_v62 = vadd.f32 %v4904_v16, %v14997_v15  ;;  %v4998_v31 = vadd.f32 %v4997_v22, %v14997_v15  ;;  %v4906_v20 = vpop.f32.mrb[59].mxu0  ;;  %v4999_v57 = vpop.f32.mrb[59].mxu1  ;;  %5499 = vmatpush1.bf16.msra.mxu0 %v5335_v46  ;;  %v5250_v44 = vmax.f32 %v4901_v53, 0.0 }
 0x35f   : > { %v4907_v42 = vadd.f32 %v4906_v20, %v14997_v15  ;;  %v5000_v54 = vadd.f32 %v4999_v57, %v14997_v15  ;;  %v5252_v5 = vmax.f32 %v4994_v29, 0.0  ;;  %v5251_v30 = vmax.f32 %v4903_v55, 0.0 }
 0x360   : > { %5592 = vmatpush1.bf16.msra.mxu1 %v5337_v32  ;;  %v5258_v47 = vmax.f32 %v4905_v62, 0.0  ;;  %v5260_v17 = vmax.f32 %v4998_v31, 0.0  ;;  %v5253_v35 = vmax.f32 %v4996_v60, 0.0 }
 0x361   : > { %v5259_v3 = vmax.f32 %v4907_v42, 0.0  ;;  %v5261_v50 = vmax.f32 %v5000_v54, 0.0 }
 0x362   : > { %v5343_v63 = vpack.c.bf16 %v5258_v47, %v5250_v44  ;;  %v5345_v14 = vpack.c.bf16 %v5260_v17, %v5252_v5 }
 0x363   : > { %v4910_v56 = vpop.f32.mrb[60].mxu0  ;;  %v5003_v1 = vpop.f32.mrb[60].mxu1  ;;  %v5344_v58 = vpack.c.bf16 %v5259_v3, %v5251_v30  ;;  %v5346_v36 = vpack.c.bf16 %v5261_v50, %v5253_v35 }
 0x364   : > { %v4911_v25 = vadd.f32 %v4910_v56, %v15033_v26  ;;  %v5004_v6 = vadd.f32 %v5003_v1, %v15033_v26  ;;  %v4912_v45 = vpop.f32.mrb[61].mxu0  ;;  %v5005_v12 = vpop.f32.mrb[61].mxu1 }
 0x365   : > { %v4913_v4 = vadd.f32 %v4912_v45, %v15033_v26  ;;  %v5006_v52 = vadd.f32 %v5005_v12, %v15033_v26  ;;  %v4914_v9 = vpop.f32.mrb[62].mxu0  ;;  %v5007_v0 = vpop.f32.mrb[62].mxu1  ;;  %5500 = vmatprep.subr.bf16.mxu0 %v5344_v58  ;;  %5593 = vmatprep.subr.bf16.mxu1 %v5346_v36 }
 0x366   : > { %v4915_v46 = vadd.f32 %v4914_v9, %v15031_v61  ;;  %v5008_v32 = vadd.f32 %v5007_v0, %v15031_v61  ;;  %v4916_v8 = vpop.f32.mrb[63].mxu0  ;;  %v5009_v28 = vpop.f32.mrb[63].mxu1  ;;  %5501 = vmatpush1.bf16.msra.mxu0 %v5343_v63  ;;  %5594 = vmatpush1.bf16.msra.mxu1 %v5345_v14  ;;  %v5266_v53 = vmax.f32 %v4911_v25, 0.0  ;;  %v5268_v29 = vmax.f32 %v5004_v6, 0.0 }
 0x367   : > { %v4917_v7 = vadd.f32 %v4916_v8, %v15031_v61  ;;  %v5010_v23 = vadd.f32 %v5009_v28, %v15031_v61  ;;  %v5267_v55 = vmax.f32 %v4913_v4, 0.0  ;;  %v5269_v60 = vmax.f32 %v5006_v52, 0.0 }
 0x368   : > { %v5274_v34 = vmax.f32 %v4915_v46, 0.0  ;;  %v5276_v2 = vmax.f32 %v5008_v32, 0.0 }
 0x369   : > { %v5275_v16 = vmax.f32 %v4917_v7, 0.0  ;;  %v5277_v22 = vmax.f32 %v5010_v23, 0.0 }
 0x36a   : > { %v5351_v62 = vpack.c.bf16 %v5274_v34, %v5266_v53  ;;  %v5353_v31 = vpack.c.bf16 %v5276_v2, %v5268_v29  ;;  %v18774_v53 = vld [vmem:[#allocation10_spill] sm:$0xff] }
 0x36b   : > { %v4920_v20 = vpop.f32.mrb[64].mxu0  ;;  %v5013_v57 = vpop.f32.mrb[64].mxu1  ;;  %v5352_v42 = vpack.c.bf16 %v5275_v16, %v5267_v55  ;;  %v5354_v54 = vpack.c.bf16 %v5277_v22, %v5269_v60 }
 0x36c   : > { %v4921_v44 = vadd.f32 %v4920_v20, %v15057_v33  ;;  %v5014_v5 = vadd.f32 %v5013_v57, %v15057_v33  ;;  %v4922_v47 = vpop.f32.mrb[65].mxu0  ;;  %v5015_v17 = vpop.f32.mrb[65].mxu1 }
 0x36d   : > { %v4923_v30 = vadd.f32 %v4922_v47, %v15057_v33  ;;  %v5016_v35 = vadd.f32 %v5015_v17, %v15057_v33  ;;  %v4924_v3 = vpop.f32.mrb[66].mxu0  ;;  %v5017_v50 = vpop.f32.mrb[66].mxu1  ;;  %5502 = vmatprep.subr.bf16.mxu0 %v5352_v42  ;;  %5595 = vmatprep.subr.bf16.mxu1 %v5354_v54 }
 0x36e   : > { %v4925_v63 = vadd.f32 %v4924_v3, %v15055_v18  ;;  %v5018_v14 = vadd.f32 %v5017_v50, %v15055_v18  ;;  %v4926_v56 = vpop.f32.mrb[67].mxu0  ;;  %v5019_v1 = vpop.f32.mrb[67].mxu1  ;;  %5503 = vmatpush1.bf16.msra.mxu0 %v5351_v62  ;;  %5596 = vmatpush1.bf16.msra.mxu1 %v5353_v31  ;;  %v5282_v25 = vmax.f32 %v4921_v44, 0.0  ;;  %v5284_v6 = vmax.f32 %v5014_v5, 0.0  ;;  %v18775_v31 = vld [vmem:[#allocation9_spill] sm:$0xff] }
 0x36f   : > { %v4927_v58 = vadd.f32 %v4926_v56, %v15055_v18  ;;  %v5020_v36 = vadd.f32 %v5019_v1, %v15055_v18  ;;  %v5283_v4 = vmax.f32 %v4923_v30, 0.0  ;;  %v5285_v52 = vmax.f32 %v5016_v35, 0.0 }
 0x370   : > { %v5290_v45 = vmax.f32 %v4925_v63, 0.0  ;;  %v5292_v12 = vmax.f32 %v5018_v14, 0.0 }
 0x371   : > { %v5291_v9 = vmax.f32 %v4927_v58, 0.0  ;;  %v5293_v0 = vmax.f32 %v5020_v36, 0.0 }
 0x372   : > { %v5359_v46 = vpack.c.bf16 %v5290_v45, %v5282_v25  ;;  %v5361_v32 = vpack.c.bf16 %v5292_v12, %v5284_v6  ;;  %v15799_v25 = vld [vmem:[%s18486_s4 + $0x30] sm:$0xff]   ;;  %v15810_v6 = vld [vmem:[%s18486_s4 + $0x38] sm:$0xff]   ;;  %v15821_v45 = vld [vmem:[%s18486_s4 + $0x40] sm:$0xff]  }
 0x373   : > { %v4930_v8 = vpop.f32.mrb[68].mxu0  ;;  %v5023_v28 = vpop.f32.mrb[68].mxu1  ;;  %v5360_v7 = vpack.c.bf16 %v5291_v9, %v5283_v4  ;;  %v5362_v23 = vpack.c.bf16 %v5293_v0, %v5285_v52  ;;  %v15832_v12 = vld [vmem:[%s18486_s4 + $0x48] sm:$0xff]   ;;  %v15843_v4 = vld [vmem:[%s18486_s4 + $0x50] sm:$0xff]   ;;  %v15854_v52 = vld [vmem:[%s18486_s4 + $0x58] sm:$0xff]  }
 0x374   : > { %v4931_v29 = vadd.f32 %v4930_v8, %v18774_v53  ;;  %v5024_v34 = vadd.f32 %v5023_v28, %v18774_v53  ;;  %v4932_v2 = vpop.f32.mrb[69].mxu0  ;;  %v5025_v55 = vpop.f32.mrb[69].mxu1 }
 0x375   : > { %v4933_v60 = vadd.f32 %v4932_v2, %v18774_v53  ;;  %v5026_v16 = vadd.f32 %v5025_v55, %v18774_v53  ;;  %v4934_v22 = vpop.f32.mrb[70].mxu0  ;;  %v5027_v62 = vpop.f32.mrb[70].mxu1  ;;  %5504 = vmatprep.subr.bf16.mxu0 %v5360_v7  ;;  %5597 = vmatprep.subr.bf16.mxu1 %v5362_v23 }
 0x376   : > { %v4935_v20 = vadd.f32 %v4934_v22, %v18775_v31  ;;  %v5028_v57 = vadd.f32 %v5027_v62, %v18775_v31  ;;  %v4936_v42 = vpop.f32.mrb[71].mxu0  ;;  %v5029_v54 = vpop.f32.mrb[71].mxu1  ;;  %5505 = vmatpush1.bf16.msra.mxu0 %v5359_v46  ;;  %5598 = vmatpush1.bf16.msra.mxu1 %v5361_v32  ;;  %v5298_v47 = vmax.f32 %v4931_v29, 0.0  ;;  %v5300_v17 = vmax.f32 %v5024_v34, 0.0 }
 0x377   : > { %v4937_v44 = vadd.f32 %v4936_v42, %v18775_v31  ;;  %v5030_v5 = vadd.f32 %v5029_v54, %v18775_v31  ;;  %v5299_v3 = vmax.f32 %v4933_v60, 0.0  ;;  %v5301_v50 = vmax.f32 %v5026_v16, 0.0 }
 0x378   : > { %v5306_v30 = vmax.f32 %v4935_v20, 0.0  ;;  %v5308_v35 = vmax.f32 %v5028_v57, 0.0 }
 0x379   : > { %v5307_v63 = vmax.f32 %v4937_v44, 0.0  ;;  %v5309_v14 = vmax.f32 %v5030_v5, 0.0 }
 0x37a   : > { %v5367_v56 = vpack.c.bf16 %v5306_v30, %v5298_v47  ;;  %v5369_v1 = vpack.c.bf16 %v5308_v35, %v5300_v17 }
 0x37b   : > { %v5368_v58 = vpack.c.bf16 %v5307_v63, %v5299_v3  ;;  %v5370_v36 = vpack.c.bf16 %v5309_v14, %v5301_v50 }
 0x37d   : > { %5506 = vmatprep.subr.bf16.mxu0 %v5368_v58  ;;  %5599 = vmatprep.subr.bf16.mxu1 %v5370_v36 }
 0x37e   : > { %5507 = vmatpush1.bf16.msra.mxu0 %v5367_v56  ;;  %5600 = vmatpush1.bf16.msra.mxu1 %v5369_v1 }
 0x381   : > { %11806 = vmatmul.mubr.msk.bf16.vlgmr.msra.gmra.mrb[96].mxu0 %vm18616_vm2, %v15799_v25  ;;  %11812 = vmatmul.mubr.msk.bf16.vlgmr.msra.gmra.mrb[96].mxu1 %vm18616_vm2, %v15799_v25 }
 0x382   : > { %5538 = vmatprep.mubr.bf16.mxu0 %v18690_v13  ;;  %5631 = vmatprep.mubr.bf16.mxu1 %v18690_v13 }
 0x389   : > { %11807 = vmatmul.mubr.msk.bf16.gmra.mrb[100].mxu0 %vm18616_vm2, %v15810_v6  ;;  %11813 = vmatmul.mubr.msk.bf16.gmra.mrb[100].mxu1 %vm18616_vm2, %v15810_v6 }
 0x38a   : > { %5548 = vmatprep.mubr.bf16.mxu0 %v18690_v13  ;;  %5641 = vmatprep.mubr.bf16.mxu1 %v18690_v13 }
 0x391   : > { %11808 = vmatmul.mubr.msk.bf16.gmra.mrb[104].mxu0 %vm18616_vm2, %v15821_v45  ;;  %11814 = vmatmul.mubr.msk.bf16.gmra.mrb[104].mxu1 %vm18616_vm2, %v15821_v45 }
 0x392   : > { %5558 = vmatprep.mubr.bf16.mxu0 %v18690_v13  ;;  %5651 = vmatprep.mubr.bf16.mxu1 %v18690_v13 }
 0x399   : > { %11809 = vmatmul.mubr.msk.bf16.gmra.mrb[108].mxu0 %vm18616_vm2, %v15832_v12  ;;  %11815 = vmatmul.mubr.msk.bf16.gmra.mrb[108].mxu1 %vm18616_vm2, %v15832_v12 }
 0x39a   : > { %5568 = vmatprep.mubr.bf16.mxu0 %v18690_v13  ;;  %5661 = vmatprep.mubr.bf16.mxu1 %v18690_v13 }
 0x3a1   : > { %11810 = vmatmul.mubr.msk.bf16.gmra.mrb[112].mxu0 %vm18616_vm2, %v15843_v4  ;;  %11816 = vmatmul.mubr.msk.bf16.gmra.mrb[112].mxu1 %vm18616_vm2, %v15843_v4 }
 0x3a2   : > { %5578 = vmatprep.mubr.bf16.mxu0 %v18690_v13  ;;  %5671 = vmatprep.mubr.bf16.mxu1 %v18690_v13 }
 0x3a9   : > { %11811 = vmatmul.mubr.msk.bf16.gmra.mrb[116].mxu0 %vm18616_vm2, %v15854_v52  ;;  %11817 = vmatmul.mubr.msk.bf16.gmra.mrb[116].mxu1 %vm18616_vm2, %v15854_v52 }
 0x3aa   : > { %5714 = vmatprep.mubr.bf16.mxu0 %v18690_v13  ;;  %5807 = vmatprep.mubr.bf16.mxu1 %v18690_v13 }
 0x3e6   : > { %v5066_v9 = vpop.f32.mrb[72].mxu0 }
 0x3e7   : > { %v5067_v0 = vadd.f32 %v5066_v9, %v14938_v40  ;;  %v5068_v46 = vpop.f32.mrb[73].mxu0 }
 0x3e8   : > { %v5069_v32 = vadd.f32 %v5068_v46, %v14938_v40  ;;  %v5070_v8 = vpop.f32.mrb[74].mxu0 }
 0x3e9   : > { %v5071_v28 = vadd.f32 %v5070_v8, %v14936_v21  ;;  %v5072_v7 = vpop.f32.mrb[75].mxu0  ;;  %v5222_v29 = vmax.f32 %v5067_v0, 0.0 }
 0x3ea   : > { %v5073_v23 = vadd.f32 %v5072_v7, %v14936_v21  ;;  %v5223_v2 = vmax.f32 %v5069_v32, 0.0 }
 0x3eb   : > { %v5230_v34 = vmax.f32 %v5071_v28, 0.0 }
 0x3ec   : > { %v5231_v55 = vmax.f32 %v5073_v23, 0.0 }
 0x3ed   : > { %v5331_v60 = vpack.c.bf16 %v5230_v34, %v5222_v29 }
 0x3ee   : > { %v5076_v16 = vpop.f32.mrb[76].mxu0  ;;  %v5332_v22 = vpack.c.bf16 %v5231_v55, %v5223_v2 }
 0x3ef   : > { %v5077_v62 = vadd.f32 %v5076_v16, %v14975_v41  ;;  %v5078_v20 = vpop.f32.mrb[77].mxu0 }
 0x3f0   : > { %v5079_v57 = vadd.f32 %v5078_v20, %v14975_v41  ;;  %v5080_v42 = vpop.f32.mrb[78].mxu0  ;;  %5682 = vmatprep.subr.bf16.mxu0 %v5332_v22 }
 0x3f1   : > { %v5081_v54 = vadd.f32 %v5080_v42, %v14973_v24  ;;  %v5082_v44 = vpop.f32.mrb[79].mxu0  ;;  %5683 = vmatpush1.bf16.msra.mxu0 %v5331_v60  ;;  %v5238_v47 = vmax.f32 %v5077_v62, 0.0 }
 0x3f2   : > { %v5083_v5 = vadd.f32 %v5082_v44, %v14973_v24  ;;  %v5239_v30 = vmax.f32 %v5079_v57, 0.0 }
 0x3f3   : > { %v5246_v17 = vmax.f32 %v5081_v54, 0.0 }
 0x3f4   : > { %v5247_v35 = vmax.f32 %v5083_v5, 0.0 }
 0x3f5   : > { %v5339_v3 = vpack.c.bf16 %v5246_v17, %v5238_v47 }
 0x3f6   : > { %v5086_v50 = vpop.f32.mrb[80].mxu0  ;;  %v5340_v63 = vpack.c.bf16 %v5247_v35, %v5239_v30 }
 0x3f7   : > { %v5087_v14 = vadd.f32 %v5086_v50, %v14999_v43  ;;  %v5088_v56 = vpop.f32.mrb[81].mxu0 }
 0x3f8   : > { %v5089_v1 = vadd.f32 %v5088_v56, %v14999_v43  ;;  %v5090_v58 = vpop.f32.mrb[82].mxu0  ;;  %5684 = vmatprep.subr.bf16.mxu0 %v5340_v63 }
 0x3f9   : > { %v5091_v36 = vadd.f32 %v5090_v58, %v14997_v15  ;;  %v5092_v9 = vpop.f32.mrb[83].mxu0  ;;  %5685 = vmatpush1.bf16.msra.mxu0 %v5339_v3  ;;  %v5254_v46 = vmax.f32 %v5087_v14, 0.0 }
 0x3fa   : > { %v5093_v0 = vadd.f32 %v5092_v9, %v14997_v15  ;;  %v5255_v8 = vmax.f32 %v5089_v1, 0.0 }
 0x3fb   : > { %v5262_v32 = vmax.f32 %v5091_v36, 0.0 }
 0x3fc   : > { %v5263_v28 = vmax.f32 %v5093_v0, 0.0 }
 0x3fd   : > { %v5347_v7 = vpack.c.bf16 %v5262_v32, %v5254_v46 }
 0x3fe   : > { %v5096_v23 = vpop.f32.mrb[84].mxu0  ;;  %v5348_v29 = vpack.c.bf16 %v5263_v28, %v5255_v8 }
 0x3ff   : > { %v5097_v34 = vadd.f32 %v5096_v23, %v15033_v26  ;;  %v5098_v2 = vpop.f32.mrb[85].mxu0 }
 0x400   : > { %v5099_v55 = vadd.f32 %v5098_v2, %v15033_v26  ;;  %v5100_v60 = vpop.f32.mrb[86].mxu0  ;;  %5686 = vmatprep.subr.bf16.mxu0 %v5348_v29 }
 0x401   : > { %v5101_v16 = vadd.f32 %v5100_v60, %v15031_v61  ;;  %v5102_v22 = vpop.f32.mrb[87].mxu0  ;;  %5687 = vmatpush1.bf16.msra.mxu0 %v5347_v7  ;;  %v5270_v20 = vmax.f32 %v5097_v34, 0.0 }
 0x402   : > { %v5103_v62 = vadd.f32 %v5102_v22, %v15031_v61  ;;  %v5271_v42 = vmax.f32 %v5099_v55, 0.0 }
 0x403   : > { %v5278_v57 = vmax.f32 %v5101_v16, 0.0 }
 0x404   : > { %v5279_v54 = vmax.f32 %v5103_v62, 0.0 }
 0x405   : > { %v5159_v44 = vpop.f32.mrb[72].mxu1  ;;  %v5355_v5 = vpack.c.bf16 %v5278_v57, %v5270_v20 }
 0x406   : > { %v5160_v47 = vadd.f32 %v5159_v44, %v14938_v40  ;;  %v5161_v17 = vpop.f32.mrb[73].mxu1  ;;  %v5106_v30 = vpop.f32.mrb[88].mxu0  ;;  %v5356_v35 = vpack.c.bf16 %v5279_v54, %v5271_v42 }
 0x407   : > { %v5162_v3 = vadd.f32 %v5161_v17, %v14938_v40  ;;  %v5163_v50 = vpop.f32.mrb[74].mxu1  ;;  %v5107_v63 = vadd.f32 %v5106_v30, %v15057_v33  ;;  %v5108_v14 = vpop.f32.mrb[89].mxu0 }
 0x408   : > { %v5164_v56 = vadd.f32 %v5163_v50, %v14936_v21  ;;  %v5165_v1 = vpop.f32.mrb[75].mxu1  ;;  %v5109_v58 = vadd.f32 %v5108_v14, %v15057_v33  ;;  %v5110_v36 = vpop.f32.mrb[90].mxu0  ;;  %5688 = vmatprep.subr.bf16.mxu0 %v5356_v35  ;;  %v5224_v32 = vmax.f32 %v5160_v47, 0.0 }
 0x409   : > { %v5166_v9 = vadd.f32 %v5165_v1, %v14936_v21  ;;  %v5111_v0 = vadd.f32 %v5110_v36, %v15055_v18  ;;  %v5112_v46 = vpop.f32.mrb[91].mxu0  ;;  %5689 = vmatpush1.bf16.msra.mxu0 %v5355_v5  ;;  %v5225_v28 = vmax.f32 %v5162_v3, 0.0  ;;  %v5286_v23 = vmax.f32 %v5107_v63, 0.0 }
 0x40a   : > { %v5232_v8 = vmax.f32 %v5164_v56, 0.0  ;;  %v5113_v40 = vadd.f32 %v5112_v46, %v15055_v18  ;;  %v5287_v2 = vmax.f32 %v5109_v58, 0.0 }
 0x40b   : > { %v5233_v7 = vmax.f32 %v5166_v9, 0.0  ;;  %v5294_v29 = vmax.f32 %v5111_v0, 0.0 }
 0x40c   : > { %v5333_v34 = vpack.c.bf16 %v5232_v8, %v5224_v32  ;;  %v5295_v55 = vmax.f32 %v5113_v40, 0.0 }
 0x40d   : > { %v5169_v60 = vpop.f32.mrb[76].mxu1  ;;  %v5334_v16 = vpack.c.bf16 %v5233_v7, %v5225_v28  ;;  %v5363_v22 = vpack.c.bf16 %v5294_v29, %v5286_v23 }
 0x40e   : > { %v5170_v21 = vadd.f32 %v5169_v60, %v14975_v41  ;;  %v5171_v62 = vpop.f32.mrb[77].mxu1  ;;  %v5364_v20 = vpack.c.bf16 %v5295_v55, %v5287_v2  ;;  %v5116_v57 = vpop.f32.mrb[92].mxu0 }
 0x40f   : > { %v5172_v42 = vadd.f32 %v5171_v62, %v14975_v41  ;;  %v5173_v54 = vpop.f32.mrb[78].mxu1  ;;  %5775 = vmatprep.subr.bf16.mxu1 %v5334_v16  ;;  %v5117_v44 = vadd.f32 %v5116_v57, %v18774_v53  ;;  %v5118_v5 = vpop.f32.mrb[93].mxu0 }
 0x410   : > { %v5174_v47 = vadd.f32 %v5173_v54, %v14973_v24  ;;  %v5175_v17 = vpop.f32.mrb[79].mxu1  ;;  %5776 = vmatpush1.bf16.msra.mxu1 %v5333_v34  ;;  %v5119_v30 = vadd.f32 %v5118_v5, %v18774_v53  ;;  %v5120_v35 = vpop.f32.mrb[94].mxu0  ;;  %5690 = vmatprep.subr.bf16.mxu0 %v5364_v20  ;;  %v5240_v41 = vmax.f32 %v5170_v21, 0.0 }
 0x411   : > { %v5176_v3 = vadd.f32 %v5175_v17, %v14973_v24  ;;  %v5121_v50 = vadd.f32 %v5120_v35, %v18775_v31  ;;  %v5122_v63 = vpop.f32.mrb[95].mxu0  ;;  %5691 = vmatpush1.bf16.msra.mxu0 %v5363_v22  ;;  %v5241_v1 = vmax.f32 %v5172_v42, 0.0  ;;  %v5302_v36 = vmax.f32 %v5117_v44, 0.0 }
 0x412   : > { %v5248_v14 = vmax.f32 %v5174_v47, 0.0  ;;  %v5123_v56 = vadd.f32 %v5122_v63, %v18775_v31  ;;  %v5303_v46 = vmax.f32 %v5119_v30, 0.0 }
 0x413   : > { %v5249_v58 = vmax.f32 %v5176_v3, 0.0  ;;  %v5310_v9 = vmax.f32 %v5121_v50, 0.0 }
 0x414   : > { %v5341_v0 = vpack.c.bf16 %v5248_v14, %v5240_v41  ;;  %v5311_v32 = vmax.f32 %v5123_v56, 0.0 }
 0x415   : > { %v5179_v8 = vpop.f32.mrb[80].mxu1  ;;  %v5342_v40 = vpack.c.bf16 %v5249_v58, %v5241_v1  ;;  %v5371_v28 = vpack.c.bf16 %v5310_v9, %v5302_v36 }
 0x416   : > { %v5180_v24 = vadd.f32 %v5179_v8, %v14999_v43  ;;  %v5181_v7 = vpop.f32.mrb[81].mxu1  ;;  %v5372_v23 = vpack.c.bf16 %v5311_v32, %v5303_v46 }
 0x417   : > { %v5182_v29 = vadd.f32 %v5181_v7, %v14999_v43  ;;  %v5183_v34 = vpop.f32.mrb[82].mxu1  ;;  %5777 = vmatprep.subr.bf16.mxu1 %v5342_v40 }
 0x418   : > { %v5184_v2 = vadd.f32 %v5183_v34, %v14997_v15  ;;  %v5185_v55 = vpop.f32.mrb[83].mxu1  ;;  %5778 = vmatpush1.bf16.msra.mxu1 %v5341_v0  ;;  %5692 = vmatprep.subr.bf16.mxu0 %v5372_v23  ;;  %v5256_v16 = vmax.f32 %v5180_v24, 0.0 }
 0x419   : > { %v5186_v60 = vadd.f32 %v5185_v55, %v14997_v15  ;;  %5693 = vmatpush1.bf16.msra.mxu0 %v5371_v28  ;;  %v5257_v21 = vmax.f32 %v5182_v29, 0.0 }
 0x41a   : > { %v5264_v22 = vmax.f32 %v5184_v2, 0.0 }
 0x41b   : > { %v5265_v62 = vmax.f32 %v5186_v60, 0.0 }
 0x41c   : > { %v5349_v20 = vpack.c.bf16 %v5264_v22, %v5256_v16  ;;  %11818 = vmatmul.mubr.msk.bf16.vlgmr.msra.gmra.mrb[120].mxu0 %vm18616_vm2, %v15799_v25 }
 0x41d   : > { %v5189_v57 = vpop.f32.mrb[84].mxu1  ;;  %v5350_v43 = vpack.c.bf16 %v5265_v62, %v5257_v21  ;;  %5724 = vmatprep.mubr.bf16.mxu0 %v18690_v13 }
 0x41e   : > { %v5190_v42 = vadd.f32 %v5189_v57, %v15033_v26  ;;  %v5191_v54 = vpop.f32.mrb[85].mxu1 }
 0x41f   : > { %v5192_v44 = vadd.f32 %v5191_v54, %v15033_v26  ;;  %v5193_v5 = vpop.f32.mrb[86].mxu1  ;;  %5779 = vmatprep.subr.bf16.mxu1 %v5350_v43 }
 0x420   : > { %v5194_v15 = vadd.f32 %v5193_v5, %v15031_v61  ;;  %v5195_v47 = vpop.f32.mrb[87].mxu1  ;;  %5780 = vmatpush1.bf16.msra.mxu1 %v5349_v20  ;;  %v5272_v30 = vmax.f32 %v5190_v42, 0.0 }
 0x421   : > { %v5196_v17 = vadd.f32 %v5195_v47, %v15031_v61  ;;  %v5273_v3 = vmax.f32 %v5192_v44, 0.0  ;;  %v18777_v44 = vld [vmem:[#allocation11_spill] sm:$0xff] }
 0x422   : > { %v5280_v35 = vmax.f32 %v5194_v15, 0.0 }
 0x423   : > { %v5281_v50 = vmax.f32 %v5196_v17, 0.0 }
 0x424   : > { %v5357_v63 = vpack.c.bf16 %v5280_v35, %v5272_v30  ;;  %11819 = vmatmul.mubr.msk.bf16.gmra.mrb[124].mxu0 %vm18616_vm2, %v15810_v6 }
 0x425   : > { %v5199_v41 = vpop.f32.mrb[88].mxu1  ;;  %v5358_v14 = vpack.c.bf16 %v5281_v50, %v5273_v3  ;;  %5734 = vmatprep.mubr.bf16.mxu0 %v18690_v13 }
 0x426   : > { %v5200_v26 = vadd.f32 %v5199_v41, %v15057_v33  ;;  %v5201_v56 = vpop.f32.mrb[89].mxu1 }
 0x427   : > { %v5202_v1 = vadd.f32 %v5201_v56, %v15057_v33  ;;  %v5203_v58 = vpop.f32.mrb[90].mxu1  ;;  %5781 = vmatprep.subr.bf16.mxu1 %v5358_v14 }
 0x428   : > { %v5204_v61 = vadd.f32 %v5203_v58, %v15055_v18  ;;  %v5205_v36 = vpop.f32.mrb[91].mxu1  ;;  %5782 = vmatpush1.bf16.msra.mxu1 %v5357_v63  ;;  %v5288_v0 = vmax.f32 %v5200_v26, 0.0 }
 0x429   : > { %v5206_v9 = vadd.f32 %v5205_v36, %v15055_v18  ;;  %v5289_v32 = vmax.f32 %v5202_v1, 0.0 }
 0x42a   : > { %v5296_v46 = vmax.f32 %v5204_v61, 0.0 }
 0x42b   : > { %v5297_v8 = vmax.f32 %v5206_v9, 0.0 }
 0x42c   : > { %v5365_v40 = vpack.c.bf16 %v5296_v46, %v5288_v0  ;;  %11820 = vmatmul.mubr.msk.bf16.gmra.mrb[128].mxu0 %vm18616_vm2, %v15821_v45 }
 0x42d   : > { %v5366_v28 = vpack.c.bf16 %v5297_v8, %v5289_v32  ;;  %v5209_v24 = vpop.f32.mrb[92].mxu1  ;;  %5744 = vmatprep.mubr.bf16.mxu0 %v18690_v13 }
 0x42e   : > { %v5210_v33 = vadd.f32 %v5209_v24, %v18774_v53  ;;  %v5211_v7 = vpop.f32.mrb[93].mxu1 }
 0x42f   : > { %v5212_v23 = vadd.f32 %v5211_v7, %v18774_v53  ;;  %v5213_v29 = vpop.f32.mrb[94].mxu1  ;;  %5783 = vmatprep.subr.bf16.mxu1 %v5366_v28  ;;  %v18778_v7 = vld [vmem:[#allocation13_spill] sm:$0xff] }
 0x430   : > { %v5214_v18 = vadd.f32 %v5213_v29, %v18775_v31  ;;  %v5215_v34 = vpop.f32.mrb[95].mxu1  ;;  %5784 = vmatpush1.bf16.msra.mxu1 %v5365_v40  ;;  %v5304_v55 = vmax.f32 %v5210_v33, 0.0 }
 0x431   : > { %v5216_v2 = vadd.f32 %v5215_v34, %v18775_v31  ;;  %v5305_v16 = vmax.f32 %v5212_v23, 0.0 }
 0x432   : > { %v5312_v60 = vmax.f32 %v5214_v18, 0.0 }
 0x433   : > { %v5313_v22 = vmax.f32 %v5216_v2, 0.0 }
 0x434   : > { %v5373_v21 = vpack.c.bf16 %v5312_v60, %v5304_v55  ;;  %11821 = vmatmul.mubr.msk.bf16.gmra.mrb[132].mxu0 %vm18616_vm2, %v15832_v12 }
 0x435   : > { %v5374_v62 = vpack.c.bf16 %v5313_v22, %v5305_v16  ;;  %5754 = vmatprep.mubr.bf16.mxu0 %v18690_v13 }
 0x437   : > { %5785 = vmatprep.subr.bf16.mxu1 %v5374_v62 }
 0x438   : > { %5786 = vmatpush1.bf16.msra.mxu1 %v5373_v21 }
 0x43b   : > { %11824 = vmatmul.mubr.msk.bf16.vlgmr.msra.gmra.mrb[120].mxu1 %vm18616_vm2, %v15799_v25  ;;  %v18776_v25 = vld [vmem:[#allocation12_spill] sm:$0xff] }
 0x43c   : > { %5817 = vmatprep.mubr.bf16.mxu1 %v18690_v13  ;;  %11822 = vmatmul.mubr.msk.bf16.gmra.mrb[136].mxu0 %vm18616_vm2, %v15843_v4 }
 0x43d   : > { %5764 = vmatprep.mubr.bf16.mxu0 %v18690_v13 }
 0x443   : > { %11825 = vmatmul.mubr.msk.bf16.gmra.mrb[124].mxu1 %vm18616_vm2, %v15810_v6 }
 0x444   : > { %5827 = vmatprep.mubr.bf16.mxu1 %v18690_v13  ;;  %11823 = vmatmul.mubr.msk.bf16.gmra.mrb[140].mxu0 %vm18616_vm2, %v15854_v52 }
 0x445   : > { %6178 = vmatprep.mubr.bf16.mxu0 %v18690_v13 }
 0x44b   : > { %11826 = vmatmul.mubr.msk.bf16.gmra.mrb[128].mxu1 %vm18616_vm2, %v15821_v45 }
 0x44c   : > { %5837 = vmatprep.mubr.bf16.mxu1 %v18690_v13 }
 0x453   : > { %11827 = vmatmul.mubr.msk.bf16.gmra.mrb[132].mxu1 %vm18616_vm2, %v15832_v12 }
 0x454   : > { %5847 = vmatprep.mubr.bf16.mxu1 %v18690_v13  ;;  %v5530_v53 = vpop.f32.mrb[96].mxu0  ;;  %v5623_v31 = vpop.f32.mrb[96].mxu1 }
 0x455   : > { %v5531_v6 = vadd.f32 %v5530_v53, %v18776_v25  ;;  %v5624_v20 = vadd.f32 %v5623_v31, %v18776_v25  ;;  %v5532_v57 = vpop.f32.mrb[97].mxu0  ;;  %v5625_v45 = vpop.f32.mrb[97].mxu1 }
 0x456   : > { %v5533_v43 = vadd.f32 %v5532_v57, %v18776_v25  ;;  %v5626_v42 = vadd.f32 %v5625_v45, %v18776_v25  ;;  %v5534_v12 = vpop.f32.mrb[98].mxu0  ;;  %v5627_v54 = vpop.f32.mrb[98].mxu1 }
 0x457   : > { %v5535_v5 = vadd.f32 %v5534_v12, %v18777_v44  ;;  %v5536_v15 = vpop.f32.mrb[99].mxu0  ;;  %v5629_v47 = vpop.f32.mrb[99].mxu1  ;;  %v5868_v35 = vmax.f32 %v5531_v6, 0.0  ;;  %v5870_v3 = vmax.f32 %v5624_v20, 0.0 }
 0x458   : > { %v5537_v17 = vadd.f32 %v5536_v15, %v18777_v44  ;;  %v5630_v30 = vadd.f32 %v5629_v47, %v18777_v44  ;;  %v5869_v41 = vmax.f32 %v5533_v43, 0.0  ;;  %v5871_v14 = vmax.f32 %v5626_v42, 0.0 }
 0x459   : > { %v5876_v50 = vmax.f32 %v5535_v5, 0.0 }
 0x45a   : > { %v5877_v26 = vmax.f32 %v5537_v17, 0.0  ;;  %v5879_v56 = vmax.f32 %v5630_v30, 0.0 }
 0x45b   : > { %11828 = vmatmul.mubr.msk.bf16.gmra.mrb[136].mxu1 %vm18616_vm2, %v15843_v4  ;;  %v5628_v4 = vadd.f32 %v5627_v54, %v18777_v44  ;;  %v5977_v1 = vpack.c.bf16 %v5876_v50, %v5868_v35  ;;  %v18779_v54 = vld [vmem:[#allocation15_spill] sm:$0xff]  ;;  %v18780_v50 = vld [vmem:[#allocation14_spill] sm:$0xff] }
 0x45c   : > { %5857 = vmatprep.mubr.bf16.mxu1 %v18690_v13  ;;  %v5978_v61 = vpack.c.bf16 %v5877_v26, %v5869_v41  ;;  %v5980_v36 = vpack.c.bf16 %v5879_v56, %v5871_v14  ;;  %v5540_v9 = vpop.f32.mrb[100].mxu0  ;;  %v5633_v0 = vpop.f32.mrb[100].mxu1 }
 0x45d   : > { %v5878_v63 = vmax.f32 %v5628_v4, 0.0  ;;  %v5541_v46 = vadd.f32 %v5540_v9, %v15146_v39  ;;  %v5542_v32 = vpop.f32.mrb[101].mxu0  ;;  %v5635_v8 = vpop.f32.mrb[101].mxu1 }
 0x45e   : > { %v5543_v40 = vadd.f32 %v5542_v32, %v15146_v39  ;;  %v5636_v28 = vadd.f32 %v5635_v8, %v15146_v39  ;;  %v5544_v24 = vpop.f32.mrb[102].mxu0  ;;  %v5637_v33 = vpop.f32.mrb[102].mxu1  ;;  %6146 = vmatprep.subr.bf16.mxu0 %v5978_v61  ;;  %6239 = vmatprep.subr.bf16.mxu1 %v5980_v36 }
 0x45f   : > { %v5979_v58 = vpack.c.bf16 %v5878_v63, %v5870_v3  ;;  %v5545_v23 = vadd.f32 %v5544_v24, %v18778_v7  ;;  %v5638_v29 = vadd.f32 %v5637_v33, %v18778_v7  ;;  %v5546_v18 = vpop.f32.mrb[103].mxu0  ;;  %v5639_v34 = vpop.f32.mrb[103].mxu1  ;;  %6147 = vmatpush1.bf16.msra.mxu0 %v5977_v1  ;;  %v5884_v60 = vmax.f32 %v5541_v46, 0.0 }
 0x460   : > { %v5547_v2 = vadd.f32 %v5546_v18, %v18778_v7  ;;  %v5640_v55 = vadd.f32 %v5639_v34, %v18778_v7  ;;  %v5885_v62 = vmax.f32 %v5543_v40, 0.0  ;;  %v5887_v53 = vmax.f32 %v5636_v28, 0.0 }
 0x461   : > { %6240 = vmatpush1.bf16.msra.mxu1 %v5979_v58  ;;  %v5892_v22 = vmax.f32 %v5545_v23, 0.0  ;;  %v5894_v21 = vmax.f32 %v5638_v29, 0.0  ;;  %v18781_v29 = vld [vmem:[#allocation17_spill] sm:$0xff] }
 0x462   : > { %v5893_v31 = vmax.f32 %v5547_v2, 0.0  ;;  %v5895_v6 = vmax.f32 %v5640_v55, 0.0 }
 0x463   : > { %11829 = vmatmul.mubr.msk.bf16.gmra.mrb[140].mxu1 %vm18616_vm2, %v15854_v52  ;;  %v5634_v52 = vadd.f32 %v5633_v0, %v15146_v39  ;;  %v5985_v20 = vpack.c.bf16 %v5892_v22, %v5884_v60 }
 0x464   : > { %6271 = vmatprep.mubr.bf16.mxu1 %v18690_v13  ;;  %v5986_v45 = vpack.c.bf16 %v5893_v31, %v5885_v62  ;;  %v5988_v43 = vpack.c.bf16 %v5895_v6, %v5887_v53  ;;  %v5550_v42 = vpop.f32.mrb[104].mxu0  ;;  %v5643_v12 = vpop.f32.mrb[104].mxu1  ;;  %v18782_v62 = vld [vmem:[#allocation16_spill] sm:$0xff] }
 0x465   : > { %v5886_v16 = vmax.f32 %v5634_v52, 0.0  ;;  %v5551_v5 = vadd.f32 %v5550_v42, %v18779_v54  ;;  %v5644_v4 = vadd.f32 %v5643_v12, %v18779_v54  ;;  %v5552_v15 = vpop.f32.mrb[105].mxu0  ;;  %v5645_v47 = vpop.f32.mrb[105].mxu1 }
 0x466   : > { %v5553_v17 = vadd.f32 %v5552_v15, %v18779_v54  ;;  %v5646_v30 = vadd.f32 %v5645_v47, %v18779_v54  ;;  %v5554_v35 = vpop.f32.mrb[106].mxu0  ;;  %v5647_v3 = vpop.f32.mrb[106].mxu1  ;;  %6148 = vmatprep.subr.bf16.mxu0 %v5986_v45  ;;  %6241 = vmatprep.subr.bf16.mxu1 %v5988_v43 }
 0x467   : > { %v5987_v57 = vpack.c.bf16 %v5894_v21, %v5886_v16  ;;  %v5555_v63 = vadd.f32 %v5554_v35, %v18780_v50  ;;  %v5648_v41 = vadd.f32 %v5647_v3, %v18780_v50  ;;  %v5556_v14 = vpop.f32.mrb[107].mxu0  ;;  %v5649_v26 = vpop.f32.mrb[107].mxu1  ;;  %6149 = vmatpush1.bf16.msra.mxu0 %v5985_v20  ;;  %v5900_v58 = vmax.f32 %v5551_v5, 0.0 }
 0x468   : > { %v5557_v56 = vadd.f32 %v5556_v14, %v18780_v50  ;;  %v5650_v1 = vadd.f32 %v5649_v26, %v18780_v50  ;;  %v5902_v61 = vmax.f32 %v5644_v4, 0.0  ;;  %v5901_v0 = vmax.f32 %v5553_v17, 0.0  ;;  %v18783_v26 = vld [vmem:[#allocation19_spill] sm:$0xff] }
 0x469   : > { %6242 = vmatpush1.bf16.msra.mxu1 %v5987_v57  ;;  %v5908_v36 = vmax.f32 %v5555_v63, 0.0  ;;  %v5910_v9 = vmax.f32 %v5648_v41, 0.0  ;;  %v5903_v46 = vmax.f32 %v5646_v30, 0.0 }
 0x46a   : > { %v5909_v52 = vmax.f32 %v5557_v56, 0.0  ;;  %v5911_v32 = vmax.f32 %v5650_v1, 0.0 }
 0x46b   : > { %v5993_v8 = vpack.c.bf16 %v5908_v36, %v5900_v58  ;;  %v5995_v40 = vpack.c.bf16 %v5910_v9, %v5902_v61 }
 0x46c   : > { %v5994_v28 = vpack.c.bf16 %v5909_v52, %v5901_v0  ;;  %v5996_v24 = vpack.c.bf16 %v5911_v32, %v5903_v46  ;;  %v5560_v33 = vpop.f32.mrb[108].mxu0  ;;  %v5653_v23 = vpop.f32.mrb[108].mxu1  ;;  %v18784_v52 = vld [vmem:[#allocation18_spill] sm:$0xff] }
 0x46d   : > { %v5561_v18 = vadd.f32 %v5560_v33, %v18781_v29  ;;  %v5654_v34 = vadd.f32 %v5653_v23, %v18781_v29  ;;  %v5562_v2 = vpop.f32.mrb[109].mxu0  ;;  %v5655_v55 = vpop.f32.mrb[109].mxu1 }
 0x46e   : > { %v5563_v60 = vadd.f32 %v5562_v2, %v18781_v29  ;;  %v5656_v16 = vadd.f32 %v5655_v55, %v18781_v29  ;;  %v5564_v22 = vpop.f32.mrb[110].mxu0  ;;  %v5657_v21 = vpop.f32.mrb[110].mxu1  ;;  %6150 = vmatprep.subr.bf16.mxu0 %v5994_v28  ;;  %6243 = vmatprep.subr.bf16.mxu1 %v5996_v24 }
 0x46f   : > { %v5565_v53 = vadd.f32 %v5564_v22, %v18782_v62  ;;  %v5658_v31 = vadd.f32 %v5657_v21, %v18782_v62  ;;  %v5566_v6 = vpop.f32.mrb[111].mxu0  ;;  %v5659_v20 = vpop.f32.mrb[111].mxu1  ;;  %6151 = vmatpush1.bf16.msra.mxu0 %v5993_v8  ;;  %6244 = vmatpush1.bf16.msra.mxu1 %v5995_v40  ;;  %v5916_v43 = vmax.f32 %v5561_v18, 0.0  ;;  %v5918_v42 = vmax.f32 %v5654_v34, 0.0 }
 0x470   : > { %v5567_v57 = vadd.f32 %v5566_v6, %v18782_v62  ;;  %v5660_v45 = vadd.f32 %v5659_v20, %v18782_v62  ;;  %v5917_v4 = vmax.f32 %v5563_v60, 0.0  ;;  %v5919_v15 = vmax.f32 %v5656_v16, 0.0 }
 0x471   : > { %v5924_v12 = vmax.f32 %v5565_v53, 0.0  ;;  %v5926_v5 = vmax.f32 %v5658_v31, 0.0 }
 0x472   : > { %v5925_v47 = vmax.f32 %v5567_v57, 0.0  ;;  %v5927_v17 = vmax.f32 %v5660_v45, 0.0  ;;  %v18785_v45 = vld [vmem:[#allocation21_spill] sm:$0xff] }
 0x473   : > { %v6001_v30 = vpack.c.bf16 %v5924_v12, %v5916_v43  ;;  %v6003_v35 = vpack.c.bf16 %v5926_v5, %v5918_v42 }
 0x474   : > { %v6002_v3 = vpack.c.bf16 %v5925_v47, %v5917_v4  ;;  %v6004_v63 = vpack.c.bf16 %v5927_v17, %v5919_v15  ;;  %v5570_v41 = vpop.f32.mrb[112].mxu0  ;;  %v5663_v14 = vpop.f32.mrb[112].mxu1 }
 0x475   : > { %v5571_v56 = vadd.f32 %v5570_v41, %v18783_v26  ;;  %v5664_v1 = vadd.f32 %v5663_v14, %v18783_v26  ;;  %v5572_v58 = vpop.f32.mrb[113].mxu0  ;;  %v5665_v61 = vpop.f32.mrb[113].mxu1 }
 0x476   : > { %v5573_v36 = vadd.f32 %v5572_v58, %v18783_v26  ;;  %v5666_v9 = vadd.f32 %v5665_v61, %v18783_v26  ;;  %v5574_v0 = vpop.f32.mrb[114].mxu0  ;;  %v5667_v46 = vpop.f32.mrb[114].mxu1  ;;  %6152 = vmatprep.subr.bf16.mxu0 %v6002_v3  ;;  %6245 = vmatprep.subr.bf16.mxu1 %v6004_v63 }
 0x477   : > { %v5575_v32 = vadd.f32 %v5574_v0, %v18784_v52  ;;  %v5668_v8 = vadd.f32 %v5667_v46, %v18784_v52  ;;  %v5576_v40 = vpop.f32.mrb[115].mxu0  ;;  %v5669_v28 = vpop.f32.mrb[115].mxu1  ;;  %6153 = vmatpush1.bf16.msra.mxu0 %v6001_v30  ;;  %6246 = vmatpush1.bf16.msra.mxu1 %v6003_v35  ;;  %v5932_v23 = vmax.f32 %v5571_v56, 0.0  ;;  %v5934_v18 = vmax.f32 %v5664_v1, 0.0  ;;  %v18786_v30 = vld [vmem:[#allocation20_spill] sm:$0xff] }
 0x478   : > { %v5577_v24 = vadd.f32 %v5576_v40, %v18784_v52  ;;  %v5670_v33 = vadd.f32 %v5669_v28, %v18784_v52  ;;  %v5933_v55 = vmax.f32 %v5573_v36, 0.0  ;;  %v5935_v60 = vmax.f32 %v5666_v9, 0.0 }
 0x479   : > { %v5940_v34 = vmax.f32 %v5575_v32, 0.0  ;;  %v5942_v2 = vmax.f32 %v5668_v8, 0.0 }
 0x47a   : > { %v5941_v16 = vmax.f32 %v5577_v24, 0.0  ;;  %v5943_v22 = vmax.f32 %v5670_v33, 0.0  ;;  %v15997_v33 = vld [vmem:[%s18486_s4 + $0x60] sm:$0xff]  }
 0x47b   : > { %v6009_v21 = vpack.c.bf16 %v5940_v34, %v5932_v23  ;;  %v6011_v53 = vpack.c.bf16 %v5942_v2, %v5934_v18  ;;  %v16008_v23 = vld [vmem:[%s18486_s4 + $0x68] sm:$0xff]   ;;  %v16019_v18 = vld [vmem:[%s18486_s4 + $0x70] sm:$0xff]   ;;  %v16030_v34 = vld [vmem:[%s18486_s4 + $0x78] sm:$0xff]  }
 0x47c   : > { %v6010_v31 = vpack.c.bf16 %v5941_v16, %v5933_v55  ;;  %v6012_v6 = vpack.c.bf16 %v5943_v22, %v5935_v60  ;;  %v5580_v20 = vpop.f32.mrb[116].mxu0  ;;  %v5673_v57 = vpop.f32.mrb[116].mxu1  ;;  %v16041_v2 = vld [vmem:[%s18486_s4 + $0x80] sm:$0xff]   ;;  %v16052_v55 = vld [vmem:[%s18486_s4 + $0x88] sm:$0xff]  }
 0x47d   : > { %v5581_v43 = vadd.f32 %v5580_v20, %v18785_v45  ;;  %v5674_v42 = vadd.f32 %v5673_v57, %v18785_v45  ;;  %v5582_v12 = vpop.f32.mrb[117].mxu0  ;;  %v5675_v5 = vpop.f32.mrb[117].mxu1  ;;  %18787 = vst [vmem:[#allocation10_spill] sm:$0xff] %v16041_v2  ;;  %18788 = vst [vmem:[#allocation9_spill] sm:$0xff] %v16052_v55  ;;  %v16061_v60 = vld [vmem:[%s15240_s21] sm:$0x77] }
 0x47e   : > { %v5583_v4 = vadd.f32 %v5582_v12, %v18785_v45  ;;  %v5676_v15 = vadd.f32 %v5675_v5, %v18785_v45  ;;  %v5584_v47 = vpop.f32.mrb[118].mxu0  ;;  %v5677_v17 = vpop.f32.mrb[118].mxu1  ;;  %6154 = vmatprep.subr.bf16.mxu0 %v6010_v31  ;;  %6247 = vmatprep.subr.bf16.mxu1 %v6012_v6  ;;  %v16064_v16 = vmul.f32 2.0, %v16061_v60  ;;  %v6617_v22 = vand.u32 2139095040, %v16061_v60  ;;  %v16069_v12 = vld [vmem:[%s15240_s21 + $0x8] sm:$0x77] }
 0x47f   : > { %v5585_v35 = vadd.f32 %v5584_v47, %v18786_v30  ;;  %v5678_v3 = vadd.f32 %v5677_v17, %v18786_v30  ;;  %v5586_v63 = vpop.f32.mrb[119].mxu0  ;;  %v5679_v41 = vpop.f32.mrb[119].mxu1  ;;  %6155 = vmatpush1.bf16.msra.mxu0 %v6009_v21  ;;  %6248 = vmatpush1.bf16.msra.mxu1 %v6011_v53  ;;  %v5948_v1 = vmax.f32 %v5581_v43, 0.0  ;;  %v5950_v58 = vmax.f32 %v5674_v42, 0.0 }
 0x480   : > { %v5587_v14 = vadd.f32 %v5586_v63, %v18786_v30  ;;  %v5680_v56 = vadd.f32 %v5679_v41, %v18786_v30  ;;  %v5949_v9 = vmax.f32 %v5583_v4, 0.0  ;;  %v5951_v0 = vmax.f32 %v5676_v15, 0.0 }
 0x481   : > { %v5956_v61 = vmax.f32 %v5585_v35, 0.0  ;;  %v5958_v36 = vmax.f32 %v5678_v3, 0.0  ;;  %v7449_v21 = vand.u32 2139095040, %v16064_v16  ;;  %v6618_v53 = vshrl.u32 %v6617_v22, 23 }
 0x482   : > { %v5957_v46 = vmax.f32 %v5587_v14, 0.0  ;;  %v5959_v32 = vmax.f32 %v5680_v56, 0.0  ;;  %v18602_v4 = vand.u32 2147483647, %v16061_v60  ;;  %v6721_v15 = vand.u32 2139095040, %v16069_v12 }
 0x483   : > { %v6017_v8 = vpack.c.bf16 %v5956_v61, %v5948_v1  ;;  %v6019_v40 = vpack.c.bf16 %v5958_v36, %v5950_v58  ;;  %v7450_v31 = vshrl.u32 %v7449_v21, 23  ;;  %v11884_v6 = vadd.s32 4294967169, %v6618_v53 }
 0x484   : > { %v6018_v28 = vpack.c.bf16 %v5957_v46, %v5949_v9  ;;  %v6020_v24 = vpack.c.bf16 %v5959_v32, %v5951_v0  ;;  %v16074_v47 = vmul.f32 2.0, %v16069_v12  ;;  %v18789_v35 = vmov 683565275  }
 0x485   : > { %v11916_v20 = vadd.s32 4294967169, %v7450_v31  ;;  %v6624_v57 = vadd.s32 1, %v11884_v6  ;;  %v18790_v63 = vmov 2475754826   ;;  %v6621_v14 = vand.u32 8388607, %v18602_v4 }
 0x486   : > { %6156 = vmatprep.subr.bf16.mxu0 %v6018_v28  ;;  %6249 = vmatprep.subr.bf16.mxu1 %v6020_v24  ;;  %v18791_v1 = vmov 2131351028   ;;  %v18792_v61 = vmov 2102212464   ;;  %v18794_v53 = vmov 1326507024  }
 0x487   : > { %6157 = vmatpush1.bf16.msra.mxu0 %v6017_v8  ;;  %6250 = vmatpush1.bf16.msra.mxu1 %v6019_v40  ;;  %vm6625_vm11 = vcmp.gt.s32.totalorder %v6624_v57, 0  ;;  %v7456_v43 = vadd.s32 1, %v11916_v20  ;;  %v18793_v8 = vmov 920167782   ;;  %vm6616_vm12 = vcmp.lt.s32.totalorder %v16061_v60, 0 }
 0x488   : > { %v6626_v42 = vsel %vm6625_vm11, %v6624_v57, 0  ;;  %v6622_v57 = vor.u32 8388608, %v6621_v14 }
 0x489   : > { %v6628_v5 = vand.u32 31, %v6626_v42  ;;  %vm7457_vm8 = vcmp.gt.s32.totalorder %v7456_v43, 0  ;;  %v16080_v56 = vshrl.u32 %v6626_v42, 5 }
 0x48a   : > { %11860 = vmatmul.mubr.msk.bf16.vlgmr.msra.gmra.mrb[144].mxu0 %vm18616_vm2, %v15997_v33  ;;  %11866 = vmatmul.mubr.msk.bf16.vlgmr.msra.gmra.mrb[144].mxu1 %vm18616_vm2, %v15997_v33 }
 0x48b   : > { %6188 = vmatprep.mubr.bf16.mxu0 %v18690_v13  ;;  %6281 = vmatprep.mubr.bf16.mxu1 %v18690_v13  ;;  %v6629_v17 = vsub.s32 32, %v6628_v5  ;;  %v6631_v3 = vshll.u32 %v18789_v35, %v6628_v5  ;;  %v6634_v41 = vshll.u32 %v18790_v63, %v6628_v5  ;;  %v6637_v58 = vshll.u32 %v18791_v1, %v6628_v5 }
 0x48c   : > { %v6640_v36 = vshll.u32 %v18792_v61, %v6628_v5  ;;  %v6643_v40 = vshll.u32 %v18793_v8, %v6628_v5  ;;  %vm6646_vm5 = vcmp.lt.s32.totalorder %v16080_v56, 1  ;;  %vm6647_vm1 = vcmp.lt.s32.totalorder %v16080_v56, 2 }
 0x48d   : > { %v6632_v0 = vshrl.u32 %v18790_v63, %v6629_v17  ;;  %v6635_v46 = vshrl.u32 %v18791_v1, %v6629_v17  ;;  %v6638_v32 = vshrl.u32 %v18792_v61, %v6629_v17  ;;  %v6630_v22 = vshrl.u32 %v18789_v35, %v6629_v17 }
 0x48e   : > { %v6641_v21 = vshrl.u32 %v18793_v8, %v6629_v17  ;;  %v6644_v31 = vshrl.u32 %v18794_v53, %v6629_v17  ;;  %vm6648_vm4 = vcmp.lt.s32.totalorder %v16080_v56, 3  ;;  %vm6649_vm13 = vcmp.lt.s32.totalorder %v16080_v56, 4 }
 0x48f   : > { %v6633_v42 = vor.u32 %v6632_v0, %v6631_v3  ;;  %v6636_v4 = vor.u32 %v6635_v46, %v6634_v41  ;;  %v6639_v5 = vor.u32 %v6638_v32, %v6637_v58 }
 0x490   : > { %v6642_v10 = vor.u32 %v6641_v21, %v6640_v36  ;;  %v6645_v19 = vor.u32 %v6644_v31, %v6643_v40  ;;  %v6662_v21 = vshll.u32 %v6622_v57, 8 }
 0x491   : > { %v6651_v3 = vsel %vm6649_vm13, %v6639_v5, 2102212464  ;;  %v6654_v41 = vsel %vm6646_vm5, %v6633_v42, %v6636_v4  ;;  %v6658_v36 = vsel %vm6646_vm5, %v6636_v4, %v6639_v5  ;;  %v6650_v32 = vsel %vm6646_vm5, %v6630_v22, %v6633_v42 }
 0x492   : > { %11861 = vmatmul.mubr.msk.bf16.gmra.mrb[148].mxu0 %vm18616_vm2, %v16008_v23  ;;  %11867 = vmatmul.mubr.msk.bf16.gmra.mrb[148].mxu1 %vm18616_vm2, %v16008_v23  ;;  %v6655_v14 = vsel %vm6649_vm13, %v6642_v10, 920167782  ;;  %v6652_v40 = vsel %vm6648_vm4, %v6636_v4, %v6651_v3 }
 0x493   : > { %6198 = vmatprep.mubr.bf16.mxu0 %v18690_v13  ;;  %6291 = vmatprep.mubr.bf16.mxu1 %v18690_v13  ;;  %v6656_v58 = vsel %vm6648_vm4, %v6639_v5, %v6655_v14 }
 0x49a   : > { %11862 = vmatmul.mubr.msk.bf16.gmra.mrb[152].mxu0 %vm18616_vm2, %v16019_v18  ;;  %11868 = vmatmul.mubr.msk.bf16.gmra.mrb[152].mxu1 %vm18616_vm2, %v16019_v18 }
 0x49b   : > { %6208 = vmatprep.mubr.bf16.mxu0 %v18690_v13  ;;  %6301 = vmatprep.mubr.bf16.mxu1 %v18690_v13 }
 0x4a2   : > { %11863 = vmatmul.mubr.msk.bf16.gmra.mrb[156].mxu0 %vm18616_vm2, %v16030_v34  ;;  %11869 = vmatmul.mubr.msk.bf16.gmra.mrb[156].mxu1 %vm18616_vm2, %v16030_v34 }
 0x4a3   : > { %6218 = vmatprep.mubr.bf16.mxu0 %v18690_v13  ;;  %6311 = vmatprep.mubr.bf16.mxu1 %v18690_v13 }
 0x4aa   : > { %11864 = vmatmul.mubr.msk.bf16.gmra.mrb[160].mxu0 %vm18616_vm2, %v16041_v2  ;;  %11870 = vmatmul.mubr.msk.bf16.gmra.mrb[160].mxu1 %vm18616_vm2, %v16041_v2 }
 0x4ab   : > { %6228 = vmatprep.mubr.bf16.mxu0 %v18690_v13  ;;  %6321 = vmatprep.mubr.bf16.mxu1 %v18690_v13 }
 0x4b2   : > { %11865 = vmatmul.mubr.msk.bf16.gmra.mrb[164].mxu0 %vm18616_vm2, %v16052_v55  ;;  %11871 = vmatmul.mubr.msk.bf16.gmra.mrb[164].mxu1 %vm18616_vm2, %v16052_v55 }
 0x4b3   : > { %6364 = vmatprep.mubr.bf16.mxu0 %v18690_v13  ;;  %6457 = vmatprep.mubr.bf16.mxu1 %v18690_v13 }
 0x4ef   : > { %v5716_v9 = vpop.f32.mrb[120].mxu0 }
 0x4f0   : > { %v5717_v28 = vadd.f32 %v5716_v9, %v18776_v25  ;;  %v5718_v24 = vpop.f32.mrb[121].mxu0 }
 0x4f1   : > { %v5719_v6 = vadd.f32 %v5718_v24, %v18776_v25  ;;  %v5720_v20 = vpop.f32.mrb[122].mxu0 }
 0x4f2   : > { %v5872_v37 = vmax.f32 %v5717_v28, 0.0  ;;  %v5721_v38 = vadd.f32 %v5720_v20, %v18777_v44  ;;  %v5722_v59 = vpop.f32.mrb[123].mxu0  ;;  %v6659_v28 = vsel %vm6649_vm13, %v6645_v19, 1326507024  ;;  %v7553_v19 = vand.u32 2139095040, %v16074_v47 }
 0x4f3   : > { %v5873_v9 = vmax.f32 %v5719_v6, 0.0  ;;  %v5723_v11 = vadd.f32 %v5722_v59, %v18777_v44  ;;  %v16102_v59 = vsel %vm7457_vm8, %v7456_v43, 0  ;;  %v6722_v6 = vshrl.u32 %v6721_v15, 23 }
 0x4f4   : > { %v5880_v51 = vmax.f32 %v5721_v38, 0.0 }
 0x4f5   : > { %v5881_v17 = vmax.f32 %v5723_v11, 0.0 }
 0x4f6   : > { %v5981_v0 = vpack.c.bf16 %v5880_v51, %v5872_v37  ;;  %v6657_v51 = vsel %vm6647_vm1, %v6654_v41, %v6656_v58  ;;  %v6660_v37 = vsel %vm6648_vm4, %v6642_v10, %v6659_v28  ;;  %v16120_v10 = vand.u32 31, %v16102_v59 }
 0x4f7   : > { %v5982_v46 = vpack.c.bf16 %v5881_v17, %v5873_v9  ;;  %v5726_v38 = vpop.f32.mrb[124].mxu0  ;;  %v6661_v22 = vsel %vm6647_vm1, %v6658_v36, %v6660_v37  ;;  %v6653_v9 = vsel %vm6647_vm1, %v6650_v32, %v6652_v40  ;;  %v11888_v36 = vadd.s32 4294967169, %v6722_v6 }
 0x4f8   : > { %v5727_v11 = vadd.f32 %v5726_v38, %v15146_v39  ;;  %v5728_v24 = vpop.f32.mrb[125].mxu0  ;;  %v16116_v42 = vmul.u32.u64.low %v6662_v21, %v6661_v22  ;;  %v16117_v5 = vmul.u32.u64.high %v6662_v21, %v6661_v22, %v16116_v42  ;;  %v6669_v38 = vmul.u32 %v6662_v21, %v6653_v9 }
 0x4f9   : > { %v5729_v43 = vadd.f32 %v5728_v24, %v15146_v39  ;;  %v5730_v31 = vpop.f32.mrb[126].mxu0  ;;  %6332 = vmatprep.subr.bf16.mxu0 %v5982_v46  ;;  %v16125_v17 = vmul.u32.u64.low %v6662_v21, %v6657_v51  ;;  %v16126_v3 = vmul.u32.u64.high %v6662_v21, %v6657_v51, %v16125_v17  ;;  %v18610_v28 = vand.u32 2147483647, %v16064_v16 }
 0x4fa   : > { %v5731_v4 = vadd.f32 %v5730_v31, %v18778_v7  ;;  %v5732_v20 = vpop.f32.mrb[127].mxu0  ;;  %6333 = vmatpush1.bf16.msra.mxu0 %v5981_v0  ;;  %v5888_v15 = vmax.f32 %v5727_v11, 0.0  ;;  %v7554_v0 = vshrl.u32 %v7553_v19, 23  ;;  %v7461_v32 = vsub.s32 32, %v16120_v10 }
 0x4fb   : > { %v5733_v57 = vadd.f32 %v5732_v20, %v18778_v7  ;;  %v5889_v14 = vmax.f32 %v5729_v43, 0.0  ;;  %vm6671_vm7 = vc.u32 %v16117_v5, %v16125_v17  ;;  %v6672_v56 = vadd.s32 1, %v16126_v3 }
 0x4fc   : > { %v5896_v41 = vmax.f32 %v5731_v4, 0.0  ;;  %v16135_v21 = vadd.s32 4294967169, %v7554_v0  ;;  %v16140_v4 = vand.u32 8388607, %v18610_v28  ;;  %v16142_v20 = vadd.s32 1, %v11888_v36 }
 0x4fd   : > { %v5897_v58 = vmax.f32 %v5733_v57, 0.0  ;;  %v6673_v31 = vsel %vm6671_vm7, %v6672_v56, %v16126_v3  ;;  %v7463_v57 = vshll.u32 %v18789_v35, %v16120_v10  ;;  %v7464_v9 = vshrl.u32 %v18790_v63, %v7461_v32 }
 0x4fe   : > { %v5989_v46 = vpack.c.bf16 %v5896_v41, %v5888_v15  ;;  %v6674_v19 = vadd.s32 %v6673_v31, %v6669_v38  ;;  %v7466_v3 = vshll.u32 %v18790_v63, %v16120_v10  ;;  %v7469_v36 = vshll.u32 %v18791_v1, %v16120_v10 }
 0x4ff   : > { %v5990_v24 = vpack.c.bf16 %v5897_v58, %v5889_v14  ;;  %v5736_v37 = vpop.f32.mrb[128].mxu0  ;;  %v7467_v58 = vshrl.u32 %v18791_v1, %v7461_v32  ;;  %v7470_v38 = vshrl.u32 %v18792_v61, %v7461_v32  ;;  %v7472_v56 = vshll.u32 %v18792_v61, %v16120_v10 }
 0x500   : > { %v5737_v40 = vadd.f32 %v5736_v37, %v18779_v54  ;;  %v5738_v11 = vpop.f32.mrb[129].mxu0  ;;  %v6675_v14 = vadd.s32 536870912, %v6674_v19  ;;  %v16158_v31 = vadd.s32 %v16125_v17, %v16117_v5  ;;  %v7475_v17 = vshll.u32 %v18793_v8, %v16120_v10 }
 0x501   : > { %v5739_v51 = vadd.f32 %v5738_v11, %v18779_v54  ;;  %v5740_v43 = vpop.f32.mrb[130].mxu0  ;;  %6334 = vmatprep.subr.bf16.mxu0 %v5990_v24  ;;  %v7473_v11 = vshrl.u32 %v18793_v8, %v7461_v32  ;;  %v7468_v5 = vor.u32 %v7467_v58, %v7466_v3  ;;  %v16174_v49 = vor.u32 %v7470_v38, %v7469_v36 }
 0x502   : > { %v5741_v22 = vadd.f32 %v5740_v43, %v18780_v50  ;;  %v5742_v6 = vpop.f32.mrb[131].mxu0  ;;  %6335 = vmatpush1.bf16.msra.mxu0 %v5989_v46  ;;  %v5904_v15 = vmax.f32 %v5737_v40, 0.0  ;;  %v6676_v37 = vshrl.u32 %v6675_v14, 30  ;;  %v7465_v14 = vor.u32 %v7464_v9, %v7463_v57 }
 0x503   : > { %v5743_v42 = vadd.f32 %v5742_v6, %v18780_v50  ;;  %v5905_v0 = vmax.f32 %v5739_v51, 0.0  ;;  %v7474_v27 = vor.u32 %v7473_v11, %v7472_v56  ;;  %vm6729_vm15 = vcmp.gt.s32.totalorder %v16142_v20, 0 }
 0x504   : > { %v5912_v41 = vmax.f32 %v5741_v22, 0.0  ;;  %v16162_v22 = vshrl.u32 %v16102_v59, 5  ;;  %v7476_v59 = vshrl.u32 %v18794_v53, %v7461_v32  ;;  %v6700_v36 = vsub.s32 4, %v6676_v37 }
 0x505   : > { %v5913_v46 = vmax.f32 %v5743_v42, 0.0  ;;  %vm7448_vm1 = vcmp.lt.s32.totalorder %v16064_v16, 0 }
 0x506   : > { %v5997_v24 = vpack.c.bf16 %v5912_v41, %v5904_v15  ;;  %v6677_v15 = vshll.u32 %v6676_v37, 30  ;;  %v7462_v41 = vshrl.u32 %v18789_v35, %v7461_v32  ;;  %vm7478_vm6 = vcmp.lt.s32.totalorder %v16162_v22, 1 }
 0x507   : > { %v5998_v43 = vpack.c.bf16 %v5913_v46, %v5905_v0  ;;  %v5746_v40 = vpop.f32.mrb[132].mxu0  ;;  %vm7479_vm14 = vcmp.lt.s32.totalorder %v16162_v22, 2  ;;  %vm7481_vm10 = vcmp.lt.s32.totalorder %v16162_v22, 4  ;;  %v7477_v38 = vor.u32 %v7476_v59, %v7475_v17 }
 0x508   : > { %v5747_v6 = vadd.f32 %v5746_v40, %v18781_v29  ;;  %v5748_v42 = vpop.f32.mrb[133].mxu0  ;;  %v16172_v51 = vsub.s32 %v6674_v19, %v6677_v15  ;;  %v7483_v19 = vsel %vm7481_vm10, %v16174_v49, 2102212464  ;;  %vm7480_vm3 = vcmp.lt.s32.totalorder %v16162_v22, 3 }
 0x509   : > { %v5749_v0 = vadd.f32 %v5748_v42, %v18781_v29  ;;  %v5750_v46 = vpop.f32.mrb[134].mxu0  ;;  %6336 = vmatprep.subr.bf16.mxu0 %v5998_v43  ;;  %v7482_v43 = vsel %vm7478_vm6, %v7462_v41, %v7465_v14  ;;  %v7487_v41 = vsel %vm7481_vm10, %v7474_v27, 920167782 }
 0x50a   : > { %v5751_v28 = vadd.f32 %v5750_v46, %v18782_v62  ;;  %v5752_v40 = vpop.f32.mrb[135].mxu0  ;;  %6337 = vmatpush1.bf16.msra.mxu0 %v5997_v24  ;;  %v5920_v10 = vmax.f32 %v5747_v6, 0.0  ;;  %v6680_v32 = vsub.s32 0, %v16172_v51  ;;  %v16193_v46 = vsel %vm7478_vm6, %v7465_v14, %v7468_v5 }
 0x50b   : > { %v5753_v57 = vadd.f32 %v5752_v40, %v18782_v62  ;;  %v5921_v3 = vmax.f32 %v5749_v0, 0.0  ;;  %v7484_v0 = vsel %vm7480_vm3, %v7468_v5, %v7483_v19  ;;  %v16203_v14 = vsel %vm6616_vm12, %v6700_v36, %v6676_v37 }
 0x50c   : > { %v5928_v9 = vmax.f32 %v5751_v28, 0.0  ;;  %v11885_v11 = vmin.u32 %v6680_v32, %v16172_v51 }
 0x50d   : > { %v5929_v58 = vmax.f32 %v5753_v57, 0.0 }
 0x50e   : > { %v5809_v24 = vpop.f32.mrb[120].mxu1  ;;  %v6005_v56 = vpack.c.bf16 %v5928_v9, %v5920_v10  ;;  %v6682_v10 = vclz %v11885_v11 }
 0x50f   : > { %v5810_v28 = vadd.f32 %v5809_v24, %v18776_v25  ;;  %v5811_v6 = vpop.f32.mrb[121].mxu1  ;;  %v6006_v42 = vpack.c.bf16 %v5929_v58, %v5921_v3  ;;  %v5756_v15 = vpop.f32.mrb[136].mxu0 }
 0x510   : > { %v5812_v17 = vadd.f32 %v5811_v6, %v18776_v25  ;;  %v5813_v59 = vpop.f32.mrb[122].mxu1  ;;  %v5757_v40 = vadd.f32 %v5756_v15, %v18783_v26  ;;  %v5758_v57 = vpop.f32.mrb[137].mxu0  ;;  %v7490_v25 = vsel %vm7478_vm6, %v7468_v5, %v16174_v49  ;;  %v16212_v6 = vsel %vm7479_vm14, %v7482_v43, %v7484_v0 }
 0x511   : > { %v5814_v9 = vadd.f32 %v5813_v59, %v18777_v44  ;;  %v5815_v32 = vpop.f32.mrb[123].mxu1  ;;  %v5759_v3 = vadd.f32 %v5758_v57, %v18783_v26  ;;  %v5760_v19 = vpop.f32.mrb[138].mxu0  ;;  %6338 = vmatprep.subr.bf16.mxu0 %v6006_v42  ;;  %v7491_v42 = vsel %vm7481_vm10, %v7477_v38, 1326507024  ;;  %v5874_v15 = vmax.f32 %v5810_v28, 0.0 }
 0x512   : > { %v5816_v58 = vadd.f32 %v5815_v32, %v18777_v44  ;;  %v5761_v24 = vadd.f32 %v5760_v19, %v18784_v52  ;;  %v5762_v11 = vpop.f32.mrb[139].mxu0  ;;  %6339 = vmatpush1.bf16.msra.mxu0 %v6005_v56  ;;  %v11886_v59 = vadd.s32 4294967294, %v6682_v10  ;;  %v5875_v57 = vmax.f32 %v5812_v17, 0.0 }
 0x513   : > { %v5882_v37 = vmax.f32 %v5814_v9, 0.0  ;;  %v5763_v36 = vadd.f32 %v5762_v11, %v18784_v52  ;;  %v5936_v48 = vmax.f32 %v5757_v40, 0.0  ;;  %v5937_v19 = vmax.f32 %v5759_v3, 0.0 }
 0x514   : > { %v5883_v5 = vmax.f32 %v5816_v58, 0.0  ;;  %v5944_v44 = vmax.f32 %v5761_v24, 0.0  ;;  %vm11887_vm0 = vcmp.lt.s32.totalorder %v11886_v59, 0  ;;  %v7492_v38 = vsel %vm7480_vm3, %v7474_v27, %v7491_v42 }
 0x515   : > { %v5983_v32 = vpack.c.bf16 %v5882_v37, %v5874_v15  ;;  %v5945_v55 = vmax.f32 %v5763_v36, 0.0  ;;  %v6685_v0 = vsel %vm11887_vm0, 0, %v11886_v59  ;;  %v7488_v27 = vsel %vm7480_vm3, %v16174_v49, %v7487_v41 }
 0x516   : > { %v5984_v56 = vpack.c.bf16 %v5883_v5, %v5875_v57  ;;  %v5819_v2 = vpop.f32.mrb[124].mxu1  ;;  %v6013_v43 = vpack.c.bf16 %v5944_v44, %v5936_v48  ;;  %v6686_v17 = vsub.s32 32, %v6685_v0  ;;  %v6687_v40 = vshll.u32 %v16172_v51, %v6685_v0 }
 0x517   : > { %v5820_v28 = vadd.f32 %v5819_v2, %v15146_v39  ;;  %v5821_v9 = vpop.f32.mrb[125].mxu1  ;;  %v6014_v11 = vpack.c.bf16 %v5945_v55, %v5937_v19  ;;  %v5766_v10 = vpop.f32.mrb[140].mxu0  ;;  %v6690_v15 = vsub.s32 4294967266, %v6685_v0  ;;  %v18795_v37 = vor.u32 8388608, %v16140_v4 }
 0x518   : > { %v5822_v3 = vadd.f32 %v5821_v9, %v15146_v39  ;;  %v5823_v58 = vpop.f32.mrb[126].mxu1  ;;  %6425 = vmatprep.subr.bf16.mxu1 %v5984_v56  ;;  %v5767_v48 = vadd.f32 %v5766_v10, %v18785_v45  ;;  %v5768_v24 = vpop.f32.mrb[141].mxu0  ;;  %v6688_v39 = vshrl.u32 %v16158_v31, %v6686_v17  ;;  %v7493_v41 = vsel %vm7479_vm14, %v7490_v25, %v7492_v38 }
 0x519   : > { %v5824_v2 = vadd.f32 %v5823_v58, %v18778_v7  ;;  %v5825_v55 = vpop.f32.mrb[127].mxu1  ;;  %6426 = vmatpush1.bf16.msra.mxu1 %v5983_v32  ;;  %v5769_v51 = vadd.f32 %v5768_v24, %v18785_v45  ;;  %v5770_v42 = vpop.f32.mrb[142].mxu0  ;;  %6340 = vmatprep.subr.bf16.mxu0 %v6014_v11  ;;  %v16232_v36 = vshll.u32 %v18795_v37, 8  ;;  %v5890_v59 = vmax.f32 %v5820_v28, 0.0 }
 0x51a   : > { %v5826_v57 = vadd.f32 %v5825_v55, %v18778_v7  ;;  %v5771_v5 = vadd.f32 %v5770_v42, %v18786_v30  ;;  %v5772_v49 = vpop.f32.mrb[143].mxu0  ;;  %6341 = vmatpush1.bf16.msra.mxu0 %v6013_v43  ;;  %v5891_v44 = vmax.f32 %v5822_v3, 0.0  ;;  %v6689_v56 = vor.u32 %v6688_v39, %v6687_v40 }
 0x51b   : > { %v5898_v32 = vmax.f32 %v5824_v2, 0.0  ;;  %v5773_v19 = vadd.f32 %v5772_v49, %v18786_v30  ;;  %v5952_v0 = vmax.f32 %v5767_v48, 0.0  ;;  %v6691_v9 = vadd.s32 127, %v6690_v15 }
 0x51c   : > { %v5899_v31 = vmax.f32 %v5826_v57, 0.0  ;;  %v5960_v4 = vmax.f32 %v5771_v5, 0.0  ;;  %v5953_v28 = vmax.f32 %v5769_v51, 0.0  ;;  %v7489_v7 = vsel %vm7479_vm14, %v16193_v46, %v7488_v27 }
 0x51d   : > { %v5991_v11 = vpack.c.bf16 %v5898_v32, %v5890_v59  ;;  %v5961_v10 = vmax.f32 %v5773_v19, 0.0  ;;  %v6692_v25 = vshll.u32 %v6691_v9, 23  ;;  %v6696_v38 = vcvt.s32.f32 %v6689_v56 }
 0x51e   : > { %v5992_v43 = vpack.c.bf16 %v5899_v31, %v5891_v44  ;;  %v5829_v17 = vpop.f32.mrb[128].mxu1  ;;  %v6021_v58 = vpack.c.bf16 %v5960_v4, %v5952_v0  ;;  %v16244_v48 = vmul.u32.u64.low %v16232_v36, %v7493_v41  ;;  %v16245_v2 = vmul.u32.u64.high %v16232_v36, %v7493_v41, %v16244_v48 }
 0x51f   : > { %v5830_v3 = vadd.f32 %v5829_v17, %v18779_v54  ;;  %v5831_v24 = vpop.f32.mrb[129].mxu1  ;;  %v6022_v40 = vpack.c.bf16 %v5961_v10, %v5953_v28  ;;  %v6693_v51 = vor.u32 4788187, %v6692_v25  ;;  %v18796_v39 = vand.u32 2147483647, %v16061_v60 }
 0x520   : > { %v5832_v15 = vadd.f32 %v5831_v24, %v18779_v54  ;;  %v5833_v55 = vpop.f32.mrb[130].mxu1  ;;  %6427 = vmatprep.subr.bf16.mxu1 %v5992_v43  ;;  %v16249_v22 = vmul.u32.u64.low %v16232_v36, %v7489_v7  ;;  %v16250_v46 = vmul.u32.u64.high %v16232_v36, %v7489_v7, %v16249_v22  ;;  %v7560_v54 = vadd.s32 1, %v16135_v21 }
 0x521   : > { %v5834_v27 = vadd.f32 %v5833_v55, %v18780_v50  ;;  %v5835_v42 = vpop.f32.mrb[131].mxu1  ;;  %6428 = vmatpush1.bf16.msra.mxu1 %v5991_v11  ;;  %6342 = vmatprep.subr.bf16.mxu0 %v6022_v40  ;;  %vm16256_vm11 = vcmp.le.f32.partialorder %v18796_v39, 0.7853982  ;;  %v6694_v57 = vand.u32 2147483647, %v6693_v51  ;;  %v16268_v49 = vsel %vm6729_vm15, %v16142_v20, 0 }
 0x522   : > { %v5836_v59 = vadd.f32 %v5835_v42, %v18780_v50  ;;  %6343 = vmatpush1.bf16.msra.mxu0 %v6021_v58  ;;  %v6703_v5 = vsel %vm16256_vm11, 0, %v16203_v14  ;;  %v5906_v41 = vmax.f32 %v5830_v3, 0.0  ;;  %v7501_v32 = vmul.u32 %v16232_v36, %v16212_v6 }
 0x523   : > { %v5914_v44 = vmax.f32 %v5834_v27, 0.0  ;;  %vm7503_vm8 = vc.u32 %v16245_v2, %v16249_v22  ;;  %v5907_v50 = vmax.f32 %v5832_v15, 0.0  ;;  %v6697_v19 = vmul.f32 %v6696_v38, %v6694_v57 }
 0x524   : > { %v5915_v21 = vmax.f32 %v5836_v59, 0.0  ;;  %v7504_v56 = vadd.s32 1, %v16250_v46  ;;  %v16278_v20 = vand.u32 31, %v16268_v49  ;;  %vm7561_vm5 = vcmp.gt.s32.totalorder %v7560_v54, 0 }
 0x525   : > { %v5999_v31 = vpack.c.bf16 %v5914_v44, %v5906_v41  ;;  %11872 = vmatmul.mubr.msk.bf16.vlgmr.msra.gmra.mrb[168].mxu0 %vm18616_vm2, %v15997_v33  ;;  %v6698_v6 = vxor.u32 2147483648, %v6697_v19  ;;  %v6707_v36 = vadd.s32 3, %v6703_v5  ;;  %v6718_v17 = vand.u32 2147483647, %v16069_v12 }
 0x526   : > { %v6000_v14 = vpack.c.bf16 %v5915_v21, %v5907_v50  ;;  %v5839_v0 = vpop.f32.mrb[132].mxu1  ;;  %6374 = vmatprep.mubr.bf16.mxu0 %v18690_v13  ;;  %v7505_v4 = vsel %vm7503_vm8, %v7504_v56, %v16250_v46  ;;  %v16287_v58 = vsel %vm7561_vm5, %v7560_v54, 0  ;;  %v16293_v24 = vand.u32 3, %v6703_v5 }
 0x527   : > { %v5840_v9 = vadd.f32 %v5839_v0, %v18781_v29  ;;  %v5841_v11 = vpop.f32.mrb[133].mxu1  ;;  %v7506_v28 = vadd.s32 %v7505_v4, %v7501_v32  ;;  %v6699_v43 = vsel %vm6616_vm12, %v6698_v6, %v6697_v19  ;;  %v16296_v48 = vand.u32 3, %v6707_v36 }
 0x528   : > { %v5842_v10 = vadd.f32 %v5841_v11, %v18781_v29  ;;  %v5843_v7 = vpop.f32.mrb[134].mxu1  ;;  %6429 = vmatprep.subr.bf16.mxu1 %v6000_v14  ;;  %v6702_v3 = vsel %vm16256_vm11, %v16061_v60, %v6699_v43  ;;  %v6733_v15 = vsub.s32 32, %v16278_v20  ;;  %v16303_v39 = vand.u32 8388607, %v6718_v17 }
 0x529   : > { %v5844_v25 = vadd.f32 %v5843_v7, %v18782_v62  ;;  %v5845_v38 = vpop.f32.mrb[135].mxu1  ;;  %6430 = vmatpush1.bf16.msra.mxu1 %v5999_v31  ;;  %v7507_v29 = vadd.s32 536870912, %v7506_v28  ;;  %12521 = vcosq.f32 %v6702_v3  ;;  %v5922_v55 = vmax.f32 %v5840_v9, 0.0 }
 0x52a   : > { %v5846_v40 = vadd.f32 %v5845_v38, %v18782_v62  ;;  %12523 = vsinq.f32 %v6702_v3  ;;  %v5923_v27 = vmax.f32 %v5842_v10, 0.0  ;;  %v16309_v54 = vand.u32 31, %v16287_v58 }
 0x52b   : > { %v5930_v51 = vmax.f32 %v5844_v25, 0.0  ;;  %v16299_v46 = vshrl.u32 %v7507_v29, 30  ;;  %v16315_v5 = vadd.s32 %v16249_v22, %v16245_v2  ;;  %v8278_v41 = vcombine.high %v16061_v60, %v16061_v60 }
 0x52c   : > { %v5931_v42 = vmax.f32 %v5846_v40, 0.0  ;;  %vm6710_vm4 = vcmp.eq.s32.totalorder %v16296_v48, 0  ;;  %vm6713_vm13 = vcmp.eq.s32.totalorder %v16296_v48, 2  ;;  %vm7128_vm7 = vcmp.eq.s32.totalorder %v16293_v24, 2 }
 0x52d   : > { %v6007_v37 = vpack.c.bf16 %v5930_v51, %v5922_v55  ;;  %11873 = vmatmul.mubr.msk.bf16.gmra.mrb[172].mxu0 %vm18616_vm2, %v16008_v23  ;;  %v7509_v62 = vshll.u32 %v16299_v46, 30  ;;  %v6735_v21 = vshll.u32 %v18789_v35, %v16278_v20  ;;  %v6736_v2 = vshrl.u32 %v18790_v63, %v6733_v15 }
 0x52e   : > { %v6008_v59 = vpack.c.bf16 %v5931_v42, %v5923_v27  ;;  %v5849_v57 = vpop.f32.mrb[136].mxu1  ;;  %6384 = vmatprep.mubr.bf16.mxu0 %v18690_v13  ;;  %vm7125_vm12 = vcmp.eq.s32.totalorder %v16293_v24, 0  ;;  %v18799_v56 = vand.u32 2147483647, %v16064_v16  ;;  %v6726_v14 = vor.u32 8388608, %v16303_v39  ;;  %v18802_v39 = vld [vmem:[#allocation10_spill] sm:$0xff] }
 0x52f   : > { %v5850_v44 = vadd.f32 %v5849_v57, %v18783_v26  ;;  %v5851_v32 = vpop.f32.mrb[137].mxu1  ;;  %v16323_v50 = vsub.s32 %v7506_v28, %v7509_v62  ;;  %v16338_v0 = vshrl.u32 %v16268_v49, 5  ;;  %v6738_v6 = vshll.u32 %v18790_v63, %v16278_v20 }
 0x530   : > { %v5852_v22 = vadd.f32 %v5851_v32, %v18783_v26  ;;  %v5853_v19 = vpop.f32.mrb[138].mxu1  ;;  %6431 = vmatprep.subr.bf16.mxu1 %v6008_v59  ;;  %vm16332_vm6 = vcmp.le.f32.partialorder %v18799_v56, 0.7853982  ;;  %v16345_v9 = vshrl.u32 %v18789_v35, %v6733_v15  ;;  %v6741_v11 = vshll.u32 %v18791_v1, %v16278_v20 }
 0x531   : > { %v5854_v26 = vadd.f32 %v5853_v19, %v18784_v52  ;;  %v5855_v36 = vpop.f32.mrb[139].mxu1  ;;  %6432 = vmatpush1.bf16.msra.mxu1 %v6007_v37  ;;  %v7512_v4 = vsub.s32 0, %v16323_v50  ;;  %v7532_v49 = vsub.s32 4, %v16299_v46  ;;  %v6739_v10 = vshrl.u32 %v18791_v1, %v6733_v15 }
 0x532   : > { %v5856_v28 = vadd.f32 %v5855_v36, %v18784_v52  ;;  %v6742_v7 = vshrl.u32 %v18792_v61, %v6733_v15  ;;  %v5938_v43 = vmax.f32 %v5850_v44, 0.0  ;;  %vm6709_vm14 = vcmp.lt.s32.totalorder %v16296_v48, 2 }
 0x533   : > { %v5946_v25 = vmax.f32 %v5854_v26, 0.0  ;;  %v11917_v38 = vmin.u32 %v7512_v4, %v16323_v50  ;;  %v16355_v3 = vor.u32 %v6736_v2, %v6735_v21  ;;  %v12522_v29 = vpop.eup %12521  ;;  %v5939_v40 = vmax.f32 %v5852_v22, 0.0 }
 0x534   : > { %v5947_v55 = vmax.f32 %v5856_v28, 0.0  ;;  %v6744_v52 = vshll.u32 %v18792_v61, %v16278_v20  ;;  %v6745_v51 = vshrl.u32 %v18793_v8, %v6733_v15  ;;  %v12524_v27 = vpop.eup %12523  ;;  %vm7124_vm10 = vcmp.lt.s32.totalorder %v16293_v24, 2 }
 0x535   : > { %v6015_v42 = vpack.c.bf16 %v5946_v25, %v5938_v43  ;;  %11874 = vmatmul.mubr.msk.bf16.gmra.mrb[176].mxu0 %vm18616_vm2, %v16019_v18  ;;  %v7514_v37 = vclz %v11917_v38  ;;  %v6747_v62 = vshll.u32 %v18793_v8, %v16278_v20  ;;  %v6748_v59 = vshrl.u32 %v18794_v53, %v6733_v15 }
 0x536   : > { %v6016_v57 = vpack.c.bf16 %v5947_v55, %v5939_v40  ;;  %v5859_v44 = vpop.f32.mrb[140].mxu1  ;;  %6394 = vmatprep.mubr.bf16.mxu0 %v18690_v13  ;;  %vm6706_vm3 = vweird.f32 %v16061_v60  ;;  %v6711_v32 = vxor.u32 2147483648, %v12524_v27  ;;  %v6714_v21 = vxor.u32 2147483648, %v12522_v29 }
 0x537   : > { %v7533_v18 = vsel %vm7448_vm1, %v7532_v49, %v16299_v46  ;;  %v5860_v2 = vadd.f32 %v5859_v44, %v18785_v45  ;;  %v5861_v22 = vpop.f32.mrb[141].mxu1  ;;  %v11918_v19 = vadd.s32 4294967294, %v7514_v37  ;;  %v6740_v56 = vor.u32 %v6739_v10, %v6738_v6 }
 0x538   : > { %v6743_v20 = vor.u32 %v6742_v7, %v6741_v11  ;;  %v5862_v15 = vadd.f32 %v5861_v22, %v18785_v45  ;;  %v5863_v26 = vpop.f32.mrb[142].mxu1  ;;  %6433 = vmatprep.subr.bf16.mxu1 %v6016_v57  ;;  %v6746_v36 = vor.u32 %v6745_v51, %v6744_v52  ;;  %vm6750_vm0 = vcmp.lt.s32.totalorder %v16338_v0, 1 }
 0x539   : > { %vm6751_vm15 = vcmp.lt.s32.totalorder %v16338_v0, 2  ;;  %v5864_v4 = vadd.f32 %v5863_v26, %v18786_v30  ;;  %v5865_v28 = vpop.f32.mrb[143].mxu1  ;;  %6434 = vmatpush1.bf16.msra.mxu1 %v6015_v42  ;;  %v7535_v46 = vsel %vm16332_vm6, 0, %v7533_v18  ;;  %v6749_v49 = vor.u32 %v6748_v59, %v6747_v62 }
 0x53a   : > { %vm6753_vm11 = vcmp.lt.s32.totalorder %v16338_v0, 4  ;;  %v5866_v6 = vadd.f32 %v5865_v28, %v18786_v30  ;;  %v6712_v45 = vsel %vm6710_vm4, %v12522_v29, %v6711_v32  ;;  %v6715_v11 = vsel %vm6713_vm13, %v6714_v21, %v12524_v27 }
 0x53b   : > { %v7130_v10 = vsel %vm7128_vm7, %v6714_v21, %v12524_v27  ;;  %v5954_v7 = vmax.f32 %v5860_v2, 0.0  ;;  %v5962_v43 = vmax.f32 %v5864_v4, 0.0  ;;  %v7127_v25 = vsel %vm7125_vm12, %v12522_v29, %v6711_v32 }
 0x53c   : > { %vm11919_vm8 = vcmp.lt.s32.totalorder %v11918_v19, 0  ;;  %v5955_v38 = vmax.f32 %v5862_v15, 0.0  ;;  %v5963_v40 = vmax.f32 %v5866_v6, 0.0  ;;  %v6755_v30 = vsel %vm6753_vm11, %v6743_v20, 2102212464 }
 0x53d   : > { %v7517_v55 = vsel %vm11919_vm8, 0, %v11918_v19  ;;  %v6023_v52 = vpack.c.bf16 %v5962_v43, %v5954_v7  ;;  %11875 = vmatmul.mubr.msk.bf16.gmra.mrb[180].mxu0 %vm18616_vm2, %v16030_v34  ;;  %v6716_v29 = vsel %vm6709_vm14, %v6712_v45, %v6715_v11  ;;  %vm6752_vm5 = vcmp.lt.s32.totalorder %v16338_v0, 3 }
 0x53e   : > { %v7518_v51 = vsub.s32 32, %v7517_v55  ;;  %v7519_v42 = vshll.u32 %v16323_v50, %v7517_v55  ;;  %v7522_v27 = vsub.s32 4294967266, %v7517_v55  ;;  %v6024_v37 = vpack.c.bf16 %v5963_v40, %v5955_v38  ;;  %6404 = vmatprep.mubr.bf16.mxu0 %v18690_v13 }
 0x53f   : > { %v6754_v62 = vsel %vm6750_vm0, %v16345_v9, %v16355_v3  ;;  %v6756_v50 = vsel %vm6752_vm5, %v6740_v56, %v6755_v30  ;;  %v6758_v57 = vsel %vm6750_vm0, %v16355_v3, %v6740_v56  ;;  %v7131_v48 = vsel %vm7124_vm10, %v7127_v25, %v7130_v10 }
 0x540   : > { %v7520_v59 = vshrl.u32 %v16315_v5, %v7518_v51  ;;  %v7523_v34 = vadd.s32 127, %v7522_v27  ;;  %6435 = vmatprep.subr.bf16.mxu1 %v6024_v37  ;;  %v6759_v44 = vsel %vm6753_vm11, %v6746_v36, 920167782  ;;  %v6762_v9 = vsel %vm6750_vm0, %v6740_v56, %v6743_v20 }
 0x541   : > { %v6763_v5 = vsel %vm6753_vm11, %v6749_v49, 1326507024  ;;  %6436 = vmatpush1.bf16.msra.mxu1 %v6023_v52  ;;  %v16417_v32 = vsel %vm6706_vm3, nan, %v6716_v29  ;;  %v6760_v24 = vsel %vm6752_vm5, %v6743_v20, %v6759_v44  ;;  %v6757_v18 = vsel %vm6751_vm15, %v6754_v62, %v6756_v50 }
 0x542   : > { %v7521_v21 = vor.u32 %v7520_v59, %v7519_v42  ;;  %v7524_v3 = vshll.u32 %v7523_v34, 23  ;;  %v6761_v2 = vsel %vm6751_vm15, %v6758_v57, %v6760_v24  ;;  %v6764_v22 = vsel %vm6752_vm5, %v6746_v36, %v6763_v5 }
 0x543   : > { %v6766_v19 = vshll.u32 %v6726_v14, 8  ;;  %v6765_v26 = vsel %vm6751_vm15, %v6762_v9, %v6764_v22  ;;  %v7550_v4 = vand.u32 2147483647, %v16074_v47  ;;  %v16446_v14 = vsel %vm6706_vm3, nan, %v7131_v48 }
 0x544   : > { %v7525_v56 = vor.u32 4788187, %v7524_v3  ;;  %v7528_v15 = vcvt.s32.f32 %v7521_v21  ;;  %11878 = vmatmul.mubr.msk.bf16.vlgmr.msra.gmra.mrb[168].mxu1 %vm18616_vm2, %v15997_v33  ;;  %v7539_v36 = vadd.s32 3, %v7535_v46  ;;  %v16448_v45 = vand.u32 3, %v7535_v46 }
 0x545   : > { %v16434_v20 = vmul.u32.u64.low %v6766_v19, %v6765_v26  ;;  %v16435_v28 = vmul.u32.u64.high %v6766_v19, %v6765_v26, %v16434_v20  ;;  %v16437_v49 = vmul.u32.u64.low %v6766_v19, %v6761_v2  ;;  %v16438_v6 = vmul.u32.u64.high %v6766_v19, %v6761_v2, %v16437_v49  ;;  %6467 = vmatprep.mubr.bf16.mxu1 %v18690_v13  ;;  %11876 = vmatmul.mubr.msk.bf16.gmra.mrb[184].mxu0 %vm18616_vm2, %v18802_v39 }
 0x546   : > { %v7526_v0 = vand.u32 2147483647, %v7525_v56  ;;  %6414 = vmatprep.mubr.bf16.mxu0 %v18690_v13  ;;  %v8290_v33 = vcombine.high %v16417_v32, %v16417_v32  ;;  %v6773_v11 = vmul.u32 %v6766_v19, %v6757_v18  ;;  %v7557_v10 = vand.u32 8388607, %v7550_v4 }
 0x547   : > { %v7565_v7 = vsub.s32 32, %v16309_v54  ;;  %v16457_v25 = vshrl.u32 %v16287_v58, 5  ;;  %v7567_v38 = vshll.u32 %v18789_v35, %v16309_v54  ;;  %v7570_v46 = vshll.u32 %v18790_v63, %v16309_v54 }
 0x548   : > { %v7529_v43 = vmul.f32 %v7528_v15, %v7526_v0  ;;  %vm6775_vm4 = vc.u32 %v16435_v28, %v16437_v49  ;;  %v6776_v40 = vadd.s32 1, %v16438_v6  ;;  %v7573_v55 = vshll.u32 %v18791_v1, %v16309_v54 }
 0x549   : > { %v7576_v30 = vshll.u32 %v18792_v61, %v16309_v54  ;;  %v7558_v58 = vor.u32 8388608, %v7557_v10  ;;  %v7568_v51 = vshrl.u32 %v18790_v63, %v7565_v7  ;;  %v7571_v42 = vshrl.u32 %v18791_v1, %v7565_v7 }
 0x54a   : > { %v7530_v52 = vxor.u32 2147483648, %v7529_v43  ;;  %v6777_v27 = vsel %vm6775_vm4, %v6776_v40, %v16438_v6  ;;  %v7574_v37 = vshrl.u32 %v18792_v61, %v7565_v7  ;;  %v7577_v29 = vshrl.u32 %v18793_v8, %v7565_v7 }
 0x54b   : > { %v7579_v62 = vshll.u32 %v18793_v8, %v16309_v54  ;;  %v6778_v34 = vadd.s32 %v6777_v27, %v6773_v11  ;;  %v7569_v50 = vor.u32 %v7568_v51, %v7567_v38  ;;  %v7572_v57 = vor.u32 %v7571_v42, %v7570_v46  ;;  %v18803_v54 = vld [vmem:[#allocation9_spill] sm:$0xff] }
 0x54c   : > { %v7531_v59 = vsel %vm7448_vm1, %v7530_v52, %v7529_v43  ;;  %11879 = vmatmul.mubr.msk.bf16.gmra.mrb[172].mxu1 %vm18616_vm2, %v16008_v23  ;;  %v7575_v44 = vor.u32 %v7574_v37, %v7573_v55  ;;  %v7578_v9 = vor.u32 %v7577_v29, %v7576_v30  ;;  %v7580_v5 = vshrl.u32 %v18794_v53, %v7565_v7  ;;  %v12591_v43 = vld [vmem:[%s18486_s4 + $0x70] sm:$0xff]  }
 0x54d   : > { %v7534_v48 = vsel %vm16332_vm6, %v16064_v16, %v7531_v59  ;;  %6477 = vmatprep.mubr.bf16.mxu1 %v18690_v13  ;;  %11877 = vmatmul.mubr.msk.bf16.gmra.mrb[188].mxu0 %vm18616_vm2, %v18803_v54  ;;  %v6779_v21 = vadd.s32 536870912, %v6778_v34  ;;  %v7566_v3 = vshrl.u32 %v18789_v35, %v7565_v7  ;;  %vm7582_vm1 = vcmp.lt.s32.totalorder %v16457_v25, 1 }
 0x54e   : > { %12525 = vcosq.f32 %v7534_v48  ;;  %v7581_v23 = vor.u32 %v7580_v5, %v7579_v62  ;;  %vm7584_vm13 = vcmp.lt.s32.totalorder %v16457_v25, 3  ;;  %vm7585_vm7 = vcmp.lt.s32.totalorder %v16457_v25, 4  ;;  %8571 = vmatprep.mubr.bf16.mxu0 %v18690_v13 }
 0x54f   : > { %12527 = vsinq.f32 %v7534_v48  ;;  %v8314_v31 = vcombine.high %v16446_v14, %v16446_v14  ;;  %v6780_v24 = vshrl.u32 %v6779_v21, 30  ;;  %vm7583_vm12 = vcmp.lt.s32.totalorder %v16457_v25, 2 }
 0x550   : > { %v7587_v18 = vsel %vm7585_vm7, %v7575_v44, 2102212464  ;;  %v7590_v2 = vsel %vm7582_vm1, %v7569_v50, %v7572_v57  ;;  %v7591_v22 = vsel %vm7585_vm7, %v7578_v9, 920167782  ;;  %v7594_v19 = vsel %vm7582_vm1, %v7572_v57, %v7575_v44 }
 0x551   : > { %v7595_v56 = vsel %vm7585_vm7, %v7581_v23, 1326507024  ;;  %v7540_v15 = vand.u32 3, %v7539_v36  ;;  %v8295_v26 = vrot.slane %v8290_v33, 5  ;;  %v6781_v20 = vshll.u32 %v6780_v24, 30  ;;  %v12593_v23 = vld [vmem:[%s18486_s4 + $0x78] sm:$0xff]  }
 0x552   : > { %v7592_v6 = vsel %vm7584_vm13, %v7575_v44, %v7591_v22  ;;  %vm7538_vm6 = vweird.f32 %v16064_v16  ;;  %vm6720_vm14 = vcmp.lt.s32.totalorder %v16069_v12, 0  ;;  %v7586_v39 = vsel %vm7582_vm1, %v7566_v3, %v7569_v50  ;;  %v12592_v50 = vld [vmem:[%s15240_s21] sm:$0x77]  ;;  %v16669_v12 = vld [vmem:[%s18489_s7 + $0x8] sm:$0xff]  }
 0x553   : > { %v7588_v0 = vsel %vm7584_vm13, %v7572_v57, %v7587_v18  ;;  %v7596_v11 = vsel %vm7584_vm13, %v7578_v9, %v7595_v56  ;;  %v7598_v10 = vshll.u32 %v7558_v58, 8  ;;  %vm7956_vm10 = vcmp.lt.s32.totalorder %v16448_v45, 2 }
 0x554   : > { %v16511_v36 = vsub.s32 %v6778_v34, %v6781_v20  ;;  %v7593_v33 = vsel %vm7583_vm12, %v7590_v2, %v7592_v6  ;;  %v7597_v7 = vsel %vm7583_vm12, %v7594_v19, %v7596_v11  ;;  %11880 = vmatmul.mubr.msk.bf16.gmra.mrb[176].mxu1 %vm18616_vm2, %v12591_v43  ;;  %vm7957_vm3 = vcmp.eq.s32.totalorder %v16448_v45, 0 }
 0x555   : > { %v16522_v38 = vrot.slane %v8314_v31, 2  ;;  %v16524_v46 = vmul.u32.u64.low %v7598_v10, %v7597_v7  ;;  %v16525_v40 = vmul.u32.u64.high %v7598_v10, %v7597_v7, %v16524_v46  ;;  %6487 = vmatprep.mubr.bf16.mxu1 %v18690_v13  ;;  %v8294_v55 = vrot.slane %v16417_v32, 5 }
 0x556   : > { %v8371_v30 = vsel %vm18618_vm9, %v8278_v41, %v8295_v26  ;;  %v6784_v52 = vsub.s32 0, %v16511_v36  ;;  %v7589_v58 = vsel %vm7583_vm12, %v7586_v39, %v7588_v0  ;;  %vm7541_vm0 = vcmp.lt.s32.totalorder %v7540_v15, 2 }
 0x557   : > { %vm7960_vm15 = vcmp.eq.s32.totalorder %v16448_v45, 2  ;;  %v16537_v51 = vmul.u32.u64.low %v7598_v10, %v7593_v33  ;;  %v16538_v42 = vmul.u32.u64.high %v7598_v10, %v7593_v33, %v16537_v51  ;;  %vm7542_vm11 = vcmp.eq.s32.totalorder %v7540_v15, 0  ;;  %v16576_v45 = vld [vmem:[%s15240_s21 + $0x10] sm:$0x77] }
 0x558   : > { %v12526_v27 = vpop.eup %12525  ;;  %vm7545_vm8 = vcmp.eq.s32.totalorder %v7540_v15, 2  ;;  %v11889_v60 = vmin.u32 %v6784_v52, %v16511_v36  ;;  %v6804_v32 = vsub.s32 4, %v6780_v24  ;;  %v8318_v29 = vrot.slane %v16446_v14, 2 }
 0x559   : > { %v12528_v41 = vpop.eup %12527  ;;  %v7546_v37 = vxor.u32 2147483648, %v12526_v27  ;;  %vm18804_vm5 = vcmask 1045504   ;;  %v7605_v62 = vmul.u32 %v7598_v10, %v7589_v58  ;;  %vm7607_vm4 = vc.u32 %v16525_v40, %v16537_v51 }
 0x55a   : > { %v16545_v25 = vsel %vm18804_vm5, %v8371_v30, %v16522_v38  ;;  %v7543_v59 = vxor.u32 2147483648, %v12528_v41  ;;  %v6786_v34 = vclz %v11889_v60  ;;  %v8370_v57 = vsel %vm18618_vm9, %v12592_v50, %v8294_v55  ;;  %vm18805_vm1 = vmmov %vm18804_vm5 }
 0x55b   : > { %v7547_v48 = vsel %vm7545_vm8, %v7546_v37, %v12528_v41  ;;  %v7962_v44 = vsel %vm7960_vm15, %v7546_v37, %v12528_v41  ;;  %v6774_v14 = vadd.s32 %v16437_v49, %v16435_v28  ;;  %v7608_v9 = vadd.s32 1, %v16538_v42 }
 0x55c   : > { %v7544_v5 = vsel %vm7542_vm11, %v12526_v27, %v7543_v59  ;;  %v7959_v54 = vsel %vm7957_vm3, %v12526_v27, %v7543_v59  ;;  %v11890_v21 = vadd.s32 4294967294, %v6786_v34  ;;  %v6805_v3 = vsel %vm6720_vm14, %v6804_v32, %v6780_v24  ;;  %11881 = vmatmul.mubr.msk.bf16.gmra.mrb[180].mxu1 %vm18616_vm2, %v12593_v23 }
 0x55d   : > { %v7548_v28 = vsel %vm7541_vm0, %v7544_v5, %v7547_v48  ;;  %v7963_v49 = vsel %vm7956_vm10, %v7959_v54, %v7962_v44  ;;  %v7609_v31 = vsel %vm7607_vm4, %v7608_v9, %v16538_v42  ;;  %v8378_v18 = vsel %vm18805_vm1, %v8370_v57, %v8318_v29  ;;  %6497 = vmatprep.mubr.bf16.mxu1 %v18690_v13 }
 0x55e   : > { %v7549_v24 = vsel %vm7538_vm6, nan, %v7548_v28  ;;  %v7964_v2 = vsel %vm7538_vm6, nan, %v7963_v49  ;;  %vm11891_vm13 = vcmp.lt.s32.totalorder %v11890_v21, 0  ;;  %v7610_v22 = vadd.s32 %v7609_v31, %v7605_v62 }
 0x55f   : > { %v8338_v19 = vcombine.high %v7549_v24, %v7549_v24  ;;  %v8342_v56 = vrot.slane %v7549_v24, 7  ;;  %v8362_v15 = vcombine.low %v7964_v2, %v7964_v2  ;;  %v6789_v26 = vsel %vm11891_vm13, 0, %v11890_v21 }
 0x560   : > { %v6790_v20 = vsub.s32 32, %v6789_v26  ;;  %v6791_v6 = vshll.u32 %v16511_v36, %v6789_v26  ;;  %v6794_v39 = vsub.s32 4294967266, %v6789_v26  ;;  %v7611_v0 = vadd.s32 536870912, %v7610_v22 }
 0x561   : > { %v8343_v11 = vrot.slane %v8338_v19, 7  ;;  %vm18806_vm7 = vcmask 1040384   ;;  %v6822_v33 = vand.u32 2147483647, %v16576_v45  ;;  %v6825_v16 = vand.u32 2139095040, %v16576_v45 }
 0x562   : > { %v8386_v10 = vsel %vm18806_vm7, %v8318_v29, %v8342_v56  ;;  %v6792_v7 = vshrl.u32 %v6774_v14, %v6790_v20  ;;  %v6795_v43 = vadd.s32 127, %v6794_v39  ;;  %v7612_v46 = vshrl.u32 %v7611_v0, 30  ;;  %vm18808_vm6 = vmmov %vm18806_vm7  ;;  %v16657_v0 = vld [vmem:[%s15240_s21 + $0x8] sm:$0x77] }
 0x563   : > { %vm18807_vm12 = vcmask 1043456   ;;  %v8387_v30 = vsel %vm18808_vm6, %v16522_v38, %v8343_v11  ;;  %vm16587_vm10 = vcmp.le.f32.partialorder %v6718_v17, 0.7853982  ;;  %v6826_v58 = vshrl.u32 %v6825_v16, 23  ;;  %v12594_v17 = vld [vmem:[%s18486_s4 + $0x80] sm:$0xff]  }
 0x564   : > { %v8394_v55 = vsel %vm18807_vm12, %v8386_v10, %v8362_v15  ;;  %vm18811_vm3 = vmmov %vm18807_vm12  ;;  %vm18812_vm0 = vmmov 1   ;;  %vm18813_vm15 = vcmask 1046528   ;;  %v6793_v60 = vor.u32 %v6792_v7, %v6791_v6  ;;  %11882 = vmatmul.mubr.msk.bf16.gmra.mrb[184].mxu1 %vm18616_vm2, %v12594_v17 }
 0x565   : > { %v11958_v52 = vpack.c.bf16 %v8394_v55, %v8378_v18  ;;  %v8395_v42 = vsel %vm18811_vm3, %v8387_v30, %v7964_v2  ;;  %vm16594_vm11 = vmpackc.low %vm18813_vm15, %vm18812_vm0  ;;  %v6796_v32 = vshll.u32 %v6795_v43, 23  ;;  %v7613_v41 = vshll.u32 %v7612_v46, 30  ;;  %6507 = vmatprep.mubr.bf16.mxu1 %v18690_v13 }
 0x566   : > { %v11955_v38 = vpack.c.bf16 %v8395_v42, %v16545_v25  ;;  %v6807_v37 = vsel %vm16587_vm10, 0, %v6805_v3  ;;  %v11892_v29 = vadd.s32 4294967169, %v6826_v58  ;;  %v6829_v62 = vand.u32 8388607, %v6822_v33  ;;  %v16615_v25 = vld [vmem:[%s18489_s7] sm:$0xff]  }
 0x567   : > { %v6797_v59 = vor.u32 4788187, %v6796_v32  ;;  %v6800_v34 = vcvt.s32.f32 %v6793_v60  ;;  %v16608_v50 = vsub.s32 %v7610_v22, %v7613_v41  ;;  %v7636_v57 = vsub.s32 4, %v7612_v46  ;;  %v12595_v22 = vld [vmem:[%s18486_s4 + $0x88] sm:$0xff]  }
 0x568   : > { %11956 = vmatprep.subr.msk.bf16.mxu0 %vm16594_vm11, %v11955_v38  ;;  %v6832_v48 = vadd.s32 1, %v11892_v29  ;;  %v6811_v14 = vadd.s32 3, %v6807_v37  ;;  %vm8520_vm8 = vcmask 130048   ;;  %vm7552_vm5 = vcmp.lt.s32.totalorder %v16074_v47, 0 }
 0x569   : > { %v6798_v44 = vand.u32 2147483647, %v6797_v59  ;;  %v7616_v9 = vsub.s32 0, %v16608_v50  ;;  %11959 = vmatpush1.bf16.msk.msra.mxu0 %vm16594_vm11, %v11958_v52  ;;  %v6830_v5 = vor.u32 8388608, %v6829_v62  ;;  %v7637_v3 = vsel %vm7552_vm5, %v7636_v57, %v7612_v46 }
 0x56a   : > { %vm6833_vm4 = vcmp.gt.s32.totalorder %v6832_v48, 0  ;;  %v16624_v28 = vand.u32 3, %v6807_v37  ;;  %vm16628_vm1 = vcmp.le.f32.partialorder %v7550_v4, 0.7853982  ;;  %v16634_v18 = vand.u32 3, %v6811_v14 }
 0x56b   : > { %v6801_v54 = vmul.f32 %v6800_v34, %v6798_v44  ;;  %v11921_v21 = vmin.u32 %v7616_v9, %v16608_v50  ;;  %v6834_v23 = vsel %vm6833_vm4, %v6832_v48, 0  ;;  %v7606_v4 = vadd.s32 %v16537_v51, %v16525_v40  ;;  %v16704_v9 = vld [vmem:[%s18489_s7 + $0x10] sm:$0xff]  }
 0x56c   : > { %11960 = vmatmul.mubr.msk.bf16.vlgmr.msra.gmra.mrb[192].mxu0 %vm8520_vm8, %v16615_v25  ;;  %v6836_v2 = vand.u32 31, %v6834_v23  ;;  %11883 = vmatmul.mubr.msk.bf16.gmra.mrb[188].mxu1 %vm18616_vm2, %v12595_v22  ;;  %v16645_v19 = vsel %vm16628_vm1, 0, %v7637_v3  ;;  %v16647_v56 = vshll.u32 %v6830_v5, 8  ;;  %v16650_v15 = vmul.f32 2.0, %v16576_v45 }
 0x56d   : > { %v6802_v31 = vxor.u32 2147483648, %v6801_v54  ;;  %v7618_v24 = vclz %v11921_v21  ;;  %8581 = vmatprep.mubr.bf16.mxu0 %v18690_v13  ;;  %8664 = vmatprep.mubr.bf16.mxu1 %v18690_v13  ;;  %v16662_v51 = vshrl.u32 %v6834_v23, 5  ;;  %vm6817_vm13 = vcmp.eq.s32.totalorder %v16634_v18, 2 }
 0x56e   : > { %v6837_v6 = vsub.s32 32, %v6836_v2  ;;  %v6839_v39 = vshll.u32 %v18789_v35, %v6836_v2  ;;  %v6842_v11 = vshll.u32 %v18790_v63, %v6836_v2  ;;  %v6845_v10 = vshll.u32 %v18791_v1, %v6836_v2 }
 0x56f   : > { %v6803_v26 = vsel %vm6720_vm14, %v6802_v31, %v6801_v54  ;;  %v11922_v20 = vadd.s32 4294967294, %v7618_v24  ;;  %v6848_v7 = vshll.u32 %v18792_v61, %v6836_v2  ;;  %vm7231_vm7 = vcmp.eq.s32.totalorder %v16624_v28, 2 }
 0x570   : > { %v6806_v40 = vsel %vm16587_vm10, %v16657_v0, %v6803_v26  ;;  %v6840_v16 = vshrl.u32 %v18790_v63, %v6837_v6  ;;  %v6843_v46 = vshrl.u32 %v18791_v1, %v6837_v6  ;;  %v6846_v55 = vshrl.u32 %v18792_v61, %v6837_v6 }
 0x571   : > { %12529 = vcosq.f32 %v6806_v40  ;;  %vm11923_vm14 = vcmp.lt.s32.totalorder %v11922_v20, 0  ;;  %vm6814_vm12 = vcmp.eq.s32.totalorder %v16634_v18, 0  ;;  %vm7228_vm6 = vcmp.eq.s32.totalorder %v16624_v28, 0 }
 0x572   : > { %12531 = vsinq.f32 %v6806_v40  ;;  %v7621_v43 = vsel %vm11923_vm14, 0, %v11922_v20  ;;  %v6841_v58 = vor.u32 %v6840_v16, %v6839_v39  ;;  %v6844_v42 = vor.u32 %v6843_v46, %v6842_v11 }
 0x573   : > { %v7622_v30 = vsub.s32 32, %v7621_v43  ;;  %v7623_v36 = vshll.u32 %v16608_v50, %v7621_v43  ;;  %v7626_v52 = vsub.s32 4294967266, %v7621_v43  ;;  %v6847_v60 = vor.u32 %v6846_v55, %v6845_v10 }
 0x574   : > { %v6849_v32 = vshrl.u32 %v18793_v8, %v6837_v6  ;;  %v6851_v41 = vshll.u32 %v18793_v8, %v6836_v2  ;;  %11961 = vmatmul.mubr.msk.bf16.gmra.mrb[196].mxu0 %vm8520_vm8, %v16669_v12  ;;  %vm6813_vm10 = vcmp.lt.s32.totalorder %v16634_v18, 2  ;;  %vm7227_vm3 = vcmp.lt.s32.totalorder %v16624_v28, 2 }
 0x575   : > { %v7624_v17 = vshrl.u32 %v7606_v4, %v7622_v30  ;;  %v7627_v38 = vadd.s32 127, %v7626_v52  ;;  %v6852_v37 = vshrl.u32 %v18794_v53, %v6837_v6  ;;  %vm6854_vm0 = vcmp.lt.s32.totalorder %v16662_v51, 1  ;;  %8591 = vmatprep.mubr.bf16.mxu0 %v18690_v13 }
 0x576   : > { %vm6810_vm15 = vweird.f32 %v16657_v0  ;;  %v6838_v29 = vshrl.u32 %v18789_v35, %v6837_v6  ;;  %v6850_v62 = vor.u32 %v6849_v32, %v6848_v7  ;;  %vm6856_vm4 = vcmp.lt.s32.totalorder %v16662_v51, 3 }
 0x577   : > { %vm6857_vm14 = vcmp.lt.s32.totalorder %v16662_v51, 4  ;;  %v7625_v59 = vor.u32 %v7624_v17, %v7623_v36  ;;  %v7628_v34 = vshll.u32 %v7627_v38, 23  ;;  %v6853_v50 = vor.u32 %v6852_v37, %v6851_v41 }
 0x578   : > { %vm6855_vm2 = vcmp.lt.s32.totalorder %v16662_v51, 2  ;;  %v7643_v57 = vadd.s32 3, %v16645_v19  ;;  %v6859_v48 = vsel %vm6857_vm14, %v6847_v60, 2102212464  ;;  %v6862_v44 = vsel %vm6854_vm0, %v6841_v58, %v6844_v42 }
 0x579   : > { %v6863_v14 = vsel %vm6857_vm14, %v6850_v62, 920167782  ;;  %v7629_v5 = vor.u32 4788187, %v7628_v34  ;;  %v7632_v54 = vcvt.s32.f32 %v7625_v59  ;;  %v6866_v3 = vsel %vm6854_vm0, %v6844_v42, %v6847_v60 }
 0x57a   : > { %v6864_v21 = vsel %vm6856_vm4, %v6847_v60, %v6863_v14  ;;  %v6858_v23 = vsel %vm6854_vm0, %v6838_v29, %v6841_v58  ;;  %v6867_v24 = vsel %vm6857_vm14, %v6853_v50, 1326507024  ;;  %v7657_v2 = vand.u32 2139095040, %v16650_v15 }
 0x57b   : > { %v6865_v31 = vsel %vm6855_vm2, %v6862_v44, %v6864_v21  ;;  %v12530_v22 = vpop.eup %12529  ;;  %v7630_v4 = vand.u32 2147483647, %v7629_v5  ;;  %v6868_v26 = vsel %vm6856_vm4, %v6850_v62, %v6867_v24  ;;  %v6860_v11 = vsel %vm6856_vm4, %v6844_v42, %v6859_v48  ;;  %v16756_v62 = vld [vmem:[%s18489_s7 + $0x18] sm:$0xff]  }
 0x57c   : > { %v16720_v20 = vmul.u32.u64.low %v16647_v56, %v6865_v31  ;;  %v16721_v6 = vmul.u32.u64.high %v16647_v56, %v6865_v31, %v16720_v20  ;;  %v12532_v39 = vpop.eup %12531  ;;  %v6818_v40 = vxor.u32 2147483648, %v12530_v22  ;;  %v6869_v10 = vsel %vm6855_vm2, %v6866_v3, %v6868_v26  ;;  %11962 = vmatmul.mubr.msk.bf16.gmra.mrb[200].mxu0 %vm8520_vm8, %v16704_v9 }
 0x57d   : > { %v7658_v16 = vshrl.u32 %v7657_v2, 23  ;;  %v6815_v7 = vxor.u32 2147483648, %v12532_v39  ;;  %v7633_v43 = vmul.f32 %v7632_v54, %v7630_v4  ;;  %8601 = vmatprep.mubr.bf16.mxu0 %v18690_v13  ;;  %v7654_v52 = vand.u32 2147483647, %v16650_v15 }
 0x57e   : > { %v16731_v46 = vmul.u32.u64.low %v16647_v56, %v6869_v10  ;;  %v16732_v55 = vmul.u32.u64.high %v16647_v56, %v6869_v10, %v16731_v46  ;;  %v6819_v30 = vsel %vm6817_vm13, %v6818_v40, %v12532_v39  ;;  %v7233_v36 = vsel %vm7231_vm7, %v6818_v40, %v12532_v39 }
 0x57f   : > { %v11924_v58 = vadd.s32 4294967169, %v7658_v16  ;;  %v6816_v42 = vsel %vm6814_vm12, %v12530_v22, %v6815_v7  ;;  %v7230_v60 = vsel %vm7228_vm6, %v12530_v22, %v6815_v7  ;;  %v7634_v32 = vxor.u32 2147483648, %v7633_v43 }
 0x580   : > { %v6861_v41 = vsel %vm6855_vm2, %v6858_v23, %v6860_v11  ;;  %v6820_v17 = vsel %vm6813_vm10, %v6816_v42, %v6819_v30  ;;  %v7234_v38 = vsel %vm7227_vm3, %v7230_v60, %v7233_v36  ;;  %v16751_v37 = vand.u32 3, %v16645_v19 }
 0x581   : > { %v7664_v29 = vadd.s32 1, %v11924_v58  ;;  %v6821_v59 = vsel %vm6810_vm15, nan, %v6820_v17  ;;  %v16762_v51 = vsel %vm6810_vm15, nan, %v7234_v38  ;;  %v7635_v28 = vsel %vm7552_vm5, %v7634_v32, %v7633_v43 }
 0x582   : > { %v6880_v18 = vadd.s32 1, %v16721_v6  ;;  %v7638_v19 = vsel %vm16628_vm1, %v16074_v47, %v7635_v28  ;;  %v8291_v34 = vcombine.high %v6821_v59, %v6821_v59  ;;  %v6877_v50 = vmul.u32 %v16647_v56, %v6861_v41 }
 0x583   : > { %v7661_v48 = vand.u32 8388607, %v7654_v52  ;;  %12533 = vcosq.f32 %v7638_v19  ;;  %v8315_v44 = vcombine.high %v16762_v51, %v16762_v51  ;;  %vm6879_vm2 = vc.u32 %v16732_v55, %v16720_v20 }
 0x584   : > { %vm7665_vm5 = vcmp.gt.s32.totalorder %v7664_v29, 0  ;;  %12535 = vsinq.f32 %v7638_v19  ;;  %v8279_v14 = vcombine.high %v16657_v0, %v16657_v0  ;;  %v8296_v49 = vrot.slane %v6821_v59, 5  ;;  %11963 = vmatmul.mubr.msk.bf16.gmra.mrb[204].mxu0 %vm8520_vm8, %v16756_v62 }
 0x585   : > { %v8297_v5 = vrot.slane %v8291_v34, 5  ;;  %v7644_v56 = vand.u32 3, %v7643_v57  ;;  %v6881_v54 = vsel %vm6879_vm2, %v6880_v18, %v16721_v6  ;;  %v7666_v21 = vsel %vm7665_vm5, %v7664_v29, 0  ;;  %8611 = vmatprep.mubr.bf16.mxu0 %v18690_v13  ;;  %v16794_v6 = vld [vmem:[%s18489_s7 + $0x20] sm:$0xff]  }
 0x586   : > { %v6882_v3 = vadd.s32 %v6881_v54, %v6877_v50  ;;  %v7668_v23 = vand.u32 31, %v7666_v21  ;;  %vm8059_vm1 = vcmp.lt.s32.totalorder %v16751_v37, 2  ;;  %v8320_v31 = vrot.slane %v16762_v51, 2  ;;  %v16850_v54 = vpop.f32.mrb[144].mxu0 }
 0x587   : > { %v16785_v24 = vrot.slane %v8315_v44, 2  ;;  %v7662_v2 = vor.u32 8388608, %v7661_v48  ;;  %vm7642_vm13 = vweird.f32 %v16074_v47  ;;  %v8373_v22 = vsel %vm18618_vm9, %v8279_v14, %v8297_v5  ;;  %v16845_v48 = vld [vmem:[%s18489_s7 + $0x28] sm:$0xff]  }
 0x588   : > { %v8372_v57 = vsel %vm18618_vm9, %v16657_v0, %v8296_v49  ;;  %v6883_v4 = vadd.s32 536870912, %v6882_v3  ;;  %v7669_v26 = vsub.s32 32, %v7668_v23  ;;  %vm7645_vm7 = vcmp.lt.s32.totalorder %v7644_v56, 2 }
 0x589   : > { %vm7646_vm12 = vcmp.eq.s32.totalorder %v7644_v56, 0  ;;  %vm8060_vm6 = vcmp.eq.s32.totalorder %v16751_v37, 0  ;;  %vm8063_vm10 = vcmp.eq.s32.totalorder %v16751_v37, 2  ;;  %vm7649_vm3 = vcmp.eq.s32.totalorder %v7644_v56, 2 }
 0x58a   : > { %v16800_v39 = vadd.s32 %v16720_v20, %v16732_v55  ;;  %v16802_v40 = vshrl.u32 %v6883_v4, 30  ;;  %v16804_v0 = vshrl.u32 %v7666_v21, 5  ;;  %vm18818_vm0 = vcmask 1045504   ;;  %v16852_v21 = vpop.f32.mrb[144].mxu1 }
 0x58b   : > { %v16808_v11 = vsel %vm18818_vm0, %v8373_v22, %v16785_v24  ;;  %vm18819_vm15 = vmmov %vm18818_vm0  ;;  %v7671_v16 = vshll.u32 %v18789_v35, %v7668_v23  ;;  %v16816_v7 = vshll.u32 %v7662_v2, 8  ;;  %v7672_v43 = vshrl.u32 %v18790_v63, %v7669_v26  ;;  %v16859_v22 = vpop.f32.mrb[145].mxu0 }
 0x58c   : > { %v16813_v10 = vsel %vm18819_vm15, %v8372_v57, %v8320_v31  ;;  %v6885_v20 = vshll.u32 %v16802_v40, 30  ;;  %v7674_v46 = vshll.u32 %v18790_v63, %v7668_v23  ;;  %v7677_v55 = vshll.u32 %v18791_v1, %v7668_v23  ;;  %11964 = vmatmul.mubr.msk.bf16.gmra.mrb[208].mxu0 %vm8520_vm8, %v16794_v6  ;;  %v16861_v57 = vpop.f32.mrb[145].mxu1  ;;  %v16869_v37 = vpop.f32.mrb[146].mxu0 }
 0x58d   : > { %v12534_v30 = vpop.eup %12533  ;;  %v7675_v36 = vshrl.u32 %v18791_v1, %v7669_v26  ;;  %v7678_v58 = vshrl.u32 %v18792_v61, %v7669_v26  ;;  %v7680_v42 = vshll.u32 %v18792_v61, %v7668_v23  ;;  %v16828_v60 = vshll.u32 %v18793_v8, %v7668_v23  ;;  %8621 = vmatprep.mubr.bf16.mxu0 %v18690_v13 }
 0x58e   : > { %v12536_v32 = vpop.eup %12535  ;;  %v7650_v41 = vxor.u32 2147483648, %v12534_v30  ;;  %v16831_v17 = vsub.s32 %v6882_v3, %v6885_v20  ;;  %v7670_v38 = vshrl.u32 %v18789_v35, %v7669_v26  ;;  %vm7686_vm4 = vcmp.lt.s32.totalorder %v16804_v0, 1  ;;  %v16871_v20 = vpop.f32.mrb[146].mxu1 }
 0x58f   : > { %v7647_v29 = vxor.u32 2147483648, %v12536_v32  ;;  %v7681_v59 = vshrl.u32 %v18793_v8, %v7669_v26  ;;  %v7684_v28 = vshrl.u32 %v18794_v53, %v7669_v26  ;;  %vm7687_vm14 = vcmp.lt.s32.totalorder %v16804_v0, 2 }
 0x590   : > { %v7651_v18 = vsel %vm7649_vm3, %v7650_v41, %v12536_v32  ;;  %v8065_v19 = vsel %vm8063_vm10, %v7650_v41, %v12536_v32  ;;  %v6888_v34 = vsub.s32 0, %v16831_v17  ;;  %v7673_v50 = vor.u32 %v7672_v43, %v7671_v16 }
 0x591   : > { %v7648_v44 = vsel %vm7646_vm12, %v12534_v30, %v7647_v29  ;;  %v8062_v14 = vsel %vm8060_vm6, %v12534_v30, %v7647_v29  ;;  %v7676_v49 = vor.u32 %v7675_v36, %v7674_v46  ;;  %v7679_v5 = vor.u32 %v7678_v58, %v7677_v55  ;;  %v16875_v36 = vpop.f32.mrb[147].mxu0  ;;  %v16877_v58 = vpop.f32.mrb[147].mxu1 }
 0x592   : > { %v7652_v3 = vsel %vm7645_vm7, %v7648_v44, %v7651_v18  ;;  %v8066_v23 = vsel %vm8059_vm1, %v8062_v14, %v8065_v19  ;;  %v11893_v2 = vmin.u32 %v6888_v34, %v16831_v17  ;;  %vm7689_vm2 = vcmp.lt.s32.totalorder %v16804_v0, 4  ;;  %v16897_v34 = vpop.f32.mrb[148].mxu0  ;;  %v16899_v51 = vpop.f32.mrb[148].mxu1 }
 0x593   : > { %v7653_v4 = vsel %vm7642_vm13, nan, %v7652_v3  ;;  %v8067_v26 = vsel %vm7642_vm13, nan, %v8066_v23  ;;  %v7682_v16 = vor.u32 %v7681_v59, %v7680_v42  ;;  %v7691_v56 = vsel %vm7689_vm2, %v7679_v5, 2102212464  ;;  %v16908_v3 = vpop.f32.mrb[149].mxu1 }
 0x594   : > { %v8339_v43 = vcombine.high %v7653_v4, %v7653_v4  ;;  %v8344_v46 = vrot.slane %v7653_v4, 7  ;;  %v8363_v55 = vcombine.low %v8067_v26, %v8067_v26  ;;  %v6890_v30 = vclz %v11893_v2  ;;  %11965 = vmatmul.mubr.msk.bf16.gmra.mrb[212].mxu0 %vm8520_vm8, %v16845_v48 }
 0x595   : > { %v6908_v47 = vsub.s32 4, %v16802_v40  ;;  %v7685_v42 = vor.u32 %v7684_v28, %v16828_v60  ;;  %vm7688_vm5 = vcmp.lt.s32.totalorder %v16804_v0, 3  ;;  %v7690_v32 = vsel %vm7686_vm4, %v7670_v38, %v7673_v50  ;;  %8757 = vmatprep.mubr.bf16.mxu0 %v18690_v13 }
 0x596   : > { %v8345_v41 = vrot.slane %v8339_v43, 7  ;;  %vm18820_vm1 = vcmask 1040384   ;;  %v11894_v59 = vadd.s32 4294967294, %v6890_v30  ;;  %v7692_v18 = vsel %vm7688_vm5, %v7676_v49, %v7691_v56 }
 0x597   : > { %v8388_v29 = vsel %vm18820_vm1, %v8320_v31, %v8344_v46  ;;  %vm18821_vm13 = vcmask 1043456   ;;  %v7694_v60 = vsel %vm7686_vm4, %v7673_v50, %v7676_v49  ;;  %v7695_v28 = vsel %vm7689_vm2, %v7682_v16, 920167782  ;;  %vm18822_vm7 = vmmov %vm18820_vm1  ;;  %v16906_v50 = vpop.f32.mrb[149].mxu0 }
 0x598   : > { %v8396_v19 = vsel %vm18821_vm13, %v8388_v29, %v8363_v55  ;;  %v7698_v38 = vsel %vm7686_vm4, %v7676_v49, %v7679_v5  ;;  %v8389_v31 = vsel %vm18822_vm7, %v16785_v24, %v8345_v41  ;;  %vm11895_vm12 = vcmp.lt.s32.totalorder %v11894_v59, 0  ;;  %vm18823_vm6 = vmmov %vm18821_vm13  ;;  %v16915_v24 = vpop.f32.mrb[150].mxu0 }
 0x599   : > { %v11970_v44 = vpack.c.bf16 %v8396_v19, %v16813_v10  ;;  %v7696_v14 = vsel %vm7688_vm5, %v7679_v5, %v7695_v28  ;;  %v8397_v23 = vsel %vm18823_vm6, %v8389_v31, %v8067_v26  ;;  %v6893_v49 = vsel %vm11895_vm12, 0, %v11894_v59  ;;  %v16917_v10 = vpop.f32.mrb[150].mxu1  ;;  %v16921_v55 = vpop.f32.mrb[151].mxu0 }
 0x59a   : > { %v7697_v2 = vsel %vm7687_vm14, %v7694_v60, %v7696_v14  ;;  %v7699_v4 = vsel %vm7689_vm2, %v7685_v42, 1326507024  ;;  %v11967_v56 = vpack.c.bf16 %v8397_v23, %v16808_v11  ;;  %v6894_v5 = vsub.s32 32, %v6893_v49  ;;  %v16923_v26 = vpop.f32.mrb[151].mxu1  ;;  %v16946_v60 = vld [vmem:[%s15240_s21 + $0x18] sm:$0x77] }
 0x59b   : > { %v6895_v43 = vshll.u32 %v16831_v17, %v6893_v49  ;;  %v6898_v46 = vsub.s32 4294967266, %v6893_v49  ;;  %18824 = vst [vmem:[#allocation12_spill] sm:$0xff] %v16923_v26  ;;  %vm6824_vm10 = vcmp.lt.s32.totalorder %v16576_v45, 0  ;;  %v7700_v30 = vsel %vm7688_vm5, %v7682_v16, %v7699_v4  ;;  %v16957_v23 = vpop.f32.mrb[152].mxu1 }
 0x59c   : > { %v16929_v42 = vmul.u32.u64.low %v16816_v7, %v7697_v2  ;;  %v16930_v41 = vmul.u32.u64.high %v16816_v7, %v7697_v2, %v16929_v42  ;;  %11968 = vmatprep.subr.msk.bf16.mxu1 %vm16594_vm11, %v11967_v56  ;;  %v6896_v11 = vshrl.u32 %v16800_v39, %v6894_v5  ;;  %v7693_v29 = vsel %vm7687_vm14, %v7690_v32, %v7692_v18  ;;  %18826 = vst [vmem:[#allocation13_spill] sm:$0xff] %v16957_v23 }
 0x59d   : > { %v6899_v17 = vadd.s32 127, %v6898_v46  ;;  %v7701_v59 = vsel %vm7687_vm14, %v7698_v38, %v7700_v30  ;;  %11971 = vmatpush1.bf16.msk.msra.mxu1 %vm16594_vm11, %v11970_v44  ;;  %v18617_v28 = vand.u32 2147483647, %v16946_v60  ;;  %v6929_v39 = vand.u32 2139095040, %v16946_v60  ;;  %v16955_v44 = vpop.f32.mrb[152].mxu0 }
 0x59e   : > { %v16942_v16 = vmul.u32.u64.low %v16816_v7, %v7701_v59  ;;  %v16943_v19 = vmul.u32.u64.high %v16816_v7, %v7701_v59, %v16942_v16  ;;  %v6897_v31 = vor.u32 %v6896_v11, %v6895_v43  ;;  %v6909_v0 = vsel %vm6824_vm10, %v6908_v47, %v16802_v40  ;;  %18825 = vst [vmem:[#allocation11_spill] sm:$0xff] %v16955_v44  ;;  %v16967_v47 = vpop.f32.mrb[153].mxu0 }
 0x59f   : > { %v6900_v14 = vshll.u32 %v6899_v17, 23  ;;  %v7709_v32 = vmul.u32 %v16816_v7, %v7693_v29  ;;  %v7712_v18 = vadd.s32 1, %v16930_v41  ;;  %v6930_v38 = vshrl.u32 %v6929_v39, 23  ;;  %18829 = vst [vmem:[#allocation15_spill] sm:$0xff] %v16967_v47 }
 0x5a0   : > { %11972 = vmatmul.mubr.msk.bf16.vlgmr.msra.gmra.mrb[192].mxu1 %vm8520_vm8, %v16615_v25  ;;  %vm16963_vm3 = vcmp.le.f32.partialorder %v6822_v33, 0.7853982  ;;  %v6904_v40 = vcvt.s32.f32 %v6897_v31  ;;  %vm7711_vm0 = vc.u32 %v16943_v19, %v16929_v42  ;;  %v6933_v56 = vand.u32 8388607, %v18617_v28  ;;  %v16975_v25 = vpop.f32.mrb[153].mxu1  ;;  %v16977_v33 = vpop.f32.mrb[154].mxu0 }
 0x5a1   : > { %v6901_v2 = vor.u32 4788187, %v6900_v14  ;;  %v6911_v7 = vsel %vm16963_vm3, 0, %v6909_v0  ;;  %v11896_v4 = vadd.s32 4294967169, %v6930_v38  ;;  %8674 = vmatprep.mubr.bf16.mxu1 %v18690_v13  ;;  %18830 = vst [vmem:[#allocation14_spill] sm:$0xff] %v16975_v25  ;;  %18831 = vst [vmem:[#allocation17_spill] sm:$0xff] %v16977_v33  ;;  %v7713_v43 = vsel %vm7711_vm0, %v7712_v18, %v16930_v41 }
 0x5a2   : > { %v16981_v46 = vmul.f32 2.0, %v16946_v60  ;;  %v16983_v30 = vpop.f32.mrb[154].mxu1  ;;  %v7714_v11 = vadd.s32 %v7713_v43, %v7709_v32  ;;  %v16985_v29 = vpop.f32.mrb[155].mxu0  ;;  %v6915_v39 = vadd.s32 3, %v6911_v7  ;;  %v6934_v14 = vor.u32 8388608, %v6933_v56 }
 0x5a3   : > { %v6902_v5 = vand.u32 2147483647, %v6901_v2  ;;  %18832 = vst [vmem:[#allocation16_spill] sm:$0xff] %v16983_v30  ;;  %v6936_v17 = vadd.s32 1, %v11896_v4  ;;  %18833 = vst [vmem:[#allocation19_spill] sm:$0xff] %v16985_v29  ;;  %v16987_v59 = vpop.f32.mrb[155].mxu1  ;;  %v17005_v28 = vadd.s32 %v16929_v42, %v16943_v19  ;;  %vm6914_vm6 = vweird.f32 %v16576_v45 }
 0x5a4   : > { %18834 = vst [vmem:[#allocation18_spill] sm:$0xff] %v16987_v59  ;;  %v7715_v31 = vadd.s32 536870912, %v7714_v11  ;;  %v7761_v18 = vand.u32 2139095040, %v16981_v46  ;;  %vm7656_vm4 = vcmp.lt.s32.totalorder %v16650_v15, 0  ;;  %v16994_v43 = vpop.f32.mrb[156].mxu0  ;;  %v17022_v19 = vshll.u32 %v6934_v14, 8 }
 0x5a5   : > { %v6905_v16 = vmul.f32 %v6904_v40, %v6902_v5  ;;  %vm6937_vm15 = vcmp.gt.s32.totalorder %v6936_v17, 0  ;;  %18835 = vst [vmem:[#allocation21_spill] sm:$0xff] %v16994_v43  ;;  %v16996_v40 = vpop.f32.mrb[156].mxu1  ;;  %v17000_v5 = vand.u32 3, %v6915_v39  ;;  %vm17018_vm14 = vcmp.le.f32.partialorder %v7654_v52, 0.7853982 }
 0x5a6   : > { %v6938_v38 = vsel %vm6937_vm15, %v6936_v17, 0  ;;  %v7716_v2 = vshrl.u32 %v7715_v31, 30  ;;  %18836 = vst [vmem:[#allocation20_spill] sm:$0xff] %v16996_v40  ;;  %v17002_v17 = vand.u32 3, %v6911_v7  ;;  %v17009_v31 = vpop.f32.mrb[157].mxu0  ;;  %v17011_v32 = vpop.f32.mrb[157].mxu1 }
 0x5a7   : > { %v6906_v0 = vxor.u32 2147483648, %v6905_v16  ;;  %v6940_v4 = vand.u32 31, %v6938_v38  ;;  %18837 = vst [vmem:[#allocation10_spill] sm:$0xff] %v17009_v31  ;;  %18838 = vst [vmem:[#allocation9_spill] sm:$0xff] %v17011_v32  ;;  %v17027_v39 = vpop.f32.mrb[158].mxu1  ;;  %v18844_v52 = vld [vmem:[#allocation24_spill] sm:$0xff] }
 0x5a8   : > { %11973 = vmatmul.mubr.msk.bf16.gmra.mrb[196].mxu1 %vm8520_vm8, %v16669_v12  ;;  %v7717_v7 = vshll.u32 %v7716_v2, 30  ;;  %v17025_v12 = vpop.f32.mrb[158].mxu0  ;;  %18842 = vst [vmem:[#allocation84_spill] sm:$0xff] %v17027_v39  ;;  %v18843_v49 = vand.u32 2147483647, %v16981_v46  ;;  %v17035_v32 = vadd.f32 %v16850_v54, %v18844_v52  ;;  %v17039_v14 = vpop.f32.mrb[159].mxu1 }
 0x5a9   : > { %v6907_v56 = vsel %vm6824_vm10, %v6906_v0, %v6905_v16  ;;  %v6941_v42 = vsub.s32 32, %v6940_v4  ;;  %8684 = vmatprep.mubr.bf16.mxu1 %v18690_v13  ;;  %18841 = vst [vmem:[#allocation83_spill] sm:$0xff] %v17025_v12  ;;  %v7762_v0 = vshrl.u32 %v7761_v18, 23  ;;  %v17037_v31 = vpop.f32.mrb[159].mxu0  ;;  %18846 = vst [vmem:[#allocation85_spill] sm:$0xff] %v17039_v14  ;;  %v7740_v12 = vsub.s32 4, %v7716_v2 }
 0x5aa   : > { %v6910_v41 = vsel %vm16963_vm3, %v16576_v45, %v6907_v56  ;;  %v17031_v56 = vand.u32 8388607, %v18843_v49  ;;  %18845 = vst [vmem:[#allocation24_spill] sm:$0xff] %v17037_v31  ;;  %v17041_v40 = vsub.s32 %v7714_v11, %v7717_v7  ;;  %v6943_v39 = vshll.u32 %v18789_v35, %v6940_v4  ;;  %v17068_v23 = vpop.f32.mrb[160].mxu0  ;;  %v17070_v44 = vpop.f32.mrb[160].mxu1 }
 0x5ab   : > { %12537 = vcosq.f32 %v6910_v41  ;;  %vm6921_vm2 = vcmp.eq.s32.totalorder %v17000_v5, 2  ;;  %vm7334_vm5 = vcmp.eq.s32.totalorder %v17002_v17, 2  ;;  %v6944_v18 = vshrl.u32 %v18790_v63, %v6941_v42  ;;  %18847 = vst [vmem:[#allocation86_spill] sm:$0xff] %v17068_v23  ;;  %18848 = vst [vmem:[#allocation87_spill] sm:$0xff] %v17070_v44 }
 0x5ac   : > { %12539 = vsinq.f32 %v6910_v41  ;;  %v6946_v49 = vshll.u32 %v18790_v63, %v6940_v4  ;;  %v6947_v54 = vshrl.u32 %v18791_v1, %v6941_v42  ;;  %v17051_v31 = vadd.f32 %v16852_v21, %v18844_v52 }
 0x5ad   : > { %vm6918_vm1 = vcmp.eq.s32.totalorder %v17000_v5, 0  ;;  %vm7331_vm13 = vcmp.eq.s32.totalorder %v17002_v17, 0  ;;  %v7720_v11 = vsub.s32 0, %v17041_v40  ;;  %v6949_v41 = vshll.u32 %v18791_v1, %v6940_v4 }
 0x5ae   : > { %v6950_v7 = vshrl.u32 %v18792_v61, %v6941_v42  ;;  %v6952_v14 = vshll.u32 %v18792_v61, %v6940_v4  ;;  %vm6917_vm7 = vcmp.lt.s32.totalorder %v17000_v5, 2  ;;  %v17060_v43 = vshrl.u32 %v6938_v38, 5 }
 0x5af   : > { %v6953_v59 = vshrl.u32 %v18793_v8, %v6941_v42  ;;  %v11928_v21 = vadd.s32 4294967169, %v7762_v0  ;;  %v11925_v30 = vmin.u32 %v7720_v11, %v17041_v40  ;;  %v7741_v33 = vsel %vm7656_vm4, %v7740_v12, %v7716_v2  ;;  %v17077_v11 = vpop.f32.mrb[161].mxu0  ;;  %v17079_v2 = vpop.f32.mrb[161].mxu1 }
 0x5b0   : > { %v6942_v25 = vshrl.u32 %v18789_v35, %v6941_v42  ;;  %v6945_v47 = vor.u32 %v6944_v18, %v6943_v39  ;;  %vm7330_vm12 = vcmp.lt.s32.totalorder %v17002_v17, 2  ;;  %v6948_v38 = vor.u32 %v6947_v54, %v6946_v49  ;;  %11974 = vmatmul.mubr.msk.bf16.gmra.mrb[200].mxu1 %vm8520_vm8, %v16704_v9  ;;  %18849 = vst [vmem:[#allocation88_spill] sm:$0xff] %v17077_v11 }
 0x5b1   : > { %v6954_v26 = vor.u32 %v6953_v59, %v6952_v14  ;;  %v6955_v0 = vshll.u32 %v18793_v8, %v6940_v4  ;;  %v6956_v29 = vshrl.u32 %v18794_v53, %v6941_v42  ;;  %18850 = vst [vmem:[#allocation89_spill] sm:$0xff] %v17079_v2  ;;  %v7722_v12 = vclz %v11925_v30  ;;  %8694 = vmatprep.mubr.bf16.mxu1 %v18690_v13  ;;  %v17088_v4 = vpop.f32.mrb[162].mxu0  ;;  %v17090_v42 = vpop.f32.mrb[162].mxu1 }
 0x5b2   : > { %v6951_v39 = vor.u32 %v6950_v7, %v6949_v41  ;;  %v17086_v59 = vadd.f32 %v16859_v22, %v18844_v52  ;;  %18851 = vst [vmem:[#allocation90_spill] sm:$0xff] %v17088_v4  ;;  %18852 = vst [vmem:[#allocation91_spill] sm:$0xff] %v17090_v42  ;;  %v7743_v9 = vsel %vm17018_vm14, 0, %v7741_v33  ;;  %vm6958_vm10 = vcmp.lt.s32.totalorder %v17060_v43, 1  ;;  %v17095_v49 = vpop.f32.mrb[163].mxu0  ;;  %v17097_v54 = vpop.f32.mrb[163].mxu1 }
 0x5b3   : > { %v6957_v14 = vor.u32 %v6956_v29, %v6955_v0  ;;  %v7768_v30 = vadd.s32 1, %v11928_v21  ;;  %18853 = vst [vmem:[#allocation92_spill] sm:$0xff] %v17095_v49  ;;  %18854 = vst [vmem:[#allocation93_spill] sm:$0xff] %v17097_v54  ;;  %v11926_v41 = vadd.s32 4294967294, %v7722_v12  ;;  %vm6959_vm3 = vcmp.lt.s32.totalorder %v17060_v43, 2  ;;  %v17117_v23 = vpop.f32.mrb[164].mxu0 }
 0x5b4   : > { %vm6960_vm0 = vcmp.lt.s32.totalorder %v17060_v43, 3  ;;  %vm6961_vm15 = vcmp.lt.s32.totalorder %v17060_v43, 4  ;;  %v6962_v7 = vsel %vm6958_vm10, %v6942_v25, %v6945_v47  ;;  %v6966_v29 = vsel %vm6958_vm10, %v6945_v47, %v6948_v38 }
 0x5b5   : > { %v12538_v22 = vpop.eup %12537  ;;  %v6963_v33 = vsel %vm6961_vm15, %v6951_v39, 2102212464  ;;  %v6967_v21 = vsel %vm6961_vm15, %v6954_v26, 920167782  ;;  %vm11927_vm9 = vcmp.lt.s32.totalorder %v11926_v41, 0  ;;  %v6970_v12 = vsel %vm6958_vm10, %v6948_v38, %v6951_v39 }
 0x5b6   : > { %v12540_v0 = vpop.eup %12539  ;;  %v6922_v18 = vxor.u32 2147483648, %v12538_v22  ;;  %v6971_v54 = vsel %vm6961_vm15, %v6957_v14, 1326507024  ;;  %v7725_v42 = vsel %vm11927_vm9, 0, %v11926_v41  ;;  %v6964_v4 = vsel %vm6960_vm0, %v6948_v38, %v6963_v33  ;;  %v17119_v14 = vpop.f32.mrb[164].mxu1 }
 0x5b7   : > { %v6919_v49 = vxor.u32 2147483648, %v12540_v0  ;;  %v6968_v25 = vsel %vm6960_vm0, %v6951_v39, %v6967_v21  ;;  %v7726_v11 = vsub.s32 32, %v7725_v42  ;;  %v7727_v44 = vshll.u32 %v17041_v40, %v7725_v42  ;;  %18855 = vst [vmem:[#allocation94_spill] sm:$0xff] %v17119_v14  ;;  %v17131_v40 = vpop.f32.mrb[165].mxu1 }
 0x5b8   : > { %v6923_v2 = vsel %vm6921_vm2, %v6922_v18, %v12540_v0  ;;  %v7336_v47 = vsel %vm7334_vm5, %v6922_v18, %v12540_v0  ;;  %v7730_v39 = vsub.s32 4294967266, %v7725_v42  ;;  %v6972_v33 = vsel %vm6960_vm0, %v6954_v26, %v6971_v54  ;;  %11975 = vmatmul.mubr.msk.bf16.gmra.mrb[204].mxu1 %vm8520_vm8, %v16756_v62  ;;  %v17129_v18 = vpop.f32.mrb[165].mxu0  ;;  %18856 = vst [vmem:[#allocation95_spill] sm:$0xff] %v17131_v40  ;;  %v17141_v26 = vpop.f32.mrb[166].mxu1 }
 0x5b9   : > { %v6920_v41 = vsel %vm6918_vm1, %v12538_v22, %v6919_v49  ;;  %v7333_v38 = vsel %vm7331_vm13, %v12538_v22, %v6919_v49  ;;  %v7728_v0 = vshrl.u32 %v17005_v28, %v7726_v11  ;;  %v7747_v14 = vadd.s32 3, %v7743_v9  ;;  %8704 = vmatprep.mubr.bf16.mxu1 %v18690_v13  ;;  %v17139_v42 = vpop.f32.mrb[166].mxu0  ;;  %18858 = vst [vmem:[#allocation97_spill] sm:$0xff] %v17141_v26  ;;  %v17151_v11 = vpop.f32.mrb[167].mxu1 }
 0x5ba   : > { %v6924_v21 = vsel %vm6917_vm7, %v6920_v41, %v6923_v2  ;;  %v6973_v49 = vsel %vm6959_vm3, %v6970_v12, %v6972_v33  ;;  %18857 = vst [vmem:[#allocation96_spill] sm:$0xff] %v17139_v42  ;;  %v7731_v62 = vadd.s32 127, %v7730_v39  ;;  %v18859_v54 = vor.u32 8388608, %v17031_v56  ;;  %v17149_v28 = vpop.f32.mrb[167].mxu0  ;;  %18861 = vst [vmem:[#allocation99_spill] sm:$0xff] %v17151_v11 }
 0x5bb   : > { %18860 = vst [vmem:[#allocation98_spill] sm:$0xff] %v17149_v28  ;;  %v7337_v12 = vsel %vm7330_vm12, %v7333_v38, %v7336_v47  ;;  %v7729_v41 = vor.u32 %v7728_v0, %v7727_v44  ;;  %v6965_v33 = vsel %vm6959_vm3, %v6962_v7, %v6964_v4  ;;  %v6969_v56 = vsel %vm6959_vm3, %v6966_v29, %v6968_v25 }
 0x5bc   : > { %v17145_v22 = vshll.u32 %v18859_v54, 8  ;;  %v17161_v39 = vsel %vm6914_vm6, nan, %v6924_v21  ;;  %v7732_v54 = vshll.u32 %v7731_v62, 23  ;;  %v17167_v28 = vand.u32 3, %v7747_v14 }
 0x5bd   : > { %v17164_v2 = vmul.u32.u64.low %v17022_v19, %v6973_v49  ;;  %v17165_v5 = vmul.u32.u64.high %v17022_v19, %v6973_v49, %v17164_v2  ;;  %v7736_v11 = vcvt.s32.f32 %v7729_v41  ;;  %v17169_v17 = vand.u32 3, %v7743_v9 }
 0x5be   : > { %vm7769_vm9 = vcmp.gt.s32.totalorder %v7768_v30, 0  ;;  %v7733_v44 = vor.u32 4788187, %v7732_v54  ;;  %v17172_v4 = vmul.u32.u64.low %v17022_v19, %v6969_v56  ;;  %v17173_v43 = vmul.u32.u64.high %v17022_v19, %v6969_v56, %v17172_v4 }
 0x5bf   : > { %v7770_v7 = vsel %vm7769_vm9, %v7768_v30, 0  ;;  %v17178_v29 = vsel %vm6914_vm6, nan, %v7337_v12  ;;  %v8292_v25 = vcombine.high %v17161_v39, %v17161_v39  ;;  %v6981_v47 = vmul.u32 %v17022_v19, %v6965_v33 }
 0x5c0   : > { %v7772_v14 = vand.u32 31, %v7770_v7  ;;  %v7734_v9 = vand.u32 2147483647, %v7733_v44  ;;  %vm6983_vm2 = vc.u32 %v17165_v5, %v17172_v4  ;;  %v17186_v21 = vshrl.u32 %v7770_v7, 5  ;;  %11976 = vmatmul.mubr.msk.bf16.gmra.mrb[208].mxu1 %vm8520_vm8, %v16794_v6 }
 0x5c1   : > { %8714 = vmatprep.mubr.bf16.mxu1 %v18690_v13  ;;  %v6984_v2 = vadd.s32 1, %v17173_v43  ;;  %v8316_v33 = vcombine.high %v17178_v29, %v17178_v29  ;;  %vm6928_vm1 = vcmp.lt.s32.totalorder %v16946_v60, 0  ;;  %vm8163_vm6 = vcmp.eq.s32.totalorder %v17169_v17, 0 }
 0x5c2   : > { %v7773_v30 = vsub.s32 32, %v7772_v14  ;;  %v7775_v0 = vshll.u32 %v18789_v35, %v7772_v14  ;;  %v7778_v49 = vshll.u32 %v18790_v63, %v7772_v14  ;;  %v7781_v62 = vshll.u32 %v18791_v1, %v7772_v14 }
 0x5c3   : > { %v7737_v19 = vmul.f32 %v7736_v11, %v7734_v9  ;;  %v7784_v12 = vshll.u32 %v18792_v61, %v7772_v14  ;;  %v7787_v41 = vshll.u32 %v18793_v8, %v7772_v14  ;;  %v6985_v11 = vsel %vm6983_vm2, %v6984_v2, %v17173_v43 }
 0x5c4   : > { %v7776_v6 = vshrl.u32 %v18790_v63, %v7773_v30  ;;  %v7779_v56 = vshrl.u32 %v18791_v1, %v7773_v30  ;;  %v7782_v54 = vshrl.u32 %v18792_v61, %v7773_v30  ;;  %v7785_v7 = vshrl.u32 %v18793_v8, %v7773_v30 }
 0x5c5   : > { %v7738_v44 = vxor.u32 2147483648, %v7737_v19  ;;  %v7788_v9 = vshrl.u32 %v18794_v53, %v7773_v30  ;;  %v6986_v14 = vadd.s32 %v6985_v11, %v6981_v47  ;;  %vm7790_vm5 = vcmp.lt.s32.totalorder %v17186_v21, 1 }
 0x5c6   : > { %v7777_v38 = vor.u32 %v7776_v6, %v7775_v0  ;;  %v7780_v26 = vor.u32 %v7779_v56, %v7778_v49  ;;  %v7783_v42 = vor.u32 %v7782_v54, %v7781_v62  ;;  %v7786_v1 = vor.u32 %v7785_v7, %v7784_v12 }
 0x5c7   : > { %v7739_v63 = vsel %vm7656_vm4, %v7738_v44, %v7737_v19  ;;  %v7789_v40 = vor.u32 %v7788_v9, %v7787_v41  ;;  %v6987_v8 = vadd.s32 536870912, %v6986_v14  ;;  %v7774_v53 = vshrl.u32 %v18789_v35, %v7773_v30 }
 0x5c8   : > { %v7742_v61 = vsel %vm17018_vm14, %v16650_v15, %v7739_v63  ;;  %vm7792_vm13 = vcmp.lt.s32.totalorder %v17186_v21, 3  ;;  %vm7791_vm7 = vcmp.lt.s32.totalorder %v17186_v21, 2  ;;  %vm7793_vm4 = vcmp.lt.s32.totalorder %v17186_v21, 4  ;;  %11977 = vmatmul.mubr.msk.bf16.gmra.mrb[212].mxu1 %vm8520_vm8, %v16845_v48  ;;  %v12598_v21 = vld [vmem:[%s15240_s21 + $0x10] sm:$0x77] }
 0x5c9   : > { %12541 = vcosq.f32 %v7742_v61  ;;  %v7798_v43 = vsel %vm7790_vm5, %v7777_v38, %v7780_v26  ;;  %v6988_v16 = vshrl.u32 %v6987_v8, 30  ;;  %v7795_v47 = vsel %vm7793_vm4, %v7783_v42, 2102212464  ;;  %8850 = vmatprep.mubr.bf16.mxu1 %v18690_v13 }
 0x5ca   : > { %12543 = vsinq.f32 %v7742_v61  ;;  %v7799_v0 = vsel %vm7793_vm4, %v7786_v1, 920167782  ;;  %vm8166_vm14 = vcmp.eq.s32.totalorder %v17169_v17, 2  ;;  %v8299_v35 = vrot.slane %v8292_v25, 5 }
 0x5cb   : > { %v18862_v30 = vand.u32 2147483647, %v16946_v60  ;;  %v7800_v62 = vsel %vm7792_vm13, %v7783_v42, %v7799_v0  ;;  %v7802_v48 = vsel %vm7790_vm5, %v7780_v26, %v7783_v42  ;;  %v7803_v19 = vsel %vm7793_vm4, %v7789_v40, 1326507024 }
 0x5cc   : > { %v6989_v2 = vshll.u32 %v6988_v16, 30  ;;  %v7794_v12 = vsel %vm7790_vm5, %v7774_v53, %v7777_v38  ;;  %v7796_v25 = vsel %vm7792_vm13, %v7780_v26, %v7795_v47  ;;  %v7801_v41 = vsel %vm7791_vm7, %v7798_v43, %v7800_v62 }
 0x5cd   : > { %vm17227_vm12 = vcmp.le.f32.partialorder %v18862_v30, 0.7853982  ;;  %vm7749_vm10 = vcmp.lt.s32.totalorder %v17167_v28, 2  ;;  %vm8162_vm3 = vcmp.lt.s32.totalorder %v17169_v17, 2  ;;  %v7012_v6 = vsub.s32 4, %v6988_v16 }
 0x5ce   : > { %v7804_v40 = vsel %vm7792_vm13, %v7786_v1, %v7803_v19  ;;  %v17247_v42 = vmul.u32.u64.low %v17145_v22, %v7801_v41  ;;  %v17248_v56 = vmul.u32.u64.high %v17145_v22, %v7801_v41, %v17247_v42  ;;  %vm7746_vm0 = vweird.f32 %v16650_v15  ;;  %v18867_v1 = vld [vmem:[#allocation23_spill] sm:$0xff] }
 0x5cf   : > { %vm7750_vm15 = vcmp.eq.s32.totalorder %v17167_v28, 0  ;;  %v17253_v26 = vrot.slane %v8316_v33, 2  ;;  %v17255_v38 = vsub.s32 %v6986_v14, %v6989_v2  ;;  %v7805_v54 = vsel %vm7791_vm7, %v7802_v48, %v7804_v40 }
 0x5d0   : > { %v18865_v44 = vcombine.high %v16576_v45, %v16576_v45  ;;  %vm18866_vm9 = vcmask 1042432   ;;  %v7797_v7 = vsel %vm7791_vm7, %v7794_v12, %v7796_v25  ;;  %vm7753_vm2 = vcmp.eq.s32.totalorder %v17167_v28, 2 }
 0x5d1   : > { %v17266_v9 = vmul.u32.u64.low %v17145_v22, %v7805_v54  ;;  %v17267_v63 = vmul.u32.u64.high %v17145_v22, %v7805_v54, %v17266_v9  ;;  %v8322_v33 = vrot.slane %v17178_v29, 2  ;;  %v6992_v14 = vsub.s32 0, %v17255_v38  ;;  %vm18869_vm5 = vmmov %vm18866_vm9 }
 0x5d2   : > { %v8375_v11 = vsel %vm18866_vm9, %v18865_v44, %v8299_v35  ;;  %v6185_v61 = vadd.f32 %v16869_v37, %v18867_v1  ;;  %v7013_v45 = vsel %vm6928_vm1, %v7012_v6, %v6988_v16  ;;  %v7816_v8 = vadd.s32 1, %v17248_v56 }
 0x5d3   : > { %v18868_v53 = vrot.slane %v17161_v39, 5  ;;  %v17283_v47 = vadd.f32 %v16861_v57, %v18844_v52  ;;  %vm18870_vm13 = vcmask 1045504   ;;  %v6982_v37 = vadd.s32 %v17172_v4, %v17165_v5  ;;  %v12542_v35 = vpop.eup %12541 }
 0x5d4   : > { %v17287_v29 = vsel %vm18870_vm13, %v8375_v11, %v17253_v26  ;;  %v11897_v16 = vmin.u32 %v6992_v14, %v17255_v38  ;;  %v7813_v0 = vmul.u32 %v17145_v22, %v7797_v7  ;;  %vm7815_vm7 = vc.u32 %v17267_v63, %v17247_v42  ;;  %v12544_v62 = vpop.eup %12543  ;;  %vm18871_vm4 = vmmov %vm18870_vm13 }
 0x5d5   : > { %v8374_v43 = vsel %vm18869_vm5, %v12598_v21, %v18868_v53  ;;  %v6526_v39 = vmax.f32 %v6185_v61, 0.0  ;;  %v6278_v57 = vadd.f32 %v16871_v20, %v18867_v1  ;;  %v6187_v30 = vadd.f32 %v16875_v36, %v18867_v1 }
 0x5d6   : > { %v7754_v48 = vxor.u32 2147483648, %v12542_v35  ;;  %v6994_v19 = vclz %v11897_v16  ;;  %v17301_v5 = vsel %vm17227_vm12, 0, %v7013_v45  ;;  %v17304_v22 = vsel %vm18871_vm4, %v8374_v43, %v8322_v33 }
 0x5d7   : > { %v7751_v4 = vxor.u32 2147483648, %v12544_v62  ;;  %v7817_v2 = vsel %vm7815_vm7, %v7816_v8, %v17248_v56  ;;  %v6521_v12 = vmax.f32 %v17283_v47, 0.0  ;;  %v18872_v20 = vmax.f32 %v17035_v32, 0.0 }
 0x5d8   : > { %v7755_v36 = vsel %vm7753_vm2, %v7754_v48, %v12544_v62  ;;  %v8168_v41 = vsel %vm8166_vm14, %v7754_v48, %v12544_v62  ;;  %v11898_v6 = vadd.s32 4294967294, %v6994_v19  ;;  %vm7760_vm9 = vcmp.lt.s32.totalorder %v16981_v46, 0 }
 0x5d9   : > { %v17310_v25 = vpack.c.bf16 %v6526_v39, %v18872_v20  ;;  %v7818_v40 = vadd.s32 %v7817_v2, %v7813_v0  ;;  %v7752_v54 = vsel %vm7750_vm15, %v12542_v35, %v7751_v4  ;;  %v8165_v56 = vsel %vm8163_vm6, %v12542_v35, %v7751_v4 }
 0x5da   : > { %v18873_v32 = vand.u32 2147483647, %v16981_v46  ;;  %v6528_v11 = vmax.f32 %v6278_v57, 0.0  ;;  %v6527_v7 = vmax.f32 %v6187_v30, 0.0  ;;  %v7756_v9 = vsel %vm7749_vm10, %v7752_v54, %v7755_v36 }
 0x5db   : > { %v8169_v14 = vsel %vm8162_vm3, %v8165_v56, %v8168_v41  ;;  %vm11899_vm14 = vcmp.lt.s32.totalorder %v11898_v6, 0  ;;  %v7819_v61 = vadd.s32 536870912, %v7818_v40  ;;  %v7757_v45 = vsel %vm7746_vm0, nan, %v7756_v9 }
 0x5dc   : > { %vm17323_vm5 = vcmp.le.f32.partialorder %v18873_v32, 0.7853982  ;;  %v8170_v8 = vsel %vm7746_vm0, nan, %v8169_v14  ;;  %v6997_v21 = vsel %vm11899_vm14, 0, %v11898_v6  ;;  %v18876_v53 = vmax.f32 %v17051_v31, 0.0 }
 0x5dd   : > { %v8340_v47 = vcombine.high %v7757_v45, %v7757_v45  ;;  %v8346_v16 = vrot.slane %v7757_v45, 7  ;;  %v8364_v28 = vcombine.low %v8170_v8, %v8170_v8  ;;  %v6998_v0 = vsub.s32 32, %v6997_v21 }
 0x5de   : > { %v17337_v43 = vpack.c.bf16 %v6528_v11, %v18876_v53  ;;  %v6999_v17 = vshll.u32 %v17255_v38, %v6997_v21  ;;  %v7002_v35 = vsub.s32 4294967266, %v6997_v21  ;;  %v7820_v39 = vshrl.u32 %v7819_v61, 30 }
 0x5df   : > { %v18877_v57 = vmax.f32 %v17086_v59, 0.0  ;;  %v8347_v62 = vrot.slane %v8340_v47, 7  ;;  %v7000_v48 = vshrl.u32 %v6982_v37, %v6998_v0  ;;  %vm18878_vm6 = vcmask 1040384   ;;  %v17390_v0 = vld [vmem:[%s18489_s7] sm:$0xff]  }
 0x5e0   : > { %v8390_v15 = vsel %vm18878_vm6, %v8322_v33, %v8346_v16  ;;  %v6280_v31 = vadd.f32 %v16877_v58, %v18867_v1  ;;  %v7003_v19 = vadd.s32 127, %v7002_v35  ;;  %v7821_v4 = vshll.u32 %v7820_v39, 30  ;;  %vm18880_vm3 = vmmov %vm18878_vm6 }
 0x5e1   : > { %v8431_v30 = vpack.c.bf16 %v6527_v7, %v18877_v57  ;;  %v7844_v2 = vsub.s32 4, %v7820_v39  ;;  %vm18879_vm10 = vcmask 1043456   ;;  %v8391_v38 = vsel %vm18880_vm3, %v17253_v26, %v8347_v62 }
 0x5e2   : > { %v8398_v20 = vsel %vm18879_vm10, %v8390_v15, %v8364_v28  ;;  %v7001_v36 = vor.u32 %v7000_v48, %v6999_v17  ;;  %v6529_v59 = vmax.f32 %v6280_v31, 0.0  ;;  %vm18881_vm0 = vmmov %vm18879_vm10  ;;  %v7004_v37 = vshll.u32 %v7003_v19, 23  ;;  %v18884_v15 = vld [vmem:[#allocation12_spill] sm:$0xff]  ;;  %v18885_v19 = vld [vmem:[#allocation30_spill] sm:$0xff] }
 0x5e3   : > { %v11982_v41 = vpack.c.bf16 %v8398_v20, %v17304_v22  ;;  %v8399_v6 = vsel %vm18881_vm0, %v8391_v38, %v8170_v8  ;;  %v17350_v54 = vsub.s32 %v7818_v40, %v7821_v4  ;;  %v7845_v58 = vsel %vm7760_vm9, %v7844_v2, %v7820_v39  ;;  %v18882_v40 = vld [vmem:[#allocation28_spill] sm:$0xff]  ;;  %v18886_v4 = vld [vmem:[#allocation11_spill] sm:$0xff] }
 0x5e4   : > { %v11979_v33 = vpack.c.bf16 %v8399_v6, %v17287_v29  ;;  %v7019_v56 = vadd.s32 3, %v17301_v5  ;;  %v7847_v32 = vsel %vm17323_vm5, 0, %v7845_v58  ;;  %v17358_v26 = vpack.c.bf16 %v6529_v59, %v6521_v12 }
 0x5e5   : > { %v7005_v11 = vor.u32 4788187, %v7004_v37  ;;  %v7008_v22 = vcvt.s32.f32 %v7001_v36  ;;  %v7824_v7 = vsub.s32 0, %v17350_v54  ;;  %v7851_v9 = vadd.s32 3, %v7847_v32 }
 0x5e6   : > { %11980 = vmatprep.subr.msk.bf16.mxu0 %vm16594_vm11, %v11979_v33  ;;  %v6191_v14 = vadd.f32 %v16897_v34, %v18882_v40  ;;  %v6284_v29 = vadd.f32 %v16899_v51, %v18882_v40  ;;  %v6193_v61 = vadd.f32 %v16906_v50, %v18882_v40  ;;  %v6286_v12 = vadd.f32 %v16908_v3, %v18882_v40 }
 0x5e7   : > { %v7006_v45 = vand.u32 2147483647, %v7005_v11  ;;  %v11929_v8 = vmin.u32 %v7824_v7, %v17350_v54  ;;  %v8281_v21 = vcombine.high %v16946_v60, %v16946_v60  ;;  %11983 = vmatpush1.bf16.msk.msra.mxu0 %vm16594_vm11, %v11982_v41  ;;  %v17376_v53 = vand.u32 3, %v7019_v56 }
 0x5e8   : > { %v17379_v34 = vand.u32 3, %v17301_v5  ;;  %v7814_v51 = vadd.s32 %v17247_v42, %v17267_v63  ;;  %v17383_v50 = vand.u32 3, %v7847_v32  ;;  %8959 = vmatprep.subr.bf16.mxu0 %v8431_v30  ;;  %v17385_v16 = vand.u32 3, %v7851_v9  ;;  %v18883_v42 = vld [vmem:[#allocation27_spill] sm:$0xff] }
 0x5e9   : > { %v7009_v3 = vmul.f32 %v7008_v22, %v7006_v45  ;;  %v7826_v47 = vclz %v11929_v8  ;;  %v6534_v28 = vmax.f32 %v6191_v14, 0.0  ;;  %v6536_v5 = vmax.f32 %v6284_v29, 0.0  ;;  %v18888_v9 = vld [vmem:[#allocation15_spill] sm:$0xff]  ;;  %v18889_v29 = vld [vmem:[#allocation14_spill] sm:$0xff]  ;;  %v18891_v45 = vld [vmem:[#allocation17_spill] sm:$0xff] }
 0x5ea   : > { %11984 = vmatmul.mubr.msk.bf16.vlgmr.msra.gmra.mrb[216].mxu0 %vm8520_vm8, %v17390_v0  ;;  %v6535_v17 = vmax.f32 %v6193_v61, 0.0  ;;  %v6537_v35 = vmax.f32 %v6286_v12, 0.0  ;;  %v6195_v63 = vadd.f32 %v16915_v24, %v18883_v42  ;;  %v6288_v30 = vadd.f32 %v16917_v10, %v18883_v42  ;;  %v18887_v24 = vld [vmem:[#allocation13_spill] sm:$0xff] }
 0x5eb   : > { %v7010_v39 = vxor.u32 2147483648, %v7009_v3  ;;  %v11930_v57 = vadd.s32 4294967294, %v7826_v47  ;;  %v6197_v62 = vadd.f32 %v16921_v55, %v18883_v42  ;;  %8960 = vmatpush1.bf16.msra.mxu0 %v17310_v25  ;;  %8767 = vmatprep.mubr.bf16.mxu0 %v18690_v13  ;;  %v6290_v31 = vadd.f32 %v18884_v15, %v18883_v42  ;;  %v18890_v12 = vld [vmem:[#allocation29_spill] sm:$0xff] }
 0x5ec   : > { %v6542_v48 = vmax.f32 %v6195_v63, 0.0  ;;  %v6201_v2 = vadd.f32 %v18886_v4, %v18885_v19  ;;  %v6294_v20 = vadd.f32 %v18887_v24, %v18885_v19  ;;  %v6544_v38 = vmax.f32 %v6288_v30, 0.0 }
 0x5ed   : > { %v7011_v10 = vsel %vm6928_vm1, %v7010_v39, %v7009_v3  ;;  %vm11931_vm15 = vcmp.lt.s32.totalorder %v11930_v57, 0  ;;  %v6543_v55 = vmax.f32 %v6197_v62, 0.0  ;;  %v6545_v59 = vmax.f32 %v6290_v31, 0.0 }
 0x5ee   : > { %v7014_v25 = vsel %vm17227_vm12, %v16946_v60, %v7011_v10  ;;  %v7829_v36 = vsel %vm11931_vm15, 0, %v11930_v57  ;;  %v8438_v41 = vpack.c.bf16 %v6542_v48, %v6534_v28  ;;  %v17414_v33 = vpack.c.bf16 %v6544_v38, %v6536_v5  ;;  %v18893_v5 = vld [vmem:[#allocation19_spill] sm:$0xff]  ;;  %v18896_v10 = vld [vmem:[#allocation21_spill] sm:$0xff] }
 0x5ef   : > { %12545 = vcosq.f32 %v7014_v25  ;;  %v7830_v6 = vsub.s32 32, %v7829_v36  ;;  %v7831_v37 = vshll.u32 %v17350_v54, %v7829_v36  ;;  %v7834_v58 = vsub.s32 4294967266, %v7829_v36  ;;  %v17425_v54 = vld [vmem:[%s18489_s7 + $0x8] sm:$0xff]  }
 0x5f0   : > { %12547 = vsinq.f32 %v7014_v25  ;;  %v8439_v56 = vpack.c.bf16 %v6543_v55, %v6535_v17  ;;  %v17416_v32 = vpack.c.bf16 %v6545_v59, %v6537_v35  ;;  %vm7025_vm1 = vcmp.eq.s32.totalorder %v17376_v53, 2  ;;  %v18894_v35 = vld [vmem:[#allocation18_spill] sm:$0xff]  ;;  %v18897_v55 = vld [vmem:[#allocation20_spill] sm:$0xff] }
 0x5f1   : > { %vm7437_vm2 = vcmp.eq.s32.totalorder %v17379_v34, 2  ;;  %v7832_v49 = vshrl.u32 %v7814_v51, %v7830_v6  ;;  %v7835_v11 = vadd.s32 127, %v7834_v58  ;;  %v6550_v22 = vmax.f32 %v6201_v2, 0.0  ;;  %v18892_v51 = vld [vmem:[#allocation16_spill] sm:$0xff] }
 0x5f2   : > { %v6552_v7 = vmax.f32 %v6294_v20, 0.0  ;;  %vm7022_vm12 = vcmp.eq.s32.totalorder %v17376_v53, 0  ;;  %vm7434_vm13 = vcmp.eq.s32.totalorder %v17379_v34, 0  ;;  %11985 = vmatmul.mubr.msk.bf16.gmra.mrb[220].mxu0 %vm8520_vm8, %v17425_v54  ;;  %v6203_v14 = vadd.f32 %v18888_v9, %v18885_v19  ;;  %8961 = vmatprep.subr.bf16.mxu0 %v8439_v56  ;;  %v18895_v20 = vld [vmem:[#allocation33_spill] sm:$0xff] }
 0x5f3   : > { %v6296_v61 = vadd.f32 %v18889_v29, %v18885_v19  ;;  %v6205_v8 = vadd.f32 %v18891_v45, %v18890_v12  ;;  %v6298_v3 = vadd.f32 %v18892_v51, %v18890_v12  ;;  %vm7021_vm7 = vcmp.lt.s32.totalorder %v17376_v53, 2  ;;  %8777 = vmatprep.mubr.bf16.mxu0 %v18690_v13  ;;  %8962 = vmatpush1.bf16.msra.mxu0 %v8438_v41  ;;  %v18902_v45 = vld [vmem:[#allocation84_spill] sm:$0xff] }
 0x5f4   : > { %vm7433_vm4 = vcmp.lt.s32.totalorder %v17379_v34, 2  ;;  %v7833_v47 = vor.u32 %v7832_v49, %v7831_v37  ;;  %v7836_v28 = vshll.u32 %v7835_v11, 23  ;;  %v6207_v17 = vadd.f32 %v18893_v5, %v18890_v12  ;;  %v18898_v37 = vld [vmem:[#allocation10_spill] sm:$0xff]  ;;  %v18899_v49 = vld [vmem:[#allocation9_spill] sm:$0xff]  ;;  %v18903_v51 = vld [vmem:[#allocation24_spill] sm:$0xff] }
 0x5f5   : > { %v6300_v63 = vadd.f32 %v18894_v35, %v18890_v12  ;;  %vm7018_vm14 = vweird.f32 %v16946_v60  ;;  %v6551_v39 = vmax.f32 %v6203_v14, 0.0  ;;  %v6553_v57 = vmax.f32 %v6296_v61, 0.0  ;;  %v17466_v5 = vld [vmem:[%s18489_s7 + $0x10] sm:$0xff]  }
 0x5f6   : > { %v6558_v30 = vmax.f32 %v6205_v8, 0.0  ;;  %v6560_v62 = vmax.f32 %v6298_v3, 0.0  ;;  %v7837_v48 = vor.u32 4788187, %v7836_v28  ;;  %v7840_v15 = vcvt.s32.f32 %v7833_v47  ;;  %18904 = vst [vmem:[#allocation23_spill] sm:$0xff] %v17466_v5 }
 0x5f7   : > { %v6559_v31 = vmax.f32 %v6207_v17, 0.0  ;;  %v6561_v4 = vmax.f32 %v6300_v63, 0.0  ;;  %v6211_v38 = vadd.f32 %v18896_v10, %v18895_v20  ;;  %v6304_v25 = vadd.f32 %v18897_v55, %v18895_v20  ;;  %v18905_v63 = vld [vmem:[#allocation85_spill] sm:$0xff] }
 0x5f8   : > { %v8446_v2 = vpack.c.bf16 %v6558_v30, %v6550_v22  ;;  %v17445_v24 = vpack.c.bf16 %v6560_v62, %v6552_v7  ;;  %v7838_v36 = vand.u32 2147483647, %v7837_v48  ;;  %v6213_v41 = vadd.f32 %v18898_v37, %v18895_v20  ;;  %v18900_v22 = vld [vmem:[#allocation32_spill] sm:$0xff]  ;;  %v18901_v7 = vld [vmem:[#allocation83_spill] sm:$0xff]  ;;  %v17500_v53 = vpop.f32.mrb[168].mxu0 }
 0x5f9   : > { %v8447_v59 = vpack.c.bf16 %v6559_v31, %v6551_v39  ;;  %v17451_v6 = vpack.c.bf16 %v6561_v4, %v6553_v57  ;;  %v6566_v58 = vmax.f32 %v6211_v38, 0.0  ;;  %v6568_v56 = vmax.f32 %v6304_v25, 0.0  ;;  %v12546_v14 = vpop.eup %12545 }
 0x5fa   : > { %v6306_v11 = vadd.f32 %v18899_v49, %v18895_v20  ;;  %v6215_v9 = vadd.f32 %v18901_v7, %v18900_v22  ;;  %v7841_v29 = vmul.f32 %v7840_v15, %v7838_v36  ;;  %v6567_v61 = vmax.f32 %v6213_v41, 0.0  ;;  %v12548_v47 = vpop.eup %12547  ;;  %11986 = vmatmul.mubr.msk.bf16.gmra.mrb[224].mxu0 %vm8520_vm8, %v17466_v5  ;;  %v17504_v7 = vpop.f32.mrb[169].mxu0 }
 0x5fb   : > { %v6308_v8 = vadd.f32 %v18902_v45, %v18900_v22  ;;  %8963 = vmatprep.subr.bf16.mxu0 %v8447_v59  ;;  %v6217_v3 = vadd.f32 %v18903_v51, %v18900_v22  ;;  %v7026_v28 = vxor.u32 2147483648, %v12546_v14  ;;  %v6310_v39 = vadd.f32 %v18905_v63, %v18900_v22  ;;  %8787 = vmatprep.mubr.bf16.mxu0 %v18690_v13  ;;  %v18908_v45 = vld [vmem:[#allocation87_spill] sm:$0xff]  ;;  %v18909_v51 = vld [vmem:[#allocation88_spill] sm:$0xff] }
 0x5fc   : > { %v6569_v17 = vmax.f32 %v6306_v11, 0.0  ;;  %v6574_v35 = vmax.f32 %v6215_v9, 0.0  ;;  %v7023_v57 = vxor.u32 2147483648, %v12548_v47  ;;  %v7842_v30 = vxor.u32 2147483648, %v7841_v29  ;;  %8964 = vmatpush1.bf16.msra.mxu0 %v8446_v2  ;;  %v17526_v63 = vld [vmem:[%s18489_s7 + $0x18] sm:$0xff]  }
 0x5fd   : > { %v6576_v62 = vmax.f32 %v6308_v8, 0.0  ;;  %v6575_v48 = vmax.f32 %v6217_v3, 0.0  ;;  %v7027_v15 = vsel %vm7025_vm1, %v7026_v28, %v12548_v47  ;;  %v7439_v31 = vsel %vm7437_vm2, %v7026_v28, %v12548_v47  ;;  %v17515_v47 = vpop.f32.mrb[170].mxu0  ;;  %18911 = vst [vmem:[#allocation28_spill] sm:$0xff] %v17526_v63 }
 0x5fe   : > { %v8454_v4 = vpack.c.bf16 %v6574_v35, %v6566_v58  ;;  %v6577_v10 = vmax.f32 %v6310_v39, 0.0  ;;  %v7024_v38 = vsel %vm7022_vm12, %v12546_v14, %v7023_v57  ;;  %v7436_v55 = vsel %vm7434_vm13, %v12546_v14, %v7023_v57  ;;  %v18906_v14 = vld [vmem:[#allocation36_spill] sm:$0xff]  ;;  %v18912_v39 = vld [vmem:[#allocation89_spill] sm:$0xff] }
 0x5ff   : > { %v7843_v25 = vsel %vm7760_vm9, %v7842_v30, %v7841_v29  ;;  %v17483_v2 = vpack.c.bf16 %v6576_v62, %v6568_v56  ;;  %v7028_v36 = vsel %vm7021_vm7, %v7024_v38, %v7027_v15  ;;  %v7440_v59 = vsel %vm7433_vm4, %v7436_v55, %v7439_v31  ;;  %v18907_v29 = vld [vmem:[#allocation86_spill] sm:$0xff]  ;;  %v17532_v30 = vpop.f32.mrb[171].mxu0  ;;  %v18915_v38 = vld [vmem:[#allocation35_spill] sm:$0xff] }
 0x600   : > { %v7846_v37 = vsel %vm17323_vm5, %v16981_v46, %v7843_v25  ;;  %v8455_v41 = vpack.c.bf16 %v6575_v48, %v6567_v61  ;;  %v7029_v58 = vsel %vm7018_vm14, nan, %v7028_v36  ;;  %v17496_v49 = vsel %vm7018_vm14, nan, %v7440_v59  ;;  %v18916_v55 = vld [vmem:[#allocation90_spill] sm:$0xff]  ;;  %v18917_v36 = vld [vmem:[#allocation91_spill] sm:$0xff] }
 0x601   : > { %12549 = vcosq.f32 %v7846_v37  ;;  %v17498_v56 = vpack.c.bf16 %v6577_v10, %v6569_v17  ;;  %v8293_v34 = vcombine.high %v7029_v58, %v7029_v58  ;;  %v8300_v11 = vrot.slane %v7029_v58, 5 }
 0x602   : > { %12551 = vsinq.f32 %v7846_v37  ;;  %v8317_v44 = vcombine.high %v17496_v49, %v17496_v49  ;;  %8965 = vmatprep.subr.bf16.mxu0 %v8455_v41  ;;  %vm7857_vm9 = vcmp.eq.s32.totalorder %v17385_v16, 2  ;;  %vm8269_vm5 = vcmp.eq.s32.totalorder %v17383_v50, 2  ;;  %11987 = vmatmul.mubr.msk.bf16.gmra.mrb[228].mxu0 %vm8520_vm8, %v17526_v63  ;;  %v18919_v41 = vld [vmem:[#allocation92_spill] sm:$0xff] }
 0x603   : > { %v18619_v9 = vrot.slane %v17496_v49, 2  ;;  %v6221_v61 = vadd.f32 %v18907_v29, %v18906_v14  ;;  %v6314_v8 = vadd.f32 %v18908_v45, %v18906_v14  ;;  %v6223_v3 = vadd.f32 %v18909_v51, %v18906_v14  ;;  %8966 = vmatpush1.bf16.msra.mxu0 %v8454_v4  ;;  %8797 = vmatprep.mubr.bf16.mxu0 %v18690_v13 }
 0x604   : > { %vm7854_vm6 = vcmp.eq.s32.totalorder %v17385_v16, 0  ;;  %vm8266_vm10 = vcmp.eq.s32.totalorder %v17383_v50, 0  ;;  %v8301_v28 = vrot.slane %v8293_v34, 5  ;;  %v17519_v17 = vrot.slane %v8317_v44, 2  ;;  %v18920_v34 = vld [vmem:[#allocation93_spill] sm:$0xff] }
 0x605   : > { %vm18910_vm3 = vcmask 1042432   ;;  %v6316_v57 = vadd.f32 %v18912_v39, %v18906_v14  ;;  %vm7853_vm0 = vcmp.lt.s32.totalorder %v17385_v16, 2  ;;  %vm8265_vm15 = vcmp.lt.s32.totalorder %v17383_v50, 2 }
 0x606   : > { %v8376_v35 = vsel %vm18910_vm3, %v16946_v60, %v8300_v11  ;;  %vm18913_vm1 = vcmask 1045504   ;;  %v6582_v48 = vmax.f32 %v6221_v61, 0.0  ;;  %v6584_v15 = vmax.f32 %v6314_v8, 0.0  ;;  %vm18914_vm12 = vmmov %vm18910_vm3  ;;  %v18921_v60 = vld [vmem:[#allocation38_spill] sm:$0xff] }
 0x607   : > { %v17539_v62 = vsel %vm18913_vm1, %v8376_v35, %v18619_v9  ;;  %v6583_v31 = vmax.f32 %v6223_v3, 0.0  ;;  %vm7850_vm2 = vweird.f32 %v16981_v46  ;;  %v8377_v4 = vsel %vm18914_vm12, %v8281_v21, %v8301_v28  ;;  %vm18918_vm13 = vmmov %vm18913_vm1  ;;  %v18922_v61 = vld [vmem:[#allocation94_spill] sm:$0xff]  ;;  %v18923_v35 = vld [vmem:[#allocation95_spill] sm:$0xff] }
 0x608   : > { %v6585_v10 = vmax.f32 %v6316_v57, 0.0  ;;  %v6225_v25 = vadd.f32 %v18916_v55, %v18915_v38  ;;  %v6318_v59 = vadd.f32 %v18917_v36, %v18915_v38  ;;  %v17553_v37 = vsel %vm18918_vm13, %v8377_v4, %v17519_v17  ;;  %v6376_v57 = vpop.f32.mrb[172].mxu0  ;;  %v18925_v9 = vld [vmem:[#allocation37_spill] sm:$0xff] }
 0x609   : > { %v6227_v58 = vadd.f32 %v18919_v41, %v18915_v38  ;;  %v6320_v11 = vadd.f32 %v18920_v34, %v18915_v38  ;;  %v6231_v21 = vadd.f32 %v17117_v23, %v18921_v60  ;;  %v6324_v45 = vadd.f32 %v18922_v61, %v18921_v60 }
 0x60a   : > { %v6590_v44 = vmax.f32 %v6225_v25, 0.0  ;;  %v6592_v29 = vmax.f32 %v6318_v59, 0.0  ;;  %v6233_v8 = vadd.f32 %v17129_v18, %v18921_v60  ;;  %v6326_v39 = vadd.f32 %v18923_v35, %v18921_v60  ;;  %v6378_v25 = vpop.f32.mrb[173].mxu0  ;;  %v18926_v18 = vld [vmem:[#allocation96_spill] sm:$0xff] }
 0x60b   : > { %v6591_v51 = vmax.f32 %v6227_v58, 0.0  ;;  %v6593_v3 = vmax.f32 %v6320_v11, 0.0  ;;  %v6598_v28 = vmax.f32 %v6231_v21, 0.0  ;;  %v6600_v36 = vmax.f32 %v6324_v45, 0.0  ;;  %v12550_v59 = vpop.eup %12549  ;;  %v6380_v11 = vpop.f32.mrb[174].mxu0 }
 0x60c   : > { %v8462_v4 = vpack.c.bf16 %v6590_v44, %v6582_v48  ;;  %v17567_v55 = vpack.c.bf16 %v6592_v29, %v6584_v15  ;;  %v6599_v23 = vmax.f32 %v6233_v8, 0.0  ;;  %v6601_v61 = vmax.f32 %v6326_v39, 0.0  ;;  %v12552_v21 = vpop.eup %12551  ;;  %v17576_v48 = vld [vmem:[%s18489_s7 + $0x20] sm:$0xff]   ;;  %v18930_v29 = vld [vmem:[#allocation99_spill] sm:$0xff]  ;;  %v6382_v8 = vpop.f32.mrb[175].mxu0 }
 0x60d   : > { %v8463_v41 = vpack.c.bf16 %v6591_v51, %v6583_v31  ;;  %v17569_v34 = vpack.c.bf16 %v6593_v3, %v6585_v10  ;;  %v6235_v58 = vadd.f32 %v18926_v18, %v18925_v9  ;;  %v7858_v63 = vxor.u32 2147483648, %v12550_v59  ;;  %18927 = vst [vmem:[#allocation12_spill] sm:$0xff] %v17576_v48  ;;  %11988 = vmatmul.mubr.msk.bf16.gmra.mrb[232].mxu0 %vm8520_vm8, %v17576_v48  ;;  %v18928_v15 = vld [vmem:[#allocation97_spill] sm:$0xff]  ;;  %v18929_v10 = vld [vmem:[#allocation98_spill] sm:$0xff] }
 0x60e   : > { %18924 = vst [vmem:[#allocation27_spill] sm:$0xff] %v17567_v55  ;;  %v6328_v31 = vadd.f32 %v18928_v15, %v18925_v9  ;;  %v6237_v44 = vadd.f32 %v18929_v10, %v18925_v9  ;;  %v6330_v45 = vadd.f32 %v18930_v29, %v18925_v9  ;;  %v7855_v51 = vxor.u32 2147483648, %v12552_v21  ;;  %8807 = vmatprep.mubr.bf16.mxu0 %v18690_v13 }
 0x60f   : > { %v6606_v3 = vmax.f32 %v6235_v58, 0.0  ;;  %8967 = vmatprep.subr.bf16.mxu0 %v8463_v41  ;;  %v6367_v35 = vadd.f32 %v17500_v53, %v18844_v52  ;;  %v6369_v39 = vadd.f32 %v17504_v7, %v18844_v52  ;;  %v7859_v18 = vsel %vm7857_vm9, %v7858_v63, %v12552_v21 }
 0x610   : > { %v8271_v15 = vsel %vm8269_vm5, %v7858_v63, %v12552_v21  ;;  %v6608_v10 = vmax.f32 %v6328_v31, 0.0  ;;  %v6607_v29 = vmax.f32 %v6237_v44, 0.0  ;;  %8968 = vmatpush1.bf16.msra.mxu0 %v8462_v4  ;;  %v7856_v41 = vsel %vm7854_vm6, %v12550_v59, %v7855_v51 }
 0x611   : > { %v8268_v58 = vsel %vm8266_vm10, %v12550_v59, %v7855_v51  ;;  %v8470_v48 = vpack.c.bf16 %v6606_v3, %v6598_v28  ;;  %v6609_v53 = vmax.f32 %v6330_v45, 0.0  ;;  %v7860_v7 = vsel %vm7853_vm0, %v7856_v41, %v7859_v18  ;;  %v6386_v28 = vpop.f32.mrb[176].mxu0 }
 0x612   : > { %v8272_v55 = vsel %vm8265_vm15, %v8268_v58, %v8271_v15  ;;  %v17603_v5 = vpack.c.bf16 %v6608_v10, %v6600_v36  ;;  %v8471_v63 = vpack.c.bf16 %v6607_v29, %v6599_v23  ;;  %v7861_v4 = vsel %vm7850_vm2, nan, %v7860_v7  ;;  %v6388_v50 = vpop.f32.mrb[177].mxu0 }
 0x613   : > { %v8273_v21 = vsel %vm7850_vm2, nan, %v8272_v55  ;;  %v17609_v31 = vpack.c.bf16 %v6609_v53, %v6601_v61  ;;  %v6522_v59 = vmax.f32 %v6367_v35, 0.0  ;;  %v8341_v44 = vcombine.high %v7861_v4, %v7861_v4  ;;  %v6390_v61 = vpop.f32.mrb[178].mxu0 }
 0x614   : > { %v8348_v45 = vrot.slane %v7861_v4, 7  ;;  %v8365_v16 = vcombine.low %v8273_v21, %v8273_v21  ;;  %v6523_v51 = vmax.f32 %v6369_v39, 0.0  ;;  %8969 = vmatprep.subr.bf16.mxu0 %v8471_v63  ;;  %v6371_v36 = vadd.f32 %v17515_v47, %v18867_v1  ;;  %v17623_v39 = vld [vmem:[%s18489_s7 + $0x28] sm:$0xff]   ;;  %v17639_v4 = vld [vmem:[%s18488_s6] sm:$0xff]  }
 0x615   : > { %v6373_v23 = vadd.f32 %v17532_v30, %v18867_v1  ;;  %8970 = vmatpush1.bf16.msra.mxu0 %v8470_v48  ;;  %v6377_v46 = vadd.f32 %v6376_v57, %v18882_v40  ;;  %v6379_v55 = vadd.f32 %v6378_v25, %v18882_v40  ;;  %v8349_v3 = vrot.slane %v8341_v44, 7  ;;  %v6392_v57 = vpop.f32.mrb[179].mxu0 }
 0x616   : > { %v18931_v35 = vrot.slane %v17496_v49, 2  ;;  %vm18932_vm7 = vcmask 1040384   ;;  %11989 = vmatmul.mubr.msk.bf16.gmra.mrb[236].mxu0 %vm8520_vm8, %v17623_v39  ;;  %v6381_v47 = vadd.f32 %v6380_v11, %v18883_v42  ;;  %v6383_v30 = vadd.f32 %v6382_v8, %v18883_v42 }
 0x617   : > { %vm18933_vm4 = vcmask 1043456   ;;  %v6530_v48 = vmax.f32 %v6371_v36, 0.0  ;;  %v6531_v15 = vmax.f32 %v6373_v23, 0.0  ;;  %8991 = vmatprep.mubr.bf16.mxu0 %v18690_v13  ;;  %v6538_v49 = vmax.f32 %v6377_v46, 0.0  ;;  %vm18934_vm14 = vmmov %vm18932_vm7 }
 0x618   : > { %v8392_v18 = vsel %vm18932_vm7, %v18931_v35, %v8348_v45  ;;  %v8393_v10 = vsel %vm18934_vm14, %v17519_v17, %v8349_v3  ;;  %v6539_v41 = vmax.f32 %v6379_v55, 0.0  ;;  %v6546_v58 = vmax.f32 %v6381_v47, 0.0  ;;  %vm18935_vm9 = vmmov %vm18933_vm4 }
 0x619   : > { %v8400_v25 = vsel %vm18933_vm4, %v8392_v18, %v8365_v16  ;;  %v8401_v53 = vsel %vm18935_vm9, %v8393_v10, %v8273_v21  ;;  %v8434_v11 = vpack.c.bf16 %v6530_v48, %v6522_v59  ;;  %v8435_v7 = vpack.c.bf16 %v6531_v15, %v6523_v51  ;;  %v6396_v59 = vpop.f32.mrb[180].mxu0  ;;  %v17665_v48 = vld [vmem:[%s18488_s6 + $0x8] sm:$0xff]  }
 0x61a   : > { %v11994_v29 = vpack.c.bf16 %v8400_v25, %v17539_v62  ;;  %v6547_v8 = vmax.f32 %v6383_v30, 0.0  ;;  %v11991_v63 = vpack.c.bf16 %v8401_v53, %v17553_v37  ;;  %v8442_v44 = vpack.c.bf16 %v6546_v58, %v6538_v49  ;;  %v6398_v36 = vpop.f32.mrb[181].mxu0  ;;  %v6459_v25 = vpop.f32.mrb[168].mxu1 }
 0x61b   : > { %v6387_v45 = vadd.f32 %v6386_v28, %v18885_v19  ;;  %v6389_v17 = vadd.f32 %v6388_v50, %v18885_v19  ;;  %9145 = vmatprep.subr.bf16.mxu0 %v8435_v7  ;;  %v6391_v16 = vadd.f32 %v6390_v61, %v18890_v12  ;;  %v6393_v21 = vadd.f32 %v6392_v57, %v18890_v12  ;;  %v6400_v55 = vpop.f32.mrb[182].mxu0  ;;  %v6461_v49 = vpop.f32.mrb[169].mxu1 }
 0x61c   : > { %v8443_v62 = vpack.c.bf16 %v6547_v8, %v6539_v41  ;;  %11992 = vmatprep.subr.msk.bf16.mxu1 %vm16594_vm11, %v11991_v63  ;;  %v6397_v51 = vadd.f32 %v6396_v59, %v18895_v20  ;;  %v6399_v46 = vadd.f32 %v6398_v36, %v18895_v20  ;;  %vm18936_vm5 = vcmask 785408   ;;  %v6402_v3 = vpop.f32.mrb[183].mxu0  ;;  %v6463_v41 = vpop.f32.mrb[170].mxu1 }
 0x61d   : > { %v6554_v37 = vmax.f32 %v6387_v45, 0.0  ;;  %11995 = vmatpush1.bf16.msk.msra.mxu1 %vm16594_vm11, %v11994_v29  ;;  %v6555_v28 = vmax.f32 %v6389_v17, 0.0  ;;  %v6562_v23 = vmax.f32 %v6391_v16, 0.0  ;;  %v6563_v50 = vmax.f32 %v6393_v21, 0.0  ;;  %v6406_v29 = vpop.f32.mrb[184].mxu0  ;;  %vm18937_vm11 = vmmov %vm18936_vm5 }
 0x61e   : > { %9052 = vmatprep.subr.bf16.mxu1 %v17358_v26  ;;  %12008 = vmatmul.mubr.msk.bf16.vlgmr.msra.gmra.mrb[192].mxu0 %vm18936_vm5, %v17639_v4  ;;  %v6401_v61 = vadd.f32 %v6400_v55, %v18900_v22  ;;  %v6403_v18 = vadd.f32 %v6402_v3, %v18900_v22  ;;  %v6570_v47 = vmax.f32 %v6397_v51, 0.0  ;;  %v6571_v26 = vmax.f32 %v6399_v46, 0.0  ;;  %vm18938_vm6 = vmmov %vm18936_vm5 }
 0x61f   : > { %9146 = vmatpush1.bf16.msra.mxu0 %v8434_v11  ;;  %9001 = vmatprep.mubr.bf16.mxu0 %v18690_v13  ;;  %v8450_v35 = vpack.c.bf16 %v6562_v23, %v6554_v37  ;;  %v8451_v27 = vpack.c.bf16 %v6563_v50, %v6555_v28  ;;  %v6407_v58 = vadd.f32 %v6406_v29, %v18906_v14  ;;  %v6465_v11 = vpop.f32.mrb[171].mxu1  ;;  %vm18941_vm10 = vmmov %vm18936_vm5 }
 0x620   : > { %11996 = vmatmul.mubr.msk.bf16.vlgmr.msra.gmra.mrb[216].mxu1 %vm8520_vm8, %v17390_v0  ;;  %9147 = vmatprep.subr.bf16.mxu0 %v8443_v62  ;;  %v6578_v30 = vmax.f32 %v6401_v61, 0.0  ;;  %v6579_v57 = vmax.f32 %v6403_v18, 0.0  ;;  %v6460_v0 = vadd.f32 %v6459_v25, %v18844_v52  ;;  %v6464_v53 = vadd.f32 %v6463_v41, %v18867_v1  ;;  %v6469_v36 = vpop.f32.mrb[172].mxu1  ;;  %vm18943_vm3 = vmmov %vm18936_vm5 }
 0x621   : > { %9053 = vmatpush1.bf16.msra.mxu1 %v17337_v43  ;;  %8860 = vmatprep.mubr.bf16.mxu1 %v18690_v13  ;;  %v6462_v43 = vadd.f32 %v6461_v49, %v18844_v52  ;;  %v6466_v63 = vadd.f32 %v6465_v11, %v18867_v1  ;;  %v6586_v16 = vmax.f32 %v6407_v58, 0.0  ;;  %v6470_v23 = vadd.f32 %v6469_v36, %v18882_v40  ;;  %v6471_v50 = vpop.f32.mrb[173].mxu1  ;;  %vm18945_vm0 = vmmov %vm18943_vm3 }
 0x622   : > { %9054 = vmatprep.subr.bf16.mxu1 %v17416_v32  ;;  %v8458_v15 = vpack.c.bf16 %v6578_v30, %v6570_v47  ;;  %v8459_v10 = vpack.c.bf16 %v6579_v57, %v6571_v26  ;;  %v6408_v32 = vpop.f32.mrb[185].mxu0  ;;  %v6524_v45 = vmax.f32 %v6460_v0, 0.0  ;;  %v6532_v17 = vmax.f32 %v6464_v53, 0.0  ;;  %v6473_v61 = vpop.f32.mrb[174].mxu1  ;;  %v17717_v53 = vld [vmem:[%s18488_s6 + $0x18] sm:$0xff]   ;;  %vm18947_vm15 = vmmov %vm18945_vm0 }
 0x623   : > { %9148 = vmatpush1.bf16.msra.mxu0 %v8442_v44  ;;  %v6409_v7 = vadd.f32 %v6408_v32, %v18906_v14  ;;  %v6410_v8 = vpop.f32.mrb[186].mxu0  ;;  %v6525_v62 = vmax.f32 %v6462_v43, 0.0  ;;  %v6472_v55 = vadd.f32 %v6471_v50, %v18882_v40  ;;  %v6540_v57 = vmax.f32 %v6470_v23, 0.0  ;;  %vm18948_vm1 = vmmov %vm18945_vm0 }
 0x624   : > { %9149 = vmatprep.subr.bf16.mxu0 %v8451_v27  ;;  %v6411_v52 = vadd.f32 %v6410_v8, %v18915_v38  ;;  %v6412_v44 = vpop.f32.mrb[187].mxu0  ;;  %v17684_v21 = vpack.c.bf16 %v6532_v17, %v6524_v45  ;;  %v6475_v27 = vpop.f32.mrb[175].mxu1  ;;  %vm18949_vm2 = vmmov %vm18945_vm0 }
 0x625   : > { %9055 = vmatpush1.bf16.msra.mxu1 %v17414_v33  ;;  %v6413_v33 = vadd.f32 %v6412_v44, %v18915_v38  ;;  %v6587_v59 = vmax.f32 %v6409_v7, 0.0  ;;  %v6476_v30 = vadd.f32 %v6475_v27, %v18883_v42  ;;  %v6541_v0 = vmax.f32 %v6472_v55, 0.0  ;;  %vm18950_vm12 = vmmov %vm18945_vm0 }
 0x626   : > { %9056 = vmatprep.subr.bf16.mxu1 %v17451_v6  ;;  %12009 = vmatmul.mubr.msk.bf16.gmra.mrb[196].mxu0 %vm18937_vm11, %v17665_v48  ;;  %v6533_v6 = vmax.f32 %v6466_v63, 0.0  ;;  %v6594_v1 = vmax.f32 %v6411_v52, 0.0  ;;  %vm18951_vm13 = vmmov %vm18945_vm0 }
 0x627   : > { %9011 = vmatprep.mubr.bf16.mxu0 %v18690_v13  ;;  %9150 = vmatpush1.bf16.msra.mxu0 %v8450_v35  ;;  %v6595_v37 = vmax.f32 %v6413_v33, 0.0  ;;  %v6474_v35 = vadd.f32 %v6473_v61, %v18883_v42  ;;  %v6479_v32 = vpop.f32.mrb[176].mxu1  ;;  %v18944_v61 = vld [vmem:[#allocation12_spill] sm:$0xff]  ;;  %vm18952_vm7 = vmmov %vm18945_vm0 }
 0x628   : > { %11997 = vmatmul.mubr.msk.bf16.gmra.mrb[220].mxu1 %vm8520_vm8, %v17425_v54  ;;  %9151 = vmatprep.subr.bf16.mxu0 %v8459_v10  ;;  %v8437_v51 = vpack.c.bf16 %v6533_v6, %v6525_v62  ;;  %v17690_v54 = vld [vmem:[%s18488_s6 + $0x10] sm:$0xff]   ;;  %v8466_v28 = vpack.c.bf16 %v6594_v1, %v6586_v16  ;;  %v6480_v7 = vadd.f32 %v6479_v32, %v18885_v19  ;;  %v6481_v8 = vpop.f32.mrb[177].mxu1  ;;  %v18942_v6 = vld [vmem:[#allocation28_spill] sm:$0xff]  ;;  %vm18953_vm4 = vmmov %vm18945_vm0 }
 0x629   : > { %8870 = vmatprep.mubr.bf16.mxu1 %v18690_v13  ;;  %9057 = vmatpush1.bf16.msra.mxu1 %v17445_v24  ;;  %v8467_v46 = vpack.c.bf16 %v6595_v37, %v6587_v59  ;;  %v6416_v24 = vpop.f32.mrb[188].mxu0  ;;  %v6548_v25 = vmax.f32 %v6474_v35, 0.0  ;;  %v18940_v10 = vld [vmem:[#allocation27_spill] sm:$0xff]  ;;  %v6482_v52 = vadd.f32 %v6481_v8, %v18885_v19  ;;  %v6483_v44 = vpop.f32.mrb[178].mxu1  ;;  %vm18954_vm14 = vmmov %vm18945_vm0 }
 0x62a   : > { %9058 = vmatprep.subr.bf16.mxu1 %v17498_v56  ;;  %v6417_v3 = vadd.f32 %v6416_v24, %v18921_v60  ;;  %v6418_v56 = vpop.f32.mrb[189].mxu0  ;;  %v6485_v45 = vpop.f32.mrb[179].mxu1  ;;  %v6556_v33 = vmax.f32 %v6480_v7, 0.0  ;;  %vm18955_vm9 = vmmov %vm18945_vm0 }
 0x62b   : > { %9152 = vmatpush1.bf16.msra.mxu0 %v8458_v15  ;;  %v6419_v18 = vadd.f32 %v6418_v56, %v18921_v60  ;;  %v6420_v47 = vpop.f32.mrb[190].mxu0  ;;  %v18939_v15 = vld [vmem:[#allocation23_spill] sm:$0xff]  ;;  %v17709_v29 = vpack.c.bf16 %v6548_v25, %v6540_v57  ;;  %v6486_v17 = vadd.f32 %v6485_v45, %v18890_v12  ;;  %v6557_v19 = vmax.f32 %v6482_v52, 0.0  ;;  %vm18956_vm5 = vmmov %vm18945_vm0 }
 0x62c   : > { %9153 = vmatprep.subr.bf16.mxu0 %v8467_v46  ;;  %v6421_v40 = vadd.f32 %v6420_v47, %v18925_v9  ;;  %v6422_v26 = vpop.f32.mrb[191].mxu0  ;;  %v6602_v49 = vmax.f32 %v6417_v3, 0.0  ;;  %vm18957_vm11 = vmmov %vm18945_vm0 }
 0x62d   : > { %9059 = vmatpush1.bf16.msra.mxu1 %v17483_v2  ;;  %v6423_v2 = vadd.f32 %v6422_v26, %v18925_v9  ;;  %v6603_v43 = vmax.f32 %v6419_v18, 0.0 }
 0x62e   : > { %9060 = vmatprep.subr.bf16.mxu1 %v17569_v34  ;;  %12010 = vmatmul.mubr.msk.bf16.gmra.mrb[200].mxu0 %vm18938_vm6, %v17690_v54  ;;  %v6549_v34 = vmax.f32 %v6476_v30, 0.0  ;;  %v6610_v42 = vmax.f32 %v6421_v40, 0.0  ;;  %vm18958_vm6 = vmmov %vm18945_vm0 }
 0x62f   : > { %9021 = vmatprep.mubr.bf16.mxu0 %v18690_v13  ;;  %9154 = vmatpush1.bf16.msra.mxu0 %v8466_v28  ;;  %v6611_v41 = vmax.f32 %v6423_v2, 0.0  ;;  %v6489_v59 = vpop.f32.mrb[180].mxu1 }
 0x630   : > { %11998 = vmatmul.mubr.msk.bf16.gmra.mrb[224].mxu1 %vm8520_vm8, %v18939_v15  ;;  %v17712_v58 = vpack.c.bf16 %v6549_v34, %v6541_v0  ;;  %v8474_v11 = vpack.c.bf16 %v6610_v42, %v6602_v49  ;;  %v6490_v37 = vadd.f32 %v6489_v59, %v18895_v20 }
 0x631   : > { %8880 = vmatprep.mubr.bf16.mxu1 %v18690_v13  ;;  %9061 = vmatpush1.bf16.msra.mxu1 %v18940_v10  ;;  %v8475_v63 = vpack.c.bf16 %v6611_v41, %v6603_v43 }
 0x632   : > { %9062 = vmatprep.subr.bf16.mxu1 %v17609_v31  ;;  %v6484_v31 = vadd.f32 %v6483_v44, %v18890_v12  ;;  %v17735_v12 = vld [vmem:[%s18488_s6 + $0x20] sm:$0xff]   ;;  %v6572_v24 = vmax.f32 %v6490_v37, 0.0 }
 0x633   : > { %9155 = vmatprep.subr.bf16.mxu0 %v8475_v63 }
 0x634   : > { %v6564_v62 = vmax.f32 %v6484_v31, 0.0  ;;  %9156 = vmatpush1.bf16.msra.mxu0 %v8474_v11 }
 0x635   : > { %9063 = vmatpush1.bf16.msra.mxu1 %v17603_v5  ;;  %v6565_v5 = vmax.f32 %v6486_v17, 0.0 }
 0x636   : > { %9238 = vmatprep.subr.bf16.mxu1 %v8437_v51  ;;  %12011 = vmatmul.mubr.msk.bf16.gmra.mrb[204].mxu0 %vm18941_vm10, %v17717_v53  ;;  %v17730_v16 = vpack.c.bf16 %v6564_v62, %v6556_v33  ;;  %v6491_v51 = vpop.f32.mrb[181].mxu1  ;;  %vm18959_vm10 = vmmov %vm18945_vm0 }
 0x637   : > { %9031 = vmatprep.mubr.bf16.mxu0 %v18690_v13  ;;  %v8453_v1 = vpack.c.bf16 %v6565_v5, %v6557_v19  ;;  %v6492_v36 = vadd.f32 %v6491_v51, %v18895_v20  ;;  %v6493_v28 = vpop.f32.mrb[182].mxu1 }
 0x638   : > { %11999 = vmatmul.mubr.msk.bf16.gmra.mrb[228].mxu1 %vm8520_vm8, %v18942_v6  ;;  %v6494_v23 = vadd.f32 %v6493_v28, %v18900_v22  ;;  %v6495_v50 = vpop.f32.mrb[183].mxu1 }
 0x639   : > { %8890 = vmatprep.mubr.bf16.mxu1 %v18690_v13  ;;  %v6496_v46 = vadd.f32 %v6495_v50, %v18900_v22  ;;  %v6573_v3 = vmax.f32 %v6492_v36, 0.0  ;;  %v6499_v27 = vpop.f32.mrb[184].mxu1  ;;  %v17750_v22 = vld [vmem:[%s18488_s6 + $0x28] sm:$0xff]  }
 0x63a   : > { %v6580_v55 = vmax.f32 %v6494_v23, 0.0  ;;  %v6500_v18 = vadd.f32 %v6499_v27, %v18906_v14  ;;  %v6501_v47 = vpop.f32.mrb[185].mxu1  ;;  %v18966_v36 = vld [vmem:[#allocation42_spill] sm:$0xff] }
 0x63b   : > { %v6581_v56 = vmax.f32 %v6496_v46, 0.0  ;;  %v6502_v30 = vadd.f32 %v6501_v47, %v18906_v14  ;;  %v6503_v40 = vpop.f32.mrb[186].mxu1 }
 0x63c   : > { %v8460_v20 = vpack.c.bf16 %v6580_v55, %v6572_v24  ;;  %v6504_v26 = vadd.f32 %v6503_v40, %v18915_v38  ;;  %v6505_v57 = vpop.f32.mrb[187].mxu1  ;;  %v6588_v2 = vmax.f32 %v6500_v18, 0.0 }
 0x63d   : > { %v8461_v35 = vpack.c.bf16 %v6581_v56, %v6573_v3  ;;  %v6506_v25 = vadd.f32 %v6505_v57, %v18915_v38  ;;  %v6589_v0 = vmax.f32 %v6502_v30, 0.0  ;;  %v18968_v30 = vld [vmem:[#allocation44_spill] sm:$0xff] }
 0x63e   : > { %12012 = vmatmul.mubr.msk.bf16.gmra.mrb[208].mxu0 %vm18943_vm3, %v17735_v12  ;;  %v6596_v15 = vmax.f32 %v6504_v26, 0.0  ;;  %vm18960_vm3 = vmmov %vm18945_vm0 }
 0x63f   : > { %9041 = vmatprep.mubr.bf16.mxu0 %v18690_v13  ;;  %v6597_v34 = vmax.f32 %v6506_v25, 0.0  ;;  %v6509_v42 = vpop.f32.mrb[188].mxu1 }
 0x640   : > { %12000 = vmatmul.mubr.msk.bf16.gmra.mrb[232].mxu1 %vm8520_vm8, %v18944_v61  ;;  %v8468_v14 = vpack.c.bf16 %v6596_v15, %v6588_v2  ;;  %v6510_v10 = vadd.f32 %v6509_v42, %v18921_v60  ;;  %v6511_v38 = vpop.f32.mrb[189].mxu1  ;;  %v18969_v42 = vld [vmem:[#allocation47_spill] sm:$0xff] }
 0x641   : > { %8900 = vmatprep.mubr.bf16.mxu1 %v18690_v13  ;;  %v8469_v49 = vpack.c.bf16 %v6597_v34, %v6589_v0  ;;  %v6512_v43 = vadd.f32 %v6511_v38, %v18921_v60  ;;  %v6513_v41 = vpop.f32.mrb[190].mxu1 }
 0x642   : > { %v6514_v32 = vadd.f32 %v6513_v41, %v18925_v9  ;;  %v6515_v11 = vpop.f32.mrb[191].mxu1 }
 0x643   : > { %v6516_v7 = vadd.f32 %v6515_v11, %v18925_v9  ;;  %v6605_v63 = vmax.f32 %v6512_v43, 0.0 }
 0x644   : > { %v6612_v8 = vmax.f32 %v6514_v32, 0.0  ;;  %v18970_v32 = vld [vmem:[#allocation46_spill] sm:$0xff] }
 0x645   : > { %v6613_v52 = vmax.f32 %v6516_v7, 0.0 }
 0x646   : > { %12013 = vmatmul.mubr.msk.bf16.gmra.mrb[212].mxu0 %vm18945_vm0, %v17750_v22 }
 0x647   : > { %9177 = vmatprep.mubr.bf16.mxu0 %v18690_v13  ;;  %v8477_v9 = vpack.c.bf16 %v6613_v52, %v6605_v63 }
 0x648   : > { %12001 = vmatmul.mubr.msk.bf16.gmra.mrb[236].mxu1 %vm8520_vm8, %v17623_v39  ;;  %vm18946_vm8 = vmmov %vm18945_vm0  ;;  %v6604_v39 = vmax.f32 %v6510_v10, 0.0 }
 0x649   : > { %9084 = vmatprep.mubr.bf16.mxu1 %v18690_v13 }
 0x64a   : > { %v8476_v60 = vpack.c.bf16 %v6612_v8, %v6604_v39 }
 0x64e   : > { %12020 = vmatmul.mubr.msk.bf16.vlgmr.msra.gmra.mrb[216].mxu0 %vm18946_vm8, %v17639_v4  ;;  %vm18961_vm8 = vmmov %vm18945_vm0 }
 0x64f   : > { %9187 = vmatprep.mubr.bf16.mxu0 %v18690_v13 }
 0x650   : > { %12014 = vmatmul.mubr.msk.bf16.vlgmr.msra.gmra.mrb[192].mxu1 %vm18947_vm15, %v17639_v4  ;;  %vm18962_vm15 = vmmov %vm18945_vm0 }
 0x651   : > { %9239 = vmatpush1.bf16.msra.mxu1 %v17684_v21  ;;  %9094 = vmatprep.mubr.bf16.mxu1 %v18690_v13 }
 0x652   : > { %9240 = vmatprep.subr.bf16.mxu1 %v17712_v58 }
 0x655   : > { %9241 = vmatpush1.bf16.msra.mxu1 %v17709_v29 }
 0x656   : > { %9242 = vmatprep.subr.bf16.mxu1 %v8453_v1  ;;  %12021 = vmatmul.mubr.msk.bf16.gmra.mrb[220].mxu0 %vm18948_vm1, %v17665_v48  ;;  %v18965_v1 = vld [vmem:[#allocation43_spill] sm:$0xff]  ;;  %vm18975_vm1 = vmmov %vm18945_vm0 }
 0x657   : > { %9197 = vmatprep.mubr.bf16.mxu0 %v18690_v13 }
 0x658   : > { %12015 = vmatmul.mubr.msk.bf16.gmra.mrb[196].mxu1 %vm18949_vm2, %v17665_v48  ;;  %vm18976_vm2 = vmmov %vm18945_vm0 }
 0x659   : > { %9104 = vmatprep.mubr.bf16.mxu1 %v18690_v13  ;;  %9243 = vmatpush1.bf16.msra.mxu1 %v17730_v16 }
 0x65a   : > { %9244 = vmatprep.subr.bf16.mxu1 %v8461_v35  ;;  %v18967_v35 = vld [vmem:[#allocation45_spill] sm:$0xff] }
 0x65d   : > { %9245 = vmatpush1.bf16.msra.mxu1 %v8460_v20 }
 0x65e   : > { %9246 = vmatprep.subr.bf16.mxu1 %v8469_v49  ;;  %12022 = vmatmul.mubr.msk.bf16.gmra.mrb[224].mxu0 %vm18950_vm12, %v17690_v54  ;;  %vm18977_vm12 = vmmov %vm18945_vm0 }
 0x65f   : > { %9207 = vmatprep.mubr.bf16.mxu0 %v18690_v13 }
 0x660   : > { %12016 = vmatmul.mubr.msk.bf16.gmra.mrb[200].mxu1 %vm18951_vm13, %v17690_v54  ;;  %vm18978_vm13 = vmmov %vm18945_vm0 }
 0x661   : > { %9114 = vmatprep.mubr.bf16.mxu1 %v18690_v13  ;;  %9247 = vmatpush1.bf16.msra.mxu1 %v8468_v14 }
 0x662   : > { %9248 = vmatprep.subr.bf16.mxu1 %v8477_v9 }
 0x665   : > { %9249 = vmatpush1.bf16.msra.mxu1 %v8476_v60 }
 0x666   : > { %12023 = vmatmul.mubr.msk.bf16.gmra.mrb[228].mxu0 %vm18952_vm7, %v17717_v53  ;;  %vm18979_vm7 = vmmov %vm18945_vm0 }
 0x667   : > { %9217 = vmatprep.mubr.bf16.mxu0 %v18690_v13 }
 0x668   : > { %12017 = vmatmul.mubr.msk.bf16.gmra.mrb[204].mxu1 %vm18953_vm4, %v17717_v53  ;;  %vm18980_vm4 = vmmov %vm18945_vm0 }
 0x669   : > { %9124 = vmatprep.mubr.bf16.mxu1 %v18690_v13 }
 0x66e   : > { %12024 = vmatmul.mubr.msk.bf16.gmra.mrb[232].mxu0 %vm18954_vm14, %v17735_v12  ;;  %vm18981_vm14 = vmmov %vm18945_vm0 }
 0x66f   : > { %9227 = vmatprep.mubr.bf16.mxu0 %v18690_v13 }
 0x670   : > { %12018 = vmatmul.mubr.msk.bf16.gmra.mrb[208].mxu1 %vm18955_vm9, %v17735_v12  ;;  %vm18982_vm9 = vmmov %vm18945_vm0 }
 0x671   : > { %9134 = vmatprep.mubr.bf16.mxu1 %v18690_v13 }
 0x676   : > { %12025 = vmatmul.mubr.msk.bf16.gmra.mrb[236].mxu0 %vm18956_vm5, %v17750_v22  ;;  %vm18983_vm5 = vmmov %vm18945_vm0 }
 0x677   : > { %9809 = vmatprep.mubr.bf16.mxu0 %v18690_v13 }
 0x678   : > { %12019 = vmatmul.mubr.msk.bf16.gmra.mrb[212].mxu1 %vm18957_vm11, %v17750_v22  ;;  %vm18984_vm11 = vmmov %vm18945_vm0 }
 0x679   : > { %9270 = vmatprep.mubr.bf16.mxu1 %v18690_v13 }
 0x680   : > { %12026 = vmatmul.mubr.msk.bf16.vlgmr.msra.gmra.mrb[216].mxu1 %vm18958_vm6, %v17639_v4  ;;  %vm18985_vm6 = vmmov %vm18945_vm0 }
 0x681   : > { %9280 = vmatprep.mubr.bf16.mxu1 %v18690_v13 }
 0x688   : > { %12027 = vmatmul.mubr.msk.bf16.gmra.mrb[220].mxu1 %vm18959_vm10, %v17665_v48  ;;  %v18963_v48 = vld [vmem:[#allocation41_spill] sm:$0xff]  ;;  %vm18986_vm10 = vmmov %vm18945_vm0 }
 0x689   : > { %9290 = vmatprep.mubr.bf16.mxu1 %v18690_v13 }
 0x690   : > { %12028 = vmatmul.mubr.msk.bf16.gmra.mrb[224].mxu1 %vm18960_vm3, %v17690_v54  ;;  %vm18987_vm3 = vmmov %vm18945_vm0 }
 0x691   : > { %9300 = vmatprep.mubr.bf16.mxu1 %v18690_v13 }
 0x698   : > { %12029 = vmatmul.mubr.msk.bf16.gmra.mrb[228].mxu1 %vm18945_vm0, %v17717_v53  ;;  %v18964_v53 = vld [vmem:[#allocation40_spill] sm:$0xff] }
 0x699   : > { %9310 = vmatprep.mubr.bf16.mxu1 %v18690_v13 }
 0x6a0   : > { %12030 = vmatmul.mubr.msk.bf16.gmra.mrb[232].mxu1 %vm18961_vm8, %v17735_v12  ;;  %vm18988_vm8 = vmmov %vm18945_vm0 }
 0x6a1   : > { %9320 = vmatprep.mubr.bf16.mxu1 %v18690_v13 }
 0x6a8   : > { %12031 = vmatmul.mubr.msk.bf16.gmra.mrb[236].mxu1 %vm18962_vm15, %v17750_v22  ;;  %vm18989_vm15 = vmmov %vm18945_vm0 }
 0x6a9   : > { %9902 = vmatprep.mubr.bf16.mxu1 %v18690_v13 }
 0x6f1   : > { %v8993_v4 = vpop.f32.mrb[192].mxu0 }
 0x6f2   : > { %v9403_v21 = vadd.f32 %v18963_v48, %v8993_v4  ;;  %v8995_v54 = vpop.f32.mrb[193].mxu0 }
 0x6f3   : > { %v9404_v29 = vadd.f32 %v18963_v48, %v8995_v54  ;;  %v8997_v58 = vpop.f32.mrb[194].mxu0  ;;  %v18971_v54 = vld [vmem:[#allocation49_spill] sm:$0xff] }
 0x6f4   : > { %v9411_v44 = vadd.f32 %v18964_v53, %v8997_v58  ;;  %v8999_v31 = vpop.f32.mrb[195].mxu0  ;;  %v9499_v17 = vmax.f32 %v9403_v21, 0.0 }
 0x6f5   : > { %v9412_v45 = vadd.f32 %v18964_v53, %v8999_v31  ;;  %v9500_v62 = vmax.f32 %v9404_v29, 0.0 }
 0x6f6   : > { %v9507_v33 = vmax.f32 %v9411_v44, 0.0 }
 0x6f7   : > { %v9508_v6 = vmax.f32 %v9412_v45, 0.0  ;;  %v18972_v45 = vld [vmem:[#allocation48_spill] sm:$0xff] }
 0x6f8   : > { %v9608_v19 = vpack.c.bf16 %v9507_v33, %v9499_v17 }
 0x6f9   : > { %v9609_v5 = vpack.c.bf16 %v9508_v6, %v9500_v62  ;;  %v9003_v16 = vpop.f32.mrb[196].mxu0 }
 0x6fa   : > { %v9419_v59 = vadd.f32 %v18965_v1, %v9003_v16  ;;  %v9005_v12 = vpop.f32.mrb[197].mxu0 }
 0x6fb   : > { %v9420_v37 = vadd.f32 %v18965_v1, %v9005_v12  ;;  %v9007_v51 = vpop.f32.mrb[198].mxu0  ;;  %9777 = vmatprep.subr.bf16.mxu0 %v9609_v5 }
 0x6fc   : > { %v9427_v28 = vadd.f32 %v18966_v36, %v9007_v51  ;;  %v9009_v23 = vpop.f32.mrb[199].mxu0  ;;  %9778 = vmatpush1.bf16.msra.mxu0 %v9608_v19  ;;  %v9515_v46 = vmax.f32 %v9419_v59, 0.0  ;;  %v18973_v51 = vld [vmem:[#allocation51_spill] sm:$0xff] }
 0x6fd   : > { %v9428_v50 = vadd.f32 %v18966_v36, %v9009_v23  ;;  %v9516_v55 = vmax.f32 %v9420_v37, 0.0 }
 0x6fe   : > { %v9523_v24 = vmax.f32 %v9427_v28, 0.0 }
 0x6ff   : > { %v9524_v61 = vmax.f32 %v9428_v50, 0.0 }
 0x700   : > { %v9616_v3 = vpack.c.bf16 %v9523_v24, %v9515_v46  ;;  %v18974_v24 = vld [vmem:[#allocation50_spill] sm:$0xff] }
 0x701   : > { %v9617_v56 = vpack.c.bf16 %v9524_v61, %v9516_v55  ;;  %v9013_v20 = vpop.f32.mrb[200].mxu0 }
 0x702   : > { %v9435_v27 = vadd.f32 %v18967_v35, %v9013_v20  ;;  %v9015_v22 = vpop.f32.mrb[201].mxu0 }
 0x703   : > { %v9436_v18 = vadd.f32 %v18967_v35, %v9015_v22  ;;  %v9017_v47 = vpop.f32.mrb[202].mxu0  ;;  %9779 = vmatprep.subr.bf16.mxu0 %v9617_v56 }
 0x704   : > { %v9443_v40 = vadd.f32 %v18968_v30, %v9017_v47  ;;  %v9019_v26 = vpop.f32.mrb[203].mxu0  ;;  %9780 = vmatpush1.bf16.msra.mxu0 %v9616_v3  ;;  %v9531_v25 = vmax.f32 %v9435_v27, 0.0 }
 0x705   : > { %v9444_v57 = vadd.f32 %v18968_v30, %v9019_v26  ;;  %v9532_v15 = vmax.f32 %v9436_v18, 0.0 }
 0x706   : > { %v9539_v2 = vmax.f32 %v9443_v40, 0.0 }
 0x707   : > { %v9540_v0 = vmax.f32 %v9444_v57, 0.0 }
 0x708   : > { %v9624_v34 = vpack.c.bf16 %v9539_v2, %v9531_v25 }
 0x709   : > { %v9625_v14 = vpack.c.bf16 %v9540_v0, %v9532_v15  ;;  %v9023_v49 = vpop.f32.mrb[204].mxu0  ;;  %v17853_v0 = vld [vmem:[%s18486_s4 + $0x90] sm:$0xff]  }
 0x70a   : > { %v9451_v10 = vadd.f32 %v18969_v42, %v9023_v49  ;;  %v9025_v38 = vpop.f32.mrb[205].mxu0 }
 0x70b   : > { %v9452_v43 = vadd.f32 %v18969_v42, %v9025_v38  ;;  %v9027_v41 = vpop.f32.mrb[206].mxu0  ;;  %9781 = vmatprep.subr.bf16.mxu0 %v9625_v14 }
 0x70c   : > { %v9459_v11 = vadd.f32 %v18970_v32, %v9027_v41  ;;  %v9029_v7 = vpop.f32.mrb[207].mxu0  ;;  %9782 = vmatpush1.bf16.msra.mxu0 %v9624_v34  ;;  %v9547_v8 = vmax.f32 %v9451_v10, 0.0 }
 0x70d   : > { %v9460_v39 = vadd.f32 %v18970_v32, %v9029_v7  ;;  %v9548_v52 = vmax.f32 %v9452_v43, 0.0 }
 0x70e   : > { %v9555_v63 = vmax.f32 %v9459_v11, 0.0 }
 0x70f   : > { %v9556_v60 = vmax.f32 %v9460_v39, 0.0 }
 0x710   : > { %v9632_v9 = vpack.c.bf16 %v9555_v63, %v9547_v8 }
 0x711   : > { %v9633_v4 = vpack.c.bf16 %v9556_v60, %v9548_v52  ;;  %v9033_v21 = vpop.f32.mrb[208].mxu0 }
 0x712   : > { %v9467_v29 = vadd.f32 %v18971_v54, %v9033_v21  ;;  %v9035_v58 = vpop.f32.mrb[209].mxu0 }
 0x713   : > { %v9468_v44 = vadd.f32 %v18971_v54, %v9035_v58  ;;  %v9037_v31 = vpop.f32.mrb[210].mxu0  ;;  %9783 = vmatprep.subr.bf16.mxu0 %v9633_v4 }
 0x714   : > { %v9475_v17 = vadd.f32 %v18972_v45, %v9037_v31  ;;  %v9039_v33 = vpop.f32.mrb[211].mxu0  ;;  %9784 = vmatpush1.bf16.msra.mxu0 %v9632_v9  ;;  %v9563_v6 = vmax.f32 %v9467_v29, 0.0 }
 0x715   : > { %v9476_v62 = vadd.f32 %v18972_v45, %v9039_v33  ;;  %v9564_v5 = vmax.f32 %v9468_v44, 0.0 }
 0x716   : > { %v9571_v19 = vmax.f32 %v9475_v17, 0.0 }
 0x717   : > { %v9572_v16 = vmax.f32 %v9476_v62, 0.0 }
 0x718   : > { %v9640_v59 = vpack.c.bf16 %v9571_v19, %v9563_v6 }
 0x719   : > { %v9641_v12 = vpack.c.bf16 %v9572_v16, %v9564_v5  ;;  %v9043_v37 = vpop.f32.mrb[212].mxu0 }
 0x71a   : > { %v9483_v28 = vadd.f32 %v18973_v51, %v9043_v37  ;;  %v9045_v23 = vpop.f32.mrb[213].mxu0 }
 0x71b   : > { %v9484_v50 = vadd.f32 %v18973_v51, %v9045_v23  ;;  %v9047_v46 = vpop.f32.mrb[214].mxu0  ;;  %9785 = vmatprep.subr.bf16.mxu0 %v9641_v12 }
 0x71c   : > { %v9491_v55 = vadd.f32 %v18974_v24, %v9047_v46  ;;  %v9049_v61 = vpop.f32.mrb[215].mxu0  ;;  %9786 = vmatpush1.bf16.msra.mxu0 %v9640_v59  ;;  %v9579_v56 = vmax.f32 %v9483_v28, 0.0  ;;  %v17869_v59 = vld [vmem:[%s18486_s4 + $0x98] sm:$0xff]  }
 0x71d   : > { %v9492_v3 = vadd.f32 %v18974_v24, %v9049_v61  ;;  %v9580_v27 = vmax.f32 %v9484_v50, 0.0 }
 0x71e   : > { %v9587_v20 = vmax.f32 %v9491_v55, 0.0 }
 0x71f   : > { %v9588_v22 = vmax.f32 %v9492_v3, 0.0 }
 0x720   : > { %v9648_v18 = vpack.c.bf16 %v9587_v20, %v9579_v56 }
 0x721   : > { %v9649_v47 = vpack.c.bf16 %v9588_v22, %v9580_v27  ;;  %v9179_v40 = vpop.f32.mrb[216].mxu0 }
 0x722   : > { %v9407_v26 = vadd.f32 %v18963_v48, %v9179_v40  ;;  %v9181_v57 = vpop.f32.mrb[217].mxu0 }
 0x723   : > { %v9086_v25 = vpop.f32.mrb[192].mxu1  ;;  %v9408_v2 = vadd.f32 %v18963_v48, %v9181_v57  ;;  %v9183_v15 = vpop.f32.mrb[218].mxu0  ;;  %9787 = vmatprep.subr.bf16.mxu0 %v9649_v47 }
 0x724   : > { %v9405_v34 = vadd.f32 %v18963_v48, %v9086_v25  ;;  %v9088_v14 = vpop.f32.mrb[193].mxu1  ;;  %v9415_v49 = vadd.f32 %v18964_v53, %v9183_v15  ;;  %v9185_v10 = vpop.f32.mrb[219].mxu0  ;;  %9788 = vmatpush1.bf16.msra.mxu0 %v9648_v18  ;;  %v9503_v39 = vmax.f32 %v9407_v26, 0.0 }
 0x725   : > { %v9406_v38 = vadd.f32 %v18963_v48, %v9088_v14  ;;  %v9090_v43 = vpop.f32.mrb[194].mxu1  ;;  %v9416_v41 = vadd.f32 %v18964_v53, %v9185_v10  ;;  %v9504_v52 = vmax.f32 %v9408_v2, 0.0 }
 0x726   : > { %v9413_v11 = vadd.f32 %v18964_v53, %v9090_v43  ;;  %v9092_v7 = vpop.f32.mrb[195].mxu1  ;;  %v9511_v8 = vmax.f32 %v9415_v49, 0.0  ;;  %v9501_v9 = vmax.f32 %v9405_v34, 0.0 }
 0x727   : > { %v9414_v63 = vadd.f32 %v18964_v53, %v9092_v7  ;;  %v9512_v60 = vmax.f32 %v9416_v41, 0.0  ;;  %12062 = vmatmul.mubr.msk.bf16.vlgmr.msra.gmra.mrb[240].mxu0 %vm18975_vm1, %v17853_v0  ;;  %v9502_v29 = vmax.f32 %v9406_v38, 0.0  ;;  %vm18990_vm1 = vmmov %vm18945_vm0 }
 0x728   : > { %v9509_v4 = vmax.f32 %v9413_v11, 0.0  ;;  %v9612_v21 = vpack.c.bf16 %v9511_v8, %v9503_v39  ;;  %9819 = vmatprep.mubr.bf16.mxu0 %v18690_v13  ;;  %v17885_v11 = vld [vmem:[%s18486_s4 + $0xa0] sm:$0xff]  }
 0x729   : > { %v9510_v58 = vmax.f32 %v9414_v63, 0.0  ;;  %v9613_v44 = vpack.c.bf16 %v9512_v60, %v9504_v52  ;;  %v9189_v31 = vpop.f32.mrb[220].mxu0 }
 0x72a   : > { %v9610_v17 = vpack.c.bf16 %v9509_v4, %v9501_v9  ;;  %v9423_v33 = vadd.f32 %v18965_v1, %v9189_v31  ;;  %v9191_v62 = vpop.f32.mrb[221].mxu0 }
 0x72b   : > { %v9611_v6 = vpack.c.bf16 %v9510_v58, %v9502_v29  ;;  %v9096_v19 = vpop.f32.mrb[196].mxu1  ;;  %v9424_v5 = vadd.f32 %v18965_v1, %v9191_v62  ;;  %v9193_v16 = vpop.f32.mrb[222].mxu0  ;;  %9963 = vmatprep.subr.bf16.mxu0 %v9613_v44 }
 0x72c   : > { %v9421_v12 = vadd.f32 %v18965_v1, %v9096_v19  ;;  %v9098_v37 = vpop.f32.mrb[197].mxu1  ;;  %v9431_v28 = vadd.f32 %v18966_v36, %v9193_v16  ;;  %v9195_v23 = vpop.f32.mrb[223].mxu0  ;;  %9964 = vmatpush1.bf16.msra.mxu0 %v9612_v21  ;;  %v9519_v56 = vmax.f32 %v9423_v33, 0.0 }
 0x72d   : > { %v9422_v50 = vadd.f32 %v18965_v1, %v9098_v37  ;;  %v9100_v46 = vpop.f32.mrb[198].mxu1  ;;  %9870 = vmatprep.subr.bf16.mxu1 %v9611_v6  ;;  %v9432_v55 = vadd.f32 %v18966_v36, %v9195_v23  ;;  %v9520_v22 = vmax.f32 %v9424_v5, 0.0 }
 0x72e   : > { %v9429_v61 = vadd.f32 %v18966_v36, %v9100_v46  ;;  %v9102_v3 = vpop.f32.mrb[199].mxu1  ;;  %9871 = vmatpush1.bf16.msra.mxu1 %v9610_v17  ;;  %v9527_v20 = vmax.f32 %v9431_v28, 0.0  ;;  %v9517_v47 = vmax.f32 %v9421_v12, 0.0 }
 0x72f   : > { %v9430_v27 = vadd.f32 %v18966_v36, %v9102_v3  ;;  %v9528_v18 = vmax.f32 %v9432_v55, 0.0  ;;  %12063 = vmatmul.mubr.msk.bf16.gmra.mrb[244].mxu0 %vm18976_vm2, %v17869_v59  ;;  %v9518_v57 = vmax.f32 %v9422_v50, 0.0  ;;  %v17901_v3 = vld [vmem:[%s18486_s4 + $0xa8] sm:$0xff]   ;;  %vm18991_vm2 = vmmov %vm18945_vm0 }
 0x730   : > { %v9525_v40 = vmax.f32 %v9429_v61, 0.0  ;;  %v9620_v26 = vpack.c.bf16 %v9527_v20, %v9519_v56  ;;  %9829 = vmatprep.mubr.bf16.mxu0 %v18690_v13 }
 0x731   : > { %v9526_v25 = vmax.f32 %v9430_v27, 0.0  ;;  %v9621_v2 = vpack.c.bf16 %v9528_v18, %v9520_v22  ;;  %v9199_v15 = vpop.f32.mrb[224].mxu0 }
 0x732   : > { %v9618_v34 = vpack.c.bf16 %v9525_v40, %v9517_v47  ;;  %v9439_v14 = vadd.f32 %v18967_v35, %v9199_v15  ;;  %v9201_v49 = vpop.f32.mrb[225].mxu0 }
 0x733   : > { %v9619_v10 = vpack.c.bf16 %v9526_v25, %v9518_v57  ;;  %v9106_v38 = vpop.f32.mrb[200].mxu1  ;;  %v9440_v43 = vadd.f32 %v18967_v35, %v9201_v49  ;;  %v9203_v41 = vpop.f32.mrb[226].mxu0  ;;  %9965 = vmatprep.subr.bf16.mxu0 %v9621_v2 }
 0x734   : > { %v9437_v7 = vadd.f32 %v18967_v35, %v9106_v38  ;;  %v9108_v39 = vpop.f32.mrb[201].mxu1  ;;  %v9447_v8 = vadd.f32 %v18968_v30, %v9203_v41  ;;  %v9205_v63 = vpop.f32.mrb[227].mxu0  ;;  %9966 = vmatpush1.bf16.msra.mxu0 %v9620_v26  ;;  %v9535_v29 = vmax.f32 %v9439_v14, 0.0 }
 0x735   : > { %v9438_v52 = vadd.f32 %v18967_v35, %v9108_v39  ;;  %v9110_v60 = vpop.f32.mrb[202].mxu1  ;;  %9872 = vmatprep.subr.bf16.mxu1 %v9619_v10  ;;  %v9448_v9 = vadd.f32 %v18968_v30, %v9205_v63  ;;  %v9536_v31 = vmax.f32 %v9440_v43, 0.0 }
 0x736   : > { %v9445_v4 = vadd.f32 %v18968_v30, %v9110_v60  ;;  %v9112_v21 = vpop.f32.mrb[203].mxu1  ;;  %9873 = vmatpush1.bf16.msra.mxu1 %v9618_v34  ;;  %v9543_v58 = vmax.f32 %v9447_v8, 0.0  ;;  %v9533_v33 = vmax.f32 %v9437_v7, 0.0 }
 0x737   : > { %v9446_v44 = vadd.f32 %v18968_v30, %v9112_v21  ;;  %v9544_v17 = vmax.f32 %v9448_v9, 0.0  ;;  %12064 = vmatmul.mubr.msk.bf16.gmra.mrb[248].mxu0 %vm18977_vm12, %v17885_v11  ;;  %v9534_v19 = vmax.f32 %v9438_v52, 0.0  ;;  %vm18992_vm12 = vmmov %vm18945_vm0 }
 0x738   : > { %v9541_v62 = vmax.f32 %v9445_v4, 0.0  ;;  %v9628_v6 = vpack.c.bf16 %v9543_v58, %v9535_v29  ;;  %9839 = vmatprep.mubr.bf16.mxu0 %v18690_v13  ;;  %v17917_v29 = vld [vmem:[%s18486_s4 + $0xb0] sm:$0xff]  }
 0x739   : > { %v9542_v5 = vmax.f32 %v9446_v44, 0.0  ;;  %v9629_v16 = vpack.c.bf16 %v9544_v17, %v9536_v31  ;;  %v9209_v12 = vpop.f32.mrb[228].mxu0 }
 0x73a   : > { %v9626_v37 = vpack.c.bf16 %v9541_v62, %v9533_v33  ;;  %v9455_v28 = vadd.f32 %v18969_v42, %v9209_v12  ;;  %v9211_v23 = vpop.f32.mrb[229].mxu0 }
 0x73b   : > { %v9627_v50 = vpack.c.bf16 %v9542_v5, %v9534_v19  ;;  %v9116_v46 = vpop.f32.mrb[204].mxu1  ;;  %v9456_v55 = vadd.f32 %v18969_v42, %v9211_v23  ;;  %v9213_v61 = vpop.f32.mrb[230].mxu0  ;;  %9967 = vmatprep.subr.bf16.mxu0 %v9629_v16 }
 0x73c   : > { %v9453_v56 = vadd.f32 %v18969_v42, %v9116_v46  ;;  %v9118_v20 = vpop.f32.mrb[205].mxu1  ;;  %v9463_v27 = vadd.f32 %v18970_v32, %v9213_v61  ;;  %v9215_v22 = vpop.f32.mrb[231].mxu0  ;;  %9968 = vmatpush1.bf16.msra.mxu0 %v9628_v6  ;;  %v9551_v25 = vmax.f32 %v9455_v28, 0.0 }
 0x73d   : > { %v9454_v18 = vadd.f32 %v18969_v42, %v9118_v20  ;;  %v9120_v47 = vpop.f32.mrb[206].mxu1  ;;  %9874 = vmatprep.subr.bf16.mxu1 %v9627_v50  ;;  %v9464_v40 = vadd.f32 %v18970_v32, %v9215_v22  ;;  %v9552_v34 = vmax.f32 %v9456_v55, 0.0 }
 0x73e   : > { %v9461_v26 = vadd.f32 %v18970_v32, %v9120_v47  ;;  %v9122_v57 = vpop.f32.mrb[207].mxu1  ;;  %9875 = vmatpush1.bf16.msra.mxu1 %v9626_v37  ;;  %v9559_v2 = vmax.f32 %v9463_v27, 0.0  ;;  %v9549_v49 = vmax.f32 %v9453_v56, 0.0 }
 0x73f   : > { %v9462_v15 = vadd.f32 %v18970_v32, %v9122_v57  ;;  %v9560_v14 = vmax.f32 %v9464_v40, 0.0  ;;  %12065 = vmatmul.mubr.msk.bf16.gmra.mrb[252].mxu0 %vm18978_vm13, %v17901_v3  ;;  %v9550_v43 = vmax.f32 %v9454_v18, 0.0  ;;  %vm18993_vm13 = vmmov %vm18945_vm0 }
 0x740   : > { %v9557_v10 = vmax.f32 %v9461_v26, 0.0  ;;  %v9636_v38 = vpack.c.bf16 %v9559_v2, %v9551_v25  ;;  %9849 = vmatprep.mubr.bf16.mxu0 %v18690_v13  ;;  %v17933_v2 = vld [vmem:[%s18486_s4 + $0xb8] sm:$0xff]  }
 0x741   : > { %v9558_v41 = vmax.f32 %v9462_v15, 0.0  ;;  %v9637_v7 = vpack.c.bf16 %v9560_v14, %v9552_v34  ;;  %v9219_v39 = vpop.f32.mrb[232].mxu0 }
 0x742   : > { %v9634_v8 = vpack.c.bf16 %v9557_v10, %v9549_v49  ;;  %v9471_v63 = vadd.f32 %v18971_v54, %v9219_v39  ;;  %v9221_v52 = vpop.f32.mrb[233].mxu0 }
 0x743   : > { %v9635_v60 = vpack.c.bf16 %v9558_v41, %v9550_v43  ;;  %v9126_v9 = vpop.f32.mrb[208].mxu1  ;;  %v9472_v4 = vadd.f32 %v18971_v54, %v9221_v52  ;;  %v9223_v21 = vpop.f32.mrb[234].mxu0  ;;  %9969 = vmatprep.subr.bf16.mxu0 %v9637_v7 }
 0x744   : > { %v9469_v58 = vadd.f32 %v18971_v54, %v9126_v9  ;;  %v9128_v44 = vpop.f32.mrb[209].mxu1  ;;  %v9479_v31 = vadd.f32 %v18972_v45, %v9223_v21  ;;  %v9225_v17 = vpop.f32.mrb[235].mxu0  ;;  %9970 = vmatpush1.bf16.msra.mxu0 %v9636_v38  ;;  %v9567_v16 = vmax.f32 %v9471_v63, 0.0 }
 0x745   : > { %v9470_v33 = vadd.f32 %v18971_v54, %v9128_v44  ;;  %v9130_v62 = vpop.f32.mrb[210].mxu1  ;;  %9876 = vmatprep.subr.bf16.mxu1 %v9635_v60  ;;  %v9480_v6 = vadd.f32 %v18972_v45, %v9225_v17  ;;  %v9568_v28 = vmax.f32 %v9472_v4, 0.0 }
 0x746   : > { %v9477_v19 = vadd.f32 %v18972_v45, %v9130_v62  ;;  %v9132_v5 = vpop.f32.mrb[211].mxu1  ;;  %9877 = vmatpush1.bf16.msra.mxu1 %v9634_v8  ;;  %v9575_v12 = vmax.f32 %v9479_v31, 0.0  ;;  %v9565_v50 = vmax.f32 %v9469_v58, 0.0 }
 0x747   : > { %v9478_v37 = vadd.f32 %v18972_v45, %v9132_v5  ;;  %v9576_v23 = vmax.f32 %v9480_v6, 0.0  ;;  %12066 = vmatmul.mubr.msk.bf16.gmra.mrb[0].mxu0 %vm18979_vm7, %v17917_v29  ;;  %v9566_v61 = vmax.f32 %v9470_v33, 0.0  ;;  %vm18994_vm7 = vmmov %vm18945_vm0 }
 0x748   : > { %v9573_v46 = vmax.f32 %v9477_v19, 0.0  ;;  %v9644_v55 = vpack.c.bf16 %v9575_v12, %v9567_v16  ;;  %9859 = vmatprep.mubr.bf16.mxu0 %v18690_v13 }
 0x749   : > { %v9574_v56 = vmax.f32 %v9478_v37, 0.0  ;;  %v9645_v20 = vpack.c.bf16 %v9576_v23, %v9568_v28  ;;  %v9229_v27 = vpop.f32.mrb[236].mxu0 }
 0x74a   : > { %v9642_v22 = vpack.c.bf16 %v9573_v46, %v9565_v50  ;;  %v9487_v18 = vadd.f32 %v18973_v51, %v9229_v27  ;;  %v9231_v47 = vpop.f32.mrb[237].mxu0 }
 0x74b   : > { %v9643_v40 = vpack.c.bf16 %v9574_v56, %v9566_v61  ;;  %v9136_v26 = vpop.f32.mrb[212].mxu1  ;;  %v9488_v57 = vadd.f32 %v18973_v51, %v9231_v47  ;;  %v9233_v25 = vpop.f32.mrb[238].mxu0  ;;  %9971 = vmatprep.subr.bf16.mxu0 %v9645_v20 }
 0x74c   : > { %v9485_v15 = vadd.f32 %v18973_v51, %v9136_v26  ;;  %v9138_v34 = vpop.f32.mrb[213].mxu1  ;;  %v9495_v14 = vadd.f32 %v18974_v24, %v9233_v25  ;;  %v9235_v49 = vpop.f32.mrb[239].mxu0  ;;  %9972 = vmatpush1.bf16.msra.mxu0 %v9644_v55  ;;  %v9583_v39 = vmax.f32 %v9487_v18, 0.0 }
 0x74d   : > { %v9486_v10 = vadd.f32 %v18973_v51, %v9138_v34  ;;  %v9140_v38 = vpop.f32.mrb[214].mxu1  ;;  %9878 = vmatprep.subr.bf16.mxu1 %v9643_v40  ;;  %v9496_v43 = vadd.f32 %v18974_v24, %v9235_v49  ;;  %v9584_v52 = vmax.f32 %v9488_v57, 0.0 }
 0x74e   : > { %v9493_v41 = vadd.f32 %v18974_v24, %v9140_v38  ;;  %v9142_v7 = vpop.f32.mrb[215].mxu1  ;;  %9879 = vmatpush1.bf16.msra.mxu1 %v9642_v22  ;;  %v9591_v8 = vmax.f32 %v9495_v14, 0.0  ;;  %v9581_v9 = vmax.f32 %v9485_v15, 0.0 }
 0x74f   : > { %v9494_v63 = vadd.f32 %v18974_v24, %v9142_v7  ;;  %v9592_v60 = vmax.f32 %v9496_v43, 0.0  ;;  %12067 = vmatmul.mubr.msk.bf16.gmra.mrb[4].mxu0 %vm18980_vm4, %v17933_v2  ;;  %v9582_v58 = vmax.f32 %v9486_v10, 0.0  ;;  %vm18995_vm4 = vmmov %vm18945_vm0 }
 0x750   : > { %v9589_v4 = vmax.f32 %v9493_v41, 0.0  ;;  %v9652_v21 = vpack.c.bf16 %v9591_v8, %v9583_v39  ;;  %9995 = vmatprep.mubr.bf16.mxu0 %v18690_v13 }
 0x751   : > { %v9590_v44 = vmax.f32 %v9494_v63, 0.0  ;;  %v9653_v31 = vpack.c.bf16 %v9592_v60, %v9584_v52 }
 0x752   : > { %v9650_v17 = vpack.c.bf16 %v9589_v4, %v9581_v9 }
 0x753   : > { %v9651_v33 = vpack.c.bf16 %v9590_v44, %v9582_v58  ;;  %v9272_v62 = vpop.f32.mrb[216].mxu1  ;;  %9973 = vmatprep.subr.bf16.mxu0 %v9653_v31 }
 0x754   : > { %v9409_v6 = vadd.f32 %v18963_v48, %v9272_v62  ;;  %v9274_v19 = vpop.f32.mrb[217].mxu1  ;;  %9974 = vmatpush1.bf16.msra.mxu0 %v9652_v21 }
 0x755   : > { %v9410_v5 = vadd.f32 %v18963_v48, %v9274_v19  ;;  %v9276_v16 = vpop.f32.mrb[218].mxu1  ;;  %9880 = vmatprep.subr.bf16.mxu1 %v9651_v33 }
 0x756   : > { %v9417_v12 = vadd.f32 %v18964_v53, %v9276_v16  ;;  %v9278_v37 = vpop.f32.mrb[219].mxu1  ;;  %9881 = vmatpush1.bf16.msra.mxu1 %v9650_v17  ;;  %v9505_v23 = vmax.f32 %v9409_v6, 0.0 }
 0x757   : > { %v9418_v28 = vadd.f32 %v18964_v53, %v9278_v37  ;;  %12074 = vmatmul.mubr.msk.bf16.vlgmr.msra.gmra.mrb[8].mxu0 %vm18981_vm14, %v17853_v0  ;;  %v9506_v46 = vmax.f32 %v9410_v5, 0.0  ;;  %vm18996_vm14 = vmmov %vm18945_vm0 }
 0x758   : > { %v9513_v50 = vmax.f32 %v9417_v12, 0.0  ;;  %10005 = vmatprep.mubr.bf16.mxu0 %v18690_v13 }
 0x759   : > { %v9514_v55 = vmax.f32 %v9418_v28, 0.0  ;;  %12068 = vmatmul.mubr.msk.bf16.vlgmr.msra.gmra.mrb[240].mxu1 %vm18982_vm9, %v17853_v0  ;;  %vm18997_vm9 = vmmov %vm18945_vm0 }
 0x75a   : > { %v9614_v48 = vpack.c.bf16 %v9513_v50, %v9505_v23  ;;  %9912 = vmatprep.mubr.bf16.mxu1 %v18690_v13 }
 0x75b   : > { %v9615_v61 = vpack.c.bf16 %v9514_v55, %v9506_v46  ;;  %v9282_v56 = vpop.f32.mrb[220].mxu1 }
 0x75c   : > { %v9425_v20 = vadd.f32 %v18965_v1, %v9282_v56  ;;  %v9284_v53 = vpop.f32.mrb[221].mxu1 }
 0x75d   : > { %v9426_v27 = vadd.f32 %v18965_v1, %v9284_v53  ;;  %v9286_v22 = vpop.f32.mrb[222].mxu1  ;;  %10056 = vmatprep.subr.bf16.mxu1 %v9615_v61 }
 0x75e   : > { %v9433_v18 = vadd.f32 %v18966_v36, %v9286_v22  ;;  %v9288_v47 = vpop.f32.mrb[223].mxu1  ;;  %10057 = vmatpush1.bf16.msra.mxu1 %v9614_v48  ;;  %v9521_v26 = vmax.f32 %v9425_v20, 0.0 }
 0x75f   : > { %v9434_v40 = vadd.f32 %v18966_v36, %v9288_v47  ;;  %12075 = vmatmul.mubr.msk.bf16.gmra.mrb[12].mxu0 %vm18983_vm5, %v17869_v59  ;;  %v9522_v25 = vmax.f32 %v9426_v27, 0.0  ;;  %vm19010_vm5 = vmmov %vm18945_vm0 }
 0x760   : > { %v9529_v57 = vmax.f32 %v9433_v18, 0.0  ;;  %10015 = vmatprep.mubr.bf16.mxu0 %v18690_v13 }
 0x761   : > { %v9530_v15 = vmax.f32 %v9434_v40, 0.0  ;;  %12069 = vmatmul.mubr.msk.bf16.gmra.mrb[244].mxu1 %vm18984_vm11, %v17869_v59  ;;  %vm19011_vm11 = vmmov %vm18945_vm0 }
 0x762   : > { %v9622_v1 = vpack.c.bf16 %v9529_v57, %v9521_v26  ;;  %9922 = vmatprep.mubr.bf16.mxu1 %v18690_v13 }
 0x763   : > { %v9623_v34 = vpack.c.bf16 %v9530_v15, %v9522_v25  ;;  %v9292_v14 = vpop.f32.mrb[224].mxu1 }
 0x764   : > { %v9441_v49 = vadd.f32 %v18967_v35, %v9292_v14  ;;  %v9294_v36 = vpop.f32.mrb[225].mxu1 }
 0x765   : > { %v9442_v10 = vadd.f32 %v18967_v35, %v9294_v36  ;;  %v9296_v38 = vpop.f32.mrb[226].mxu1  ;;  %10058 = vmatprep.subr.bf16.mxu1 %v9623_v34 }
 0x766   : > { %v9449_v43 = vadd.f32 %v18968_v30, %v9296_v38  ;;  %v9298_v41 = vpop.f32.mrb[227].mxu1  ;;  %10059 = vmatpush1.bf16.msra.mxu1 %v9622_v1  ;;  %v9537_v39 = vmax.f32 %v9441_v49, 0.0 }
 0x767   : > { %v9450_v7 = vadd.f32 %v18968_v30, %v9298_v41  ;;  %12076 = vmatmul.mubr.msk.bf16.gmra.mrb[16].mxu0 %vm18985_vm6, %v17885_v11  ;;  %v9538_v63 = vmax.f32 %v9442_v10, 0.0  ;;  %vm19012_vm6 = vmmov %vm18945_vm0 }
 0x768   : > { %v9545_v8 = vmax.f32 %v9449_v43, 0.0  ;;  %10025 = vmatprep.mubr.bf16.mxu0 %v18690_v13 }
 0x769   : > { %v9546_v52 = vmax.f32 %v9450_v7, 0.0  ;;  %12070 = vmatmul.mubr.msk.bf16.gmra.mrb[248].mxu1 %vm18986_vm10, %v17885_v11  ;;  %vm19013_vm10 = vmmov %vm18945_vm0 }
 0x76a   : > { %v9630_v35 = vpack.c.bf16 %v9545_v8, %v9537_v39  ;;  %9932 = vmatprep.mubr.bf16.mxu1 %v18690_v13 }
 0x76b   : > { %v9631_v60 = vpack.c.bf16 %v9546_v52, %v9538_v63  ;;  %v9302_v9 = vpop.f32.mrb[228].mxu1  ;;  %v19000_v63 = vld [vmem:[#allocation55_spill] sm:$0xff] }
 0x76c   : > { %v9457_v4 = vadd.f32 %v18969_v42, %v9302_v9  ;;  %v9304_v30 = vpop.f32.mrb[229].mxu1 }
 0x76d   : > { %v9458_v21 = vadd.f32 %v18969_v42, %v9304_v30  ;;  %v9306_v58 = vpop.f32.mrb[230].mxu1  ;;  %10060 = vmatprep.subr.bf16.mxu1 %v9631_v60 }
 0x76e   : > { %v9465_v44 = vadd.f32 %v18970_v32, %v9306_v58  ;;  %v9308_v31 = vpop.f32.mrb[231].mxu1  ;;  %10061 = vmatpush1.bf16.msra.mxu1 %v9630_v35  ;;  %v9553_v33 = vmax.f32 %v9457_v4, 0.0  ;;  %v19001_v4 = vld [vmem:[#allocation54_spill] sm:$0xff] }
 0x76f   : > { %v9466_v17 = vadd.f32 %v18970_v32, %v9308_v31  ;;  %12077 = vmatmul.mubr.msk.bf16.gmra.mrb[20].mxu0 %vm18987_vm3, %v17901_v3  ;;  %v9554_v6 = vmax.f32 %v9458_v21, 0.0  ;;  %vm19014_vm3 = vmmov %vm18945_vm0 }
 0x770   : > { %v9561_v62 = vmax.f32 %v9465_v44, 0.0  ;;  %10035 = vmatprep.mubr.bf16.mxu0 %v18690_v13 }
 0x771   : > { %v9562_v19 = vmax.f32 %v9466_v17, 0.0  ;;  %12071 = vmatmul.mubr.msk.bf16.gmra.mrb[252].mxu1 %vm18945_vm0, %v17901_v3 }
 0x772   : > { %v9638_v42 = vpack.c.bf16 %v9561_v62, %v9553_v33  ;;  %9942 = vmatprep.mubr.bf16.mxu1 %v18690_v13 }
 0x773   : > { %v9639_v5 = vpack.c.bf16 %v9562_v19, %v9554_v6  ;;  %v9312_v16 = vpop.f32.mrb[232].mxu1 }
 0x774   : > { %v9473_v12 = vadd.f32 %v18971_v54, %v9312_v16  ;;  %v9314_v32 = vpop.f32.mrb[233].mxu1 }
 0x775   : > { %v9474_v37 = vadd.f32 %v18971_v54, %v9314_v32  ;;  %v9316_v28 = vpop.f32.mrb[234].mxu1  ;;  %10062 = vmatprep.subr.bf16.mxu1 %v9639_v5 }
 0x776   : > { %v9481_v23 = vadd.f32 %v18972_v45, %v9316_v28  ;;  %v9318_v50 = vpop.f32.mrb[235].mxu1  ;;  %10063 = vmatpush1.bf16.msra.mxu1 %v9638_v42  ;;  %v9569_v55 = vmax.f32 %v9473_v12, 0.0  ;;  %v19002_v42 = vld [vmem:[#allocation57_spill] sm:$0xff] }
 0x777   : > { %v9482_v46 = vadd.f32 %v18972_v45, %v9318_v50  ;;  %12078 = vmatmul.mubr.msk.bf16.gmra.mrb[24].mxu0 %vm18988_vm8, %v17917_v29  ;;  %v9570_v61 = vmax.f32 %v9474_v37, 0.0  ;;  %v19003_v37 = vld [vmem:[#allocation56_spill] sm:$0xff]  ;;  %vm19015_vm8 = vmmov %vm18945_vm0 }
 0x778   : > { %v9577_v48 = vmax.f32 %v9481_v23, 0.0  ;;  %10045 = vmatprep.mubr.bf16.mxu0 %v18690_v13 }
 0x779   : > { %v9578_v56 = vmax.f32 %v9482_v46, 0.0  ;;  %12072 = vmatmul.mubr.msk.bf16.gmra.mrb[0].mxu1 %vm18989_vm15, %v17917_v29  ;;  %vm19016_vm15 = vmmov %vm18945_vm0 }
 0x77a   : > { %v9646_v54 = vpack.c.bf16 %v9577_v48, %v9569_v55  ;;  %9952 = vmatprep.mubr.bf16.mxu1 %v18690_v13 }
 0x77b   : > { %v9647_v20 = vpack.c.bf16 %v9578_v56, %v9570_v61  ;;  %v9322_v53 = vpop.f32.mrb[236].mxu1 }
 0x77c   : > { %v9489_v27 = vadd.f32 %v18973_v51, %v9322_v53  ;;  %v9324_v45 = vpop.f32.mrb[237].mxu1  ;;  %v19004_v53 = vld [vmem:[#allocation59_spill] sm:$0xff] }
 0x77d   : > { %v9490_v22 = vadd.f32 %v18973_v51, %v9324_v45  ;;  %v9326_v18 = vpop.f32.mrb[238].mxu1  ;;  %10064 = vmatprep.subr.bf16.mxu1 %v9647_v20 }
 0x77e   : > { %v9497_v47 = vadd.f32 %v18974_v24, %v9326_v18  ;;  %v9328_v40 = vpop.f32.mrb[239].mxu1  ;;  %10065 = vmatpush1.bf16.msra.mxu1 %v9646_v54  ;;  %v9585_v57 = vmax.f32 %v9489_v27, 0.0 }
 0x77f   : > { %v9498_v26 = vadd.f32 %v18974_v24, %v9328_v40  ;;  %12079 = vmatmul.mubr.msk.bf16.gmra.mrb[28].mxu0 %vm18990_vm1, %v17933_v2  ;;  %v9586_v15 = vmax.f32 %v9490_v22, 0.0  ;;  %vm19017_vm1 = vmmov %vm18945_vm0 }
 0x780   : > { %v9593_v25 = vmax.f32 %v9497_v47, 0.0  ;;  %10459 = vmatprep.mubr.bf16.mxu0 %v18690_v13  ;;  %v19005_v47 = vld [vmem:[#allocation58_spill] sm:$0xff] }
 0x781   : > { %v9594_v1 = vmax.f32 %v9498_v26, 0.0  ;;  %12073 = vmatmul.mubr.msk.bf16.gmra.mrb[4].mxu1 %vm18991_vm2, %v17933_v2  ;;  %vm19018_vm2 = vmmov %vm18945_vm0 }
 0x782   : > { %v9654_v51 = vpack.c.bf16 %v9593_v25, %v9585_v57  ;;  %10088 = vmatprep.mubr.bf16.mxu1 %v18690_v13 }
 0x783   : > { %v9655_v34 = vpack.c.bf16 %v9594_v1, %v9586_v15 }
 0x785   : > { %10066 = vmatprep.subr.bf16.mxu1 %v9655_v34 }
 0x786   : > { %10067 = vmatpush1.bf16.msra.mxu1 %v9654_v51 }
 0x789   : > { %12080 = vmatmul.mubr.msk.bf16.vlgmr.msra.gmra.mrb[8].mxu1 %vm18992_vm12, %v17853_v0  ;;  %v18998_v0 = vld [vmem:[#allocation53_spill] sm:$0xff]  ;;  %vm19019_vm12 = vmmov %vm18945_vm0 }
 0x78a   : > { %10098 = vmatprep.mubr.bf16.mxu1 %v18690_v13 }
 0x791   : > { %12081 = vmatmul.mubr.msk.bf16.gmra.mrb[12].mxu1 %vm18993_vm13, %v17869_v59  ;;  %vm19020_vm13 = vmmov %vm18945_vm0 }
 0x792   : > { %10108 = vmatprep.mubr.bf16.mxu1 %v18690_v13 }
 0x799   : > { %12082 = vmatmul.mubr.msk.bf16.gmra.mrb[16].mxu1 %vm18994_vm7, %v17885_v11  ;;  %vm19021_vm7 = vmmov %vm18945_vm0 }
 0x79a   : > { %10118 = vmatprep.mubr.bf16.mxu1 %v18690_v13 }
 0x7a1   : > { %12083 = vmatmul.mubr.msk.bf16.gmra.mrb[20].mxu1 %vm18995_vm4, %v17901_v3  ;;  %v18999_v3 = vld [vmem:[#allocation52_spill] sm:$0xff]  ;;  %vm19022_vm4 = vmmov %vm18945_vm0 }
 0x7a2   : > { %10128 = vmatprep.mubr.bf16.mxu1 %v18690_v13 }
 0x7a9   : > { %12084 = vmatmul.mubr.msk.bf16.gmra.mrb[24].mxu1 %vm18996_vm14, %v17917_v29  ;;  %vm19023_vm14 = vmmov %vm18945_vm0 }
 0x7aa   : > { %10138 = vmatprep.mubr.bf16.mxu1 %v18690_v13 }
 0x7b1   : > { %12085 = vmatmul.mubr.msk.bf16.gmra.mrb[28].mxu1 %vm18997_vm9, %v17933_v2  ;;  %vm19024_vm9 = vmmov %vm18945_vm0 }
 0x7b2   : > { %10552 = vmatprep.mubr.bf16.mxu1 %v18690_v13 }
 0x7fa   : > { %v9811_v24 = vpop.f32.mrb[240].mxu0 }
 0x7fb   : > { %v9812_v59 = vadd.f32 %v9811_v24, %v18998_v0  ;;  %v9813_v11 = vpop.f32.mrb[241].mxu0 }
 0x7fc   : > { %v9814_v14 = vadd.f32 %v9813_v11, %v18998_v0  ;;  %v9815_v49 = vpop.f32.mrb[242].mxu0  ;;  %v19006_v11 = vld [vmem:[#allocation61_spill] sm:$0xff] }
 0x7fd   : > { %v9816_v36 = vadd.f32 %v9815_v49, %v18999_v3  ;;  %v9817_v10 = vpop.f32.mrb[243].mxu0  ;;  %v10149_v29 = vmax.f32 %v9812_v59, 0.0 }
 0x7fe   : > { %v9818_v38 = vadd.f32 %v9817_v10, %v18999_v3  ;;  %v10150_v41 = vmax.f32 %v9814_v14, 0.0 }
 0x7ff   : > { %v10157_v43 = vmax.f32 %v9816_v36, 0.0 }
 0x800   : > { %v10158_v7 = vmax.f32 %v9818_v38, 0.0  ;;  %v19007_v38 = vld [vmem:[#allocation60_spill] sm:$0xff] }
 0x801   : > { %v10258_v39 = vpack.c.bf16 %v10157_v43, %v10149_v29 }
 0x802   : > { %v10259_v2 = vpack.c.bf16 %v10158_v7, %v10150_v41  ;;  %v9821_v8 = vpop.f32.mrb[244].mxu0 }
 0x803   : > { %v9822_v52 = vadd.f32 %v9821_v8, %v19000_v63  ;;  %v9823_v35 = vpop.f32.mrb[245].mxu0 }
 0x804   : > { %v9824_v60 = vadd.f32 %v9823_v35, %v19000_v63  ;;  %v9825_v9 = vpop.f32.mrb[246].mxu0  ;;  %10427 = vmatprep.subr.bf16.mxu0 %v10259_v2 }
 0x805   : > { %v9826_v30 = vadd.f32 %v9825_v9, %v19001_v4  ;;  %v9827_v21 = vpop.f32.mrb[247].mxu0  ;;  %10428 = vmatpush1.bf16.msra.mxu0 %v10258_v39  ;;  %v10165_v44 = vmax.f32 %v9822_v52, 0.0  ;;  %v19008_v9 = vld [vmem:[#allocation63_spill] sm:$0xff] }
 0x806   : > { %v9828_v58 = vadd.f32 %v9827_v21, %v19001_v4  ;;  %v10166_v17 = vmax.f32 %v9824_v60, 0.0 }
 0x807   : > { %v10173_v31 = vmax.f32 %v9826_v30, 0.0 }
 0x808   : > { %v10174_v33 = vmax.f32 %v9828_v58, 0.0 }
 0x809   : > { %v10266_v62 = vpack.c.bf16 %v10173_v31, %v10165_v44  ;;  %v19009_v31 = vld [vmem:[#allocation62_spill] sm:$0xff] }
 0x80a   : > { %v10267_v6 = vpack.c.bf16 %v10174_v33, %v10166_v17  ;;  %v9831_v19 = vpop.f32.mrb[248].mxu0 }
 0x80b   : > { %v9832_v5 = vadd.f32 %v9831_v19, %v19002_v42  ;;  %v9833_v16 = vpop.f32.mrb[249].mxu0 }
 0x80c   : > { %v9834_v12 = vadd.f32 %v9833_v16, %v19002_v42  ;;  %v9835_v32 = vpop.f32.mrb[250].mxu0  ;;  %10429 = vmatprep.subr.bf16.mxu0 %v10267_v6 }
 0x80d   : > { %v9836_v28 = vadd.f32 %v9835_v32, %v19003_v37  ;;  %v9837_v23 = vpop.f32.mrb[251].mxu0  ;;  %10430 = vmatpush1.bf16.msra.mxu0 %v10266_v62  ;;  %v10181_v46 = vmax.f32 %v9832_v5, 0.0 }
 0x80e   : > { %v9838_v50 = vadd.f32 %v9837_v23, %v19003_v37  ;;  %v10182_v48 = vmax.f32 %v9834_v12, 0.0 }
 0x80f   : > { %v10189_v55 = vmax.f32 %v9836_v28, 0.0 }
 0x810   : > { %v10190_v61 = vmax.f32 %v9838_v50, 0.0 }
 0x811   : > { %v10274_v56 = vpack.c.bf16 %v10189_v55, %v10181_v46 }
 0x812   : > { %v10275_v54 = vpack.c.bf16 %v10190_v61, %v10182_v48  ;;  %v9841_v20 = vpop.f32.mrb[252].mxu0  ;;  %v18051_v61 = vld [vmem:[%s18486_s4 + $0xc0] sm:$0xff]  }
 0x813   : > { %v9842_v27 = vadd.f32 %v9841_v20, %v19004_v53  ;;  %v9843_v45 = vpop.f32.mrb[253].mxu0 }
 0x814   : > { %v9844_v22 = vadd.f32 %v9843_v45, %v19004_v53  ;;  %v9845_v18 = vpop.f32.mrb[254].mxu0  ;;  %10431 = vmatprep.subr.bf16.mxu0 %v10275_v54 }
 0x815   : > { %v9846_v40 = vadd.f32 %v9845_v18, %v19005_v47  ;;  %v9847_v26 = vpop.f32.mrb[255].mxu0  ;;  %10432 = vmatpush1.bf16.msra.mxu0 %v10274_v56  ;;  %v10197_v25 = vmax.f32 %v9842_v27, 0.0 }
 0x816   : > { %v9848_v57 = vadd.f32 %v9847_v26, %v19005_v47  ;;  %v10198_v1 = vmax.f32 %v9844_v22, 0.0 }
 0x817   : > { %v10205_v15 = vmax.f32 %v9846_v40, 0.0 }
 0x818   : > { %v10206_v51 = vmax.f32 %v9848_v57, 0.0 }
 0x819   : > { %v10282_v34 = vpack.c.bf16 %v10205_v15, %v10197_v25 }
 0x81a   : > { %v10283_v24 = vpack.c.bf16 %v10206_v51, %v10198_v1  ;;  %v9851_v59 = vpop.f32.mrb[0].mxu0 }
 0x81b   : > { %v9852_v14 = vadd.f32 %v9851_v59, %v19006_v11  ;;  %v9853_v49 = vpop.f32.mrb[1].mxu0 }
 0x81c   : > { %v9854_v36 = vadd.f32 %v9853_v49, %v19006_v11  ;;  %v9855_v10 = vpop.f32.mrb[2].mxu0  ;;  %10433 = vmatprep.subr.bf16.mxu0 %v10283_v24 }
 0x81d   : > { %v9856_v29 = vadd.f32 %v9855_v10, %v19007_v38  ;;  %v9857_v43 = vpop.f32.mrb[3].mxu0  ;;  %10434 = vmatpush1.bf16.msra.mxu0 %v10282_v34  ;;  %v10213_v7 = vmax.f32 %v9852_v14, 0.0 }
 0x81e   : > { %v9858_v41 = vadd.f32 %v9857_v43, %v19007_v38  ;;  %v10214_v2 = vmax.f32 %v9854_v36, 0.0 }
 0x81f   : > { %v10221_v39 = vmax.f32 %v9856_v29, 0.0 }
 0x820   : > { %v10222_v8 = vmax.f32 %v9858_v41, 0.0 }
 0x821   : > { %v10290_v52 = vpack.c.bf16 %v10221_v39, %v10213_v7 }
 0x822   : > { %v10291_v35 = vpack.c.bf16 %v10222_v8, %v10214_v2  ;;  %v9861_v60 = vpop.f32.mrb[4].mxu0 }
 0x823   : > { %v9862_v30 = vadd.f32 %v9861_v60, %v19008_v9  ;;  %v9863_v21 = vpop.f32.mrb[5].mxu0 }
 0x824   : > { %v9864_v58 = vadd.f32 %v9863_v21, %v19008_v9  ;;  %v9865_v44 = vpop.f32.mrb[6].mxu0  ;;  %10435 = vmatprep.subr.bf16.mxu0 %v10291_v35 }
 0x825   : > { %v9866_v17 = vadd.f32 %v9865_v44, %v19009_v31  ;;  %v9867_v33 = vpop.f32.mrb[7].mxu0  ;;  %10436 = vmatpush1.bf16.msra.mxu0 %v10290_v52  ;;  %v10229_v6 = vmax.f32 %v9862_v30, 0.0  ;;  %v18067_v52 = vld [vmem:[%s18486_s4 + $0xc8] sm:$0xff]  }
 0x826   : > { %v9868_v62 = vadd.f32 %v9867_v33, %v19009_v31  ;;  %v10230_v5 = vmax.f32 %v9864_v58, 0.0 }
 0x827   : > { %v10237_v19 = vmax.f32 %v9866_v17, 0.0 }
 0x828   : > { %v10238_v16 = vmax.f32 %v9868_v62, 0.0 }
 0x829   : > { %v10298_v12 = vpack.c.bf16 %v10237_v19, %v10229_v6 }
 0x82a   : > { %v10299_v32 = vpack.c.bf16 %v10238_v16, %v10230_v5  ;;  %v9997_v28 = vpop.f32.mrb[8].mxu0 }
 0x82b   : > { %v9998_v23 = vadd.f32 %v9997_v28, %v18998_v0  ;;  %v9999_v50 = vpop.f32.mrb[9].mxu0 }
 0x82c   : > { %v9904_v46 = vpop.f32.mrb[240].mxu1  ;;  %v10000_v55 = vadd.f32 %v9999_v50, %v18998_v0  ;;  %v10001_v48 = vpop.f32.mrb[10].mxu0  ;;  %10437 = vmatprep.subr.bf16.mxu0 %v10299_v32 }
 0x82d   : > { %v9905_v56 = vadd.f32 %v9904_v46, %v18998_v0  ;;  %v9906_v54 = vpop.f32.mrb[241].mxu1  ;;  %v10002_v20 = vadd.f32 %v10001_v48, %v18999_v3  ;;  %v10003_v27 = vpop.f32.mrb[11].mxu0  ;;  %10438 = vmatpush1.bf16.msra.mxu0 %v10298_v12  ;;  %v10153_v57 = vmax.f32 %v9998_v23, 0.0 }
 0x82e   : > { %v9907_v45 = vadd.f32 %v9906_v54, %v18998_v0  ;;  %v9908_v22 = vpop.f32.mrb[242].mxu1  ;;  %v10004_v18 = vadd.f32 %v10003_v27, %v18999_v3  ;;  %v10154_v1 = vmax.f32 %v10000_v55, 0.0 }
 0x82f   : > { %v9909_v40 = vadd.f32 %v9908_v22, %v18999_v3  ;;  %v9910_v26 = vpop.f32.mrb[243].mxu1  ;;  %v10161_v25 = vmax.f32 %v10002_v20, 0.0  ;;  %v10151_v34 = vmax.f32 %v9905_v56, 0.0 }
 0x830   : > { %v9911_v15 = vadd.f32 %v9910_v26, %v18999_v3  ;;  %v10162_v51 = vmax.f32 %v10004_v18, 0.0  ;;  %12116 = vmatmul.mubr.msk.bf16.vlgmr.msra.gmra.mrb[32].mxu0 %vm19010_vm5, %v18051_v61  ;;  %v10152_v14 = vmax.f32 %v9907_v45, 0.0  ;;  %vm19025_vm5 = vmmov %vm18945_vm0 }
 0x831   : > { %v10159_v24 = vmax.f32 %v9909_v40, 0.0  ;;  %v10262_v59 = vpack.c.bf16 %v10161_v25, %v10153_v57  ;;  %10469 = vmatprep.mubr.bf16.mxu0 %v18690_v13  ;;  %v18083_v40 = vld [vmem:[%s18486_s4 + $0xd0] sm:$0xff]  }
 0x832   : > { %v10160_v49 = vmax.f32 %v9911_v15, 0.0  ;;  %v10263_v36 = vpack.c.bf16 %v10162_v51, %v10154_v1  ;;  %v10007_v10 = vpop.f32.mrb[12].mxu0 }
 0x833   : > { %v10260_v29 = vpack.c.bf16 %v10159_v24, %v10151_v34  ;;  %v10008_v43 = vadd.f32 %v10007_v10, %v19000_v63  ;;  %v10009_v41 = vpop.f32.mrb[13].mxu0 }
 0x834   : > { %v10261_v7 = vpack.c.bf16 %v10160_v49, %v10152_v14  ;;  %v9914_v39 = vpop.f32.mrb[244].mxu1  ;;  %v10010_v2 = vadd.f32 %v10009_v41, %v19000_v63  ;;  %v10011_v8 = vpop.f32.mrb[14].mxu0  ;;  %10613 = vmatprep.subr.bf16.mxu0 %v10263_v36 }
 0x835   : > { %v9915_v35 = vadd.f32 %v9914_v39, %v19000_v63  ;;  %v9916_v60 = vpop.f32.mrb[245].mxu1  ;;  %v10012_v30 = vadd.f32 %v10011_v8, %v19001_v4  ;;  %v10013_v21 = vpop.f32.mrb[15].mxu0  ;;  %10614 = vmatpush1.bf16.msra.mxu0 %v10262_v59  ;;  %v10169_v6 = vmax.f32 %v10008_v43, 0.0 }
 0x836   : > { %v9917_v58 = vadd.f32 %v9916_v60, %v19000_v63  ;;  %v9918_v44 = vpop.f32.mrb[246].mxu1  ;;  %10520 = vmatprep.subr.bf16.mxu1 %v10261_v7  ;;  %v10014_v17 = vadd.f32 %v10013_v21, %v19001_v4  ;;  %v10170_v16 = vmax.f32 %v10010_v2, 0.0 }
 0x837   : > { %v9919_v33 = vadd.f32 %v9918_v44, %v19001_v4  ;;  %v9920_v62 = vpop.f32.mrb[247].mxu1  ;;  %10521 = vmatpush1.bf16.msra.mxu1 %v10260_v29  ;;  %v10177_v19 = vmax.f32 %v10012_v30, 0.0  ;;  %v10167_v32 = vmax.f32 %v9915_v35, 0.0 }
 0x838   : > { %v9921_v5 = vadd.f32 %v9920_v62, %v19001_v4  ;;  %v10178_v12 = vmax.f32 %v10014_v17, 0.0  ;;  %12117 = vmatmul.mubr.msk.bf16.gmra.mrb[36].mxu0 %vm19011_vm11, %v18067_v52  ;;  %v10168_v50 = vmax.f32 %v9917_v58, 0.0  ;;  %v18099_v62 = vld [vmem:[%s18486_s4 + $0xd8] sm:$0xff]   ;;  %vm19026_vm11 = vmmov %vm18945_vm0 }
 0x839   : > { %v10175_v28 = vmax.f32 %v9919_v33, 0.0  ;;  %v10270_v23 = vpack.c.bf16 %v10177_v19, %v10169_v6  ;;  %10479 = vmatprep.mubr.bf16.mxu0 %v18690_v13 }
 0x83a   : > { %v10176_v46 = vmax.f32 %v9921_v5, 0.0  ;;  %v10271_v55 = vpack.c.bf16 %v10178_v12, %v10170_v16  ;;  %v10017_v48 = vpop.f32.mrb[16].mxu0 }
 0x83b   : > { %v10268_v56 = vpack.c.bf16 %v10175_v28, %v10167_v32  ;;  %v10018_v54 = vadd.f32 %v10017_v48, %v19002_v42  ;;  %v10019_v20 = vpop.f32.mrb[17].mxu0 }
 0x83c   : > { %v10269_v27 = vpack.c.bf16 %v10176_v46, %v10168_v50  ;;  %v9924_v45 = vpop.f32.mrb[248].mxu1  ;;  %v10020_v22 = vadd.f32 %v10019_v20, %v19002_v42  ;;  %v10021_v18 = vpop.f32.mrb[18].mxu0  ;;  %10615 = vmatprep.subr.bf16.mxu0 %v10271_v55 }
 0x83d   : > { %v9925_v26 = vadd.f32 %v9924_v45, %v19002_v42  ;;  %v9926_v57 = vpop.f32.mrb[249].mxu1  ;;  %v10022_v25 = vadd.f32 %v10021_v18, %v19003_v37  ;;  %v10023_v15 = vpop.f32.mrb[19].mxu0  ;;  %10616 = vmatpush1.bf16.msra.mxu0 %v10270_v23  ;;  %v10185_v14 = vmax.f32 %v10018_v54, 0.0 }
 0x83e   : > { %v9927_v1 = vadd.f32 %v9926_v57, %v19002_v42  ;;  %v9928_v51 = vpop.f32.mrb[250].mxu1  ;;  %10522 = vmatprep.subr.bf16.mxu1 %v10269_v27  ;;  %v10024_v34 = vadd.f32 %v10023_v15, %v19003_v37  ;;  %v10186_v10 = vmax.f32 %v10020_v22, 0.0 }
 0x83f   : > { %v9929_v24 = vadd.f32 %v9928_v51, %v19003_v37  ;;  %v9930_v59 = vpop.f32.mrb[251].mxu1  ;;  %10523 = vmatpush1.bf16.msra.mxu1 %v10268_v56  ;;  %v10193_v49 = vmax.f32 %v10022_v25, 0.0  ;;  %v10183_v43 = vmax.f32 %v9925_v26, 0.0 }
 0x840   : > { %v9931_v36 = vadd.f32 %v9930_v59, %v19003_v37  ;;  %v10194_v29 = vmax.f32 %v10024_v34, 0.0  ;;  %12118 = vmatmul.mubr.msk.bf16.gmra.mrb[40].mxu0 %vm19012_vm6, %v18083_v40  ;;  %v10184_v39 = vmax.f32 %v9927_v1, 0.0  ;;  %vm19027_vm6 = vmmov %vm18945_vm0 }
 0x841   : > { %v10191_v41 = vmax.f32 %v9929_v24, 0.0  ;;  %v10278_v7 = vpack.c.bf16 %v10193_v49, %v10185_v14  ;;  %10489 = vmatprep.mubr.bf16.mxu0 %v18690_v13  ;;  %v18115_v14 = vld [vmem:[%s18486_s4 + $0xe0] sm:$0xff]  }
 0x842   : > { %v10192_v2 = vmax.f32 %v9931_v36, 0.0  ;;  %v10279_v8 = vpack.c.bf16 %v10194_v29, %v10186_v10  ;;  %v10027_v35 = vpop.f32.mrb[20].mxu0 }
 0x843   : > { %v10276_v60 = vpack.c.bf16 %v10191_v41, %v10183_v43  ;;  %v10028_v30 = vadd.f32 %v10027_v35, %v19004_v53  ;;  %v10029_v21 = vpop.f32.mrb[21].mxu0 }
 0x844   : > { %v10277_v58 = vpack.c.bf16 %v10192_v2, %v10184_v39  ;;  %v9934_v44 = vpop.f32.mrb[252].mxu1  ;;  %v10030_v17 = vadd.f32 %v10029_v21, %v19004_v53  ;;  %v10031_v33 = vpop.f32.mrb[22].mxu0  ;;  %10617 = vmatprep.subr.bf16.mxu0 %v10279_v8 }
 0x845   : > { %v9935_v6 = vadd.f32 %v9934_v44, %v19004_v53  ;;  %v9936_v19 = vpop.f32.mrb[253].mxu1  ;;  %v10032_v5 = vadd.f32 %v10031_v33, %v19005_v47  ;;  %v10033_v16 = vpop.f32.mrb[23].mxu0  ;;  %10618 = vmatpush1.bf16.msra.mxu0 %v10278_v7  ;;  %v10201_v46 = vmax.f32 %v10028_v30, 0.0 }
 0x846   : > { %v9937_v12 = vadd.f32 %v9936_v19, %v19004_v53  ;;  %v9938_v32 = vpop.f32.mrb[254].mxu1  ;;  %10524 = vmatprep.subr.bf16.mxu1 %v10277_v58  ;;  %v10034_v28 = vadd.f32 %v10033_v16, %v19005_v47  ;;  %v10202_v56 = vmax.f32 %v10030_v17, 0.0 }
 0x847   : > { %v9939_v23 = vadd.f32 %v9938_v32, %v19005_v47  ;;  %v9940_v50 = vpop.f32.mrb[255].mxu1  ;;  %10525 = vmatpush1.bf16.msra.mxu1 %v10276_v60  ;;  %v10209_v55 = vmax.f32 %v10032_v5, 0.0  ;;  %v10199_v20 = vmax.f32 %v9935_v6, 0.0 }
 0x848   : > { %v9941_v48 = vadd.f32 %v9940_v50, %v19005_v47  ;;  %v10210_v54 = vmax.f32 %v10034_v28, 0.0  ;;  %12119 = vmatmul.mubr.msk.bf16.gmra.mrb[44].mxu0 %vm19013_vm10, %v18099_v62  ;;  %v10200_v22 = vmax.f32 %v9937_v12, 0.0  ;;  %vm19028_vm10 = vmmov %vm18945_vm0 }
 0x849   : > { %v10207_v27 = vmax.f32 %v9939_v23, 0.0  ;;  %v10286_v45 = vpack.c.bf16 %v10209_v55, %v10201_v46  ;;  %10499 = vmatprep.mubr.bf16.mxu0 %v18690_v13  ;;  %v18131_v55 = vld [vmem:[%s18486_s4 + $0xe8] sm:$0xff]  }
 0x84a   : > { %v10208_v18 = vmax.f32 %v9941_v48, 0.0  ;;  %v10287_v26 = vpack.c.bf16 %v10210_v54, %v10202_v56  ;;  %v10037_v57 = vpop.f32.mrb[24].mxu0 }
 0x84b   : > { %v10284_v25 = vpack.c.bf16 %v10207_v27, %v10199_v20  ;;  %v10038_v15 = vadd.f32 %v10037_v57, %v19006_v11  ;;  %v10039_v1 = vpop.f32.mrb[25].mxu0 }
 0x84c   : > { %v10285_v51 = vpack.c.bf16 %v10208_v18, %v10200_v22  ;;  %v9944_v34 = vpop.f32.mrb[0].mxu1  ;;  %v10040_v24 = vadd.f32 %v10039_v1, %v19006_v11  ;;  %v10041_v59 = vpop.f32.mrb[26].mxu0  ;;  %10619 = vmatprep.subr.bf16.mxu0 %v10287_v26 }
 0x84d   : > { %v9945_v49 = vadd.f32 %v9944_v34, %v19006_v11  ;;  %v9946_v36 = vpop.f32.mrb[1].mxu1  ;;  %v10042_v10 = vadd.f32 %v10041_v59, %v19007_v38  ;;  %v10043_v29 = vpop.f32.mrb[27].mxu0  ;;  %10620 = vmatpush1.bf16.msra.mxu0 %v10286_v45  ;;  %v10217_v8 = vmax.f32 %v10038_v15, 0.0 }
 0x84e   : > { %v9947_v43 = vadd.f32 %v9946_v36, %v19006_v11  ;;  %v9948_v41 = vpop.f32.mrb[2].mxu1  ;;  %10526 = vmatprep.subr.bf16.mxu1 %v10285_v51  ;;  %v10044_v7 = vadd.f32 %v10043_v29, %v19007_v38  ;;  %v10218_v30 = vmax.f32 %v10040_v24, 0.0 }
 0x84f   : > { %v9949_v39 = vadd.f32 %v9948_v41, %v19007_v38  ;;  %v9950_v2 = vpop.f32.mrb[3].mxu1  ;;  %10527 = vmatpush1.bf16.msra.mxu1 %v10284_v25  ;;  %v10225_v35 = vmax.f32 %v10042_v10, 0.0  ;;  %v10215_v58 = vmax.f32 %v9945_v49, 0.0 }
 0x850   : > { %v9951_v60 = vadd.f32 %v9950_v2, %v19007_v38  ;;  %v10226_v21 = vmax.f32 %v10044_v7, 0.0  ;;  %12120 = vmatmul.mubr.msk.bf16.gmra.mrb[48].mxu0 %vm19014_vm3, %v18115_v14  ;;  %v10216_v33 = vmax.f32 %v9947_v43, 0.0  ;;  %vm19029_vm3 = vmmov %vm18945_vm0 }
 0x851   : > { %v10223_v44 = vmax.f32 %v9949_v39, 0.0  ;;  %v10294_v17 = vpack.c.bf16 %v10225_v35, %v10217_v8  ;;  %10509 = vmatprep.mubr.bf16.mxu0 %v18690_v13 }
 0x852   : > { %v10224_v6 = vmax.f32 %v9951_v60, 0.0  ;;  %v10295_v19 = vpack.c.bf16 %v10226_v21, %v10218_v30  ;;  %v10047_v5 = vpop.f32.mrb[28].mxu0 }
 0x853   : > { %v10292_v16 = vpack.c.bf16 %v10223_v44, %v10215_v58  ;;  %v10048_v12 = vadd.f32 %v10047_v5, %v19008_v9  ;;  %v10049_v32 = vpop.f32.mrb[29].mxu0 }
 0x854   : > { %v10293_v28 = vpack.c.bf16 %v10224_v6, %v10216_v33  ;;  %v9954_v23 = vpop.f32.mrb[4].mxu1  ;;  %v10050_v50 = vadd.f32 %v10049_v32, %v19008_v9  ;;  %v10051_v46 = vpop.f32.mrb[30].mxu0  ;;  %10621 = vmatprep.subr.bf16.mxu0 %v10295_v19 }
 0x855   : > { %v9955_v48 = vadd.f32 %v9954_v23, %v19008_v9  ;;  %v9956_v56 = vpop.f32.mrb[5].mxu1  ;;  %v10052_v54 = vadd.f32 %v10051_v46, %v19009_v31  ;;  %v10053_v20 = vpop.f32.mrb[31].mxu0  ;;  %10622 = vmatpush1.bf16.msra.mxu0 %v10294_v17  ;;  %v10233_v57 = vmax.f32 %v10048_v12, 0.0 }
 0x856   : > { %v9957_v27 = vadd.f32 %v9956_v56, %v19008_v9  ;;  %v9958_v45 = vpop.f32.mrb[6].mxu1  ;;  %10528 = vmatprep.subr.bf16.mxu1 %v10293_v28  ;;  %v10054_v22 = vadd.f32 %v10053_v20, %v19009_v31  ;;  %v10234_v1 = vmax.f32 %v10050_v50, 0.0 }
 0x857   : > { %v9959_v18 = vadd.f32 %v9958_v45, %v19009_v31  ;;  %v9960_v26 = vpop.f32.mrb[7].mxu1  ;;  %10529 = vmatpush1.bf16.msra.mxu1 %v10292_v16  ;;  %v10241_v25 = vmax.f32 %v10052_v54, 0.0  ;;  %v10231_v34 = vmax.f32 %v9955_v48, 0.0 }
 0x858   : > { %v9961_v15 = vadd.f32 %v9960_v26, %v19009_v31  ;;  %v10242_v51 = vmax.f32 %v10054_v22, 0.0  ;;  %12121 = vmatmul.mubr.msk.bf16.gmra.mrb[52].mxu0 %vm18945_vm0, %v18131_v55  ;;  %v10232_v49 = vmax.f32 %v9957_v27, 0.0 }
 0x859   : > { %v10239_v24 = vmax.f32 %v9959_v18, 0.0  ;;  %v10302_v59 = vpack.c.bf16 %v10241_v25, %v10233_v57  ;;  %10645 = vmatprep.mubr.bf16.mxu0 %v18690_v13 }
 0x85a   : > { %v10240_v36 = vmax.f32 %v9961_v15, 0.0  ;;  %v10303_v10 = vpack.c.bf16 %v10242_v51, %v10234_v1 }
 0x85b   : > { %v10300_v29 = vpack.c.bf16 %v10239_v24, %v10231_v34 }
 0x85c   : > { %v10301_v43 = vpack.c.bf16 %v10240_v36, %v10232_v49  ;;  %v10090_v41 = vpop.f32.mrb[8].mxu1  ;;  %10623 = vmatprep.subr.bf16.mxu0 %v10303_v10 }
 0x85d   : > { %v10091_v7 = vadd.f32 %v10090_v41, %v18998_v0  ;;  %v10092_v39 = vpop.f32.mrb[9].mxu1  ;;  %10624 = vmatpush1.bf16.msra.mxu0 %v10302_v59 }
 0x85e   : > { %v10093_v2 = vadd.f32 %v10092_v39, %v18998_v0  ;;  %v10094_v8 = vpop.f32.mrb[10].mxu1  ;;  %10530 = vmatprep.subr.bf16.mxu1 %v10301_v43 }
 0x85f   : > { %v10095_v35 = vadd.f32 %v10094_v8, %v18999_v3  ;;  %v10096_v60 = vpop.f32.mrb[11].mxu1  ;;  %10531 = vmatpush1.bf16.msra.mxu1 %v10300_v29  ;;  %v10155_v21 = vmax.f32 %v10091_v7, 0.0 }
 0x860   : > { %v10097_v30 = vadd.f32 %v10096_v60, %v18999_v3  ;;  %12128 = vmatmul.mubr.msk.bf16.vlgmr.msra.gmra.mrb[56].mxu0 %vm19015_vm8, %v18051_v61  ;;  %v10156_v44 = vmax.f32 %v10093_v2, 0.0  ;;  %vm19030_vm8 = vmmov %vm18945_vm0 }
 0x861   : > { %v10163_v58 = vmax.f32 %v10095_v35, 0.0  ;;  %10655 = vmatprep.mubr.bf16.mxu0 %v18690_v13 }
 0x862   : > { %v10164_v17 = vmax.f32 %v10097_v30, 0.0  ;;  %12122 = vmatmul.mubr.msk.bf16.vlgmr.msra.gmra.mrb[32].mxu1 %vm19016_vm15, %v18051_v61  ;;  %vm19031_vm15 = vmmov %vm18945_vm0 }
 0x863   : > { %v10264_v0 = vpack.c.bf16 %v10163_v58, %v10155_v21  ;;  %10562 = vmatprep.mubr.bf16.mxu1 %v18690_v13 }
 0x864   : > { %v10265_v33 = vpack.c.bf16 %v10164_v17, %v10156_v44  ;;  %v10100_v6 = vpop.f32.mrb[12].mxu1 }
 0x865   : > { %v10101_v19 = vadd.f32 %v10100_v6, %v19000_v63  ;;  %v10102_v3 = vpop.f32.mrb[13].mxu1 }
 0x866   : > { %v10103_v5 = vadd.f32 %v10102_v3, %v19000_v63  ;;  %v10104_v16 = vpop.f32.mrb[14].mxu1  ;;  %10706 = vmatprep.subr.bf16.mxu1 %v10265_v33 }
 0x867   : > { %v10105_v12 = vadd.f32 %v10104_v16, %v19001_v4  ;;  %v10106_v32 = vpop.f32.mrb[15].mxu1  ;;  %10707 = vmatpush1.bf16.msra.mxu1 %v10264_v0  ;;  %v10171_v23 = vmax.f32 %v10101_v19, 0.0 }
 0x868   : > { %v10107_v28 = vadd.f32 %v10106_v32, %v19001_v4  ;;  %12129 = vmatmul.mubr.msk.bf16.gmra.mrb[60].mxu0 %vm19017_vm1, %v18067_v52  ;;  %v10172_v46 = vmax.f32 %v10103_v5, 0.0  ;;  %vm19044_vm1 = vmmov %vm18945_vm0 }
 0x869   : > { %v10179_v50 = vmax.f32 %v10105_v12, 0.0  ;;  %10665 = vmatprep.mubr.bf16.mxu0 %v18690_v13 }
 0x86a   : > { %v10180_v48 = vmax.f32 %v10107_v28, 0.0  ;;  %12123 = vmatmul.mubr.msk.bf16.gmra.mrb[36].mxu1 %vm19018_vm2, %v18067_v52  ;;  %vm19045_vm2 = vmmov %vm18945_vm0 }
 0x86b   : > { %v10272_v63 = vpack.c.bf16 %v10179_v50, %v10171_v23  ;;  %10572 = vmatprep.mubr.bf16.mxu1 %v18690_v13 }
 0x86c   : > { %v10273_v56 = vpack.c.bf16 %v10180_v48, %v10172_v46  ;;  %v10110_v54 = vpop.f32.mrb[16].mxu1 }
 0x86d   : > { %v10111_v20 = vadd.f32 %v10110_v54, %v19002_v42  ;;  %v10112_v4 = vpop.f32.mrb[17].mxu1 }
 0x86e   : > { %v10113_v27 = vadd.f32 %v10112_v4, %v19002_v42  ;;  %v10114_v45 = vpop.f32.mrb[18].mxu1  ;;  %10708 = vmatprep.subr.bf16.mxu1 %v10273_v56 }
 0x86f   : > { %v10115_v22 = vadd.f32 %v10114_v45, %v19003_v37  ;;  %v10116_v18 = vpop.f32.mrb[19].mxu1  ;;  %10709 = vmatpush1.bf16.msra.mxu1 %v10272_v63  ;;  %v10187_v57 = vmax.f32 %v10111_v20, 0.0 }
 0x870   : > { %v10117_v26 = vadd.f32 %v10116_v18, %v19003_v37  ;;  %12130 = vmatmul.mubr.msk.bf16.gmra.mrb[64].mxu0 %vm19019_vm12, %v18083_v40  ;;  %v10188_v15 = vmax.f32 %v10113_v27, 0.0  ;;  %vm19046_vm12 = vmmov %vm18945_vm0 }
 0x871   : > { %v10195_v25 = vmax.f32 %v10115_v22, 0.0  ;;  %10675 = vmatprep.mubr.bf16.mxu0 %v18690_v13 }
 0x872   : > { %v10196_v1 = vmax.f32 %v10117_v26, 0.0  ;;  %12124 = vmatmul.mubr.msk.bf16.gmra.mrb[40].mxu1 %vm19020_vm13, %v18083_v40  ;;  %vm19047_vm13 = vmmov %vm18945_vm0 }
 0x873   : > { %v10280_v42 = vpack.c.bf16 %v10195_v25, %v10187_v57  ;;  %10582 = vmatprep.mubr.bf16.mxu1 %v18690_v13 }
 0x874   : > { %v10281_v51 = vpack.c.bf16 %v10196_v1, %v10188_v15  ;;  %v10120_v34 = vpop.f32.mrb[20].mxu1  ;;  %v19034_v15 = vld [vmem:[#allocation67_spill] sm:$0xff] }
 0x875   : > { %v10121_v24 = vadd.f32 %v10120_v34, %v19004_v53  ;;  %v10122_v37 = vpop.f32.mrb[21].mxu1 }
 0x876   : > { %v10123_v59 = vadd.f32 %v10122_v37, %v19004_v53  ;;  %v10124_v49 = vpop.f32.mrb[22].mxu1  ;;  %10710 = vmatprep.subr.bf16.mxu1 %v10281_v51 }
 0x877   : > { %v10125_v36 = vadd.f32 %v10124_v49, %v19005_v47  ;;  %v10126_v10 = vpop.f32.mrb[23].mxu1  ;;  %10711 = vmatpush1.bf16.msra.mxu1 %v10280_v42  ;;  %v10203_v43 = vmax.f32 %v10121_v24, 0.0  ;;  %v19035_v24 = vld [vmem:[#allocation66_spill] sm:$0xff] }
 0x878   : > { %v10127_v29 = vadd.f32 %v10126_v10, %v19005_v47  ;;  %12131 = vmatmul.mubr.msk.bf16.gmra.mrb[68].mxu0 %vm19021_vm7, %v18099_v62  ;;  %v10204_v7 = vmax.f32 %v10123_v59, 0.0 }
 0x879   : > { %v10211_v41 = vmax.f32 %v10125_v36, 0.0  ;;  %10685 = vmatprep.mubr.bf16.mxu0 %v18690_v13 }
 0x87a   : > { %v10212_v39 = vmax.f32 %v10127_v29, 0.0  ;;  %12125 = vmatmul.mubr.msk.bf16.gmra.mrb[44].mxu1 %vm19022_vm4, %v18099_v62 }
 0x87b   : > { %v10288_v53 = vpack.c.bf16 %v10211_v41, %v10203_v43  ;;  %10592 = vmatprep.mubr.bf16.mxu1 %v18690_v13 }
 0x87c   : > { %v10289_v2 = vpack.c.bf16 %v10212_v39, %v10204_v7  ;;  %v10130_v8 = vpop.f32.mrb[24].mxu1 }
 0x87d   : > { %v10131_v35 = vadd.f32 %v10130_v8, %v19006_v11  ;;  %v10132_v47 = vpop.f32.mrb[25].mxu1 }
 0x87e   : > { %v10133_v60 = vadd.f32 %v10132_v47, %v19006_v11  ;;  %v10134_v30 = vpop.f32.mrb[26].mxu1  ;;  %10712 = vmatprep.subr.bf16.mxu1 %v10289_v2 }
 0x87f   : > { %v10135_v21 = vadd.f32 %v10134_v30, %v19007_v38  ;;  %v10136_v58 = vpop.f32.mrb[27].mxu1  ;;  %10713 = vmatpush1.bf16.msra.mxu1 %v10288_v53  ;;  %v10219_v17 = vmax.f32 %v10131_v35, 0.0  ;;  %v19036_v53 = vld [vmem:[#allocation69_spill] sm:$0xff] }
 0x880   : > { %v10137_v44 = vadd.f32 %v10136_v58, %v19007_v38  ;;  %12132 = vmatmul.mubr.msk.bf16.gmra.mrb[72].mxu0 %vm19023_vm14, %v18115_v14  ;;  %v10220_v33 = vmax.f32 %v10133_v60, 0.0  ;;  %v19037_v60 = vld [vmem:[#allocation68_spill] sm:$0xff] }
 0x881   : > { %v10227_v0 = vmax.f32 %v10135_v21, 0.0  ;;  %10695 = vmatprep.mubr.bf16.mxu0 %v18690_v13 }
 0x882   : > { %v10228_v6 = vmax.f32 %v10137_v44, 0.0  ;;  %12126 = vmatmul.mubr.msk.bf16.gmra.mrb[48].mxu1 %vm19024_vm9, %v18115_v14 }
 0x883   : > { %v10296_v11 = vpack.c.bf16 %v10227_v0, %v10219_v17  ;;  %10602 = vmatprep.mubr.bf16.mxu1 %v18690_v13 }
 0x884   : > { %v10297_v19 = vpack.c.bf16 %v10228_v6, %v10220_v33  ;;  %v10140_v3 = vpop.f32.mrb[28].mxu1 }
 0x885   : > { %v10141_v5 = vadd.f32 %v10140_v3, %v19008_v9  ;;  %v10142_v38 = vpop.f32.mrb[29].mxu1  ;;  %v19038_v3 = vld [vmem:[#allocation71_spill] sm:$0xff] }
 0x886   : > { %v10143_v16 = vadd.f32 %v10142_v38, %v19008_v9  ;;  %v10144_v12 = vpop.f32.mrb[30].mxu1  ;;  %10714 = vmatprep.subr.bf16.mxu1 %v10297_v19 }
 0x887   : > { %v10145_v32 = vadd.f32 %v10144_v12, %v19009_v31  ;;  %v10146_v28 = vpop.f32.mrb[31].mxu1  ;;  %10715 = vmatpush1.bf16.msra.mxu1 %v10296_v11  ;;  %v10235_v50 = vmax.f32 %v10141_v5, 0.0 }
 0x888   : > { %v10147_v23 = vadd.f32 %v10146_v28, %v19009_v31  ;;  %12133 = vmatmul.mubr.msk.bf16.gmra.mrb[76].mxu0 %vm19025_vm5, %v18131_v55  ;;  %v10236_v48 = vmax.f32 %v10143_v16, 0.0 }
 0x889   : > { %v10243_v46 = vmax.f32 %v10145_v32, 0.0  ;;  %10985 = vmatprep.mubr.bf16.mxu0 %v18690_v13  ;;  %v19039_v32 = vld [vmem:[#allocation70_spill] sm:$0xff] }
 0x88a   : > { %v10244_v63 = vmax.f32 %v10147_v23, 0.0  ;;  %12127 = vmatmul.mubr.msk.bf16.gmra.mrb[52].mxu1 %vm19026_vm11, %v18131_v55 }
 0x88b   : > { %v10304_v9 = vpack.c.bf16 %v10243_v46, %v10235_v50  ;;  %10738 = vmatprep.mubr.bf16.mxu1 %v18690_v13 }
 0x88c   : > { %v10305_v56 = vpack.c.bf16 %v10244_v63, %v10236_v48 }
 0x88e   : > { %10716 = vmatprep.subr.bf16.mxu1 %v10305_v56 }
 0x88f   : > { %10717 = vmatpush1.bf16.msra.mxu1 %v10304_v9 }
 0x892   : > { %12134 = vmatmul.mubr.msk.bf16.vlgmr.msra.gmra.mrb[56].mxu1 %vm19027_vm6, %v18051_v61  ;;  %v19032_v61 = vld [vmem:[#allocation65_spill] sm:$0xff] }
 0x893   : > { %10748 = vmatprep.mubr.bf16.mxu1 %v18690_v13 }
 0x89a   : > { %12135 = vmatmul.mubr.msk.bf16.gmra.mrb[60].mxu1 %vm19028_vm10, %v18067_v52 }
 0x89b   : > { %10758 = vmatprep.mubr.bf16.mxu1 %v18690_v13 }
 0x8a2   : > { %12136 = vmatmul.mubr.msk.bf16.gmra.mrb[64].mxu1 %vm19029_vm3, %v18083_v40 }
 0x8a3   : > { %10768 = vmatprep.mubr.bf16.mxu1 %v18690_v13 }
 0x8aa   : > { %12137 = vmatmul.mubr.msk.bf16.gmra.mrb[68].mxu1 %vm18945_vm0, %v18099_v62  ;;  %v19033_v62 = vld [vmem:[#allocation64_spill] sm:$0xff] }
 0x8ab   : > { %10778 = vmatprep.mubr.bf16.mxu1 %v18690_v13 }
 0x8b2   : > { %12138 = vmatmul.mubr.msk.bf16.gmra.mrb[72].mxu1 %vm19030_vm8, %v18115_v14 }
 0x8b3   : > { %10788 = vmatprep.mubr.bf16.mxu1 %v18690_v13 }
 0x8ba   : > { %12139 = vmatmul.mubr.msk.bf16.gmra.mrb[76].mxu1 %vm19031_vm15, %v18131_v55 }
 0x8bb   : > { %11026 = vmatprep.mubr.bf16.mxu1 %v18690_v13 }
 0x903   : > { %v10461_v31 = vpop.f32.mrb[32].mxu0 }
 0x904   : > { %v10462_v52 = vadd.f32 %v10461_v31, %v19032_v61  ;;  %v10463_v40 = vpop.f32.mrb[33].mxu0 }
 0x905   : > { %v10464_v54 = vadd.f32 %v10463_v40, %v19032_v61  ;;  %v10465_v20 = vpop.f32.mrb[34].mxu0  ;;  %v19040_v40 = vld [vmem:[#allocation73_spill] sm:$0xff] }
 0x906   : > { %v10466_v4 = vadd.f32 %v10465_v20, %v19033_v62  ;;  %v10467_v27 = vpop.f32.mrb[35].mxu0  ;;  %v10799_v14 = vmax.f32 %v10462_v52, 0.0 }
 0x907   : > { %v10468_v45 = vadd.f32 %v10467_v27, %v19033_v62  ;;  %v10800_v18 = vmax.f32 %v10464_v54, 0.0 }
 0x908   : > { %v10807_v22 = vmax.f32 %v10466_v4, 0.0 }
 0x909   : > { %v10808_v26 = vmax.f32 %v10468_v45, 0.0  ;;  %v19041_v45 = vld [vmem:[#allocation72_spill] sm:$0xff] }
 0x90a   : > { %v10896_v57 = vpack.c.bf16 %v10807_v22, %v10799_v14 }
 0x90b   : > { %v10897_v55 = vpack.c.bf16 %v10808_v26, %v10800_v18  ;;  %v10471_v25 = vpop.f32.mrb[36].mxu0 }
 0x90c   : > { %v10472_v1 = vadd.f32 %v10471_v25, %v19034_v15  ;;  %v10473_v42 = vpop.f32.mrb[37].mxu0 }
 0x90d   : > { %v10474_v51 = vadd.f32 %v10473_v42, %v19034_v15  ;;  %v10475_v34 = vpop.f32.mrb[38].mxu0  ;;  %10953 = vmatprep.subr.bf16.mxu0 %v10897_v55 }
 0x90e   : > { %v10476_v37 = vadd.f32 %v10475_v34, %v19035_v24  ;;  %v10477_v59 = vpop.f32.mrb[39].mxu0  ;;  %10954 = vmatpush1.bf16.msra.mxu0 %v10896_v57  ;;  %v10815_v36 = vmax.f32 %v10472_v1, 0.0  ;;  %v19042_v34 = vld [vmem:[#allocation75_spill] sm:$0xff] }
 0x90f   : > { %v10478_v49 = vadd.f32 %v10477_v59, %v19035_v24  ;;  %v10816_v29 = vmax.f32 %v10474_v51, 0.0 }
 0x910   : > { %v10823_v10 = vmax.f32 %v10476_v37, 0.0 }
 0x911   : > { %v10824_v43 = vmax.f32 %v10478_v49, 0.0 }
 0x912   : > { %v10904_v41 = vpack.c.bf16 %v10823_v10, %v10815_v36  ;;  %v19043_v10 = vld [vmem:[#allocation74_spill] sm:$0xff] }
 0x913   : > { %v10905_v7 = vpack.c.bf16 %v10824_v43, %v10816_v29  ;;  %v10481_v39 = vpop.f32.mrb[40].mxu0 }
 0x914   : > { %v10482_v2 = vadd.f32 %v10481_v39, %v19036_v53  ;;  %v10483_v8 = vpop.f32.mrb[41].mxu0 }
 0x915   : > { %v10484_v35 = vadd.f32 %v10483_v8, %v19036_v53  ;;  %v10485_v47 = vpop.f32.mrb[42].mxu0  ;;  %10955 = vmatprep.subr.bf16.mxu0 %v10905_v7 }
 0x916   : > { %v10486_v30 = vadd.f32 %v10485_v47, %v19037_v60  ;;  %v10487_v21 = vpop.f32.mrb[43].mxu0  ;;  %10956 = vmatpush1.bf16.msra.mxu0 %v10904_v41  ;;  %v10831_v44 = vmax.f32 %v10482_v2, 0.0 }
 0x917   : > { %v10488_v58 = vadd.f32 %v10487_v21, %v19037_v60  ;;  %v10832_v0 = vmax.f32 %v10484_v35, 0.0 }
 0x918   : > { %v10839_v17 = vmax.f32 %v10486_v30, 0.0 }
 0x919   : > { %v10840_v33 = vmax.f32 %v10488_v58, 0.0 }
 0x91a   : > { %v10912_v6 = vpack.c.bf16 %v10839_v17, %v10831_v44 }
 0x91b   : > { %v10913_v11 = vpack.c.bf16 %v10840_v33, %v10832_v0  ;;  %v10491_v19 = vpop.f32.mrb[44].mxu0 }
 0x91c   : > { %v10492_v5 = vadd.f32 %v10491_v19, %v19038_v3  ;;  %v10493_v38 = vpop.f32.mrb[45].mxu0 }
 0x91d   : > { %v10494_v16 = vadd.f32 %v10493_v38, %v19038_v3  ;;  %v10495_v12 = vpop.f32.mrb[46].mxu0  ;;  %10957 = vmatprep.subr.bf16.mxu0 %v10913_v11 }
 0x91e   : > { %v10496_v28 = vadd.f32 %v10495_v12, %v19039_v32  ;;  %v10497_v23 = vpop.f32.mrb[47].mxu0  ;;  %10958 = vmatpush1.bf16.msra.mxu0 %v10912_v6  ;;  %v10847_v46 = vmax.f32 %v10492_v5, 0.0  ;;  %v18251_v5 = vld [vmem:[%s18491_s9] sm:$0x3] }
 0x91f   : > { %v10498_v50 = vadd.f32 %v10497_v23, %v19039_v32  ;;  %v10848_v63 = vmax.f32 %v10494_v16, 0.0 }
 0x920   : > { %v10855_v48 = vmax.f32 %v10496_v28, 0.0 }
 0x921   : > { %v10856_v9 = vmax.f32 %v10498_v50, 0.0 }
 0x922   : > { %v10920_v56 = vpack.c.bf16 %v10855_v48, %v10847_v46 }
 0x923   : > { %v10921_v31 = vpack.c.bf16 %v10856_v9, %v10848_v63  ;;  %v10501_v52 = vpop.f32.mrb[48].mxu0 }
 0x924   : > { %v10502_v54 = vadd.f32 %v10501_v52, %v19040_v40  ;;  %v10503_v20 = vpop.f32.mrb[49].mxu0 }
 0x925   : > { %v10504_v4 = vadd.f32 %v10503_v20, %v19040_v40  ;;  %v10505_v27 = vpop.f32.mrb[50].mxu0  ;;  %10959 = vmatprep.subr.bf16.mxu0 %v10921_v31 }
 0x926   : > { %v10506_v14 = vadd.f32 %v10505_v27, %v19041_v45  ;;  %v10507_v22 = vpop.f32.mrb[51].mxu0  ;;  %10960 = vmatpush1.bf16.msra.mxu0 %v10920_v56  ;;  %v10863_v26 = vmax.f32 %v10502_v54, 0.0 }
 0x927   : > { %v10508_v18 = vadd.f32 %v10507_v22, %v19041_v45  ;;  %v10864_v55 = vmax.f32 %v10504_v4, 0.0 }
 0x928   : > { %v10871_v57 = vmax.f32 %v10506_v14, 0.0 }
 0x929   : > { %v10872_v25 = vmax.f32 %v10508_v18, 0.0 }
 0x92a   : > { %v10928_v1 = vpack.c.bf16 %v10871_v57, %v10863_v26 }
 0x92b   : > { %v10929_v42 = vpack.c.bf16 %v10872_v25, %v10864_v55  ;;  %v10511_v51 = vpop.f32.mrb[52].mxu0 }
 0x92c   : > { %v10512_v37 = vadd.f32 %v10511_v51, %v19042_v34  ;;  %v10513_v59 = vpop.f32.mrb[53].mxu0 }
 0x92d   : > { %v10514_v49 = vadd.f32 %v10513_v59, %v19042_v34  ;;  %v10515_v36 = vpop.f32.mrb[54].mxu0  ;;  %10961 = vmatprep.subr.bf16.mxu0 %v10929_v42 }
 0x92e   : > { %v10516_v29 = vadd.f32 %v10515_v36, %v19043_v10  ;;  %v10517_v43 = vpop.f32.mrb[55].mxu0  ;;  %10962 = vmatpush1.bf16.msra.mxu0 %v10928_v1  ;;  %v10879_v7 = vmax.f32 %v10512_v37, 0.0 }
 0x92f   : > { %v10518_v41 = vadd.f32 %v10517_v43, %v19043_v10  ;;  %v10880_v2 = vmax.f32 %v10514_v49, 0.0 }
 0x930   : > { %v10887_v39 = vmax.f32 %v10516_v29, 0.0 }
 0x931   : > { %v10888_v8 = vmax.f32 %v10518_v41, 0.0 }
 0x932   : > { %v10936_v35 = vpack.c.bf16 %v10887_v39, %v10879_v7 }
 0x933   : > { %v10937_v47 = vpack.c.bf16 %v10888_v8, %v10880_v2  ;;  %v10647_v30 = vpop.f32.mrb[56].mxu0 }
 0x934   : > { %v10648_v21 = vadd.f32 %v10647_v30, %v19032_v61  ;;  %v10649_v58 = vpop.f32.mrb[57].mxu0 }
 0x935   : > { %v10554_v44 = vpop.f32.mrb[32].mxu1  ;;  %v10650_v17 = vadd.f32 %v10649_v58, %v19032_v61  ;;  %v10651_v0 = vpop.f32.mrb[58].mxu0  ;;  %10963 = vmatprep.subr.bf16.mxu0 %v10937_v47 }
 0x936   : > { %v10555_v33 = vadd.f32 %v10554_v44, %v19032_v61  ;;  %v10556_v6 = vpop.f32.mrb[33].mxu1  ;;  %v10652_v11 = vadd.f32 %v10651_v0, %v19033_v62  ;;  %v10653_v19 = vpop.f32.mrb[59].mxu0  ;;  %10964 = vmatpush1.bf16.msra.mxu0 %v10936_v35  ;;  %v10803_v50 = vmax.f32 %v10648_v21, 0.0 }
 0x937   : > { %v10557_v38 = vadd.f32 %v10556_v6, %v19032_v61  ;;  %v10558_v16 = vpop.f32.mrb[34].mxu1  ;;  %v10654_v12 = vadd.f32 %v10653_v19, %v19033_v62  ;;  %v10804_v63 = vmax.f32 %v10650_v17, 0.0 }
 0x938   : > { %v10559_v28 = vadd.f32 %v10558_v16, %v19033_v62  ;;  %v10560_v23 = vpop.f32.mrb[35].mxu1  ;;  %v10811_v46 = vmax.f32 %v10652_v11, 0.0  ;;  %v10801_v56 = vmax.f32 %v10555_v33, 0.0 }
 0x939   : > { %v10561_v48 = vadd.f32 %v10560_v23, %v19033_v62  ;;  %v10812_v9 = vmax.f32 %v10654_v12, 0.0  ;;  %12140 = vmatmul.mubr.msk.bf16.vlgmr.msra.gmra.mrb[80].mxu0 %vm19044_vm1, %v18251_v5  ;;  %v10802_v54 = vmax.f32 %v10557_v38, 0.0 }
 0x93a   : > { %v10809_v31 = vmax.f32 %v10559_v28, 0.0  ;;  %v10900_v52 = vpack.c.bf16 %v10811_v46, %v10803_v50  ;;  %11067 = vmatprep.mubr.bf16.mxu0 %v18690_v13 }
 0x93b   : > { %v10810_v20 = vmax.f32 %v10561_v48, 0.0  ;;  %v10901_v4 = vpack.c.bf16 %v10812_v9, %v10804_v63  ;;  %v10657_v27 = vpop.f32.mrb[60].mxu0 }
 0x93c   : > { %v10898_v14 = vpack.c.bf16 %v10809_v31, %v10801_v56  ;;  %v10658_v22 = vadd.f32 %v10657_v27, %v19034_v15  ;;  %v10659_v18 = vpop.f32.mrb[61].mxu0 }
 0x93d   : > { %v10899_v26 = vpack.c.bf16 %v10810_v20, %v10802_v54  ;;  %v10564_v57 = vpop.f32.mrb[36].mxu1  ;;  %v10660_v55 = vadd.f32 %v10659_v18, %v19034_v15  ;;  %v10661_v25 = vpop.f32.mrb[62].mxu0  ;;  %11035 = vmatprep.subr.bf16.mxu0 %v10901_v4 }
 0x93e   : > { %v10565_v1 = vadd.f32 %v10564_v57, %v19034_v15  ;;  %v10566_v42 = vpop.f32.mrb[37].mxu1  ;;  %v10662_v51 = vadd.f32 %v10661_v25, %v19035_v24  ;;  %v10663_v37 = vpop.f32.mrb[63].mxu0  ;;  %11036 = vmatpush1.bf16.msra.mxu0 %v10900_v52  ;;  %v10819_v41 = vmax.f32 %v10658_v22, 0.0 }
 0x93f   : > { %v10567_v59 = vadd.f32 %v10566_v42, %v19034_v15  ;;  %v10568_v49 = vpop.f32.mrb[38].mxu1  ;;  %10994 = vmatprep.subr.bf16.mxu1 %v10899_v26  ;;  %v10664_v36 = vadd.f32 %v10663_v37, %v19035_v24  ;;  %v10820_v2 = vmax.f32 %v10660_v55, 0.0 }
 0x940   : > { %v10569_v29 = vadd.f32 %v10568_v49, %v19035_v24  ;;  %v10570_v43 = vpop.f32.mrb[39].mxu1  ;;  %10995 = vmatpush1.bf16.msra.mxu1 %v10898_v14  ;;  %v10827_v7 = vmax.f32 %v10662_v51, 0.0  ;;  %v10817_v35 = vmax.f32 %v10565_v1, 0.0 }
 0x941   : > { %v10571_v39 = vadd.f32 %v10570_v43, %v19035_v24  ;;  %v10828_v8 = vmax.f32 %v10664_v36, 0.0  ;;  %v10818_v21 = vmax.f32 %v10567_v59, 0.0 }
 0x942   : > { %v10825_v47 = vmax.f32 %v10569_v29, 0.0  ;;  %v10908_v30 = vpack.c.bf16 %v10827_v7, %v10819_v41 }
 0x943   : > { %v10826_v58 = vmax.f32 %v10571_v39, 0.0  ;;  %v10909_v44 = vpack.c.bf16 %v10828_v8, %v10820_v2  ;;  %v10667_v17 = vpop.f32.mrb[64].mxu0 }
 0x944   : > { %v10906_v0 = vpack.c.bf16 %v10825_v47, %v10817_v35  ;;  %v10668_v33 = vadd.f32 %v10667_v17, %v19036_v53  ;;  %v10669_v6 = vpop.f32.mrb[65].mxu0 }
 0x945   : > { %v10907_v11 = vpack.c.bf16 %v10826_v58, %v10818_v21  ;;  %v10574_v19 = vpop.f32.mrb[40].mxu1  ;;  %v10670_v38 = vadd.f32 %v10669_v6, %v19036_v53  ;;  %v10671_v16 = vpop.f32.mrb[66].mxu0  ;;  %11037 = vmatprep.subr.bf16.mxu0 %v10909_v44 }
 0x946   : > { %v10575_v12 = vadd.f32 %v10574_v19, %v19036_v53  ;;  %v10576_v28 = vpop.f32.mrb[41].mxu1  ;;  %v10672_v23 = vadd.f32 %v10671_v16, %v19037_v60  ;;  %v10673_v50 = vpop.f32.mrb[67].mxu0  ;;  %11038 = vmatpush1.bf16.msra.mxu0 %v10908_v30  ;;  %v10835_v31 = vmax.f32 %v10668_v33, 0.0 }
 0x947   : > { %v10577_v46 = vadd.f32 %v10576_v28, %v19036_v53  ;;  %v10578_v48 = vpop.f32.mrb[42].mxu1  ;;  %10996 = vmatprep.subr.bf16.mxu1 %v10907_v11  ;;  %v10674_v63 = vadd.f32 %v10673_v50, %v19037_v60  ;;  %v10836_v20 = vmax.f32 %v10670_v38, 0.0 }
 0x948   : > { %v10579_v9 = vadd.f32 %v10578_v48, %v19037_v60  ;;  %v10580_v56 = vpop.f32.mrb[43].mxu1  ;;  %10997 = vmatpush1.bf16.msra.mxu1 %v10906_v0  ;;  %v10843_v52 = vmax.f32 %v10672_v23, 0.0  ;;  %v10833_v27 = vmax.f32 %v10575_v12, 0.0 }
 0x949   : > { %v10581_v54 = vadd.f32 %v10580_v56, %v19037_v60  ;;  %v10844_v4 = vmax.f32 %v10674_v63, 0.0  ;;  %v10834_v18 = vmax.f32 %v10577_v46, 0.0 }
 0x94a   : > { %v10841_v14 = vmax.f32 %v10579_v9, 0.0  ;;  %v10916_v22 = vpack.c.bf16 %v10843_v52, %v10835_v31 }
 0x94b   : > { %v10842_v26 = vmax.f32 %v10581_v54, 0.0  ;;  %v10917_v57 = vpack.c.bf16 %v10844_v4, %v10836_v20  ;;  %v10677_v55 = vpop.f32.mrb[68].mxu0 }
 0x94c   : > { %v10914_v25 = vpack.c.bf16 %v10841_v14, %v10833_v27  ;;  %v10678_v1 = vadd.f32 %v10677_v55, %v19038_v3  ;;  %v10679_v42 = vpop.f32.mrb[69].mxu0 }
 0x94d   : > { %v10915_v51 = vpack.c.bf16 %v10842_v26, %v10834_v18  ;;  %v10584_v37 = vpop.f32.mrb[44].mxu1  ;;  %v10680_v59 = vadd.f32 %v10679_v42, %v19038_v3  ;;  %v10681_v49 = vpop.f32.mrb[70].mxu0  ;;  %11039 = vmatprep.subr.bf16.mxu0 %v10917_v57 }
 0x94e   : > { %v10585_v36 = vadd.f32 %v10584_v37, %v19038_v3  ;;  %v10586_v29 = vpop.f32.mrb[45].mxu1  ;;  %v10682_v43 = vadd.f32 %v10681_v49, %v19039_v32  ;;  %v10683_v41 = vpop.f32.mrb[71].mxu0  ;;  %11040 = vmatpush1.bf16.msra.mxu0 %v10916_v22  ;;  %v10851_v47 = vmax.f32 %v10678_v1, 0.0 }
 0x94f   : > { %v10587_v7 = vadd.f32 %v10586_v29, %v19038_v3  ;;  %v10588_v39 = vpop.f32.mrb[46].mxu1  ;;  %10998 = vmatprep.subr.bf16.mxu1 %v10915_v51  ;;  %v10684_v2 = vadd.f32 %v10683_v41, %v19039_v32  ;;  %v10852_v58 = vmax.f32 %v10680_v59, 0.0 }
 0x950   : > { %v10589_v8 = vadd.f32 %v10588_v39, %v19039_v32  ;;  %v10590_v35 = vpop.f32.mrb[47].mxu1  ;;  %10999 = vmatpush1.bf16.msra.mxu1 %v10914_v25  ;;  %v10859_v30 = vmax.f32 %v10682_v43, 0.0  ;;  %v10849_v17 = vmax.f32 %v10585_v36, 0.0 }
 0x951   : > { %v10591_v21 = vadd.f32 %v10590_v35, %v19039_v32  ;;  %v10860_v44 = vmax.f32 %v10684_v2, 0.0  ;;  %v10850_v6 = vmax.f32 %v10587_v7, 0.0 }
 0x952   : > { %v10857_v0 = vmax.f32 %v10589_v8, 0.0  ;;  %v10924_v33 = vpack.c.bf16 %v10859_v30, %v10851_v47 }
 0x953   : > { %v10858_v11 = vmax.f32 %v10591_v21, 0.0  ;;  %v10925_v19 = vpack.c.bf16 %v10860_v44, %v10852_v58  ;;  %v10687_v38 = vpop.f32.mrb[72].mxu0 }
 0x954   : > { %v10922_v16 = vpack.c.bf16 %v10857_v0, %v10849_v17  ;;  %v10688_v12 = vadd.f32 %v10687_v38, %v19040_v40  ;;  %v10689_v28 = vpop.f32.mrb[73].mxu0 }
 0x955   : > { %v10923_v23 = vpack.c.bf16 %v10858_v11, %v10850_v6  ;;  %v10594_v50 = vpop.f32.mrb[48].mxu1  ;;  %v10690_v46 = vadd.f32 %v10689_v28, %v19040_v40  ;;  %v10691_v48 = vpop.f32.mrb[74].mxu0  ;;  %11041 = vmatprep.subr.bf16.mxu0 %v10925_v19 }
 0x956   : > { %v10595_v63 = vadd.f32 %v10594_v50, %v19040_v40  ;;  %v10596_v9 = vpop.f32.mrb[49].mxu1  ;;  %v10692_v56 = vadd.f32 %v10691_v48, %v19041_v45  ;;  %v10693_v31 = vpop.f32.mrb[75].mxu0  ;;  %11042 = vmatpush1.bf16.msra.mxu0 %v10924_v33  ;;  %v10867_v14 = vmax.f32 %v10688_v12, 0.0 }
 0x957   : > { %v10597_v52 = vadd.f32 %v10596_v9, %v19040_v40  ;;  %v10598_v54 = vpop.f32.mrb[50].mxu1  ;;  %11000 = vmatprep.subr.bf16.mxu1 %v10923_v23  ;;  %v10694_v20 = vadd.f32 %v10693_v31, %v19041_v45  ;;  %v10868_v26 = vmax.f32 %v10690_v46, 0.0 }
 0x958   : > { %v10599_v4 = vadd.f32 %v10598_v54, %v19041_v45  ;;  %v10600_v27 = vpop.f32.mrb[51].mxu1  ;;  %11001 = vmatpush1.bf16.msra.mxu1 %v10922_v16  ;;  %v10875_v22 = vmax.f32 %v10692_v56, 0.0  ;;  %v10865_v55 = vmax.f32 %v10595_v63, 0.0 }
 0x959   : > { %v10601_v18 = vadd.f32 %v10600_v27, %v19041_v45  ;;  %v10876_v57 = vmax.f32 %v10694_v20, 0.0  ;;  %v10866_v42 = vmax.f32 %v10597_v52, 0.0 }
 0x95a   : > { %v10873_v25 = vmax.f32 %v10599_v4, 0.0  ;;  %v10932_v1 = vpack.c.bf16 %v10875_v22, %v10867_v14 }
 0x95b   : > { %v10874_v51 = vmax.f32 %v10601_v18, 0.0  ;;  %v10933_v37 = vpack.c.bf16 %v10876_v57, %v10868_v26  ;;  %v10697_v59 = vpop.f32.mrb[76].mxu0 }
 0x95c   : > { %v10930_v49 = vpack.c.bf16 %v10873_v25, %v10865_v55  ;;  %v10698_v36 = vadd.f32 %v10697_v59, %v19042_v34  ;;  %v10699_v29 = vpop.f32.mrb[77].mxu0 }
 0x95d   : > { %v10931_v43 = vpack.c.bf16 %v10874_v51, %v10866_v42  ;;  %v10604_v41 = vpop.f32.mrb[52].mxu1  ;;  %v10700_v7 = vadd.f32 %v10699_v29, %v19042_v34  ;;  %v10701_v39 = vpop.f32.mrb[78].mxu0  ;;  %11043 = vmatprep.subr.bf16.mxu0 %v10933_v37 }
 0x95e   : > { %v10605_v2 = vadd.f32 %v10604_v41, %v19042_v34  ;;  %v10606_v8 = vpop.f32.mrb[53].mxu1  ;;  %v10702_v35 = vadd.f32 %v10701_v39, %v19043_v10  ;;  %v10703_v47 = vpop.f32.mrb[79].mxu0  ;;  %11044 = vmatpush1.bf16.msra.mxu0 %v10932_v1  ;;  %v10883_v0 = vmax.f32 %v10698_v36, 0.0 }
 0x95f   : > { %v10607_v30 = vadd.f32 %v10606_v8, %v19042_v34  ;;  %v10608_v21 = vpop.f32.mrb[54].mxu1  ;;  %11002 = vmatprep.subr.bf16.mxu1 %v10931_v43  ;;  %v10704_v58 = vadd.f32 %v10703_v47, %v19043_v10  ;;  %v10884_v11 = vmax.f32 %v10700_v7, 0.0 }
 0x960   : > { %v10609_v44 = vadd.f32 %v10608_v21, %v19043_v10  ;;  %v10610_v17 = vpop.f32.mrb[55].mxu1  ;;  %11003 = vmatpush1.bf16.msra.mxu1 %v10930_v49  ;;  %v10891_v33 = vmax.f32 %v10702_v35, 0.0  ;;  %v10881_v38 = vmax.f32 %v10605_v2, 0.0 }
 0x961   : > { %v10611_v6 = vadd.f32 %v10610_v17, %v19043_v10  ;;  %v10892_v19 = vmax.f32 %v10704_v58, 0.0  ;;  %v10882_v28 = vmax.f32 %v10607_v30, 0.0 }
 0x962   : > { %v10889_v16 = vmax.f32 %v10609_v44, 0.0  ;;  %v10940_v12 = vpack.c.bf16 %v10891_v33, %v10883_v0 }
 0x963   : > { %v10890_v23 = vmax.f32 %v10611_v6, 0.0  ;;  %v10941_v50 = vpack.c.bf16 %v10892_v19, %v10884_v11 }
 0x964   : > { %v10938_v46 = vpack.c.bf16 %v10889_v16, %v10881_v38 }
 0x965   : > { %v10939_v48 = vpack.c.bf16 %v10890_v23, %v10882_v28  ;;  %v10740_v63 = vpop.f32.mrb[56].mxu1  ;;  %11045 = vmatprep.subr.bf16.mxu0 %v10941_v50 }
 0x966   : > { %v10741_v9 = vadd.f32 %v10740_v63, %v19032_v61  ;;  %v10742_v56 = vpop.f32.mrb[57].mxu1  ;;  %11046 = vmatpush1.bf16.msra.mxu0 %v10940_v12 }
 0x967   : > { %v10743_v31 = vadd.f32 %v10742_v56, %v19032_v61  ;;  %v10744_v52 = vpop.f32.mrb[58].mxu1  ;;  %11004 = vmatprep.subr.bf16.mxu1 %v10939_v48 }
 0x968   : > { %v10745_v54 = vadd.f32 %v10744_v52, %v19033_v62  ;;  %v10746_v20 = vpop.f32.mrb[59].mxu1  ;;  %11005 = vmatpush1.bf16.msra.mxu1 %v10938_v46  ;;  %v10805_v27 = vmax.f32 %v10741_v9, 0.0 }
 0x969   : > { %v10747_v4 = vadd.f32 %v10746_v20, %v19033_v62  ;;  %12142 = vmatmul.mubr.msk.bf16.vlgmr.msra.gmra.mrb[84].mxu0 %vm19045_vm2, %v18251_v5  ;;  %v10806_v22 = vmax.f32 %v10743_v31, 0.0 }
 0x96a   : > { %v10813_v14 = vmax.f32 %v10745_v54, 0.0 }
 0x96b   : > { %v10814_v18 = vmax.f32 %v10747_v4, 0.0  ;;  %12141 = vmatmul.mubr.msk.bf16.vlgmr.msra.gmra.mrb[80].mxu1 %vm19046_vm12, %v18251_v5 }
 0x96c   : > { %v10902_v26 = vpack.c.bf16 %v10813_v14, %v10805_v27  ;;  %11108 = vmatprep.mubr.bf16.mxu1 %v18690_v13 }
 0x96d   : > { %v10903_v61 = vpack.c.bf16 %v10814_v18, %v10806_v22  ;;  %v10750_v57 = vpop.f32.mrb[60].mxu1 }
 0x96e   : > { %v10751_v55 = vadd.f32 %v10750_v57, %v19034_v15  ;;  %v10752_v25 = vpop.f32.mrb[61].mxu1 }
 0x96f   : > { %v10753_v62 = vadd.f32 %v10752_v25, %v19034_v15  ;;  %v10754_v1 = vpop.f32.mrb[62].mxu1  ;;  %11076 = vmatprep.subr.bf16.mxu1 %v10903_v61 }
 0x970   : > { %v10755_v42 = vadd.f32 %v10754_v1, %v19035_v24  ;;  %v10756_v51 = vpop.f32.mrb[63].mxu1  ;;  %11077 = vmatpush1.bf16.msra.mxu1 %v10902_v26  ;;  %v10821_v59 = vmax.f32 %v10751_v55, 0.0 }
 0x971   : > { %v10757_v37 = vadd.f32 %v10756_v51, %v19035_v24  ;;  %v10822_v36 = vmax.f32 %v10753_v62, 0.0 }
 0x972   : > { %v10829_v49 = vmax.f32 %v10755_v42, 0.0 }
 0x973   : > { %v10830_v29 = vmax.f32 %v10757_v37, 0.0 }
 0x974   : > { %v10910_v13 = vpack.c.bf16 %v10829_v49, %v10821_v59  ;;  %v19048_v49 = vld [vmem:[#allocation25_spill] sm:$0xff] }
 0x975   : > { %v10911_v43 = vpack.c.bf16 %v10830_v29, %v10822_v36  ;;  %v10760_v41 = vpop.f32.mrb[64].mxu1  ;;  %v19049_v29 = vld [vmem:[#allocation31_spill] sm:$0xff] }
 0x976   : > { %v10761_v7 = vadd.f32 %v10760_v41, %v19036_v53  ;;  %v10762_v39 = vpop.f32.mrb[65].mxu1 }
 0x977   : > { %v10763_v15 = vadd.f32 %v10762_v39, %v19036_v53  ;;  %v10764_v2 = vpop.f32.mrb[66].mxu1  ;;  %11078 = vmatprep.subr.bf16.mxu1 %v10911_v43  ;;  %v19050_v43 = vld [vmem:[#allocation22_spill] sm:$0xff] }
 0x978   : > { %v10765_v8 = vadd.f32 %v10764_v2, %v19037_v60  ;;  %v10766_v35 = vpop.f32.mrb[67].mxu1  ;;  %11079 = vmatpush1.bf16.msra.mxu1 %v10910_v13  ;;  %v10837_v47 = vmax.f32 %v10761_v7, 0.0  ;;  %v19051_v7 = vld [vmem:[#allocation26_spill] sm:$0xff]  ;;  %v19052_v2 = vld [vmem:[#allocation39_spill] sm:$0xff] }
 0x979   : > { %v10767_v24 = vadd.f32 %v10766_v35, %v19037_v60  ;;  %v10838_v21 = vmax.f32 %v10763_v15, 0.0 }
 0x97a   : > { %v10845_v30 = vmax.f32 %v10765_v8, 0.0 }
 0x97b   : > { %v10846_v58 = vmax.f32 %v10767_v24, 0.0 }
 0x97c   : > { %v10918_v44 = vpack.c.bf16 %v10845_v30, %v10837_v47  ;;  %v19054_v30 = vld [vmem:[#allocation76_spill] sm:$0xff] }
 0x97d   : > { %v10919_v17 = vpack.c.bf16 %v10846_v58, %v10838_v21  ;;  %v10770_v0 = vpop.f32.mrb[68].mxu1  ;;  %v19055_v58 = vld [vmem:[#allocation77_spill] sm:$0xff] }
 0x97e   : > { %v10771_v33 = vadd.f32 %v10770_v0, %v19038_v3  ;;  %v10772_v6 = vpop.f32.mrb[69].mxu1 }
 0x97f   : > { %v10773_v53 = vadd.f32 %v10772_v6, %v19038_v3  ;;  %v10774_v11 = vpop.f32.mrb[70].mxu1  ;;  %11080 = vmatprep.subr.bf16.mxu1 %v10919_v17 }
 0x980   : > { %v10775_v19 = vadd.f32 %v10774_v11, %v19039_v32  ;;  %v10776_v38 = vpop.f32.mrb[71].mxu1  ;;  %11081 = vmatpush1.bf16.msra.mxu1 %v10918_v44  ;;  %v10853_v16 = vmax.f32 %v10771_v33, 0.0 }
 0x981   : > { %v10777_v60 = vadd.f32 %v10776_v38, %v19039_v32  ;;  %v10854_v28 = vmax.f32 %v10773_v53, 0.0  ;;  %v19056_v53 = vld [vmem:[#allocation79_spill] sm:$0xff] }
 0x982   : > { %v10861_v12 = vmax.f32 %v10775_v19, 0.0 }
 0x983   : > { %v10862_v23 = vmax.f32 %v10777_v60, 0.0 }
 0x984   : > { %v10926_v50 = vpack.c.bf16 %v10861_v12, %v10853_v16 }
 0x985   : > { %v10927_v46 = vpack.c.bf16 %v10862_v23, %v10854_v28  ;;  %v10780_v48 = vpop.f32.mrb[72].mxu1  ;;  %v19057_v28 = vld [vmem:[#allocation80_spill] sm:$0xff] }
 0x986   : > { %v10781_v63 = vadd.f32 %v10780_v48, %v19040_v40  ;;  %v10782_v9 = vpop.f32.mrb[73].mxu1  ;;  %v19058_v48 = vld [vmem:[#allocation78_spill] sm:$0xff] }
 0x987   : > { %v10783_v3 = vadd.f32 %v10782_v9, %v19040_v40  ;;  %v10784_v56 = vpop.f32.mrb[74].mxu1  ;;  %11082 = vmatprep.subr.bf16.mxu1 %v10927_v46 }
 0x988   : > { %v10785_v31 = vadd.f32 %v10784_v56, %v19041_v45  ;;  %v10786_v52 = vpop.f32.mrb[75].mxu1  ;;  %11083 = vmatpush1.bf16.msra.mxu1 %v10926_v50  ;;  %v10869_v54 = vmax.f32 %v10781_v63, 0.0 }
 0x989   : > { %v10787_v32 = vadd.f32 %v10786_v52, %v19041_v45  ;;  %v10870_v4 = vmax.f32 %v10783_v3, 0.0 }
 0x98a   : > { %v10877_v20 = vmax.f32 %v10785_v31, 0.0 }
 0x98b   : > { %v10878_v27 = vmax.f32 %v10787_v32, 0.0 }
 0x98c   : > { %v10934_v14 = vpack.c.bf16 %v10877_v20, %v10869_v54 }
 0x98d   : > { %v10935_v22 = vpack.c.bf16 %v10878_v27, %v10870_v4  ;;  %v10790_v18 = vpop.f32.mrb[76].mxu1 }
 0x98e   : > { %v10791_v26 = vadd.f32 %v10790_v18, %v19042_v34  ;;  %v10792_v61 = vpop.f32.mrb[77].mxu1 }
 0x98f   : > { %v10793_v40 = vadd.f32 %v10792_v61, %v19042_v34  ;;  %v10794_v57 = vpop.f32.mrb[78].mxu1  ;;  %11084 = vmatprep.subr.bf16.mxu1 %v10935_v22  ;;  %v12605_v34 = vld [vmem:[%s15240_s21] sm:$0x77] }
 0x990   : > { %v10795_v55 = vadd.f32 %v10794_v57, %v19043_v10  ;;  %v10796_v25 = vpop.f32.mrb[79].mxu1  ;;  %11085 = vmatpush1.bf16.msra.mxu1 %v10934_v14  ;;  %v10885_v62 = vmax.f32 %v10791_v26, 0.0  ;;  %v11218_v36 = vrot.slane %v12605_v34, %v19048_v49  ;;  %v11134_v13 = vrot.slane %v12605_v34, %v19049_v29  ;;  %v18358_v26 = vld [vmem:[%s15240_s21 + $0x8] sm:$0x77] }
 0x991   : > { %v10797_v45 = vadd.f32 %v10796_v25, %v19043_v10  ;;  %v10886_v42 = vmax.f32 %v10793_v40, 0.0  ;;  %v11222_v41 = vrot.slane %v12605_v34, %v19050_v43  ;;  %v11138_v10 = vrot.slane %v12605_v34, %v19051_v7 }
 0x992   : > { %v10893_v1 = vmax.f32 %v10795_v55, 0.0  ;;  %v11258_v39 = vrot.slane %v11218_v36, %v19048_v49  ;;  %v11174_v15 = vrot.slane %v11134_v13, %v19049_v29  ;;  %v11310_v8 = vrot.slane %v12605_v34, %v19052_v2 }
 0x993   : > { %v10894_v51 = vmax.f32 %v10797_v45, 0.0  ;;  %v11262_v35 = vrot.slane %v11222_v41, %v19048_v49  ;;  %v11178_v24 = vrot.slane %v11138_v10, %v19049_v29  ;;  %v11226_v61 = vrot.slane %v18358_v26, %v19048_v49  ;;  %v18369_v45 = vld [vmem:[%s15240_s21 + $0x10] sm:$0x77] }
 0x994   : > { %v10942_v37 = vpack.c.bf16 %v10893_v1, %v10885_v62  ;;  %v11287_v21 = vmul.f32 %v11258_v39, %v19054_v30  ;;  %v11203_v44 = vmul.f32 %v11174_v15, %v19055_v58  ;;  %v11350_v17 = vrot.slane %v11310_v8, %v19052_v2 }
 0x995   : > { %v10943_v59 = vpack.c.bf16 %v10894_v51, %v10886_v42  ;;  %v11288_v0 = vmul.f32 %v11262_v35, %v19054_v30  ;;  %v11204_v33 = vmul.f32 %v11178_v24, %v19055_v58  ;;  %v11142_v40 = vrot.slane %v18358_v26, %v19049_v29 }
 0x996   : > { %v11379_v11 = vmul.f32 %v11350_v17, %v19056_v53  ;;  %v11295_v19 = vadd.f32 %v11287_v21, %v11203_v44  ;;  %v11230_v55 = vrot.slane %v18358_v26, %v19050_v43  ;;  %v11146_v25 = vrot.slane %v18358_v26, %v19051_v7 }
 0x997   : > { %11086 = vmatprep.subr.bf16.mxu1 %v10943_v59  ;;  %v11296_v60 = vadd.f32 %v11288_v0, %v11204_v33  ;;  %v11234_v62 = vrot.slane %v18369_v45, %v19048_v49  ;;  %v11150_v1 = vrot.slane %v18369_v45, %v19049_v29  ;;  %v11238_v42 = vrot.slane %v18369_v45, %v19050_v43 }
 0x998   : > { %11087 = vmatpush1.bf16.msra.mxu1 %v10942_v37  ;;  %v11387_v16 = vadd.f32 %v11379_v11, %v11295_v19  ;;  %v11154_v51 = vrot.slane %v18369_v45, %v19051_v7  ;;  %v11266_v37 = vrot.slane %v11226_v61, %v19048_v49  ;;  %v11182_v59 = vrot.slane %v11142_v40, %v19049_v29 }
 0x999   : > { %v11270_v36 = vrot.slane %v11230_v55, %v19048_v49  ;;  %v11186_v13 = vrot.slane %v11146_v25, %v19049_v29  ;;  %v11274_v10 = vrot.slane %v11234_v62, %v19048_v49  ;;  %v11190_v43 = vrot.slane %v11150_v1, %v19049_v29 }
 0x99a   : > { %v11401_v23 = vadd.f32 %v19057_v28, %v11387_v16  ;;  %v11326_v7 = vrot.slane %v18369_v45, %v19052_v2  ;;  %v11278_v39 = vrot.slane %v11238_v42, %v19048_v49  ;;  %v11194_v15 = vrot.slane %v11154_v51, %v19049_v29 }
 0x99b   : > { %12143 = vmatmul.mubr.msk.bf16.vlgmr.msra.gmra.mrb[84].mxu1 %vm19047_vm13, %v18251_v5  ;;  %v19053_v5 = vld [vmem:[#allocation34_spill] sm:$0xff]  ;;  %v11289_v35 = vmul.f32 %v11266_v37, %v19054_v30  ;;  %v11205_v24 = vmul.f32 %v11182_v59, %v19055_v58  ;;  %v11290_v21 = vmul.f32 %v11270_v36, %v19054_v30  ;;  %v11206_v44 = vmul.f32 %v11186_v13, %v19055_v58 }
 0x99c   : > { %v11314_v47 = vrot.slane %v12605_v34, %v19053_v5  ;;  %12553 = vtanh.f32 %v11401_v23  ;;  %v11322_v41 = vrot.slane %v18358_v26, %v19053_v5  ;;  %v11330_v8 = vrot.slane %v18369_v45, %v19053_v5 }
 0x99d   : > { %v11291_v0 = vmul.f32 %v11274_v10, %v19054_v30  ;;  %v11207_v49 = vmul.f32 %v11190_v43, %v19055_v58  ;;  %v11366_v29 = vrot.slane %v11326_v7, %v19052_v2  ;;  %v11292_v5 = vmul.f32 %v11278_v39, %v19054_v30 }
 0x99e   : > { %v11354_v6 = vrot.slane %v11314_v47, %v19052_v2  ;;  %v11362_v17 = vrot.slane %v11322_v41, %v19052_v2  ;;  %v11208_v33 = vmul.f32 %v11194_v15, %v19055_v58  ;;  %v11297_v19 = vadd.f32 %v11289_v35, %v11205_v24 }
 0x99f   : > { %v11383_v16 = vmul.f32 %v11366_v29, %v19056_v53  ;;  %v19059_v29 = vld [vmem:[#allocation81_spill] sm:$0xff] }
 0x9a0   : > { %v11380_v38 = vmul.f32 %v11354_v6, %v19056_v53  ;;  %v11370_v6 = vrot.slane %v11330_v8, %v19052_v2 }
 0x9a2   : > { %v11388_v12 = vadd.f32 %v11380_v38, %v11296_v60  ;;  %v11382_v38 = vmul.f32 %v11362_v17, %v19056_v53  ;;  %v11298_v60 = vadd.f32 %v11290_v21, %v11206_v44  ;;  %v11384_v23 = vmul.f32 %v11370_v6, %v19056_v53 }
 0x9a4   : > { %v11402_v50 = vadd.f32 %v19057_v28, %v11388_v12  ;;  %v11299_v12 = vadd.f32 %v11291_v0, %v11207_v49  ;;  %v12608_v0 = vld [vmem:[%s15240_s21 + $0x18] sm:$0x77]  ;;  %s11470_s21 = scalar_lea.sflag [#allocation3], %s448_s16 }
 0x9a6   : > { %12555 = vtanh.f32 %v11402_v50  ;;  %v12554_v52 = vpop.eup %12553  ;;  %v11300_v50 = vadd.f32 %v11292_v5, %v11208_v33  ;;  %v19060_v5 = vld [vmem:[#allocation82_spill] sm:$0xff] }
 0x9a7   : > { %v19061_v33 = vcombine.low %v19059_v29, %v19060_v5 }
 0x9a8   : > { %v11392_v30 = vadd.f32 %v11384_v23, %v11300_v50 }
 0x9b0   : > { %v12556_v32 = vpop.eup %12555 }
 0x9b1   : > { %v11445_v14 = vcombine.low %v12554_v52, %v12556_v32 }
 0xa0c   : > { %v10987_v46 = vpop.f32.mrb[80].mxu0 }
 0xa0d   : > { %v10988_v63 = vadd.f32 %v10987_v46, %v19058_v48  ;;  %v10989_v9 = vpop.f32.mrb[81].mxu0 }
 0xa0e   : > { %v10990_v3 = vadd.f32 %v10989_v9, %v19058_v48  ;;  %v10991_v56 = vpop.f32.mrb[82].mxu0  ;;  %v11391_v9 = vadd.f32 %v11383_v16, %v11299_v12 }
 0xa0f   : > { %12557 = vtanh.f32 %v10988_v63  ;;  %v10992_v31 = vpop.f32.mrb[83].mxu0  ;;  %v11390_v63 = vadd.f32 %v11382_v38, %v11298_v60  ;;  %v11406_v56 = vadd.f32 %v19057_v28, %v11392_v30 }
 0xa10   : > { %12559 = vtanh.f32 %v10990_v3  ;;  %v11405_v3 = vadd.f32 %v19057_v28, %v11391_v9 }
 0xa19   : > { %v12558_v54 = vpop.eup %12557 }
 0xa1a   : > { %v12560_v20 = vpop.eup %12559 }
 0xa1b   : > { %v11425_v4 = vcombine.low %v12558_v54, %v12560_v20 }
 0xa1d   : > { %v11433_v27 = vadd.f32 %v12605_v34, %v11425_v4  ;;  %v11318_v34 = vrot.slane %v18358_v26, %v19052_v2 }
 0xa1f   : > { %v11453_v22 = vadd.f32 %v11445_v14, %v11433_v27  ;;  %v11358_v47 = vrot.slane %v11318_v34, %v19052_v2  ;;  %v11404_v2 = vadd.f32 %v19057_v28, %v11390_v63 }
 0xa21   : > { %v11457_v18 = vmax.f32 %v11453_v22, 0.0  ;;  %v11381_v11 = vmul.f32 %v11358_v47, %v19056_v53 }
 0xa23   : > { %v11461_v57 = vmin.f32 %v11457_v18, 1.0  ;;  %v11389_v46 = vadd.f32 %v11381_v11, %v11297_v19 }
 0xa25   : > { %11465 = vst [vmem:[%s18375_s14] sm:$0x77] %v11461_v57  ;;  %v11403_v58 = vadd.f32 %v19057_v28, %v11389_v46 }
 0xa27   : > { %12561 = vtanh.f32 %v11403_v58 }
 0xa28   : > { %12563 = vtanh.f32 %v11404_v2 }
 0xa29   : > { %12565 = vtanh.f32 %v11405_v3 }
 0xa2a   : > { %12567 = vtanh.f32 %v11406_v56 }
 0xa31   : > { %v12562_v61 = vpop.eup %12561 }
 0xa32   : > { %v12564_v40 = vpop.eup %12563 }
 0xa33   : > { %v12566_v57 = vpop.eup %12565  ;;  %v11446_v13 = vcombine.low %v12562_v61, %v12564_v40 }
 0xa34   : > { %v12568_v55 = vpop.eup %12567 }
 0xa35   : > { %v11447_v34 = vcombine.low %v12566_v57, %v12568_v55 }
 0xa3c   : > { %v11069_v31 = vpop.f32.mrb[84].mxu0 }
 0xa3d   : > { %v11070_v52 = vadd.f32 %v11069_v31, %v19058_v48  ;;  %v11071_v53 = vpop.f32.mrb[85].mxu0 }
 0xa3e   : > { %v11028_v32 = vpop.f32.mrb[80].mxu1  ;;  %v11072_v54 = vadd.f32 %v11071_v53, %v19058_v48  ;;  %v11073_v20 = vpop.f32.mrb[86].mxu0 }
 0xa3f   : > { %v11029_v4 = vadd.f32 %v11028_v32, %v19058_v48  ;;  %v11030_v27 = vpop.f32.mrb[81].mxu1  ;;  %12569 = vtanh.f32 %v11070_v52  ;;  %v11074_v14 = vpop.f32.mrb[87].mxu0 }
 0xa40   : > { %v11031_v22 = vadd.f32 %v11030_v27, %v19058_v48  ;;  %v11032_v28 = vpop.f32.mrb[82].mxu1  ;;  %12571 = vtanh.f32 %v11072_v54 }
 0xa41   : > { %12573 = vtanh.f32 %v11029_v4  ;;  %v11033_v18 = vpop.f32.mrb[83].mxu1 }
 0xa42   : > { %12575 = vtanh.f32 %v11031_v22 }
 0xa49   : > { %v12570_v25 = vpop.eup %12569 }
 0xa4a   : > { %v12572_v62 = vpop.eup %12571 }
 0xa4b   : > { %v12574_v1 = vpop.eup %12573  ;;  %v11427_v42 = vcombine.low %v12570_v25, %v12572_v62 }
 0xa4c   : > { %v12576_v51 = vpop.eup %12575 }
 0xa4d   : > { %v11426_v37 = vcombine.low %v12574_v1, %v12576_v51  ;;  %v11435_v59 = vadd.f32 %v18369_v45, %v11427_v42 }
 0xa4f   : > { %v11434_v36 = vadd.f32 %v18358_v26, %v11426_v37  ;;  %v11455_v41 = vadd.f32 %v11447_v34, %v11435_v59 }
 0xa51   : > { %v11454_v10 = vadd.f32 %v11446_v13, %v11434_v36  ;;  %v11459_v43 = vmax.f32 %v11455_v41, 0.0 }
 0xa53   : > { %v11458_v7 = vmax.f32 %v11454_v10, 0.0  ;;  %v11463_v39 = vmin.f32 %v11459_v43, 1.0 }
 0xa55   : > { %v11462_v15 = vmin.f32 %v11458_v7, 1.0  ;;  %11467 = vst [vmem:[%s18375_s14 + $0x10] sm:$0x77] %v11463_v39 }
 0xa57   : > { %11466 = vst [vmem:[%s18375_s14 + $0x8] sm:$0x77] %v11462_v15 }
 0xa6e   : > { %v11110_v8 = vpop.f32.mrb[84].mxu1 }
 0xa6f   : > { %v11111_v35 = vadd.f32 %v11110_v8, %v19058_v48  ;;  %v11112_v24 = vpop.f32.mrb[85].mxu1 }
 0xa70   : > { %v11113_v45 = vadd.f32 %v11112_v24, %v19058_v48  ;;  %v11114_v47 = vpop.f32.mrb[86].mxu1 }
 0xa71   : > { %12577 = vtanh.f32 %v11111_v35  ;;  %v11115_v26 = vpop.f32.mrb[87].mxu1 }
 0xa72   : > { %12579 = vtanh.f32 %v11113_v45 }
 0xa7b   : > { %v12578_v21 = vpop.eup %12577 }
 0xa7c   : > { %v12580_v44 = vpop.eup %12579 }
 0xa7d   : > { %v11428_v17 = vcombine.low %v12578_v21, %v12580_v44 }
 0xa7f   : > { %v11436_v49 = vadd.f32 %v12608_v0, %v11428_v17 }
 0xa81   : > { %v11456_v6 = vadd.f32 %v19061_v33, %v11436_v49 }
 0xa83   : > { %v11460_v11 = vmax.f32 %v11456_v6, 0.0 }
 0xa85   : > { %v11464_v48 = vmin.f32 %v11460_v11, 1.0 }
 0xa87   : > { %11468 = vst [vmem:[%s18375_s14 + $0x18] sm:$0x77] %v11464_v48 }
 0xa88   : > { %12622 = shalt.err (!%p12619_p3)
}
 0xa89   : > { %s12623_s16 = scalar_lea.hbm %s18437_s20, 512  ;;  %s12627_s24 = scalar_lea.hbm %s18495_s13, 1024 }
 0xa8a   : > { %p12624_p4 = scmp.ne.s32.totalorder %s18437_s20, %s12623_s16  ;;  %p12628_p9 = scmp.lt.u32.totalorder %s18437_s20, %s18495_s13 }
 0xa8b   : > { %p12629_p10 = scmp.lt.u32.totalorder %s12627_s24, %s12623_s16  ;;  %p12631_p12 = scmp.lt.u32.totalorder %s12623_s16, %s18437_s20 }
 0xa8c   : > { %p12625_p7 = pnand %p12624_p4, %p12792_p5 }
 0xa8d   : > { %p12630_p11 = por %p12629_p10, %p12628_p9 }
 0xa8e   : > { %p12626_p8 = pneg %p12625_p7 }
 0xa8f   : > { %p12632_p13 = por %p12631_p12, %p12630_p11 }
 0xa91   : > { %p12633_p0 = pnand %p12632_p13, %p12626_p8 }
 0xa93   : > { %12636 = shalt.err (!%p12633_p0)
}
 0xa94   : > { %12342 = dma.vmem_to_hbm [thread:$0]  (%p12792_p5), %s18439_s15, 512, %s18437_s20, %s11470_s21  }
 0xa95 PF: > { %p12348_p1 = scmp.ge.s32.totalorder %s12671_s28, 2  ;;  %s11496_s29 = sand.u32 1, %s12659_s25  }
 0xa96   : > { %s11497_s23 = scalar_lea.sflag [#allocation3], %s11496_s29 }
 0xa97   : > { %p12345_p2 = pnand %p12348_p1, %p12796_p6 }
 0xa99   : > { %12654 = dma.done.wait (!%p12345_p2), %s11497_s23, 512  }
 0xa9a   : > { %12656 = vsyncadd (!%p12345_p2), %s11497_s23, 4294966784  ;;  %s19063_s28 = sld [smem:[#allocation6_spill]]  ;;  %s19064_s30 = sld [smem:[#allocation5_spill]] }
 0xa9b   : > { %s19065_s27 = sld [smem:[#allocation7_spill]]  ;;  %s19066_s25 = smov %s12663_s26 }
 0xaa0   : > { %p23_p3 = scmp.ge.s32.totalorder %s19063_s28, 4   ;;  %s19067_s26 = smov %s19064_s30 }
 0xaa2   :  { %25 = sbr.rel (!%p23_p3) target bundleno = 3 (0x3), region = 118 }
 0xaa9   :  { %11502 = vsyncpa [#allocation3], 1 }
 0xaaa   :  { %11504 = vsyncpa [#allocation3 + $0x1], 1 }

</bundles_post_ra>
